<compile_context>
chip_gen: v6e
topology: v6e:2x2x1
jax: 0.10.0
libtpu: 0.0.40
codegen_flags: <defaults>
</compile_context>

<pallas_src>
import math
import functools

import jax
import jax.numpy as jnp
from jax import lax
from jax.experimental import pallas as pl
from jax.experimental.pallas import tpu as pltpu


def _round_up(n, m):
    return ((n + m - 1) // m) * m


def _pick_row_tile(n):
    for t in (512, 256, 128, 64, 32, 16, 8):
        if n % t == 0 and (n // t) >= 2:
            return t
    return n


def _vmem_limit_bytes():
    # v5e / v6e have 128 MiB physical VMEM -> allow big resident blocks;
    # stay conservative on v7x (64 MiB per TensorCore) / unknown chips.
    try:
        kind = jax.devices()[0].device_kind.lower()
    except Exception:
        kind = ""
    if "v5" in kind or "v6" in kind:
        return 100 * 1024 * 1024
    return 48 * 1024 * 1024


def _ln(v, g, b, eps=1e-5):
    mu = jnp.mean(v, axis=-1, keepdims=True)
    var = jnp.mean(jnp.square(v - mu), axis=-1, keepdims=True)
    return (v - mu) * lax.rsqrt(var + eps) * g + b


def _softplus(x):
    # matches F.softplus(beta=1, threshold=20)
    return jnp.where(x > 20.0, x, jnp.log(1.0 + jnp.exp(jnp.minimum(x, 20.0))))


# ------------------------------------------------------------- kernel 1 ----
def _in_proj_kernel(x_ref, w_ref, ox_ref, oz_ref):
    # One fused matmul with concatenated RHS [Wx | Wz]; split the result in-kernel.
    xb = x_ref[...].astype(jnp.bfloat16)
    res = jnp.dot(xb, w_ref[...], preferred_element_type=jnp.float32)
    din = ox_ref.shape[1]
    ox_ref[...] = res[:, :din].astype(ox_ref.dtype)
    oz_ref[...] = res[:, din:].astype(oz_ref.dtype)


# ------------------------------------------------------------- kernel 2 ----
def _ssm_kernel(xin_ref, z_ref, mask_ref, convw_ref, convb_ref, wcat_ref,
                wdt_ref, dtb_ref, a_ref, d_ref,
                ong_ref, onb_ref, wz_ref, zng_ref, znb_ref, wout_ref,
                o_ref,
                xf_ref, proj_ref, dl_ref, y_ref,
                *, W, d_state, d_inner, dt_rank, CH, NB):
    L = z_ref.shape[1]
    Din = xin_ref.shape[2]          # d_inner rounded up to 128 (pad lanes are zero)
    N = d_state
    R = dt_rank
    SW = NB * Din                   # state-column strip width (lanes)
    n_strips = N // NB
    n_chunks = L // CH
    seg = wcat_ref.shape[1] // 2    # 128

    # ---- depthwise 3x3 conv + SiLU (in-register zero pad + w-boundary masks) ------
    xin = xin_ref[0].astype(jnp.float32)                       # (L, Din)
    zpad = jnp.zeros((W + 1, Din), jnp.float32)
    xp = jnp.concatenate([zpad, xin, zpad], axis=0)            # (L + 2W + 2, Din)
    m_left = mask_ref[0]                                       # (L, 1): 0 where w == 0
    m_right = mask_ref[1]                                      # (L, 1): 0 where w == W-1
    acc = jnp.zeros((L, Din), jnp.float32)
    for dy in range(3):
        for dx in range(3):
            off = dy * W + dx
            tap = xp[off:off + L, :] * convw_ref[dy * 3 + dx]
            if dx == 0:
                tap = tap * m_left
            elif dx == 2:
                tap = tap * m_right
            acc = acc + tap
    acc = acc + convb_ref[...]
    xf = acc * (1.0 / (1.0 + jnp.exp(-acc)))                   # SiLU, pad lanes stay 0
    xf_ref[...] = xf

    # ---- fused x_proj for both directions: (L, Din) x (Din, 256) bf16 matmul ------
    # column layout: [dt_0 | B_0 | C_0 | pad] [dt_1 | B_1 | C_1 | pad]
    proj = jnp.dot(xf.astype(jnp.bfloat16), wcat_ref[...],
                   preferred_element_type=jnp.float32)          # (L, 2*seg)
    proj_ref[...] = proj

    # ---- delta_k for the whole sequence (wdt rows >= dt_rank are zero, so feeding
    #      the full packed 128-lane block is equivalent to slicing dt out of it) ----
    for k in range(2):
        dts = jnp.dot(proj[:, k * seg:(k + 1) * seg], wdt_ref[k],
                      preferred_element_type=jnp.float32) + dtb_ref[k]
        dl_ref[k] = _softplus(dts)

    # ---- y initialised with the skip term (D_0 + D_1) * u --------------------------
    y_ref[...] = xf * (d_ref[0] + d_ref[1])

    # ---- per-strip state->lane replication matrices, generated from iota ----------
    fp_strips = []
    for g in range(n_strips):
        col = lax.broadcasted_iota(jnp.int32, (N, SW), 1)
        row = lax.broadcasted_iota(jnp.int32, (N, SW), 0)
        rr = col - (row - g * NB) * Din
        fp_strips.append(((rr >= 0) & (rr < Din)).astype(jnp.float32))

    row_ids = lax.broadcasted_iota(jnp.int32, (CH, 1), 0)       # (CH, 1)

    def chunk_inputs(k, start):
        delta = dl_ref[k, pl.ds(start, CH), :]                  # (CH, Din)
        du = delta * xf_ref[pl.ds(start, CH), :]                # delta * u
        pblk = proj_ref[pl.ds(start, CH), pl.ds(k * seg, seg)]  # (CH, 128)
        bm = pblk[:, R:R + N]                                   # (CH, N)
        cm = pblk[:, R + N:R + 2 * N]                           # (CH, N)
        return delta, du, bm, cm

    def chunk_body(c, carry):
        hf, hb = carry                                          # tuples of (1, SW) states
        rf = pl.multiple_of(c * CH, CH)                         # forward rows
        rb = pl.multiple_of((n_chunks - 1 - c) * CH, CH)        # backward rows

        dlt_f, du_f, bm_f, cm_f = chunk_inputs(0, rf)
        dlt_b, du_b, bm_b, cm_b = chunk_inputs(1, rb)

        y_f = jnp.zeros((CH, Din), jnp.float32)
        y_b = jnp.zeros((CH, Din), jnp.float32)
        new_hf = []
        new_hb = []
        for g in range(n_strips):
            c0 = g * SW
            fp_g = fp_strips[g]
            a0 = a_ref[0, :, c0:c0 + SW]                        # (1, SW)
            a1 = a_ref[1, :, c0:c0 + SW]
            # tiny K = d_state matmuls (broadcast B / C over channels) overlap the
            # latency-bound scan on the otherwise idle MXU.
            bB_f = jnp.dot(bm_f, fp_g, preferred_element_type=jnp.float32)
            cb_f = jnp.dot(cm_f, fp_g, preferred_element_type=jnp.float32)
            bB_b = jnp.dot(bm_b, fp_g, preferred_element_type=jnp.float32)
            cb_b = jnp.dot(cm_b, fp_g, preferred_element_type=jnp.float32)

            dA_f = jnp.exp(jnp.concatenate([dlt_f] * NB, axis=1) * a0)
            dA_b = jnp.exp(jnp.concatenate([dlt_b] * NB, axis=1) * a1)
            dBx_f = jnp.concatenate([du_f] * NB, axis=1) * bB_f
            dBx_b = jnp.concatenate([du_b] * NB, axis=1) * bB_b

            hf_g = hf[g]
            hb_g = hb[g]
            for j in range(CH):
                jb = CH - 1 - j
                hf_g = dA_f[j:j + 1, :] * hf_g + dBx_f[j:j + 1, :]
                hb_g = dA_b[jb:jb + 1, :] * hb_g + dBx_b[jb:jb + 1, :]
                pf = hf_g * cb_f[j:j + 1, :]
                pb = hb_g * cb_b[jb:jb + 1, :]
                yfj = pf[:, :Din]
                ybj = pb[:, :Din]
                for m in range(1, NB):
                    yfj = yfj + pf[:, m * Din:(m + 1) * Din]
                    ybj = ybj + pb[:, m * Din:(m + 1) * Din]
                y_f = jnp.where(row_ids == j, y_f + yfj, y_f)
                y_b = jnp.where(row_ids == jb, y_b + ybj, y_b)
            new_hf.append(hf_g)
            new_hb.append(hb_g)

        y_ref[pl.ds(rf, CH), :] = y_ref[pl.ds(rf, CH), :] + y_f
        y_ref[pl.ds(rb, CH), :] = y_ref[pl.ds(rb, CH), :] + y_b
        return tuple(new_hf), tuple(new_hb)

    h0 = tuple(jnp.zeros((1, SW), jnp.float32) for _ in range(n_strips))
    lax.fori_loop(0, n_chunks, chunk_body, (h0, h0))

    # ---- out_norm, z gating, z_proj, z_norm, out_proj ------------------------------
    y_full = y_ref[...]
    y_n = _ln(y_full[:, :d_inner], ong_ref[...], onb_ref[...])
    zg = z_ref[0].astype(jnp.float32) * xf_ref[...]             # pad lanes are zero
    zp = jnp.dot(zg.astype(jnp.bfloat16), wz_ref[...], preferred_element_type=jnp.float32)
    z_n = _ln(zp, zng_ref[...], znb_ref[...])
    o_ref[0] = jnp.dot((y_n * z_n).astype(jnp.bfloat16), wout_ref[...],
                       preferred_element_type=jnp.float32)


# ---------------------------------------------------------------- wrapper --
def lcp_mamba_forward(x, p):
    B, H, W, d_model = x.shape
    L = H * W
    BL = B * L
    d_inner = p['W_in'].shape[0] // 2
    d_state = p['A_logs'].shape[1]
    dt_rank = p['dt_projs_weight'].shape[2]

    seg = 128                                  # lane-aligned packed x_proj segment
    Din = _round_up(d_inner, 128)              # padded channel width
    DNp = d_state * Din
    dm_pad = _round_up(d_model, 128)           # lane-dense output width
    CH = 8                                     # timesteps per scan chunk (sublane tile)
    # TODO(synk): pad L (forcing delta=0 on pad rows) when H*W is not a multiple of 8.
    assert L % CH == 0, "sequence length H*W must be a multiple of 8"
    assert dt_rank + 2 * d_state <= seg

    # state-column strip width: largest divisor of d_state with NB*Din <= 512 lanes
    NB = 1
    for cand in range(1, d_state + 1):
        if d_state % cand == 0 and cand * Din <= 512:
            NB = cand

    vmem_limit = _vmem_limit_bytes()

    # ---- kernel 1: fused in_proj, row-tiled, split bf16 x / z outputs ---------------
    TM = _pick_row_tile(BL)
    x_flat = x.reshape(BL, d_model)
    wx_in = jnp.pad(p['W_in'][:d_inner].T, ((0, 0), (0, Din - d_inner)))
    wz_in = jnp.pad(p['W_in'][d_inner:].T, ((0, 0), (0, Din - d_inner)))
    w_in = jnp.concatenate([wx_in, wz_in], axis=1).astype(jnp.bfloat16)   # (d_model, 2*Din)
    x_part, z_part = pl.pallas_call(
        _in_proj_kernel,
        out_shape=(jax.ShapeDtypeStruct((BL, Din), jnp.bfloat16),
                   jax.ShapeDtypeStruct((BL, Din), jnp.bfloat16)),
        grid=(BL // TM,),
        in_specs=[pl.BlockSpec((TM, d_model), lambda i: (i, 0)),
                  pl.BlockSpec((d_model, 2 * Din), lambda i: (0, 0))],
        out_specs=(pl.BlockSpec((TM, Din), lambda i: (i, 0)),
                   pl.BlockSpec((TM, Din), lambda i: (i, 0))),
        compiler_params=pltpu.CompilerParams(
            dimension_semantics=("parallel",),
            vmem_limit_bytes=vmem_limit),
    )(x_flat, w_in)

    xin = x_part.reshape(B, L, Din)
    z_in = z_part.reshape(B, L, Din)

    # ---- kernel 2 operands -----------------------------------------------------------
    # w-boundary masks for the flat-layout 3x3 conv taps
    wpos = jnp.arange(L, dtype=jnp.int32) % W
    conv_mask = jnp.stack([(wpos > 0).astype(jnp.float32),
                           (wpos < W - 1).astype(jnp.float32)], axis=0).reshape(2, L, 1)

    # conv weights (9, 1, Din) and bias (1, Din), zero-padded channels
    w_hwc = jnp.transpose(p['conv_w'][:, 0, :, :], (1, 2, 0)).reshape(9, d_inner)
    convw = jnp.pad(w_hwc, ((0, 0), (0, Din - d_inner))).reshape(9, 1, Din)
    convb = jnp.pad(p['conv_b'], (0, Din - d_inner)).reshape(1, Din)

    # packed x_proj weight: one 128-lane segment [dt | B | C | 0-pad] per direction
    R, N = dt_rank, d_state
    Wx = p['x_proj_weight']                                    # (2, R+2N, d_inner)
    blocks = []
    for k in range(2):
        blk = Wx[k].T                                          # (d_inner, R+2N)
        blk = jnp.pad(blk, ((0, Din - d_inner), (0, seg - (R + 2 * N))))
        blocks.append(blk)
    wcat = jnp.concatenate(blocks, axis=1).astype(jnp.bfloat16)          # (Din, 2*seg)

    # dt_proj weight padded to (2, seg, Din); rows >= dt_rank zero, kept f32
    wdt = jnp.pad(jnp.transpose(p['dt_projs_weight'], (0, 2, 1)),
                  ((0, 0), (0, seg - R), (0, Din - d_inner)))
    dtb = jnp.pad(p['dt_projs_bias'], ((0, 0), (0, Din - d_inner))).reshape(2, 1, Din)

    # A, D in the d_state-major padded layout (column = n*Din + d); pad lanes = 0
    A_neg = -jnp.exp(p['A_logs']).reshape(2, d_inner, d_state)
    a_flat = jnp.pad(jnp.transpose(A_neg, (0, 2, 1)),
                     ((0, 0), (0, 0), (0, Din - d_inner))).reshape(2, 1, DNp)
    d_flat = jnp.pad(p['Ds'].reshape(2, d_inner),
                     ((0, 0), (0, Din - d_inner))).reshape(2, 1, Din)

    ong = p['out_norm_g'].reshape(1, d_inner)
    onb = p['out_norm_b'].reshape(1, d_inner)
    wz = jnp.pad(p['W_z'].T, ((0, Din - d_inner), (0, 0))).astype(jnp.bfloat16)   # (Din, d_inner)
    zng = p['z_norm_g'].reshape(1, d_inner)
    znb = p['z_norm_b'].reshape(1, d_inner)
    wout = jnp.pad(p['W_out'].T, ((0, 0), (0, dm_pad - d_model))).astype(jnp.bfloat16)

    def rep(shape):
        nd = len(shape)
        return pl.BlockSpec(shape, lambda b: (0,) * nd)

    kernel = functools.partial(_ssm_kernel, W=W, d_state=d_state, d_inner=d_inner,
                               dt_rank=dt_rank, CH=CH, NB=NB)
    out = pl.pallas_call(
        kernel,
        out_shape=jax.ShapeDtypeStruct((B, L, dm_pad), jnp.float32),
        grid=(B,),
        in_specs=[pl.BlockSpec((1, L, Din), lambda b: (b, 0, 0)),        # x half (bf16)
                  pl.BlockSpec((1, L, Din), lambda b: (b, 0, 0)),        # z half (bf16)
                  rep((2, L, 1)),                                        # conv masks
                  rep((9, 1, Din)), rep((1, Din)),                       # conv w, b
                  rep((Din, 2 * seg)),                                   # packed x_proj
                  rep((2, seg, Din)), rep((2, 1, Din)),                  # dt_proj w, b
                  rep((2, 1, DNp)), rep((2, 1, Din)),                    # A, D
                  rep((1, d_inner)), rep((1, d_inner)),                  # out_norm
                  rep((Din, d_inner)),                                   # z_proj
                  rep((1, d_inner)), rep((1, d_inner)),                  # z_norm
                  rep((d_inner, dm_pad))],                               # out_proj
        out_specs=pl.BlockSpec((1, L, dm_pad), lambda b: (b, 0, 0)),
        scratch_shapes=[pltpu.VMEM((L, Din), jnp.float32),               # xf
                        pltpu.VMEM((L, 2 * seg), jnp.float32),           # packed proj
                        pltpu.VMEM((2, L, Din), jnp.float32),            # delta (per dir)
                        pltpu.VMEM((L, Din), jnp.float32)],              # y accumulator
        compiler_params=pltpu.CompilerParams(
            dimension_semantics=("parallel",),
            vmem_limit_bytes=vmem_limit),
    )(xin, z_in, conv_mask, convw, convb, wcat, wdt, dtb, a_flat, d_flat,
      ong, onb, wz, zng, znb, wout)

    # TODO(synk): dropout is p=0.0 in the module -> identity, omitted.
    return out[..., :d_model].reshape(B, H, W, d_model)


# ----------------------------------------------------- pure-JAX reference --
def _reference_forward(x, p):
    B, H, W, d_model = x.shape
    L = H * W
    d_inner = p['W_in'].shape[0] // 2
    d_state = p['A_logs'].shape[1]
    dt_rank = p['dt_projs_weight'].shape[2]

    xz = (x.reshape(B * L, d_model) @ p['W_in'].T).reshape(B, L, 2 * d_inner)
    x_in = xz[..., :d_inner].reshape(B, H, W, d_inner)
    z = xz[..., d_inner:]

    xp = jnp.pad(x_in, ((0, 0), (1, 1), (1, 1), (0, 0)))
    conv = jnp.zeros((B, H, W, d_inner), jnp.float32)
    for dy in range(3):
        for dx in range(3):
            conv = conv + xp[:, dy:dy + H, dx:dx + W, :] * \
                p['conv_w'][:, 0, dy, dx][None, None, None, :]
    conv = conv + p['conv_b']
    xa = conv * (1.0 / (1.0 + jnp.exp(-conv)))
    xf = xa.reshape(B, L, d_inner)

    A = -jnp.exp(p['A_logs']).reshape(2, d_inner, d_state)
    Dp = p['Ds'].reshape(2, d_inner)
    y_tot = jnp.zeros((B, L, d_inner), jnp.float32)
    for k in range(2):
        xdbl = jnp.einsum('bld,cd->blc', xf, p['x_proj_weight'][k])
        dtr = xdbl[..., :dt_rank]
        Bm = xdbl[..., dt_rank:dt_rank + d_state]
        Cm = xdbl[..., dt_rank + d_state:]
        dts = jnp.einsum('blr,dr->bld', dtr, p['dt_projs_weight'][k]) + p['dt_projs_bias'][k]
        delta = _softplus(dts)
        dA = jnp.exp(delta[..., None] * A[k][None, None])            # (B,L,d,n)
        dBx = (delta * xf)[..., None] * Bm[:, :, None, :]            # (B,L,d,n)
        if k == 1:
            dA, dBx = dA[:, ::-1], dBx[:, ::-1]

        def step(h, inp):
            a, bx = inp
            h = a * h + bx
            return h, h
        _, hs = lax.scan(step, jnp.zeros((B, d_inner, d_state), jnp.float32),
                         (jnp.swapaxes(dA, 0, 1), jnp.swapaxes(dBx, 0, 1)))
        hs = jnp.swapaxes(hs, 0, 1)
        if k == 1:
            hs = hs[:, ::-1]
        y_k = jnp.einsum('bldn,bln->bld', hs, Cm) + xf * Dp[k]
        y_tot = y_tot + y_k

    y = _ln(y_tot, p['out_norm_g'], p['out_norm_b'])
    zp = (z * xf) @ p['W_z'].T
    y = y * _ln(zp, p['z_norm_g'], p['z_norm_b'])
    out = y @ p['W_out'].T
    return out.reshape(B, H, W, d_model)


# --------------------------------------------------------------------------
if __name__ == "__main__":
    d_model, d_state, d_conv, expand = 4, 16, 3, 2
    d_inner = expand * d_model                      # 8
    dt_rank = math.ceil(d_model / 16)               # 1
    B, H, W = 2, 8, 8

    key = jax.random.PRNGKey(0)
    ks = jax.random.split(key, 9)

    def U(k, shape, s):
        return jax.random.uniform(k, shape, jnp.float32, -s, s)

    dt = jnp.exp(jax.random.uniform(ks[5], (2, d_inner), jnp.float32)
                 * (math.log(0.1) - math.log(0.001)) + math.log(0.001))
    dt = jnp.clip(dt, 1e-4, None)
    params = {
        'W_in': U(ks[0], (2 * d_inner, d_model), d_model ** -0.5),
        'conv_w': U(ks[1], (d_inner, 1, d_conv, d_conv), 1.0 / 3.0),
        'conv_b': U(ks[2], (d_inner,), 0.2),
        'x_proj_weight': U(ks[3], (2, dt_rank + 2 * d_state, d_inner), d_inner ** -0.5),
        'dt_projs_weight': U(ks[4], (2, d_inner, dt_rank), dt_rank ** -0.5),
        'dt_projs_bias': dt + jnp.log(-jnp.expm1(-dt)),
        'A_logs': jnp.log(jnp.tile(jnp.arange(1, d_state + 1, dtype=jnp.float32)[None, :],
                                   (2 * d_inner, 1))),
        'Ds': jnp.ones((2 * d_inner,), jnp.float32),
        'out_norm_g': jnp.ones((d_inner,), jnp.float32),
        'out_norm_b': jnp.zeros((d_inner,), jnp.float32),
        'W_z': U(ks[6], (d_inner, d_inner), d_inner ** -0.5),
        'z_norm_g': jnp.ones((d_inner,), jnp.float32),
        'z_norm_b': jnp.zeros((d_inner,), jnp.float32),
        'W_out': U(ks[7], (d_model, d_inner), d_inner ** -0.5),
    }
    x = jax.random.normal(ks[8], (B, H, W, d_model), jnp.float32)

    fwd = jax.jit(lcp_mamba_forward)
    out = fwd(x, params)
    out = jax.block_until_ready(out)
    assert out.shape == (B, H, W, d_model)

    ref = _reference_forward(x, params)
    err = float(jnp.max(jnp.abs(out - ref)))
    # tolerance accounts for bf16 MXU inputs / bf16 intermediates (f32 scan & norms)
    assert err < 5e-2, f"mismatch vs reference: {err}"
    print("KERNEL_OK")
</pallas_src>

<mosaic_0001>
module attributes {stable_mosaic.version = 11 : i64} {
  func.func @_in_proj_kernel(%arg0: i32, %arg1: memref<64x4xf32, #tpu.memory_space<vmem>>, %arg2: memref<4x256xbf16, #tpu.memory_space<vmem>>, %arg3: memref<64x128xbf16, #tpu.memory_space<vmem>>, %arg4: memref<64x128xbf16, #tpu.memory_space<vmem>>) attributes {dimension_semantics = [#tpu.dimension_semantics<parallel>], iteration_bounds = array<i64: 2>, scalar_prefetch = 0 : i64, scratch_operands = 0 : i64, tpu.core_type = #tpu.core_type<tc>, window_params = [{transform_indices = @transform_0, window_bounds = array<i64: 64, 4>}, {pipeline_mode = #tpu.pipeline_mode<synchronous>, transform_indices = @transform_1, window_bounds = array<i64: 4, 256>}, {transform_indices = @transform_2, window_bounds = array<i64: 64, 128>}, {transform_indices = @transform_3, window_bounds = array<i64: 64, 128>}]} {
    %c0 = arith.constant 0 : index
    %c0_0 = arith.constant 0 : index
    %0 = vector.load %arg1[%c0, %c0_0] : memref<64x4xf32, #tpu.memory_space<vmem>>, vector<64x4xf32>
    %1 = arith.truncf %0 : vector<64x4xf32> to vector<64x4xbf16>
    %c0_1 = arith.constant 0 : index
    %c0_2 = arith.constant 0 : index
    %2 = vector.load %arg2[%c0_1, %c0_2] : memref<4x256xbf16, #tpu.memory_space<vmem>>, vector<4x256xbf16>
    %cst = arith.constant dense<0.000000e+00> : vector<64x256xf32>
    %3 = tpu.matmul %1, %2, %cst {dimension_numbers = #tpu.dot_dimension_numbers<[1], [0], [0], [1], [0, 0, 1, 1], [], []>} : vector<64x4xbf16>, vector<4x256xbf16>, vector<64x256xf32> -> vector<64x256xf32>
    %4 = vector.extract_strided_slice %3 {offsets = [0, 0], sizes = [64, 128], strides = [1, 1]} : vector<64x256xf32> to vector<64x128xf32>
    %5 = arith.truncf %4 : vector<64x128xf32> to vector<64x128xbf16>
    %c0_3 = arith.constant 0 : index
    %c0_4 = arith.constant 0 : index
    %6 = vector.load %arg3[%c0_3, %c0_4] : memref<64x128xbf16, #tpu.memory_space<vmem>>, vector<64x128xbf16>
    tpu.vector_store %arg3[%c0_3, %c0_4], %5 {strides = array<i32>} : memref<64x128xbf16, #tpu.memory_space<vmem>>, vector<64x128xbf16>,
    %7 = vector.extract_strided_slice %3 {offsets = [0, 128], sizes = [64, 128], strides = [1, 1]} : vector<64x256xf32> to vector<64x128xf32>
    %8 = arith.truncf %7 : vector<64x128xf32> to vector<64x128xbf16>
    %c0_5 = arith.constant 0 : index
    %c0_6 = arith.constant 0 : index
    %9 = vector.load %arg4[%c0_5, %c0_6] : memref<64x128xbf16, #tpu.memory_space<vmem>>, vector<64x128xbf16>
    tpu.vector_store %arg4[%c0_5, %c0_6], %8 {strides = array<i32>} : memref<64x128xbf16, #tpu.memory_space<vmem>>, vector<64x128xbf16>,
    return
  }
  func.func @transform_0(%arg0: i32) -> (i32, i32) {
    %c0_i32 = arith.constant 0 : i32
    %c0_i32_0 = arith.constant 0 : i32
    return %arg0, %c0_i32 : i32, i32
  }
  func.func @transform_1(%arg0: i32) -> (i32, i32) {
    %c0_i32 = arith.constant 0 : i32
    %c0_i32_0 = arith.constant 0 : i32
    %c0_i32_1 = arith.constant 0 : i32
    return %c0_i32, %c0_i32_0 : i32, i32
  }
  func.func @transform_2(%arg0: i32) -> (i32, i32) {
    %c0_i32 = arith.constant 0 : i32
    %c0_i32_0 = arith.constant 0 : i32
    return %arg0, %c0_i32 : i32, i32
  }
  func.func @transform_3(%arg0: i32) -> (i32, i32) {
    %c0_i32 = arith.constant 0 : i32
    %c0_i32_0 = arith.constant 0 : i32
    return %arg0, %c0_i32 : i32, i32
  }
}

module attributes {stable_mosaic.version = 11 : i64} {
  func.func @_ssm_kernel(%arg0: i32, %arg1: memref<1x64x128xbf16, #tpu.memory_space<vmem>>, %arg2: memref<1x64x128xbf16, #tpu.memory_space<vmem>>, %arg3: memref<2x64x1xf32, #tpu.memory_space<vmem>>, %arg4: memref<9x1x128xf32, #tpu.memory_space<vmem>>, %arg5: memref<1x128xf32, #tpu.memory_space<vmem>>, %arg6: memref<128x256xbf16, #tpu.memory_space<vmem>>, %arg7: memref<2x128x128xf32, #tpu.memory_space<vmem>>, %arg8: memref<2x1x128xf32, #tpu.memory_space<vmem>>, %arg9: memref<2x1x2048xf32, #tpu.memory_space<vmem>>, %arg10: memref<2x1x128xf32, #tpu.memory_space<vmem>>, %arg11: memref<1x8xf32, #tpu.memory_space<vmem>>, %arg12: memref<1x8xf32, #tpu.memory_space<vmem>>, %arg13: memref<128x8xbf16, #tpu.memory_space<vmem>>, %arg14: memref<1x8xf32, #tpu.memory_space<vmem>>, %arg15: memref<1x8xf32, #tpu.memory_space<vmem>>, %arg16: memref<8x128xbf16, #tpu.memory_space<vmem>>, %arg17: memref<1x64x128xf32, #tpu.memory_space<vmem>>, %arg18: memref<64x128xf32, #tpu.memory_space<vmem>>, %arg19: memref<64x256xf32, #tpu.memory_space<vmem>>, %arg20: memref<2x64x128xf32, #tpu.memory_space<vmem>>, %arg21: memref<64x128xf32, #tpu.memory_space<vmem>>) attributes {dimension_semantics = [#tpu.dimension_semantics<parallel>], iteration_bounds = array<i64: 2>, scalar_prefetch = 0 : i64, scratch_operands = 4 : i64, tpu.core_type = #tpu.core_type<tc>, window_params = [{transform_indices = @transform_0, window_bounds = array<i64: 1, 64, 128>}, {transform_indices = @transform_1, window_bounds = array<i64: 1, 64, 128>}, {pipeline_mode = #tpu.pipeline_mode<synchronous>, transform_indices = @transform_2, window_bounds = array<i64: 2, 64, 1>}, {pipeline_mode = #tpu.pipeline_mode<synchronous>, transform_indices = @transform_3, window_bounds = array<i64: 9, 1, 128>}, {pipeline_mode = #tpu.pipeline_mode<synchronous>, transform_indices = @transform_4, window_bounds = array<i64: 1, 128>}, {pipeline_mode = #tpu.pipeline_mode<synchronous>, transform_indices = @transform_5, window_bounds = array<i64: 128, 256>}, {pipeline_mode = #tpu.pipeline_mode<synchronous>, transform_indices = @transform_6, window_bounds = array<i64: 2, 128, 128>}, {pipeline_mode = #tpu.pipeline_mode<synchronous>, transform_indices = @transform_7, window_bounds = array<i64: 2, 1, 128>}, {pipeline_mode = #tpu.pipeline_mode<synchronous>, transform_indices = @transform_8, window_bounds = array<i64: 2, 1, 2048>}, {pipeline_mode = #tpu.pipeline_mode<synchronous>, transform_indices = @transform_9, window_bounds = array<i64: 2, 1, 128>}, {pipeline_mode = #tpu.pipeline_mode<synchronous>, transform_indices = @transform_10, window_bounds = array<i64: 1, 8>}, {pipeline_mode = #tpu.pipeline_mode<synchronous>, transform_indices = @transform_11, window_bounds = array<i64: 1, 8>}, {pipeline_mode = #tpu.pipeline_mode<synchronous>, transform_indices = @transform_12, window_bounds = array<i64: 128, 8>}, {pipeline_mode = #tpu.pipeline_mode<synchronous>, transform_indices = @transform_13, window_bounds = array<i64: 1, 8>}, {pipeline_mode = #tpu.pipeline_mode<synchronous>, transform_indices = @transform_14, window_bounds = array<i64: 1, 8>}, {pipeline_mode = #tpu.pipeline_mode<synchronous>, transform_indices = @transform_15, window_bounds = array<i64: 8, 128>}, {transform_indices = @transform_16, window_bounds = array<i64: 1, 64, 128>}]} {
    %c0 = arith.constant 0 : index
    %c0_0 = arith.constant 0 : index
    %c0_1 = arith.constant 0 : index
    %0 = vector.load %arg1[%c0, %c0_0, %c0_1] : memref<1x64x128xbf16, #tpu.memory_space<vmem>>, vector<1x64x128xbf16>
    %1 = vector.shape_cast %0 : vector<1x64x128xbf16> to vector<64x128xbf16>
    %2 = arith.extf %1 : vector<64x128xbf16> to vector<64x128xf32>
    %cst = arith.constant 0.000000e+00 : f32
    %3 = vector.broadcast %cst : f32 to vector<9x128xf32>
    %4 = tpu.concatenate %3, %2, %3 in 0 : vector<9x128xf32>, vector<64x128xf32>, vector<9x128xf32> -> vector<82x128xf32>
    %c0_2 = arith.constant 0 : index
    %c0_3 = arith.constant 0 : index
    %c0_4 = arith.constant 0 : index
    %5 = vector.load %arg3[%c0_2, %c0_3, %c0_4] : memref<2x64x1xf32, #tpu.memory_space<vmem>>, vector<1x64x1xf32>
    %6 = vector.shape_cast %5 : vector<1x64x1xf32> to vector<64x1xf32>
    %c1 = arith.constant 1 : index
    %c0_5 = arith.constant 0 : index
    %c0_6 = arith.constant 0 : index
    %7 = vector.load %arg3[%c1, %c0_5, %c0_6] : memref<2x64x1xf32, #tpu.memory_space<vmem>>, vector<1x64x1xf32>
    %8 = vector.shape_cast %7 : vector<1x64x1xf32> to vector<64x1xf32>
    %cst_7 = arith.constant 0.000000e+00 : f32
    %9 = vector.broadcast %cst_7 : f32 to vector<64x128xf32>
    %10 = vector.extract_strided_slice %4 {offsets = [0, 0], sizes = [64, 128], strides = [1, 1]} : vector<82x128xf32> to vector<64x128xf32>
    %c0_8 = arith.constant 0 : index
    %c0_9 = arith.constant 0 : index
    %c0_10 = arith.constant 0 : index
    %11 = vector.load %arg4[%c0_8, %c0_9, %c0_10] : memref<9x1x128xf32, #tpu.memory_space<vmem>>, vector<1x1x128xf32>
    %12 = vector.shape_cast %11 : vector<1x1x128xf32> to vector<1x128xf32>
    %13 = vector.broadcast %12 : vector<1x128xf32> to vector<64x128xf32>
    %14 = arith.mulf %10, %13 : vector<64x128xf32>
    %15 = vector.broadcast %6 : vector<64x1xf32> to vector<64x128xf32>
    %16 = arith.mulf %14, %15 : vector<64x128xf32>
    %17 = arith.addf %9, %16 : vector<64x128xf32>
    %18 = vector.extract_strided_slice %4 {offsets = [1, 0], sizes = [64, 128], strides = [1, 1]} : vector<82x128xf32> to vector<64x128xf32>
    %c1_11 = arith.constant 1 : index
    %c0_12 = arith.constant 0 : index
    %c0_13 = arith.constant 0 : index
    %19 = vector.load %arg4[%c1_11, %c0_12, %c0_13] : memref<9x1x128xf32, #tpu.memory_space<vmem>>, vector<1x1x128xf32>
    %20 = vector.shape_cast %19 : vector<1x1x128xf32> to vector<1x128xf32>
    %21 = vector.broadcast %20 : vector<1x128xf32> to vector<64x128xf32>
    %22 = arith.mulf %18, %21 : vector<64x128xf32>
    %23 = arith.addf %17, %22 : vector<64x128xf32>
    %24 = vector.extract_strided_slice %4 {offsets = [2, 0], sizes = [64, 128], strides = [1, 1]} : vector<82x128xf32> to vector<64x128xf32>
    %c2 = arith.constant 2 : index
    %c0_14 = arith.constant 0 : index
    %c0_15 = arith.constant 0 : index
    %25 = vector.load %arg4[%c2, %c0_14, %c0_15] : memref<9x1x128xf32, #tpu.memory_space<vmem>>, vector<1x1x128xf32>
    %26 = vector.shape_cast %25 : vector<1x1x128xf32> to vector<1x128xf32>
    %27 = vector.broadcast %26 : vector<1x128xf32> to vector<64x128xf32>
    %28 = arith.mulf %24, %27 : vector<64x128xf32>
    %29 = vector.broadcast %8 : vector<64x1xf32> to vector<64x128xf32>
    %30 = arith.mulf %28, %29 : vector<64x128xf32>
    %31 = arith.addf %23, %30 : vector<64x128xf32>
    %32 = vector.extract_strided_slice %4 {offsets = [8, 0], sizes = [64, 128], strides = [1, 1]} : vector<82x128xf32> to vector<64x128xf32>
    %c3 = arith.constant 3 : index
    %c0_16 = arith.constant 0 : index
    %c0_17 = arith.constant 0 : index
    %33 = vector.load %arg4[%c3, %c0_16, %c0_17] : memref<9x1x128xf32, #tpu.memory_space<vmem>>, vector<1x1x128xf32>
    %34 = vector.shape_cast %33 : vector<1x1x128xf32> to vector<1x128xf32>
    %35 = vector.broadcast %34 : vector<1x128xf32> to vector<64x128xf32>
    %36 = arith.mulf %32, %35 : vector<64x128xf32>
    %37 = vector.broadcast %6 : vector<64x1xf32> to vector<64x128xf32>
    %38 = arith.mulf %36, %37 : vector<64x128xf32>
    %39 = arith.addf %31, %38 : vector<64x128xf32>
    %40 = vector.extract_strided_slice %4 {offsets = [9, 0], sizes = [64, 128], strides = [1, 1]} : vector<82x128xf32> to vector<64x128xf32>
    %c4 = arith.constant 4 : index
    %c0_18 = arith.constant 0 : index
    %c0_19 = arith.constant 0 : index
    %41 = vector.load %arg4[%c4, %c0_18, %c0_19] : memref<9x1x128xf32, #tpu.memory_space<vmem>>, vector<1x1x128xf32>
    %42 = vector.shape_cast %41 : vector<1x1x128xf32> to vector<1x128xf32>
    %43 = vector.broadcast %42 : vector<1x128xf32> to vector<64x128xf32>
    %44 = arith.mulf %40, %43 : vector<64x128xf32>
    %45 = arith.addf %39, %44 : vector<64x128xf32>
    %46 = vector.extract_strided_slice %4 {offsets = [10, 0], sizes = [64, 128], strides = [1, 1]} : vector<82x128xf32> to vector<64x128xf32>
    %c5 = arith.constant 5 : index
    %c0_20 = arith.constant 0 : index
    %c0_21 = arith.constant 0 : index
    %47 = vector.load %arg4[%c5, %c0_20, %c0_21] : memref<9x1x128xf32, #tpu.memory_space<vmem>>, vector<1x1x128xf32>
    %48 = vector.shape_cast %47 : vector<1x1x128xf32> to vector<1x128xf32>
    %49 = vector.broadcast %48 : vector<1x128xf32> to vector<64x128xf32>
    %50 = arith.mulf %46, %49 : vector<64x128xf32>
    %51 = vector.broadcast %8 : vector<64x1xf32> to vector<64x128xf32>
    %52 = arith.mulf %50, %51 : vector<64x128xf32>
    %53 = arith.addf %45, %52 : vector<64x128xf32>
    %54 = vector.extract_strided_slice %4 {offsets = [16, 0], sizes = [64, 128], strides = [1, 1]} : vector<82x128xf32> to vector<64x128xf32>
    %c6 = arith.constant 6 : index
    %c0_22 = arith.constant 0 : index
    %c0_23 = arith.constant 0 : index
    %55 = vector.load %arg4[%c6, %c0_22, %c0_23] : memref<9x1x128xf32, #tpu.memory_space<vmem>>, vector<1x1x128xf32>
    %56 = vector.shape_cast %55 : vector<1x1x128xf32> to vector<1x128xf32>
    %57 = vector.broadcast %56 : vector<1x128xf32> to vector<64x128xf32>
    %58 = arith.mulf %54, %57 : vector<64x128xf32>
    %59 = vector.broadcast %6 : vector<64x1xf32> to vector<64x128xf32>
    %60 = arith.mulf %58, %59 : vector<64x128xf32>
    %61 = arith.addf %53, %60 : vector<64x128xf32>
    %62 = vector.extract_strided_slice %4 {offsets = [17, 0], sizes = [64, 128], strides = [1, 1]} : vector<82x128xf32> to vector<64x128xf32>
    %c7 = arith.constant 7 : index
    %c0_24 = arith.constant 0 : index
    %c0_25 = arith.constant 0 : index
    %63 = vector.load %arg4[%c7, %c0_24, %c0_25] : memref<9x1x128xf32, #tpu.memory_space<vmem>>, vector<1x1x128xf32>
    %64 = vector.shape_cast %63 : vector<1x1x128xf32> to vector<1x128xf32>
    %65 = vector.broadcast %64 : vector<1x128xf32> to vector<64x128xf32>
    %66 = arith.mulf %62, %65 : vector<64x128xf32>
    %67 = arith.addf %61, %66 : vector<64x128xf32>
    %68 = vector.extract_strided_slice %4 {offsets = [18, 0], sizes = [64, 128], strides = [1, 1]} : vector<82x128xf32> to vector<64x128xf32>
    %c8 = arith.constant 8 : index
    %c0_26 = arith.constant 0 : index
    %c0_27 = arith.constant 0 : index
    %69 = vector.load %arg4[%c8, %c0_26, %c0_27] : memref<9x1x128xf32, #tpu.memory_space<vmem>>, vector<1x1x128xf32>
    %70 = vector.shape_cast %69 : vector<1x1x128xf32> to vector<1x128xf32>
    %71 = vector.broadcast %70 : vector<1x128xf32> to vector<64x128xf32>
    %72 = arith.mulf %68, %71 : vector<64x128xf32>
    %73 = vector.broadcast %8 : vector<64x1xf32> to vector<64x128xf32>
    %74 = arith.mulf %72, %73 : vector<64x128xf32>
    %75 = arith.addf %67, %74 : vector<64x128xf32>
    %c0_28 = arith.constant 0 : index
    %c0_29 = arith.constant 0 : index
    %76 = vector.load %arg5[%c0_28, %c0_29] : memref<1x128xf32, #tpu.memory_space<vmem>>, vector<1x128xf32>
    %77 = vector.broadcast %76 : vector<1x128xf32> to vector<64x128xf32>
    %78 = arith.addf %75, %77 : vector<64x128xf32>
    %cst_30 = arith.constant 0.000000e+00 : f32
    %79 = vector.broadcast %cst_30 : f32 to vector<64x128xf32>
    %80 = arith.subf %79, %78 : vector<64x128xf32>
    %81 = math.exp %80 : vector<64x128xf32>
    %cst_31 = arith.constant 1.000000e+00 : f32
    %82 = vector.broadcast %cst_31 : f32 to vector<64x128xf32>
    %83 = arith.addf %82, %81 : vector<64x128xf32>
    %cst_32 = arith.constant 1.000000e+00 : f32
    %84 = vector.broadcast %cst_32 : f32 to vector<64x128xf32>
    %85 = arith.divf %84, %83 : vector<64x128xf32>
    %86 = arith.mulf %78, %85 : vector<64x128xf32>
    %c0_33 = arith.constant 0 : index
    %c0_34 = arith.constant 0 : index
    %87 = vector.load %arg18[%c0_33, %c0_34] : memref<64x128xf32, #tpu.memory_space<vmem>>, vector<64x128xf32>
    tpu.vector_store %arg18[%c0_33, %c0_34], %86 {strides = array<i32>} : memref<64x128xf32, #tpu.memory_space<vmem>>, vector<64x128xf32>,
    %88 = arith.truncf %86 : vector<64x128xf32> to vector<64x128xbf16>
    %c0_35 = arith.constant 0 : index
    %c0_36 = arith.constant 0 : index
    %89 = vector.load %arg6[%c0_35, %c0_36] : memref<128x256xbf16, #tpu.memory_space<vmem>>, vector<128x256xbf16>
    %cst_37 = arith.constant dense<0.000000e+00> : vector<64x256xf32>
    %90 = tpu.matmul %88, %89, %cst_37 {dimension_numbers = #tpu.dot_dimension_numbers<[1], [0], [0], [1], [0, 0, 1, 1], [], []>} : vector<64x128xbf16>, vector<128x256xbf16>, vector<64x256xf32> -> vector<64x256xf32>
    %c0_38 = arith.constant 0 : index
    %c0_39 = arith.constant 0 : index
    %91 = vector.load %arg19[%c0_38, %c0_39] : memref<64x256xf32, #tpu.memory_space<vmem>>, vector<64x256xf32>
    tpu.vector_store %arg19[%c0_38, %c0_39], %90 {strides = array<i32>} : memref<64x256xf32, #tpu.memory_space<vmem>>, vector<64x256xf32>,
    %92 = vector.extract_strided_slice %90 {offsets = [0, 0], sizes = [64, 128], strides = [1, 1]} : vector<64x256xf32> to vector<64x128xf32>
    %c0_40 = arith.constant 0 : index
    %c0_41 = arith.constant 0 : index
    %c0_42 = arith.constant 0 : index
    %93 = vector.load %arg7[%c0_40, %c0_41, %c0_42] : memref<2x128x128xf32, #tpu.memory_space<vmem>>, vector<1x128x128xf32>
    %94 = vector.shape_cast %93 : vector<1x128x128xf32> to vector<128x128xf32>
    %cst_43 = arith.constant dense<0.000000e+00> : vector<64x128xf32>
    %95 = tpu.matmul %92, %94, %cst_43 {dimension_numbers = #tpu.dot_dimension_numbers<[1], [0], [0], [1], [0, 0, 1, 1], [], []>} : vector<64x128xf32>, vector<128x128xf32>, vector<64x128xf32> -> vector<64x128xf32>
    %c0_44 = arith.constant 0 : index
    %c0_45 = arith.constant 0 : index
    %c0_46 = arith.constant 0 : index
    %96 = vector.load %arg8[%c0_44, %c0_45, %c0_46] : memref<2x1x128xf32, #tpu.memory_space<vmem>>, vector<1x1x128xf32>
    %97 = vector.shape_cast %96 : vector<1x1x128xf32> to vector<1x128xf32>
    %98 = vector.broadcast %97 : vector<1x128xf32> to vector<64x128xf32>
    %99 = arith.addf %95, %98 : vector<64x128xf32>
    %cst_47 = arith.constant 2.000000e+01 : f32
    %100 = vector.broadcast %cst_47 : f32 to vector<64x128xf32>
    %101 = arith.cmpf ogt, %99, %100 : vector<64x128xf32>
    %cst_48 = arith.constant 2.000000e+01 : f32
    %102 = vector.broadcast %cst_48 : f32 to vector<64x128xf32>
    %103 = arith.minimumf %99, %102 : vector<64x128xf32>
    %104 = math.exp %103 : vector<64x128xf32>
    %cst_49 = arith.constant 1.000000e+00 : f32
    %105 = vector.broadcast %cst_49 : f32 to vector<64x128xf32>
    %106 = arith.addf %105, %104 : vector<64x128xf32>
    %107 = math.log %106 : vector<64x128xf32>
    %108 = arith.select %101, %99, %107 : vector<64x128xi1>, vector<64x128xf32>
    %c0_50 = arith.constant 0 : index
    %c0_51 = arith.constant 0 : index
    %c0_52 = arith.constant 0 : index
    %109 = vector.load %arg20[%c0_50, %c0_51, %c0_52] : memref<2x64x128xf32, #tpu.memory_space<vmem>>, vector<1x64x128xf32>
    %110 = vector.shape_cast %109 : vector<1x64x128xf32> to vector<64x128xf32>
    %111 = vector.shape_cast %108 : vector<64x128xf32> to vector<1x64x128xf32>
    tpu.vector_store %arg20[%c0_50, %c0_51, %c0_52], %111 {strides = array<i32>} : memref<2x64x128xf32, #tpu.memory_space<vmem>>, vector<1x64x128xf32>,
    %112 = vector.extract_strided_slice %90 {offsets = [0, 128], sizes = [64, 128], strides = [1, 1]} : vector<64x256xf32> to vector<64x128xf32>
    %c1_53 = arith.constant 1 : index
    %c0_54 = arith.constant 0 : index
    %c0_55 = arith.constant 0 : index
    %113 = vector.load %arg7[%c1_53, %c0_54, %c0_55] : memref<2x128x128xf32, #tpu.memory_space<vmem>>, vector<1x128x128xf32>
    %114 = vector.shape_cast %113 : vector<1x128x128xf32> to vector<128x128xf32>
    %cst_56 = arith.constant dense<0.000000e+00> : vector<64x128xf32>
    %115 = tpu.matmul %112, %114, %cst_56 {dimension_numbers = #tpu.dot_dimension_numbers<[1], [0], [0], [1], [0, 0, 1, 1], [], []>} : vector<64x128xf32>, vector<128x128xf32>, vector<64x128xf32> -> vector<64x128xf32>
    %c1_57 = arith.constant 1 : index
    %c0_58 = arith.constant 0 : index
    %c0_59 = arith.constant 0 : index
    %116 = vector.load %arg8[%c1_57, %c0_58, %c0_59] : memref<2x1x128xf32, #tpu.memory_space<vmem>>, vector<1x1x128xf32>
    %117 = vector.shape_cast %116 : vector<1x1x128xf32> to vector<1x128xf32>
    %118 = vector.broadcast %117 : vector<1x128xf32> to vector<64x128xf32>
    %119 = arith.addf %115, %118 : vector<64x128xf32>
    %cst_60 = arith.constant 2.000000e+01 : f32
    %120 = vector.broadcast %cst_60 : f32 to vector<64x128xf32>
    %121 = arith.cmpf ogt, %119, %120 : vector<64x128xf32>
    %cst_61 = arith.constant 2.000000e+01 : f32
    %122 = vector.broadcast %cst_61 : f32 to vector<64x128xf32>
    %123 = arith.minimumf %119, %122 : vector<64x128xf32>
    %124 = math.exp %123 : vector<64x128xf32>
    %cst_62 = arith.constant 1.000000e+00 : f32
    %125 = vector.broadcast %cst_62 : f32 to vector<64x128xf32>
    %126 = arith.addf %125, %124 : vector<64x128xf32>
    %127 = math.log %126 : vector<64x128xf32>
    %128 = arith.select %121, %119, %127 : vector<64x128xi1>, vector<64x128xf32>
    %c1_63 = arith.constant 1 : index
    %c0_64 = arith.constant 0 : index
    %c0_65 = arith.constant 0 : index
    %129 = vector.load %arg20[%c1_63, %c0_64, %c0_65] : memref<2x64x128xf32, #tpu.memory_space<vmem>>, vector<1x64x128xf32>
    %130 = vector.shape_cast %129 : vector<1x64x128xf32> to vector<64x128xf32>
    %131 = vector.shape_cast %128 : vector<64x128xf32> to vector<1x64x128xf32>
    tpu.vector_store %arg20[%c1_63, %c0_64, %c0_65], %131 {strides = array<i32>} : memref<2x64x128xf32, #tpu.memory_space<vmem>>, vector<1x64x128xf32>,
    %c0_66 = arith.constant 0 : index
    %c0_67 = arith.constant 0 : index
    %c0_68 = arith.constant 0 : index
    %132 = vector.load %arg10[%c0_66, %c0_67, %c0_68] : memref<2x1x128xf32, #tpu.memory_space<vmem>>, vector<1x1x128xf32>
    %133 = vector.shape_cast %132 : vector<1x1x128xf32> to vector<1x128xf32>
    %c1_69 = arith.constant 1 : index
    %c0_70 = arith.constant 0 : index
    %c0_71 = arith.constant 0 : index
    %134 = vector.load %arg10[%c1_69, %c0_70, %c0_71] : memref<2x1x128xf32, #tpu.memory_space<vmem>>, vector<1x1x128xf32>
    %135 = vector.shape_cast %134 : vector<1x1x128xf32> to vector<1x128xf32>
    %136 = arith.addf %133, %135 : vector<1x128xf32>
    %137 = vector.broadcast %136 : vector<1x128xf32> to vector<64x128xf32>
    %138 = arith.mulf %86, %137 : vector<64x128xf32>
    %c0_72 = arith.constant 0 : index
    %c0_73 = arith.constant 0 : index
    %139 = vector.load %arg21[%c0_72, %c0_73] : memref<64x128xf32, #tpu.memory_space<vmem>>, vector<64x128xf32>
    tpu.vector_store %arg21[%c0_72, %c0_73], %138 {strides = array<i32>} : memref<64x128xf32, #tpu.memory_space<vmem>>, vector<64x128xf32>,
    %140 = tpu.iota {dimensions = array<i32: 1>} : vector<16x512xi32>
    %141 = tpu.iota {dimensions = array<i32: 0>} : vector<16x512xi32>
    %c0_i32 = arith.constant 0 : i32
    %142 = vector.broadcast %c0_i32 : i32 to vector<16x512xi32>
    %143 = arith.subi %141, %142 : vector<16x512xi32>
    %c128_i32 = arith.constant 128 : i32
    %144 = vector.broadcast %c128_i32 : i32 to vector<16x512xi32>
    %145 = arith.muli %143, %144 : vector<16x512xi32>
    %146 = arith.subi %140, %145 : vector<16x512xi32>
    %c0_i32_74 = arith.constant 0 : i32
    %147 = vector.broadcast %c0_i32_74 : i32 to vector<16x512xi32>
    %148 = arith.cmpi sge, %146, %147 : vector<16x512xi32>
    %c128_i32_75 = arith.constant 128 : i32
    %149 = vector.broadcast %c128_i32_75 : i32 to vector<16x512xi32>
    %150 = arith.cmpi slt, %146, %149 : vector<16x512xi32>
    %151 = arith.andi %148, %150 : vector<16x512xi1>
    %152 = arith.extui %151 : vector<16x512xi1> to vector<16x512xi32>
    %153 = arith.sitofp %152 : vector<16x512xi32> to vector<16x512xf32>
    %154 = tpu.iota {dimensions = array<i32: 1>} : vector<16x512xi32>
    %155 = tpu.iota {dimensions = array<i32: 0>} : vector<16x512xi32>
    %c4_i32 = arith.constant 4 : i32
    %156 = vector.broadcast %c4_i32 : i32 to vector<16x512xi32>
    %157 = arith.subi %155, %156 : vector<16x512xi32>
    %c128_i32_76 = arith.constant 128 : i32
    %158 = vector.broadcast %c128_i32_76 : i32 to vector<16x512xi32>
    %159 = arith.muli %157, %158 : vector<16x512xi32>
    %160 = arith.subi %154, %159 : vector<16x512xi32>
    %c0_i32_77 = arith.constant 0 : i32
    %161 = vector.broadcast %c0_i32_77 : i32 to vector<16x512xi32>
    %162 = arith.cmpi sge, %160, %161 : vector<16x512xi32>
    %c128_i32_78 = arith.constant 128 : i32
    %163 = vector.broadcast %c128_i32_78 : i32 to vector<16x512xi32>
    %164 = arith.cmpi slt, %160, %163 : vector<16x512xi32>
    %165 = arith.andi %162, %164 : vector<16x512xi1>
    %166 = arith.extui %165 : vector<16x512xi1> to vector<16x512xi32>
    %167 = arith.sitofp %166 : vector<16x512xi32> to vector<16x512xf32>
    %168 = tpu.iota {dimensions = array<i32: 1>} : vector<16x512xi32>
    %169 = tpu.iota {dimensions = array<i32: 0>} : vector<16x512xi32>
    %c8_i32 = arith.constant 8 : i32
    %170 = vector.broadcast %c8_i32 : i32 to vector<16x512xi32>
    %171 = arith.subi %169, %170 : vector<16x512xi32>
    %c128_i32_79 = arith.constant 128 : i32
    %172 = vector.broadcast %c128_i32_79 : i32 to vector<16x512xi32>
    %173 = arith.muli %171, %172 : vector<16x512xi32>
    %174 = arith.subi %168, %173 : vector<16x512xi32>
    %c0_i32_80 = arith.constant 0 : i32
    %175 = vector.broadcast %c0_i32_80 : i32 to vector<16x512xi32>
    %176 = arith.cmpi sge, %174, %175 : vector<16x512xi32>
    %c128_i32_81 = arith.constant 128 : i32
    %177 = vector.broadcast %c128_i32_81 : i32 to vector<16x512xi32>
    %178 = arith.cmpi slt, %174, %177 : vector<16x512xi32>
    %179 = arith.andi %176, %178 : vector<16x512xi1>
    %180 = arith.extui %179 : vector<16x512xi1> to vector<16x512xi32>
    %181 = arith.sitofp %180 : vector<16x512xi32> to vector<16x512xf32>
    %182 = tpu.iota {dimensions = array<i32: 1>} : vector<16x512xi32>
    %183 = tpu.iota {dimensions = array<i32: 0>} : vector<16x512xi32>
    %c12_i32 = arith.constant 12 : i32
    %184 = vector.broadcast %c12_i32 : i32 to vector<16x512xi32>
    %185 = arith.subi %183, %184 : vector<16x512xi32>
    %c128_i32_82 = arith.constant 128 : i32
    %186 = vector.broadcast %c128_i32_82 : i32 to vector<16x512xi32>
    %187 = arith.muli %185, %186 : vector<16x512xi32>
    %188 = arith.subi %182, %187 : vector<16x512xi32>
    %c0_i32_83 = arith.constant 0 : i32
    %189 = vector.broadcast %c0_i32_83 : i32 to vector<16x512xi32>
    %190 = arith.cmpi sge, %188, %189 : vector<16x512xi32>
    %c128_i32_84 = arith.constant 128 : i32
    %191 = vector.broadcast %c128_i32_84 : i32 to vector<16x512xi32>
    %192 = arith.cmpi slt, %188, %191 : vector<16x512xi32>
    %193 = arith.andi %190, %192 : vector<16x512xi1>
    %194 = arith.extui %193 : vector<16x512xi1> to vector<16x512xi32>
    %195 = arith.sitofp %194 : vector<16x512xi32> to vector<16x512xf32>
    %196 = tpu.iota {dimensions = array<i32: 0>} : vector<8x1xi32>
    %cst_85 = arith.constant 0.000000e+00 : f32
    %197 = vector.broadcast %cst_85 : f32 to vector<1x512xf32>
    %cst_86 = arith.constant 0.000000e+00 : f32
    %198 = vector.broadcast %cst_86 : f32 to vector<1x512xf32>
    %cst_87 = arith.constant 0.000000e+00 : f32
    %199 = vector.broadcast %cst_87 : f32 to vector<1x512xf32>
    %cst_88 = arith.constant 0.000000e+00 : f32
    %200 = vector.broadcast %cst_88 : f32 to vector<1x512xf32>
    %c0_i32_89 = arith.constant 0 : i32
    %c8_i32_90 = arith.constant 8 : i32
    %201 = arith.addi %c0_i32_89, %c8_i32_90 : i32
    %c1_i32 = arith.constant 1 : i32
    %202:8 = scf.for %arg22 = %c0_i32_89 to %201 step %c1_i32 iter_args(%arg23 = %197, %arg24 = %198, %arg25 = %199, %arg26 = %200, %arg27 = %197, %arg28 = %198, %arg29 = %199, %arg30 = %200) -> (vector<1x512xf32>, vector<1x512xf32>, vector<1x512xf32>, vector<1x512xf32>, vector<1x512xf32>, vector<1x512xf32>, vector<1x512xf32>, vector<1x512xf32>)  : i32 {
      %c8_i32_126 = arith.constant 8 : i32
      %268 = arith.muli %arg22, %c8_i32_126 : i32
      %269 = tpu.assume_multiple %268, 8 : i32
      %c7_i32 = arith.constant 7 : i32
      %270 = arith.subi %c7_i32, %arg22 : i32
      %c8_i32_127 = arith.constant 8 : i32
      %271 = arith.muli %270, %c8_i32_127 : i32
      %272 = tpu.assume_multiple %271, 8 : i32
      %c0_128 = arith.constant 0 : index
      %273 = arith.index_cast %269 : i32 to index
      %c0_129 = arith.constant 0 : index
      %274 = vector.load %arg20[%c0_128, %273, %c0_129] : memref<2x64x128xf32, #tpu.memory_space<vmem>>, vector<1x8x128xf32>
      %275 = vector.shape_cast %274 : vector<1x8x128xf32> to vector<8x128xf32>
      %276 = arith.index_cast %269 : i32 to index
      %c0_130 = arith.constant 0 : index
      %277 = vector.load %arg18[%276, %c0_130] : memref<64x128xf32, #tpu.memory_space<vmem>>, vector<8x128xf32>
      %278 = arith.mulf %275, %277 : vector<8x128xf32>
      %279 = arith.index_cast %269 : i32 to index
      %c0_131 = arith.constant 0 : index
      %280 = vector.load %arg19[%279, %c0_131] : memref<64x256xf32, #tpu.memory_space<vmem>>, vector<8x128xf32>
      %281 = vector.extract_strided_slice %280 {offsets = [0, 1], sizes = [8, 16], strides = [1, 1]} : vector<8x128xf32> to vector<8x16xf32>
      %282 = vector.extract_strided_slice %280 {offsets = [0, 17], sizes = [8, 16], strides = [1, 1]} : vector<8x128xf32> to vector<8x16xf32>
      %c1_132 = arith.constant 1 : index
      %283 = arith.index_cast %272 : i32 to index
      %c0_133 = arith.constant 0 : index
      %284 = vector.load %arg20[%c1_132, %283, %c0_133] : memref<2x64x128xf32, #tpu.memory_space<vmem>>, vector<1x8x128xf32>
      %285 = vector.shape_cast %284 : vector<1x8x128xf32> to vector<8x128xf32>
      %286 = arith.index_cast %272 : i32 to index
      %c0_134 = arith.constant 0 : index
      %287 = vector.load %arg18[%286, %c0_134] : memref<64x128xf32, #tpu.memory_space<vmem>>, vector<8x128xf32>
      %288 = arith.mulf %285, %287 : vector<8x128xf32>
      %289 = arith.index_cast %272 : i32 to index
      %c128 = arith.constant 128 : index
      %290 = vector.load %arg19[%289, %c128] : memref<64x256xf32, #tpu.memory_space<vmem>>, vector<8x128xf32>
      %291 = vector.extract_strided_slice %290 {offsets = [0, 1], sizes = [8, 16], strides = [1, 1]} : vector<8x128xf32> to vector<8x16xf32>
      %292 = vector.extract_strided_slice %290 {offsets = [0, 17], sizes = [8, 16], strides = [1, 1]} : vector<8x128xf32> to vector<8x16xf32>
      %cst_135 = arith.constant 0.000000e+00 : f32
      %293 = vector.broadcast %cst_135 : f32 to vector<8x128xf32>
      %cst_136 = arith.constant 0.000000e+00 : f32
      %294 = vector.broadcast %cst_136 : f32 to vector<8x128xf32>
      %c0_137 = arith.constant 0 : index
      %c0_138 = arith.constant 0 : index
      %c0_139 = arith.constant 0 : index
      %295 = vector.load %arg9[%c0_137, %c0_138, %c0_139] : memref<2x1x2048xf32, #tpu.memory_space<vmem>>, vector<1x1x512xf32>
      %296 = vector.shape_cast %295 : vector<1x1x512xf32> to vector<1x512xf32>
      %c1_140 = arith.constant 1 : index
      %c0_141 = arith.constant 0 : index
      %c0_142 = arith.constant 0 : index
      %297 = vector.load %arg9[%c1_140, %c0_141, %c0_142] : memref<2x1x2048xf32, #tpu.memory_space<vmem>>, vector<1x1x512xf32>
      %298 = vector.shape_cast %297 : vector<1x1x512xf32> to vector<1x512xf32>
      %cst_143 = arith.constant dense<0.000000e+00> : vector<8x512xf32>
      %299 = tpu.matmul %281, %153, %cst_143 {dimension_numbers = #tpu.dot_dimension_numbers<[1], [0], [0], [1], [0, 0, 1, 1], [], []>} : vector<8x16xf32>, vector<16x512xf32>, vector<8x512xf32> -> vector<8x512xf32>
      %cst_144 = arith.constant dense<0.000000e+00> : vector<8x512xf32>
      %300 = tpu.matmul %282, %153, %cst_144 {dimension_numbers = #tpu.dot_dimension_numbers<[1], [0], [0], [1], [0, 0, 1, 1], [], []>} : vector<8x16xf32>, vector<16x512xf32>, vector<8x512xf32> -> vector<8x512xf32>
      %cst_145 = arith.constant dense<0.000000e+00> : vector<8x512xf32>
      %301 = tpu.matmul %291, %153, %cst_145 {dimension_numbers = #tpu.dot_dimension_numbers<[1], [0], [0], [1], [0, 0, 1, 1], [], []>} : vector<8x16xf32>, vector<16x512xf32>, vector<8x512xf32> -> vector<8x512xf32>
      %cst_146 = arith.constant dense<0.000000e+00> : vector<8x512xf32>
      %302 = tpu.matmul %292, %153, %cst_146 {dimension_numbers = #tpu.dot_dimension_numbers<[1], [0], [0], [1], [0, 0, 1, 1], [], []>} : vector<8x16xf32>, vector<16x512xf32>, vector<8x512xf32> -> vector<8x512xf32>
      %303 = tpu.concatenate %275, %275, %275, %275 in 1 : vector<8x128xf32>, vector<8x128xf32>, vector<8x128xf32>, vector<8x128xf32> -> vector<8x512xf32>
      %304 = vector.broadcast %296 : vector<1x512xf32> to vector<8x512xf32>
      %305 = arith.mulf %303, %304 : vector<8x512xf32>
      %306 = math.exp %305 : vector<8x512xf32>
      %307 = tpu.concatenate %285, %285, %285, %285 in 1 : vector<8x128xf32>, vector<8x128xf32>, vector<8x128xf32>, vector<8x128xf32> -> vector<8x512xf32>
      %308 = vector.broadcast %298 : vector<1x512xf32> to vector<8x512xf32>
      %309 = arith.mulf %307, %308 : vector<8x512xf32>
      %310 = math.exp %309 : vector<8x512xf32>
      %311 = tpu.concatenate %278, %278, %278, %278 in 1 : vector<8x128xf32>, vector<8x128xf32>, vector<8x128xf32>, vector<8x128xf32> -> vector<8x512xf32>
      %312 = arith.mulf %311, %299 : vector<8x512xf32>
      %313 = tpu.concatenate %288, %288, %288, %288 in 1 : vector<8x128xf32>, vector<8x128xf32>, vector<8x128xf32>, vector<8x128xf32> -> vector<8x512xf32>
      %314 = arith.mulf %313, %301 : vector<8x512xf32>
      %315 = vector.extract_strided_slice %306 {offsets = [0, 0], sizes = [1, 512], strides = [1, 1]} : vector<8x512xf32> to vector<1x512xf32>
      %316 = arith.mulf %315, %arg23 : vector<1x512xf32>
      %317 = vector.extract_strided_slice %312 {offsets = [0, 0], sizes = [1, 512], strides = [1, 1]} : vector<8x512xf32> to vector<1x512xf32>
      %318 = arith.addf %316, %317 : vector<1x512xf32>
      %319 = vector.extract_strided_slice %310 {offsets = [7, 0], sizes = [1, 512], strides = [1, 1]} : vector<8x512xf32> to vector<1x512xf32>
      %320 = arith.mulf %319, %arg27 : vector<1x512xf32>
      %321 = vector.extract_strided_slice %314 {offsets = [7, 0], sizes = [1, 512], strides = [1, 1]} : vector<8x512xf32> to vector<1x512xf32>
      %322 = arith.addf %320, %321 : vector<1x512xf32>
      %323 = vector.extract_strided_slice %300 {offsets = [0, 0], sizes = [1, 512], strides = [1, 1]} : vector<8x512xf32> to vector<1x512xf32>
      %324 = arith.mulf %318, %323 : vector<1x512xf32>
      %325 = vector.extract_strided_slice %302 {offsets = [7, 0], sizes = [1, 512], strides = [1, 1]} : vector<8x512xf32> to vector<1x512xf32>
      %326 = arith.mulf %322, %325 : vector<1x512xf32>
      %327 = vector.extract_strided_slice %324 {offsets = [0, 0], sizes = [1, 128], strides = [1, 1]} : vector<1x512xf32> to vector<1x128xf32>
      %328 = vector.extract_strided_slice %326 {offsets = [0, 0], sizes = [1, 128], strides = [1, 1]} : vector<1x512xf32> to vector<1x128xf32>
      %329 = vector.extract_strided_slice %324 {offsets = [0, 128], sizes = [1, 128], strides = [1, 1]} : vector<1x512xf32> to vector<1x128xf32>
      %330 = arith.addf %327, %329 : vector<1x128xf32>
      %331 = vector.extract_strided_slice %326 {offsets = [0, 128], sizes = [1, 128], strides = [1, 1]} : vector<1x512xf32> to vector<1x128xf32>
      %332 = arith.addf %328, %331 : vector<1x128xf32>
      %333 = vector.extract_strided_slice %324 {offsets = [0, 256], sizes = [1, 128], strides = [1, 1]} : vector<1x512xf32> to vector<1x128xf32>
      %334 = arith.addf %330, %333 : vector<1x128xf32>
      %335 = vector.extract_strided_slice %326 {offsets = [0, 256], sizes = [1, 128], strides = [1, 1]} : vector<1x512xf32> to vector<1x128xf32>
      %336 = arith.addf %332, %335 : vector<1x128xf32>
      %337 = vector.extract_strided_slice %324 {offsets = [0, 384], sizes = [1, 128], strides = [1, 1]} : vector<1x512xf32> to vector<1x128xf32>
      %338 = arith.addf %334, %337 : vector<1x128xf32>
      %339 = vector.extract_strided_slice %326 {offsets = [0, 384], sizes = [1, 128], strides = [1, 1]} : vector<1x512xf32> to vector<1x128xf32>
      %340 = arith.addf %336, %339 : vector<1x128xf32>
      %c0_i32_147 = arith.constant 0 : i32
      %341 = vector.broadcast %c0_i32_147 : i32 to vector<8x1xi32>
      %342 = arith.cmpi eq, %196, %341 : vector<8x1xi32>
      %343 = vector.broadcast %338 : vector<1x128xf32> to vector<8x128xf32>
      %344 = arith.addf %293, %343 : vector<8x128xf32>
      %345 = vector.shape_cast %342 : vector<8x1xi1> to vector<8x1xi1>
      %346 = vector.broadcast %345 : vector<8x1xi1> to vector<8x128xi1>
      %347 = arith.select %346, %344, %293 : vector<8x128xi1>, vector<8x128xf32>
      %c7_i32_148 = arith.constant 7 : i32
      %348 = vector.broadcast %c7_i32_148 : i32 to vector<8x1xi32>
      %349 = arith.cmpi eq, %196, %348 : vector<8x1xi32>
      %350 = vector.broadcast %340 : vector<1x128xf32> to vector<8x128xf32>
      %351 = arith.addf %294, %350 : vector<8x128xf32>
      %352 = vector.shape_cast %349 : vector<8x1xi1> to vector<8x1xi1>
      %353 = vector.broadcast %352 : vector<8x1xi1> to vector<8x128xi1>
      %354 = arith.select %353, %351, %294 : vector<8x128xi1>, vector<8x128xf32>
      %355 = vector.extract_strided_slice %306 {offsets = [1, 0], sizes = [1, 512], strides = [1, 1]} : vector<8x512xf32> to vector<1x512xf32>
      %356 = arith.mulf %355, %318 : vector<1x512xf32>
      %357 = vector.extract_strided_slice %312 {offsets = [1, 0], sizes = [1, 512], strides = [1, 1]} : vector<8x512xf32> to vector<1x512xf32>
      %358 = arith.addf %356, %357 : vector<1x512xf32>
      %359 = vector.extract_strided_slice %310 {offsets = [6, 0], sizes = [1, 512], strides = [1, 1]} : vector<8x512xf32> to vector<1x512xf32>
      %360 = arith.mulf %359, %322 : vector<1x512xf32>
      %361 = vector.extract_strided_slice %314 {offsets = [6, 0], sizes = [1, 512], strides = [1, 1]} : vector<8x512xf32> to vector<1x512xf32>
      %362 = arith.addf %360, %361 : vector<1x512xf32>
      %363 = vector.extract_strided_slice %300 {offsets = [1, 0], sizes = [1, 512], strides = [1, 1]} : vector<8x512xf32> to vector<1x512xf32>
      %364 = arith.mulf %358, %363 : vector<1x512xf32>
      %365 = vector.extract_strided_slice %302 {offsets = [6, 0], sizes = [1, 512], strides = [1, 1]} : vector<8x512xf32> to vector<1x512xf32>
      %366 = arith.mulf %362, %365 : vector<1x512xf32>
      %367 = vector.extract_strided_slice %364 {offsets = [0, 0], sizes = [1, 128], strides = [1, 1]} : vector<1x512xf32> to vector<1x128xf32>
      %368 = vector.extract_strided_slice %366 {offsets = [0, 0], sizes = [1, 128], strides = [1, 1]} : vector<1x512xf32> to vector<1x128xf32>
      %369 = vector.extract_strided_slice %364 {offsets = [0, 128], sizes = [1, 128], strides = [1, 1]} : vector<1x512xf32> to vector<1x128xf32>
      %370 = arith.addf %367, %369 : vector<1x128xf32>
      %371 = vector.extract_strided_slice %366 {offsets = [0, 128], sizes = [1, 128], strides = [1, 1]} : vector<1x512xf32> to vector<1x128xf32>
      %372 = arith.addf %368, %371 : vector<1x128xf32>
      %373 = vector.extract_strided_slice %364 {offsets = [0, 256], sizes = [1, 128], strides = [1, 1]} : vector<1x512xf32> to vector<1x128xf32>
      %374 = arith.addf %370, %373 : vector<1x128xf32>
      %375 = vector.extract_strided_slice %366 {offsets = [0, 256], sizes = [1, 128], strides = [1, 1]} : vector<1x512xf32> to vector<1x128xf32>
      %376 = arith.addf %372, %375 : vector<1x128xf32>
      %377 = vector.extract_strided_slice %364 {offsets = [0, 384], sizes = [1, 128], strides = [1, 1]} : vector<1x512xf32> to vector<1x128xf32>
      %378 = arith.addf %374, %377 : vector<1x128xf32>
      %379 = vector.extract_strided_slice %366 {offsets = [0, 384], sizes = [1, 128], strides = [1, 1]} : vector<1x512xf32> to vector<1x128xf32>
      %380 = arith.addf %376, %379 : vector<1x128xf32>
      %c1_i32_149 = arith.constant 1 : i32
      %381 = vector.broadcast %c1_i32_149 : i32 to vector<8x1xi32>
      %382 = arith.cmpi eq, %196, %381 : vector<8x1xi32>
      %383 = vector.broadcast %378 : vector<1x128xf32> to vector<8x128xf32>
      %384 = arith.addf %347, %383 : vector<8x128xf32>
      %385 = vector.shape_cast %382 : vector<8x1xi1> to vector<8x1xi1>
      %386 = vector.broadcast %385 : vector<8x1xi1> to vector<8x128xi1>
      %387 = arith.select %386, %384, %347 : vector<8x128xi1>, vector<8x128xf32>
      %c6_i32 = arith.constant 6 : i32
      %388 = vector.broadcast %c6_i32 : i32 to vector<8x1xi32>
      %389 = arith.cmpi eq, %196, %388 : vector<8x1xi32>
      %390 = vector.broadcast %380 : vector<1x128xf32> to vector<8x128xf32>
      %391 = arith.addf %354, %390 : vector<8x128xf32>
      %392 = vector.shape_cast %389 : vector<8x1xi1> to vector<8x1xi1>
      %393 = vector.broadcast %392 : vector<8x1xi1> to vector<8x128xi1>
      %394 = arith.select %393, %391, %354 : vector<8x128xi1>, vector<8x128xf32>
      %395 = vector.extract_strided_slice %306 {offsets = [2, 0], sizes = [1, 512], strides = [1, 1]} : vector<8x512xf32> to vector<1x512xf32>
      %396 = arith.mulf %395, %358 : vector<1x512xf32>
      %397 = vector.extract_strided_slice %312 {offsets = [2, 0], sizes = [1, 512], strides = [1, 1]} : vector<8x512xf32> to vector<1x512xf32>
      %398 = arith.addf %396, %397 : vector<1x512xf32>
      %399 = vector.extract_strided_slice %310 {offsets = [5, 0], sizes = [1, 512], strides = [1, 1]} : vector<8x512xf32> to vector<1x512xf32>
      %400 = arith.mulf %399, %362 : vector<1x512xf32>
      %401 = vector.extract_strided_slice %314 {offsets = [5, 0], sizes = [1, 512], strides = [1, 1]} : vector<8x512xf32> to vector<1x512xf32>
      %402 = arith.addf %400, %401 : vector<1x512xf32>
      %403 = vector.extract_strided_slice %300 {offsets = [2, 0], sizes = [1, 512], strides = [1, 1]} : vector<8x512xf32> to vector<1x512xf32>
      %404 = arith.mulf %398, %403 : vector<1x512xf32>
      %405 = vector.extract_strided_slice %302 {offsets = [5, 0], sizes = [1, 512], strides = [1, 1]} : vector<8x512xf32> to vector<1x512xf32>
      %406 = arith.mulf %402, %405 : vector<1x512xf32>
      %407 = vector.extract_strided_slice %404 {offsets = [0, 0], sizes = [1, 128], strides = [1, 1]} : vector<1x512xf32> to vector<1x128xf32>
      %408 = vector.extract_strided_slice %406 {offsets = [0, 0], sizes = [1, 128], strides = [1, 1]} : vector<1x512xf32> to vector<1x128xf32>
      %409 = vector.extract_strided_slice %404 {offsets = [0, 128], sizes = [1, 128], strides = [1, 1]} : vector<1x512xf32> to vector<1x128xf32>
      %410 = arith.addf %407, %409 : vector<1x128xf32>
      %411 = vector.extract_strided_slice %406 {offsets = [0, 128], sizes = [1, 128], strides = [1, 1]} : vector<1x512xf32> to vector<1x128xf32>
      %412 = arith.addf %408, %411 : vector<1x128xf32>
      %413 = vector.extract_strided_slice %404 {offsets = [0, 256], sizes = [1, 128], strides = [1, 1]} : vector<1x512xf32> to vector<1x128xf32>
      %414 = arith.addf %410, %413 : vector<1x128xf32>
      %415 = vector.extract_strided_slice %406 {offsets = [0, 256], sizes = [1, 128], strides = [1, 1]} : vector<1x512xf32> to vector<1x128xf32>
      %416 = arith.addf %412, %415 : vector<1x128xf32>
      %417 = vector.extract_strided_slice %404 {offsets = [0, 384], sizes = [1, 128], strides = [1, 1]} : vector<1x512xf32> to vector<1x128xf32>
      %418 = arith.addf %414, %417 : vector<1x128xf32>
      %419 = vector.extract_strided_slice %406 {offsets = [0, 384], sizes = [1, 128], strides = [1, 1]} : vector<1x512xf32> to vector<1x128xf32>
      %420 = arith.addf %416, %419 : vector<1x128xf32>
      %c2_i32 = arith.constant 2 : i32
      %421 = vector.broadcast %c2_i32 : i32 to vector<8x1xi32>
      %422 = arith.cmpi eq, %196, %421 : vector<8x1xi32>
      %423 = vector.broadcast %418 : vector<1x128xf32> to vector<8x128xf32>
      %424 = arith.addf %387, %423 : vector<8x128xf32>
      %425 = vector.shape_cast %422 : vector<8x1xi1> to vector<8x1xi1>
      %426 = vector.broadcast %425 : vector<8x1xi1> to vector<8x128xi1>
      %427 = arith.select %426, %424, %387 : vector<8x128xi1>, vector<8x128xf32>
      %c5_i32 = arith.constant 5 : i32
      %428 = vector.broadcast %c5_i32 : i32 to vector<8x1xi32>
      %429 = arith.cmpi eq, %196, %428 : vector<8x1xi32>
      %430 = vector.broadcast %420 : vector<1x128xf32> to vector<8x128xf32>
      %431 = arith.addf %394, %430 : vector<8x128xf32>
      %432 = vector.shape_cast %429 : vector<8x1xi1> to vector<8x1xi1>
      %433 = vector.broadcast %432 : vector<8x1xi1> to vector<8x128xi1>
      %434 = arith.select %433, %431, %394 : vector<8x128xi1>, vector<8x128xf32>
      %435 = vector.extract_strided_slice %306 {offsets = [3, 0], sizes = [1, 512], strides = [1, 1]} : vector<8x512xf32> to vector<1x512xf32>
      %436 = arith.mulf %435, %398 : vector<1x512xf32>
      %437 = vector.extract_strided_slice %312 {offsets = [3, 0], sizes = [1, 512], strides = [1, 1]} : vector<8x512xf32> to vector<1x512xf32>
      %438 = arith.addf %436, %437 : vector<1x512xf32>
      %439 = vector.extract_strided_slice %310 {offsets = [4, 0], sizes = [1, 512], strides = [1, 1]} : vector<8x512xf32> to vector<1x512xf32>
      %440 = arith.mulf %439, %402 : vector<1x512xf32>
      %441 = vector.extract_strided_slice %314 {offsets = [4, 0], sizes = [1, 512], strides = [1, 1]} : vector<8x512xf32> to vector<1x512xf32>
      %442 = arith.addf %440, %441 : vector<1x512xf32>
      %443 = vector.extract_strided_slice %300 {offsets = [3, 0], sizes = [1, 512], strides = [1, 1]} : vector<8x512xf32> to vector<1x512xf32>
      %444 = arith.mulf %438, %443 : vector<1x512xf32>
      %445 = vector.extract_strided_slice %302 {offsets = [4, 0], sizes = [1, 512], strides = [1, 1]} : vector<8x512xf32> to vector<1x512xf32>
      %446 = arith.mulf %442, %445 : vector<1x512xf32>
      %447 = vector.extract_strided_slice %444 {offsets = [0, 0], sizes = [1, 128], strides = [1, 1]} : vector<1x512xf32> to vector<1x128xf32>
      %448 = vector.extract_strided_slice %446 {offsets = [0, 0], sizes = [1, 128], strides = [1, 1]} : vector<1x512xf32> to vector<1x128xf32>
      %449 = vector.extract_strided_slice %444 {offsets = [0, 128], sizes = [1, 128], strides = [1, 1]} : vector<1x512xf32> to vector<1x128xf32>
      %450 = arith.addf %447, %449 : vector<1x128xf32>
      %451 = vector.extract_strided_slice %446 {offsets = [0, 128], sizes = [1, 128], strides = [1, 1]} : vector<1x512xf32> to vector<1x128xf32>
      %452 = arith.addf %448, %451 : vector<1x128xf32>
      %453 = vector.extract_strided_slice %444 {offsets = [0, 256], sizes = [1, 128], strides = [1, 1]} : vector<1x512xf32> to vector<1x128xf32>
      %454 = arith.addf %450, %453 : vector<1x128xf32>
      %455 = vector.extract_strided_slice %446 {offsets = [0, 256], sizes = [1, 128], strides = [1, 1]} : vector<1x512xf32> to vector<1x128xf32>
      %456 = arith.addf %452, %455 : vector<1x128xf32>
      %457 = vector.extract_strided_slice %444 {offsets = [0, 384], sizes = [1, 128], strides = [1, 1]} : vector<1x512xf32> to vector<1x128xf32>
      %458 = arith.addf %454, %457 : vector<1x128xf32>
      %459 = vector.extract_strided_slice %446 {offsets = [0, 384], sizes = [1, 128], strides = [1, 1]} : vector<1x512xf32> to vector<1x128xf32>
      %460 = arith.addf %456, %459 : vector<1x128xf32>
      %c3_i32 = arith.constant 3 : i32
      %461 = vector.broadcast %c3_i32 : i32 to vector<8x1xi32>
      %462 = arith.cmpi eq, %196, %461 : vector<8x1xi32>
      %463 = vector.broadcast %458 : vector<1x128xf32> to vector<8x128xf32>
      %464 = arith.addf %427, %463 : vector<8x128xf32>
      %465 = vector.shape_cast %462 : vector<8x1xi1> to vector<8x1xi1>
      %466 = vector.broadcast %465 : vector<8x1xi1> to vector<8x128xi1>
      %467 = arith.select %466, %464, %427 : vector<8x128xi1>, vector<8x128xf32>
      %c4_i32_150 = arith.constant 4 : i32
      %468 = vector.broadcast %c4_i32_150 : i32 to vector<8x1xi32>
      %469 = arith.cmpi eq, %196, %468 : vector<8x1xi32>
      %470 = vector.broadcast %460 : vector<1x128xf32> to vector<8x128xf32>
      %471 = arith.addf %434, %470 : vector<8x128xf32>
      %472 = vector.shape_cast %469 : vector<8x1xi1> to vector<8x1xi1>
      %473 = vector.broadcast %472 : vector<8x1xi1> to vector<8x128xi1>
      %474 = arith.select %473, %471, %434 : vector<8x128xi1>, vector<8x128xf32>
      %475 = vector.extract_strided_slice %306 {offsets = [4, 0], sizes = [1, 512], strides = [1, 1]} : vector<8x512xf32> to vector<1x512xf32>
      %476 = arith.mulf %475, %438 : vector<1x512xf32>
      %477 = vector.extract_strided_slice %312 {offsets = [4, 0], sizes = [1, 512], strides = [1, 1]} : vector<8x512xf32> to vector<1x512xf32>
      %478 = arith.addf %476, %477 : vector<1x512xf32>
      %479 = vector.extract_strided_slice %310 {offsets = [3, 0], sizes = [1, 512], strides = [1, 1]} : vector<8x512xf32> to vector<1x512xf32>
      %480 = arith.mulf %479, %442 : vector<1x512xf32>
      %481 = vector.extract_strided_slice %314 {offsets = [3, 0], sizes = [1, 512], strides = [1, 1]} : vector<8x512xf32> to vector<1x512xf32>
      %482 = arith.addf %480, %481 : vector<1x512xf32>
      %483 = vector.extract_strided_slice %300 {offsets = [4, 0], sizes = [1, 512], strides = [1, 1]} : vector<8x512xf32> to vector<1x512xf32>
      %484 = arith.mulf %478, %483 : vector<1x512xf32>
      %485 = vector.extract_strided_slice %302 {offsets = [3, 0], sizes = [1, 512], strides = [1, 1]} : vector<8x512xf32> to vector<1x512xf32>
      %486 = arith.mulf %482, %485 : vector<1x512xf32>
      %487 = vector.extract_strided_slice %484 {offsets = [0, 0], sizes = [1, 128], strides = [1, 1]} : vector<1x512xf32> to vector<1x128xf32>
      %488 = vector.extract_strided_slice %486 {offsets = [0, 0], sizes = [1, 128], strides = [1, 1]} : vector<1x512xf32> to vector<1x128xf32>
      %489 = vector.extract_strided_slice %484 {offsets = [0, 128], sizes = [1, 128], strides = [1, 1]} : vector<1x512xf32> to vector<1x128xf32>
      %490 = arith.addf %487, %489 : vector<1x128xf32>
      %491 = vector.extract_strided_slice %486 {offsets = [0, 128], sizes = [1, 128], strides = [1, 1]} : vector<1x512xf32> to vector<1x128xf32>
      %492 = arith.addf %488, %491 : vector<1x128xf32>
      %493 = vector.extract_strided_slice %484 {offsets = [0, 256], sizes = [1, 128], strides = [1, 1]} : vector<1x512xf32> to vector<1x128xf32>
      %494 = arith.addf %490, %493 : vector<1x128xf32>
      %495 = vector.extract_strided_slice %486 {offsets = [0, 256], sizes = [1, 128], strides = [1, 1]} : vector<1x512xf32> to vector<1x128xf32>
      %496 = arith.addf %492, %495 : vector<1x128xf32>
      %497 = vector.extract_strided_slice %484 {offsets = [0, 384], sizes = [1, 128], strides = [1, 1]} : vector<1x512xf32> to vector<1x128xf32>
      %498 = arith.addf %494, %497 : vector<1x128xf32>
      %499 = vector.extract_strided_slice %486 {offsets = [0, 384], sizes = [1, 128], strides = [1, 1]} : vector<1x512xf32> to vector<1x128xf32>
      %500 = arith.addf %496, %499 : vector<1x128xf32>
      %c4_i32_151 = arith.constant 4 : i32
      %501 = vector.broadcast %c4_i32_151 : i32 to vector<8x1xi32>
      %502 = arith.cmpi eq, %196, %501 : vector<8x1xi32>
      %503 = vector.broadcast %498 : vector<1x128xf32> to vector<8x128xf32>
      %504 = arith.addf %467, %503 : vector<8x128xf32>
      %505 = vector.shape_cast %502 : vector<8x1xi1> to vector<8x1xi1>
      %506 = vector.broadcast %505 : vector<8x1xi1> to vector<8x128xi1>
      %507 = arith.select %506, %504, %467 : vector<8x128xi1>, vector<8x128xf32>
      %c3_i32_152 = arith.constant 3 : i32
      %508 = vector.broadcast %c3_i32_152 : i32 to vector<8x1xi32>
      %509 = arith.cmpi eq, %196, %508 : vector<8x1xi32>
      %510 = vector.broadcast %500 : vector<1x128xf32> to vector<8x128xf32>
      %511 = arith.addf %474, %510 : vector<8x128xf32>
      %512 = vector.shape_cast %509 : vector<8x1xi1> to vector<8x1xi1>
      %513 = vector.broadcast %512 : vector<8x1xi1> to vector<8x128xi1>
      %514 = arith.select %513, %511, %474 : vector<8x128xi1>, vector<8x128xf32>
      %515 = vector.extract_strided_slice %306 {offsets = [5, 0], sizes = [1, 512], strides = [1, 1]} : vector<8x512xf32> to vector<1x512xf32>
      %516 = arith.mulf %515, %478 : vector<1x512xf32>
      %517 = vector.extract_strided_slice %312 {offsets = [5, 0], sizes = [1, 512], strides = [1, 1]} : vector<8x512xf32> to vector<1x512xf32>
      %518 = arith.addf %516, %517 : vector<1x512xf32>
      %519 = vector.extract_strided_slice %310 {offsets = [2, 0], sizes = [1, 512], strides = [1, 1]} : vector<8x512xf32> to vector<1x512xf32>
      %520 = arith.mulf %519, %482 : vector<1x512xf32>
      %521 = vector.extract_strided_slice %314 {offsets = [2, 0], sizes = [1, 512], strides = [1, 1]} : vector<8x512xf32> to vector<1x512xf32>
      %522 = arith.addf %520, %521 : vector<1x512xf32>
      %523 = vector.extract_strided_slice %300 {offsets = [5, 0], sizes = [1, 512], strides = [1, 1]} : vector<8x512xf32> to vector<1x512xf32>
      %524 = arith.mulf %518, %523 : vector<1x512xf32>
      %525 = vector.extract_strided_slice %302 {offsets = [2, 0], sizes = [1, 512], strides = [1, 1]} : vector<8x512xf32> to vector<1x512xf32>
      %526 = arith.mulf %522, %525 : vector<1x512xf32>
      %527 = vector.extract_strided_slice %524 {offsets = [0, 0], sizes = [1, 128], strides = [1, 1]} : vector<1x512xf32> to vector<1x128xf32>
      %528 = vector.extract_strided_slice %526 {offsets = [0, 0], sizes = [1, 128], strides = [1, 1]} : vector<1x512xf32> to vector<1x128xf32>
      %529 = vector.extract_strided_slice %524 {offsets = [0, 128], sizes = [1, 128], strides = [1, 1]} : vector<1x512xf32> to vector<1x128xf32>
      %530 = arith.addf %527, %529 : vector<1x128xf32>
      %531 = vector.extract_strided_slice %526 {offsets = [0, 128], sizes = [1, 128], strides = [1, 1]} : vector<1x512xf32> to vector<1x128xf32>
      %532 = arith.addf %528, %531 : vector<1x128xf32>
      %533 = vector.extract_strided_slice %524 {offsets = [0, 256], sizes = [1, 128], strides = [1, 1]} : vector<1x512xf32> to vector<1x128xf32>
      %534 = arith.addf %530, %533 : vector<1x128xf32>
      %535 = vector.extract_strided_slice %526 {offsets = [0, 256], sizes = [1, 128], strides = [1, 1]} : vector<1x512xf32> to vector<1x128xf32>
      %536 = arith.addf %532, %535 : vector<1x128xf32>
      %537 = vector.extract_strided_slice %524 {offsets = [0, 384], sizes = [1, 128], strides = [1, 1]} : vector<1x512xf32> to vector<1x128xf32>
      %538 = arith.addf %534, %537 : vector<1x128xf32>
      %539 = vector.extract_strided_slice %526 {offsets = [0, 384], sizes = [1, 128], strides = [1, 1]} : vector<1x512xf32> to vector<1x128xf32>
      %540 = arith.addf %536, %539 : vector<1x128xf32>
      %c5_i32_153 = arith.constant 5 : i32
      %541 = vector.broadcast %c5_i32_153 : i32 to vector<8x1xi32>
      %542 = arith.cmpi eq, %196, %541 : vector<8x1xi32>
      %543 = vector.broadcast %538 : vector<1x128xf32> to vector<8x128xf32>
      %544 = arith.addf %507, %543 : vector<8x128xf32>
      %545 = vector.shape_cast %542 : vector<8x1xi1> to vector<8x1xi1>
      %546 = vector.broadcast %545 : vector<8x1xi1> to vector<8x128xi1>
      %547 = arith.select %546, %544, %507 : vector<8x128xi1>, vector<8x128xf32>
      %c2_i32_154 = arith.constant 2 : i32
      %548 = vector.broadcast %c2_i32_154 : i32 to vector<8x1xi32>
      %549 = arith.cmpi eq, %196, %548 : vector<8x1xi32>
      %550 = vector.broadcast %540 : vector<1x128xf32> to vector<8x128xf32>
      %551 = arith.addf %514, %550 : vector<8x128xf32>
      %552 = vector.shape_cast %549 : vector<8x1xi1> to vector<8x1xi1>
      %553 = vector.broadcast %552 : vector<8x1xi1> to vector<8x128xi1>
      %554 = arith.select %553, %551, %514 : vector<8x128xi1>, vector<8x128xf32>
      %555 = vector.extract_strided_slice %306 {offsets = [6, 0], sizes = [1, 512], strides = [1, 1]} : vector<8x512xf32> to vector<1x512xf32>
      %556 = arith.mulf %555, %518 : vector<1x512xf32>
      %557 = vector.extract_strided_slice %312 {offsets = [6, 0], sizes = [1, 512], strides = [1, 1]} : vector<8x512xf32> to vector<1x512xf32>
      %558 = arith.addf %556, %557 : vector<1x512xf32>
      %559 = vector.extract_strided_slice %310 {offsets = [1, 0], sizes = [1, 512], strides = [1, 1]} : vector<8x512xf32> to vector<1x512xf32>
      %560 = arith.mulf %559, %522 : vector<1x512xf32>
      %561 = vector.extract_strided_slice %314 {offsets = [1, 0], sizes = [1, 512], strides = [1, 1]} : vector<8x512xf32> to vector<1x512xf32>
      %562 = arith.addf %560, %561 : vector<1x512xf32>
      %563 = vector.extract_strided_slice %300 {offsets = [6, 0], sizes = [1, 512], strides = [1, 1]} : vector<8x512xf32> to vector<1x512xf32>
      %564 = arith.mulf %558, %563 : vector<1x512xf32>
      %565 = vector.extract_strided_slice %302 {offsets = [1, 0], sizes = [1, 512], strides = [1, 1]} : vector<8x512xf32> to vector<1x512xf32>
      %566 = arith.mulf %562, %565 : vector<1x512xf32>
      %567 = vector.extract_strided_slice %564 {offsets = [0, 0], sizes = [1, 128], strides = [1, 1]} : vector<1x512xf32> to vector<1x128xf32>
      %568 = vector.extract_strided_slice %566 {offsets = [0, 0], sizes = [1, 128], strides = [1, 1]} : vector<1x512xf32> to vector<1x128xf32>
      %569 = vector.extract_strided_slice %564 {offsets = [0, 128], sizes = [1, 128], strides = [1, 1]} : vector<1x512xf32> to vector<1x128xf32>
      %570 = arith.addf %567, %569 : vector<1x128xf32>
      %571 = vector.extract_strided_slice %566 {offsets = [0, 128], sizes = [1, 128], strides = [1, 1]} : vector<1x512xf32> to vector<1x128xf32>
      %572 = arith.addf %568, %571 : vector<1x128xf32>
      %573 = vector.extract_strided_slice %564 {offsets = [0, 256], sizes = [1, 128], strides = [1, 1]} : vector<1x512xf32> to vector<1x128xf32>
      %574 = arith.addf %570, %573 : vector<1x128xf32>
      %575 = vector.extract_strided_slice %566 {offsets = [0, 256], sizes = [1, 128], strides = [1, 1]} : vector<1x512xf32> to vector<1x128xf32>
      %576 = arith.addf %572, %575 : vector<1x128xf32>
      %577 = vector.extract_strided_slice %564 {offsets = [0, 384], sizes = [1, 128], strides = [1, 1]} : vector<1x512xf32> to vector<1x128xf32>
      %578 = arith.addf %574, %577 : vector<1x128xf32>
      %579 = vector.extract_strided_slice %566 {offsets = [0, 384], sizes = [1, 128], strides = [1, 1]} : vector<1x512xf32> to vector<1x128xf32>
      %580 = arith.addf %576, %579 : vector<1x128xf32>
      %c6_i32_155 = arith.constant 6 : i32
      %581 = vector.broadcast %c6_i32_155 : i32 to vector<8x1xi32>
      %582 = arith.cmpi eq, %196, %581 : vector<8x1xi32>
      %583 = vector.broadcast %578 : vector<1x128xf32> to vector<8x128xf32>
      %584 = arith.addf %547, %583 : vector<8x128xf32>
      %585 = vector.shape_cast %582 : vector<8x1xi1> to vector<8x1xi1>
      %586 = vector.broadcast %585 : vector<8x1xi1> to vector<8x128xi1>
      %587 = arith.select %586, %584, %547 : vector<8x128xi1>, vector<8x128xf32>
      %c1_i32_156 = arith.constant 1 : i32
      %588 = vector.broadcast %c1_i32_156 : i32 to vector<8x1xi32>
      %589 = arith.cmpi eq, %196, %588 : vector<8x1xi32>
      %590 = vector.broadcast %580 : vector<1x128xf32> to vector<8x128xf32>
      %591 = arith.addf %554, %590 : vector<8x128xf32>
      %592 = vector.shape_cast %589 : vector<8x1xi1> to vector<8x1xi1>
      %593 = vector.broadcast %592 : vector<8x1xi1> to vector<8x128xi1>
      %594 = arith.select %593, %591, %554 : vector<8x128xi1>, vector<8x128xf32>
      %595 = vector.extract_strided_slice %306 {offsets = [7, 0], sizes = [1, 512], strides = [1, 1]} : vector<8x512xf32> to vector<1x512xf32>
      %596 = arith.mulf %595, %558 : vector<1x512xf32>
      %597 = vector.extract_strided_slice %312 {offsets = [7, 0], sizes = [1, 512], strides = [1, 1]} : vector<8x512xf32> to vector<1x512xf32>
      %598 = arith.addf %596, %597 : vector<1x512xf32>
      %599 = vector.extract_strided_slice %310 {offsets = [0, 0], sizes = [1, 512], strides = [1, 1]} : vector<8x512xf32> to vector<1x512xf32>
      %600 = arith.mulf %599, %562 : vector<1x512xf32>
      %601 = vector.extract_strided_slice %314 {offsets = [0, 0], sizes = [1, 512], strides = [1, 1]} : vector<8x512xf32> to vector<1x512xf32>
      %602 = arith.addf %600, %601 : vector<1x512xf32>
      %603 = vector.extract_strided_slice %300 {offsets = [7, 0], sizes = [1, 512], strides = [1, 1]} : vector<8x512xf32> to vector<1x512xf32>
      %604 = arith.mulf %598, %603 : vector<1x512xf32>
      %605 = vector.extract_strided_slice %302 {offsets = [0, 0], sizes = [1, 512], strides = [1, 1]} : vector<8x512xf32> to vector<1x512xf32>
      %606 = arith.mulf %602, %605 : vector<1x512xf32>
      %607 = vector.extract_strided_slice %604 {offsets = [0, 0], sizes = [1, 128], strides = [1, 1]} : vector<1x512xf32> to vector<1x128xf32>
      %608 = vector.extract_strided_slice %606 {offsets = [0, 0], sizes = [1, 128], strides = [1, 1]} : vector<1x512xf32> to vector<1x128xf32>
      %609 = vector.extract_strided_slice %604 {offsets = [0, 128], sizes = [1, 128], strides = [1, 1]} : vector<1x512xf32> to vector<1x128xf32>
      %610 = arith.addf %607, %609 : vector<1x128xf32>
      %611 = vector.extract_strided_slice %606 {offsets = [0, 128], sizes = [1, 128], strides = [1, 1]} : vector<1x512xf32> to vector<1x128xf32>
      %612 = arith.addf %608, %611 : vector<1x128xf32>
      %613 = vector.extract_strided_slice %604 {offsets = [0, 256], sizes = [1, 128], strides = [1, 1]} : vector<1x512xf32> to vector<1x128xf32>
      %614 = arith.addf %610, %613 : vector<1x128xf32>
      %615 = vector.extract_strided_slice %606 {offsets = [0, 256], sizes = [1, 128], strides = [1, 1]} : vector<1x512xf32> to vector<1x128xf32>
      %616 = arith.addf %612, %615 : vector<1x128xf32>
      %617 = vector.extract_strided_slice %604 {offsets = [0, 384], sizes = [1, 128], strides = [1, 1]} : vector<1x512xf32> to vector<1x128xf32>
      %618 = arith.addf %614, %617 : vector<1x128xf32>
      %619 = vector.extract_strided_slice %606 {offsets = [0, 384], sizes = [1, 128], strides = [1, 1]} : vector<1x512xf32> to vector<1x128xf32>
      %620 = arith.addf %616, %619 : vector<1x128xf32>
      %c7_i32_157 = arith.constant 7 : i32
      %621 = vector.broadcast %c7_i32_157 : i32 to vector<8x1xi32>
      %622 = arith.cmpi eq, %196, %621 : vector<8x1xi32>
      %623 = vector.broadcast %618 : vector<1x128xf32> to vector<8x128xf32>
      %624 = arith.addf %587, %623 : vector<8x128xf32>
      %625 = vector.shape_cast %622 : vector<8x1xi1> to vector<8x1xi1>
      %626 = vector.broadcast %625 : vector<8x1xi1> to vector<8x128xi1>
      %627 = arith.select %626, %624, %587 : vector<8x128xi1>, vector<8x128xf32>
      %c0_i32_158 = arith.constant 0 : i32
      %628 = vector.broadcast %c0_i32_158 : i32 to vector<8x1xi32>
      %629 = arith.cmpi eq, %196, %628 : vector<8x1xi32>
      %630 = vector.broadcast %620 : vector<1x128xf32> to vector<8x128xf32>
      %631 = arith.addf %594, %630 : vector<8x128xf32>
      %632 = vector.shape_cast %629 : vector<8x1xi1> to vector<8x1xi1>
      %633 = vector.broadcast %632 : vector<8x1xi1> to vector<8x128xi1>
      %634 = arith.select %633, %631, %594 : vector<8x128xi1>, vector<8x128xf32>
      %c0_159 = arith.constant 0 : index
      %c0_160 = arith.constant 0 : index
      %c512 = arith.constant 512 : index
      %635 = vector.load %arg9[%c0_159, %c0_160, %c512] : memref<2x1x2048xf32, #tpu.memory_space<vmem>>, vector<1x1x512xf32>
      %636 = vector.shape_cast %635 : vector<1x1x512xf32> to vector<1x512xf32>
      %c1_161 = arith.constant 1 : index
      %c0_162 = arith.constant 0 : index
      %c512_163 = arith.constant 512 : index
      %637 = vector.load %arg9[%c1_161, %c0_162, %c512_163] : memref<2x1x2048xf32, #tpu.memory_space<vmem>>, vector<1x1x512xf32>
      %638 = vector.shape_cast %637 : vector<1x1x512xf32> to vector<1x512xf32>
      %cst_164 = arith.constant dense<0.000000e+00> : vector<8x512xf32>
      %639 = tpu.matmul %281, %167, %cst_164 {dimension_numbers = #tpu.dot_dimension_numbers<[1], [0], [0], [1], [0, 0, 1, 1], [], []>} : vector<8x16xf32>, vector<16x512xf32>, vector<8x512xf32> -> vector<8x512xf32>
      %cst_165 = arith.constant dense<0.000000e+00> : vector<8x512xf32>
      %640 = tpu.matmul %282, %167, %cst_165 {dimension_numbers = #tpu.dot_dimension_numbers<[1], [0], [0], [1], [0, 0, 1, 1], [], []>} : vector<8x16xf32>, vector<16x512xf32>, vector<8x512xf32> -> vector<8x512xf32>
      %cst_166 = arith.constant dense<0.000000e+00> : vector<8x512xf32>
      %641 = tpu.matmul %291, %167, %cst_166 {dimension_numbers = #tpu.dot_dimension_numbers<[1], [0], [0], [1], [0, 0, 1, 1], [], []>} : vector<8x16xf32>, vector<16x512xf32>, vector<8x512xf32> -> vector<8x512xf32>
      %cst_167 = arith.constant dense<0.000000e+00> : vector<8x512xf32>
      %642 = tpu.matmul %292, %167, %cst_167 {dimension_numbers = #tpu.dot_dimension_numbers<[1], [0], [0], [1], [0, 0, 1, 1], [], []>} : vector<8x16xf32>, vector<16x512xf32>, vector<8x512xf32> -> vector<8x512xf32>
      %643 = tpu.concatenate %275, %275, %275, %275 in 1 : vector<8x128xf32>, vector<8x128xf32>, vector<8x128xf32>, vector<8x128xf32> -> vector<8x512xf32>
      %644 = vector.broadcast %636 : vector<1x512xf32> to vector<8x512xf32>
      %645 = arith.mulf %643, %644 : vector<8x512xf32>
      %646 = math.exp %645 : vector<8x512xf32>
      %647 = tpu.concatenate %285, %285, %285, %285 in 1 : vector<8x128xf32>, vector<8x128xf32>, vector<8x128xf32>, vector<8x128xf32> -> vector<8x512xf32>
      %648 = vector.broadcast %638 : vector<1x512xf32> to vector<8x512xf32>
      %649 = arith.mulf %647, %648 : vector<8x512xf32>
      %650 = math.exp %649 : vector<8x512xf32>
      %651 = tpu.concatenate %278, %278, %278, %278 in 1 : vector<8x128xf32>, vector<8x128xf32>, vector<8x128xf32>, vector<8x128xf32> -> vector<8x512xf32>
      %652 = arith.mulf %651, %639 : vector<8x512xf32>
      %653 = tpu.concatenate %288, %288, %288, %288 in 1 : vector<8x128xf32>, vector<8x128xf32>, vector<8x128xf32>, vector<8x128xf32> -> vector<8x512xf32>
      %654 = arith.mulf %653, %641 : vector<8x512xf32>
      %655 = vector.extract_strided_slice %646 {offsets = [0, 0], sizes = [1, 512], strides = [1, 1]} : vector<8x512xf32> to vector<1x512xf32>
      %656 = arith.mulf %655, %arg24 : vector<1x512xf32>
      %657 = vector.extract_strided_slice %652 {offsets = [0, 0], sizes = [1, 512], strides = [1, 1]} : vector<8x512xf32> to vector<1x512xf32>
      %658 = arith.addf %656, %657 : vector<1x512xf32>
      %659 = vector.extract_strided_slice %650 {offsets = [7, 0], sizes = [1, 512], strides = [1, 1]} : vector<8x512xf32> to vector<1x512xf32>
      %660 = arith.mulf %659, %arg28 : vector<1x512xf32>
      %661 = vector.extract_strided_slice %654 {offsets = [7, 0], sizes = [1, 512], strides = [1, 1]} : vector<8x512xf32> to vector<1x512xf32>
      %662 = arith.addf %660, %661 : vector<1x512xf32>
      %663 = vector.extract_strided_slice %640 {offsets = [0, 0], sizes = [1, 512], strides = [1, 1]} : vector<8x512xf32> to vector<1x512xf32>
      %664 = arith.mulf %658, %663 : vector<1x512xf32>
      %665 = vector.extract_strided_slice %642 {offsets = [7, 0], sizes = [1, 512], strides = [1, 1]} : vector<8x512xf32> to vector<1x512xf32>
      %666 = arith.mulf %662, %665 : vector<1x512xf32>
      %667 = vector.extract_strided_slice %664 {offsets = [0, 0], sizes = [1, 128], strides = [1, 1]} : vector<1x512xf32> to vector<1x128xf32>
      %668 = vector.extract_strided_slice %666 {offsets = [0, 0], sizes = [1, 128], strides = [1, 1]} : vector<1x512xf32> to vector<1x128xf32>
      %669 = vector.extract_strided_slice %664 {offsets = [0, 128], sizes = [1, 128], strides = [1, 1]} : vector<1x512xf32> to vector<1x128xf32>
      %670 = arith.addf %667, %669 : vector<1x128xf32>
      %671 = vector.extract_strided_slice %666 {offsets = [0, 128], sizes = [1, 128], strides = [1, 1]} : vector<1x512xf32> to vector<1x128xf32>
      %672 = arith.addf %668, %671 : vector<1x128xf32>
      %673 = vector.extract_strided_slice %664 {offsets = [0, 256], sizes = [1, 128], strides = [1, 1]} : vector<1x512xf32> to vector<1x128xf32>
      %674 = arith.addf %670, %673 : vector<1x128xf32>
      %675 = vector.extract_strided_slice %666 {offsets = [0, 256], sizes = [1, 128], strides = [1, 1]} : vector<1x512xf32> to vector<1x128xf32>
      %676 = arith.addf %672, %675 : vector<1x128xf32>
      %677 = vector.extract_strided_slice %664 {offsets = [0, 384], sizes = [1, 128], strides = [1, 1]} : vector<1x512xf32> to vector<1x128xf32>
      %678 = arith.addf %674, %677 : vector<1x128xf32>
      %679 = vector.extract_strided_slice %666 {offsets = [0, 384], sizes = [1, 128], strides = [1, 1]} : vector<1x512xf32> to vector<1x128xf32>
      %680 = arith.addf %676, %679 : vector<1x128xf32>
      %c0_i32_168 = arith.constant 0 : i32
      %681 = vector.broadcast %c0_i32_168 : i32 to vector<8x1xi32>
      %682 = arith.cmpi eq, %196, %681 : vector<8x1xi32>
      %683 = vector.broadcast %678 : vector<1x128xf32> to vector<8x128xf32>
      %684 = arith.addf %627, %683 : vector<8x128xf32>
      %685 = vector.shape_cast %682 : vector<8x1xi1> to vector<8x1xi1>
      %686 = vector.broadcast %685 : vector<8x1xi1> to vector<8x128xi1>
      %687 = arith.select %686, %684, %627 : vector<8x128xi1>, vector<8x128xf32>
      %c7_i32_169 = arith.constant 7 : i32
      %688 = vector.broadcast %c7_i32_169 : i32 to vector<8x1xi32>
      %689 = arith.cmpi eq, %196, %688 : vector<8x1xi32>
      %690 = vector.broadcast %680 : vector<1x128xf32> to vector<8x128xf32>
      %691 = arith.addf %634, %690 : vector<8x128xf32>
      %692 = vector.shape_cast %689 : vector<8x1xi1> to vector<8x1xi1>
      %693 = vector.broadcast %692 : vector<8x1xi1> to vector<8x128xi1>
      %694 = arith.select %693, %691, %634 : vector<8x128xi1>, vector<8x128xf32>
      %695 = vector.extract_strided_slice %646 {offsets = [1, 0], sizes = [1, 512], strides = [1, 1]} : vector<8x512xf32> to vector<1x512xf32>
      %696 = arith.mulf %695, %658 : vector<1x512xf32>
      %697 = vector.extract_strided_slice %652 {offsets = [1, 0], sizes = [1, 512], strides = [1, 1]} : vector<8x512xf32> to vector<1x512xf32>
      %698 = arith.addf %696, %697 : vector<1x512xf32>
      %699 = vector.extract_strided_slice %650 {offsets = [6, 0], sizes = [1, 512], strides = [1, 1]} : vector<8x512xf32> to vector<1x512xf32>
      %700 = arith.mulf %699, %662 : vector<1x512xf32>
      %701 = vector.extract_strided_slice %654 {offsets = [6, 0], sizes = [1, 512], strides = [1, 1]} : vector<8x512xf32> to vector<1x512xf32>
      %702 = arith.addf %700, %701 : vector<1x512xf32>
      %703 = vector.extract_strided_slice %640 {offsets = [1, 0], sizes = [1, 512], strides = [1, 1]} : vector<8x512xf32> to vector<1x512xf32>
      %704 = arith.mulf %698, %703 : vector<1x512xf32>
      %705 = vector.extract_strided_slice %642 {offsets = [6, 0], sizes = [1, 512], strides = [1, 1]} : vector<8x512xf32> to vector<1x512xf32>
      %706 = arith.mulf %702, %705 : vector<1x512xf32>
      %707 = vector.extract_strided_slice %704 {offsets = [0, 0], sizes = [1, 128], strides = [1, 1]} : vector<1x512xf32> to vector<1x128xf32>
      %708 = vector.extract_strided_slice %706 {offsets = [0, 0], sizes = [1, 128], strides = [1, 1]} : vector<1x512xf32> to vector<1x128xf32>
      %709 = vector.extract_strided_slice %704 {offsets = [0, 128], sizes = [1, 128], strides = [1, 1]} : vector<1x512xf32> to vector<1x128xf32>
      %710 = arith.addf %707, %709 : vector<1x128xf32>
      %711 = vector.extract_strided_slice %706 {offsets = [0, 128], sizes = [1, 128], strides = [1, 1]} : vector<1x512xf32> to vector<1x128xf32>
      %712 = arith.addf %708, %711 : vector<1x128xf32>
      %713 = vector.extract_strided_slice %704 {offsets = [0, 256], sizes = [1, 128], strides = [1, 1]} : vector<1x512xf32> to vector<1x128xf32>
      %714 = arith.addf %710, %713 : vector<1x128xf32>
      %715 = vector.extract_strided_slice %706 {offsets = [0, 256], sizes = [1, 128], strides = [1, 1]} : vector<1x512xf32> to vector<1x128xf32>
      %716 = arith.addf %712, %715 : vector<1x128xf32>
      %717 = vector.extract_strided_slice %704 {offsets = [0, 384], sizes = [1, 128], strides = [1, 1]} : vector<1x512xf32> to vector<1x128xf32>
      %718 = arith.addf %714, %717 : vector<1x128xf32>
      %719 = vector.extract_strided_slice %706 {offsets = [0, 384], sizes = [1, 128], strides = [1, 1]} : vector<1x512xf32> to vector<1x128xf32>
      %720 = arith.addf %716, %719 : vector<1x128xf32>
      %c1_i32_170 = arith.constant 1 : i32
      %721 = vector.broadcast %c1_i32_170 : i32 to vector<8x1xi32>
      %722 = arith.cmpi eq, %196, %721 : vector<8x1xi32>
      %723 = vector.broadcast %718 : vector<1x128xf32> to vector<8x128xf32>
      %724 = arith.addf %687, %723 : vector<8x128xf32>
      %725 = vector.shape_cast %722 : vector<8x1xi1> to vector<8x1xi1>
      %726 = vector.broadcast %725 : vector<8x1xi1> to vector<8x128xi1>
      %727 = arith.select %726, %724, %687 : vector<8x128xi1>, vector<8x128xf32>
      %c6_i32_171 = arith.constant 6 : i32
      %728 = vector.broadcast %c6_i32_171 : i32 to vector<8x1xi32>
      %729 = arith.cmpi eq, %196, %728 : vector<8x1xi32>
      %730 = vector.broadcast %720 : vector<1x128xf32> to vector<8x128xf32>
      %731 = arith.addf %694, %730 : vector<8x128xf32>
      %732 = vector.shape_cast %729 : vector<8x1xi1> to vector<8x1xi1>
      %733 = vector.broadcast %732 : vector<8x1xi1> to vector<8x128xi1>
      %734 = arith.select %733, %731, %694 : vector<8x128xi1>, vector<8x128xf32>
      %735 = vector.extract_strided_slice %646 {offsets = [2, 0], sizes = [1, 512], strides = [1, 1]} : vector<8x512xf32> to vector<1x512xf32>
      %736 = arith.mulf %735, %698 : vector<1x512xf32>
      %737 = vector.extract_strided_slice %652 {offsets = [2, 0], sizes = [1, 512], strides = [1, 1]} : vector<8x512xf32> to vector<1x512xf32>
      %738 = arith.addf %736, %737 : vector<1x512xf32>
      %739 = vector.extract_strided_slice %650 {offsets = [5, 0], sizes = [1, 512], strides = [1, 1]} : vector<8x512xf32> to vector<1x512xf32>
      %740 = arith.mulf %739, %702 : vector<1x512xf32>
      %741 = vector.extract_strided_slice %654 {offsets = [5, 0], sizes = [1, 512], strides = [1, 1]} : vector<8x512xf32> to vector<1x512xf32>
      %742 = arith.addf %740, %741 : vector<1x512xf32>
      %743 = vector.extract_strided_slice %640 {offsets = [2, 0], sizes = [1, 512], strides = [1, 1]} : vector<8x512xf32> to vector<1x512xf32>
      %744 = arith.mulf %738, %743 : vector<1x512xf32>
      %745 = vector.extract_strided_slice %642 {offsets = [5, 0], sizes = [1, 512], strides = [1, 1]} : vector<8x512xf32> to vector<1x512xf32>
      %746 = arith.mulf %742, %745 : vector<1x512xf32>
      %747 = vector.extract_strided_slice %744 {offsets = [0, 0], sizes = [1, 128], strides = [1, 1]} : vector<1x512xf32> to vector<1x128xf32>
      %748 = vector.extract_strided_slice %746 {offsets = [0, 0], sizes = [1, 128], strides = [1, 1]} : vector<1x512xf32> to vector<1x128xf32>
      %749 = vector.extract_strided_slice %744 {offsets = [0, 128], sizes = [1, 128], strides = [1, 1]} : vector<1x512xf32> to vector<1x128xf32>
      %750 = arith.addf %747, %749 : vector<1x128xf32>
      %751 = vector.extract_strided_slice %746 {offsets = [0, 128], sizes = [1, 128], strides = [1, 1]} : vector<1x512xf32> to vector<1x128xf32>
      %752 = arith.addf %748, %751 : vector<1x128xf32>
      %753 = vector.extract_strided_slice %744 {offsets = [0, 256], sizes = [1, 128], strides = [1, 1]} : vector<1x512xf32> to vector<1x128xf32>
      %754 = arith.addf %750, %753 : vector<1x128xf32>
      %755 = vector.extract_strided_slice %746 {offsets = [0, 256], sizes = [1, 128], strides = [1, 1]} : vector<1x512xf32> to vector<1x128xf32>
      %756 = arith.addf %752, %755 : vector<1x128xf32>
      %757 = vector.extract_strided_slice %744 {offsets = [0, 384], sizes = [1, 128], strides = [1, 1]} : vector<1x512xf32> to vector<1x128xf32>
      %758 = arith.addf %754, %757 : vector<1x128xf32>
      %759 = vector.extract_strided_slice %746 {offsets = [0, 384], sizes = [1, 128], strides = [1, 1]} : vector<1x512xf32> to vector<1x128xf32>
      %760 = arith.addf %756, %759 : vector<1x128xf32>
      %c2_i32_172 = arith.constant 2 : i32
      %761 = vector.broadcast %c2_i32_172 : i32 to vector<8x1xi32>
      %762 = arith.cmpi eq, %196, %761 : vector<8x1xi32>
      %763 = vector.broadcast %758 : vector<1x128xf32> to vector<8x128xf32>
      %764 = arith.addf %727, %763 : vector<8x128xf32>
      %765 = vector.shape_cast %762 : vector<8x1xi1> to vector<8x1xi1>
      %766 = vector.broadcast %765 : vector<8x1xi1> to vector<8x128xi1>
      %767 = arith.select %766, %764, %727 : vector<8x128xi1>, vector<8x128xf32>
      %c5_i32_173 = arith.constant 5 : i32
      %768 = vector.broadcast %c5_i32_173 : i32 to vector<8x1xi32>
      %769 = arith.cmpi eq, %196, %768 : vector<8x1xi32>
      %770 = vector.broadcast %760 : vector<1x128xf32> to vector<8x128xf32>
      %771 = arith.addf %734, %770 : vector<8x128xf32>
      %772 = vector.shape_cast %769 : vector<8x1xi1> to vector<8x1xi1>
      %773 = vector.broadcast %772 : vector<8x1xi1> to vector<8x128xi1>
      %774 = arith.select %773, %771, %734 : vector<8x128xi1>, vector<8x128xf32>
      %775 = vector.extract_strided_slice %646 {offsets = [3, 0], sizes = [1, 512], strides = [1, 1]} : vector<8x512xf32> to vector<1x512xf32>
      %776 = arith.mulf %775, %738 : vector<1x512xf32>
      %777 = vector.extract_strided_slice %652 {offsets = [3, 0], sizes = [1, 512], strides = [1, 1]} : vector<8x512xf32> to vector<1x512xf32>
      %778 = arith.addf %776, %777 : vector<1x512xf32>
      %779 = vector.extract_strided_slice %650 {offsets = [4, 0], sizes = [1, 512], strides = [1, 1]} : vector<8x512xf32> to vector<1x512xf32>
      %780 = arith.mulf %779, %742 : vector<1x512xf32>
      %781 = vector.extract_strided_slice %654 {offsets = [4, 0], sizes = [1, 512], strides = [1, 1]} : vector<8x512xf32> to vector<1x512xf32>
      %782 = arith.addf %780, %781 : vector<1x512xf32>
      %783 = vector.extract_strided_slice %640 {offsets = [3, 0], sizes = [1, 512], strides = [1, 1]} : vector<8x512xf32> to vector<1x512xf32>
      %784 = arith.mulf %778, %783 : vector<1x512xf32>
      %785 = vector.extract_strided_slice %642 {offsets = [4, 0], sizes = [1, 512], strides = [1, 1]} : vector<8x512xf32> to vector<1x512xf32>
      %786 = arith.mulf %782, %785 : vector<1x512xf32>
      %787 = vector.extract_strided_slice %784 {offsets = [0, 0], sizes = [1, 128], strides = [1, 1]} : vector<1x512xf32> to vector<1x128xf32>
      %788 = vector.extract_strided_slice %786 {offsets = [0, 0], sizes = [1, 128], strides = [1, 1]} : vector<1x512xf32> to vector<1x128xf32>
      %789 = vector.extract_strided_slice %784 {offsets = [0, 128], sizes = [1, 128], strides = [1, 1]} : vector<1x512xf32> to vector<1x128xf32>
      %790 = arith.addf %787, %789 : vector<1x128xf32>
      %791 = vector.extract_strided_slice %786 {offsets = [0, 128], sizes = [1, 128], strides = [1, 1]} : vector<1x512xf32> to vector<1x128xf32>
      %792 = arith.addf %788, %791 : vector<1x128xf32>
      %793 = vector.extract_strided_slice %784 {offsets = [0, 256], sizes = [1, 128], strides = [1, 1]} : vector<1x512xf32> to vector<1x128xf32>
      %794 = arith.addf %790, %793 : vector<1x128xf32>
      %795 = vector.extract_strided_slice %786 {offsets = [0, 256], sizes = [1, 128], strides = [1, 1]} : vector<1x512xf32> to vector<1x128xf32>
      %796 = arith.addf %792, %795 : vector<1x128xf32>
      %797 = vector.extract_strided_slice %784 {offsets = [0, 384], sizes = [1, 128], strides = [1, 1]} : vector<1x512xf32> to vector<1x128xf32>
      %798 = arith.addf %794, %797 : vector<1x128xf32>
      %799 = vector.extract_strided_slice %786 {offsets = [0, 384], sizes = [1, 128], strides = [1, 1]} : vector<1x512xf32> to vector<1x128xf32>
      %800 = arith.addf %796, %799 : vector<1x128xf32>
      %c3_i32_174 = arith.constant 3 : i32
      %801 = vector.broadcast %c3_i32_174 : i32 to vector<8x1xi32>
      %802 = arith.cmpi eq, %196, %801 : vector<8x1xi32>
      %803 = vector.broadcast %798 : vector<1x128xf32> to vector<8x128xf32>
      %804 = arith.addf %767, %803 : vector<8x128xf32>
      %805 = vector.shape_cast %802 : vector<8x1xi1> to vector<8x1xi1>
      %806 = vector.broadcast %805 : vector<8x1xi1> to vector<8x128xi1>
      %807 = arith.select %806, %804, %767 : vector<8x128xi1>, vector<8x128xf32>
      %c4_i32_175 = arith.constant 4 : i32
      %808 = vector.broadcast %c4_i32_175 : i32 to vector<8x1xi32>
      %809 = arith.cmpi eq, %196, %808 : vector<8x1xi32>
      %810 = vector.broadcast %800 : vector<1x128xf32> to vector<8x128xf32>
      %811 = arith.addf %774, %810 : vector<8x128xf32>
      %812 = vector.shape_cast %809 : vector<8x1xi1> to vector<8x1xi1>
      %813 = vector.broadcast %812 : vector<8x1xi1> to vector<8x128xi1>
      %814 = arith.select %813, %811, %774 : vector<8x128xi1>, vector<8x128xf32>
      %815 = vector.extract_strided_slice %646 {offsets = [4, 0], sizes = [1, 512], strides = [1, 1]} : vector<8x512xf32> to vector<1x512xf32>
      %816 = arith.mulf %815, %778 : vector<1x512xf32>
      %817 = vector.extract_strided_slice %652 {offsets = [4, 0], sizes = [1, 512], strides = [1, 1]} : vector<8x512xf32> to vector<1x512xf32>
      %818 = arith.addf %816, %817 : vector<1x512xf32>
      %819 = vector.extract_strided_slice %650 {offsets = [3, 0], sizes = [1, 512], strides = [1, 1]} : vector<8x512xf32> to vector<1x512xf32>
      %820 = arith.mulf %819, %782 : vector<1x512xf32>
      %821 = vector.extract_strided_slice %654 {offsets = [3, 0], sizes = [1, 512], strides = [1, 1]} : vector<8x512xf32> to vector<1x512xf32>
      %822 = arith.addf %820, %821 : vector<1x512xf32>
      %823 = vector.extract_strided_slice %640 {offsets = [4, 0], sizes = [1, 512], strides = [1, 1]} : vector<8x512xf32> to vector<1x512xf32>
      %824 = arith.mulf %818, %823 : vector<1x512xf32>
      %825 = vector.extract_strided_slice %642 {offsets = [3, 0], sizes = [1, 512], strides = [1, 1]} : vector<8x512xf32> to vector<1x512xf32>
      %826 = arith.mulf %822, %825 : vector<1x512xf32>
      %827 = vector.extract_strided_slice %824 {offsets = [0, 0], sizes = [1, 128], strides = [1, 1]} : vector<1x512xf32> to vector<1x128xf32>
      %828 = vector.extract_strided_slice %826 {offsets = [0, 0], sizes = [1, 128], strides = [1, 1]} : vector<1x512xf32> to vector<1x128xf32>
      %829 = vector.extract_strided_slice %824 {offsets = [0, 128], sizes = [1, 128], strides = [1, 1]} : vector<1x512xf32> to vector<1x128xf32>
      %830 = arith.addf %827, %829 : vector<1x128xf32>
      %831 = vector.extract_strided_slice %826 {offsets = [0, 128], sizes = [1, 128], strides = [1, 1]} : vector<1x512xf32> to vector<1x128xf32>
      %832 = arith.addf %828, %831 : vector<1x128xf32>
      %833 = vector.extract_strided_slice %824 {offsets = [0, 256], sizes = [1, 128], strides = [1, 1]} : vector<1x512xf32> to vector<1x128xf32>
      %834 = arith.addf %830, %833 : vector<1x128xf32>
      %835 = vector.extract_strided_slice %826 {offsets = [0, 256], sizes = [1, 128], strides = [1, 1]} : vector<1x512xf32> to vector<1x128xf32>
      %836 = arith.addf %832, %835 : vector<1x128xf32>
      %837 = vector.extract_strided_slice %824 {offsets = [0, 384], sizes = [1, 128], strides = [1, 1]} : vector<1x512xf32> to vector<1x128xf32>
      %838 = arith.addf %834, %837 : vector<1x128xf32>
      %839 = vector.extract_strided_slice %826 {offsets = [0, 384], sizes = [1, 128], strides = [1, 1]} : vector<1x512xf32> to vector<1x128xf32>
      %840 = arith.addf %836, %839 : vector<1x128xf32>
      %c4_i32_176 = arith.constant 4 : i32
      %841 = vector.broadcast %c4_i32_176 : i32 to vector<8x1xi32>
      %842 = arith.cmpi eq, %196, %841 : vector<8x1xi32>
      %843 = vector.broadcast %838 : vector<1x128xf32> to vector<8x128xf32>
      %844 = arith.addf %807, %843 : vector<8x128xf32>
      %845 = vector.shape_cast %842 : vector<8x1xi1> to vector<8x1xi1>
      %846 = vector.broadcast %845 : vector<8x1xi1> to vector<8x128xi1>
      %847 = arith.select %846, %844, %807 : vector<8x128xi1>, vector<8x128xf32>
      %c3_i32_177 = arith.constant 3 : i32
      %848 = vector.broadcast %c3_i32_177 : i32 to vector<8x1xi32>
      %849 = arith.cmpi eq, %196, %848 : vector<8x1xi32>
      %850 = vector.broadcast %840 : vector<1x128xf32> to vector<8x128xf32>
      %851 = arith.addf %814, %850 : vector<8x128xf32>
      %852 = vector.shape_cast %849 : vector<8x1xi1> to vector<8x1xi1>
      %853 = vector.broadcast %852 : vector<8x1xi1> to vector<8x128xi1>
      %854 = arith.select %853, %851, %814 : vector<8x128xi1>, vector<8x128xf32>
      %855 = vector.extract_strided_slice %646 {offsets = [5, 0], sizes = [1, 512], strides = [1, 1]} : vector<8x512xf32> to vector<1x512xf32>
      %856 = arith.mulf %855, %818 : vector<1x512xf32>
      %857 = vector.extract_strided_slice %652 {offsets = [5, 0], sizes = [1, 512], strides = [1, 1]} : vector<8x512xf32> to vector<1x512xf32>
      %858 = arith.addf %856, %857 : vector<1x512xf32>
      %859 = vector.extract_strided_slice %650 {offsets = [2, 0], sizes = [1, 512], strides = [1, 1]} : vector<8x512xf32> to vector<1x512xf32>
      %860 = arith.mulf %859, %822 : vector<1x512xf32>
      %861 = vector.extract_strided_slice %654 {offsets = [2, 0], sizes = [1, 512], strides = [1, 1]} : vector<8x512xf32> to vector<1x512xf32>
      %862 = arith.addf %860, %861 : vector<1x512xf32>
      %863 = vector.extract_strided_slice %640 {offsets = [5, 0], sizes = [1, 512], strides = [1, 1]} : vector<8x512xf32> to vector<1x512xf32>
      %864 = arith.mulf %858, %863 : vector<1x512xf32>
      %865 = vector.extract_strided_slice %642 {offsets = [2, 0], sizes = [1, 512], strides = [1, 1]} : vector<8x512xf32> to vector<1x512xf32>
      %866 = arith.mulf %862, %865 : vector<1x512xf32>
      %867 = vector.extract_strided_slice %864 {offsets = [0, 0], sizes = [1, 128], strides = [1, 1]} : vector<1x512xf32> to vector<1x128xf32>
      %868 = vector.extract_strided_slice %866 {offsets = [0, 0], sizes = [1, 128], strides = [1, 1]} : vector<1x512xf32> to vector<1x128xf32>
      %869 = vector.extract_strided_slice %864 {offsets = [0, 128], sizes = [1, 128], strides = [1, 1]} : vector<1x512xf32> to vector<1x128xf32>
      %870 = arith.addf %867, %869 : vector<1x128xf32>
      %871 = vector.extract_strided_slice %866 {offsets = [0, 128], sizes = [1, 128], strides = [1, 1]} : vector<1x512xf32> to vector<1x128xf32>
      %872 = arith.addf %868, %871 : vector<1x128xf32>
      %873 = vector.extract_strided_slice %864 {offsets = [0, 256], sizes = [1, 128], strides = [1, 1]} : vector<1x512xf32> to vector<1x128xf32>
      %874 = arith.addf %870, %873 : vector<1x128xf32>
      %875 = vector.extract_strided_slice %866 {offsets = [0, 256], sizes = [1, 128], strides = [1, 1]} : vector<1x512xf32> to vector<1x128xf32>
      %876 = arith.addf %872, %875 : vector<1x128xf32>
      %877 = vector.extract_strided_slice %864 {offsets = [0, 384], sizes = [1, 128], strides = [1, 1]} : vector<1x512xf32> to vector<1x128xf32>
      %878 = arith.addf %874, %877 : vector<1x128xf32>
      %879 = vector.extract_strided_slice %866 {offsets = [0, 384], sizes = [1, 128], strides = [1, 1]} : vector<1x512xf32> to vector<1x128xf32>
      %880 = arith.addf %876, %879 : vector<1x128xf32>
      %c5_i32_178 = arith.constant 5 : i32
      %881 = vector.broadcast %c5_i32_178 : i32 to vector<8x1xi32>
      %882 = arith.cmpi eq, %196, %881 : vector<8x1xi32>
      %883 = vector.broadcast %878 : vector<1x128xf32> to vector<8x128xf32>
      %884 = arith.addf %847, %883 : vector<8x128xf32>
      %885 = vector.shape_cast %882 : vector<8x1xi1> to vector<8x1xi1>
      %886 = vector.broadcast %885 : vector<8x1xi1> to vector<8x128xi1>
      %887 = arith.select %886, %884, %847 : vector<8x128xi1>, vector<8x128xf32>
      %c2_i32_179 = arith.constant 2 : i32
      %888 = vector.broadcast %c2_i32_179 : i32 to vector<8x1xi32>
      %889 = arith.cmpi eq, %196, %888 : vector<8x1xi32>
      %890 = vector.broadcast %880 : vector<1x128xf32> to vector<8x128xf32>
      %891 = arith.addf %854, %890 : vector<8x128xf32>
      %892 = vector.shape_cast %889 : vector<8x1xi1> to vector<8x1xi1>
      %893 = vector.broadcast %892 : vector<8x1xi1> to vector<8x128xi1>
      %894 = arith.select %893, %891, %854 : vector<8x128xi1>, vector<8x128xf32>
      %895 = vector.extract_strided_slice %646 {offsets = [6, 0], sizes = [1, 512], strides = [1, 1]} : vector<8x512xf32> to vector<1x512xf32>
      %896 = arith.mulf %895, %858 : vector<1x512xf32>
      %897 = vector.extract_strided_slice %652 {offsets = [6, 0], sizes = [1, 512], strides = [1, 1]} : vector<8x512xf32> to vector<1x512xf32>
      %898 = arith.addf %896, %897 : vector<1x512xf32>
      %899 = vector.extract_strided_slice %650 {offsets = [1, 0], sizes = [1, 512], strides = [1, 1]} : vector<8x512xf32> to vector<1x512xf32>
      %900 = arith.mulf %899, %862 : vector<1x512xf32>
      %901 = vector.extract_strided_slice %654 {offsets = [1, 0], sizes = [1, 512], strides = [1, 1]} : vector<8x512xf32> to vector<1x512xf32>
      %902 = arith.addf %900, %901 : vector<1x512xf32>
      %903 = vector.extract_strided_slice %640 {offsets = [6, 0], sizes = [1, 512], strides = [1, 1]} : vector<8x512xf32> to vector<1x512xf32>
      %904 = arith.mulf %898, %903 : vector<1x512xf32>
      %905 = vector.extract_strided_slice %642 {offsets = [1, 0], sizes = [1, 512], strides = [1, 1]} : vector<8x512xf32> to vector<1x512xf32>
      %906 = arith.mulf %902, %905 : vector<1x512xf32>
      %907 = vector.extract_strided_slice %904 {offsets = [0, 0], sizes = [1, 128], strides = [1, 1]} : vector<1x512xf32> to vector<1x128xf32>
      %908 = vector.extract_strided_slice %906 {offsets = [0, 0], sizes = [1, 128], strides = [1, 1]} : vector<1x512xf32> to vector<1x128xf32>
      %909 = vector.extract_strided_slice %904 {offsets = [0, 128], sizes = [1, 128], strides = [1, 1]} : vector<1x512xf32> to vector<1x128xf32>
      %910 = arith.addf %907, %909 : vector<1x128xf32>
      %911 = vector.extract_strided_slice %906 {offsets = [0, 128], sizes = [1, 128], strides = [1, 1]} : vector<1x512xf32> to vector<1x128xf32>
      %912 = arith.addf %908, %911 : vector<1x128xf32>
      %913 = vector.extract_strided_slice %904 {offsets = [0, 256], sizes = [1, 128], strides = [1, 1]} : vector<1x512xf32> to vector<1x128xf32>
      %914 = arith.addf %910, %913 : vector<1x128xf32>
      %915 = vector.extract_strided_slice %906 {offsets = [0, 256], sizes = [1, 128], strides = [1, 1]} : vector<1x512xf32> to vector<1x128xf32>
      %916 = arith.addf %912, %915 : vector<1x128xf32>
      %917 = vector.extract_strided_slice %904 {offsets = [0, 384], sizes = [1, 128], strides = [1, 1]} : vector<1x512xf32> to vector<1x128xf32>
      %918 = arith.addf %914, %917 : vector<1x128xf32>
      %919 = vector.extract_strided_slice %906 {offsets = [0, 384], sizes = [1, 128], strides = [1, 1]} : vector<1x512xf32> to vector<1x128xf32>
      %920 = arith.addf %916, %919 : vector<1x128xf32>
      %c6_i32_180 = arith.constant 6 : i32
      %921 = vector.broadcast %c6_i32_180 : i32 to vector<8x1xi32>
      %922 = arith.cmpi eq, %196, %921 : vector<8x1xi32>
      %923 = vector.broadcast %918 : vector<1x128xf32> to vector<8x128xf32>
      %924 = arith.addf %887, %923 : vector<8x128xf32>
      %925 = vector.shape_cast %922 : vector<8x1xi1> to vector<8x1xi1>
      %926 = vector.broadcast %925 : vector<8x1xi1> to vector<8x128xi1>
      %927 = arith.select %926, %924, %887 : vector<8x128xi1>, vector<8x128xf32>
      %c1_i32_181 = arith.constant 1 : i32
      %928 = vector.broadcast %c1_i32_181 : i32 to vector<8x1xi32>
      %929 = arith.cmpi eq, %196, %928 : vector<8x1xi32>
      %930 = vector.broadcast %920 : vector<1x128xf32> to vector<8x128xf32>
      %931 = arith.addf %894, %930 : vector<8x128xf32>
      %932 = vector.shape_cast %929 : vector<8x1xi1> to vector<8x1xi1>
      %933 = vector.broadcast %932 : vector<8x1xi1> to vector<8x128xi1>
      %934 = arith.select %933, %931, %894 : vector<8x128xi1>, vector<8x128xf32>
      %935 = vector.extract_strided_slice %646 {offsets = [7, 0], sizes = [1, 512], strides = [1, 1]} : vector<8x512xf32> to vector<1x512xf32>
      %936 = arith.mulf %935, %898 : vector<1x512xf32>
      %937 = vector.extract_strided_slice %652 {offsets = [7, 0], sizes = [1, 512], strides = [1, 1]} : vector<8x512xf32> to vector<1x512xf32>
      %938 = arith.addf %936, %937 : vector<1x512xf32>
      %939 = vector.extract_strided_slice %650 {offsets = [0, 0], sizes = [1, 512], strides = [1, 1]} : vector<8x512xf32> to vector<1x512xf32>
      %940 = arith.mulf %939, %902 : vector<1x512xf32>
      %941 = vector.extract_strided_slice %654 {offsets = [0, 0], sizes = [1, 512], strides = [1, 1]} : vector<8x512xf32> to vector<1x512xf32>
      %942 = arith.addf %940, %941 : vector<1x512xf32>
      %943 = vector.extract_strided_slice %640 {offsets = [7, 0], sizes = [1, 512], strides = [1, 1]} : vector<8x512xf32> to vector<1x512xf32>
      %944 = arith.mulf %938, %943 : vector<1x512xf32>
      %945 = vector.extract_strided_slice %642 {offsets = [0, 0], sizes = [1, 512], strides = [1, 1]} : vector<8x512xf32> to vector<1x512xf32>
      %946 = arith.mulf %942, %945 : vector<1x512xf32>
      %947 = vector.extract_strided_slice %944 {offsets = [0, 0], sizes = [1, 128], strides = [1, 1]} : vector<1x512xf32> to vector<1x128xf32>
      %948 = vector.extract_strided_slice %946 {offsets = [0, 0], sizes = [1, 128], strides = [1, 1]} : vector<1x512xf32> to vector<1x128xf32>
      %949 = vector.extract_strided_slice %944 {offsets = [0, 128], sizes = [1, 128], strides = [1, 1]} : vector<1x512xf32> to vector<1x128xf32>
      %950 = arith.addf %947, %949 : vector<1x128xf32>
      %951 = vector.extract_strided_slice %946 {offsets = [0, 128], sizes = [1, 128], strides = [1, 1]} : vector<1x512xf32> to vector<1x128xf32>
      %952 = arith.addf %948, %951 : vector<1x128xf32>
      %953 = vector.extract_strided_slice %944 {offsets = [0, 256], sizes = [1, 128], strides = [1, 1]} : vector<1x512xf32> to vector<1x128xf32>
      %954 = arith.addf %950, %953 : vector<1x128xf32>
      %955 = vector.extract_strided_slice %946 {offsets = [0, 256], sizes = [1, 128], strides = [1, 1]} : vector<1x512xf32> to vector<1x128xf32>
      %956 = arith.addf %952, %955 : vector<1x128xf32>
      %957 = vector.extract_strided_slice %944 {offsets = [0, 384], sizes = [1, 128], strides = [1, 1]} : vector<1x512xf32> to vector<1x128xf32>
      %958 = arith.addf %954, %957 : vector<1x128xf32>
      %959 = vector.extract_strided_slice %946 {offsets = [0, 384], sizes = [1, 128], strides = [1, 1]} : vector<1x512xf32> to vector<1x128xf32>
      %960 = arith.addf %956, %959 : vector<1x128xf32>
      %c7_i32_182 = arith.constant 7 : i32
      %961 = vector.broadcast %c7_i32_182 : i32 to vector<8x1xi32>
      %962 = arith.cmpi eq, %196, %961 : vector<8x1xi32>
      %963 = vector.broadcast %958 : vector<1x128xf32> to vector<8x128xf32>
      %964 = arith.addf %927, %963 : vector<8x128xf32>
      %965 = vector.shape_cast %962 : vector<8x1xi1> to vector<8x1xi1>
      %966 = vector.broadcast %965 : vector<8x1xi1> to vector<8x128xi1>
      %967 = arith.select %966, %964, %927 : vector<8x128xi1>, vector<8x128xf32>
      %c0_i32_183 = arith.constant 0 : i32
      %968 = vector.broadcast %c0_i32_183 : i32 to vector<8x1xi32>
      %969 = arith.cmpi eq, %196, %968 : vector<8x1xi32>
      %970 = vector.broadcast %960 : vector<1x128xf32> to vector<8x128xf32>
      %971 = arith.addf %934, %970 : vector<8x128xf32>
      %972 = vector.shape_cast %969 : vector<8x1xi1> to vector<8x1xi1>
      %973 = vector.broadcast %972 : vector<8x1xi1> to vector<8x128xi1>
      %974 = arith.select %973, %971, %934 : vector<8x128xi1>, vector<8x128xf32>
      %c0_184 = arith.constant 0 : index
      %c0_185 = arith.constant 0 : index
      %c1024 = arith.constant 1024 : index
      %975 = vector.load %arg9[%c0_184, %c0_185, %c1024] : memref<2x1x2048xf32, #tpu.memory_space<vmem>>, vector<1x1x512xf32>
      %976 = vector.shape_cast %975 : vector<1x1x512xf32> to vector<1x512xf32>
      %c1_186 = arith.constant 1 : index
      %c0_187 = arith.constant 0 : index
      %c1024_188 = arith.constant 1024 : index
      %977 = vector.load %arg9[%c1_186, %c0_187, %c1024_188] : memref<2x1x2048xf32, #tpu.memory_space<vmem>>, vector<1x1x512xf32>
      %978 = vector.shape_cast %977 : vector<1x1x512xf32> to vector<1x512xf32>
      %cst_189 = arith.constant dense<0.000000e+00> : vector<8x512xf32>
      %979 = tpu.matmul %281, %181, %cst_189 {dimension_numbers = #tpu.dot_dimension_numbers<[1], [0], [0], [1], [0, 0, 1, 1], [], []>} : vector<8x16xf32>, vector<16x512xf32>, vector<8x512xf32> -> vector<8x512xf32>
      %cst_190 = arith.constant dense<0.000000e+00> : vector<8x512xf32>
      %980 = tpu.matmul %282, %181, %cst_190 {dimension_numbers = #tpu.dot_dimension_numbers<[1], [0], [0], [1], [0, 0, 1, 1], [], []>} : vector<8x16xf32>, vector<16x512xf32>, vector<8x512xf32> -> vector<8x512xf32>
      %cst_191 = arith.constant dense<0.000000e+00> : vector<8x512xf32>
      %981 = tpu.matmul %291, %181, %cst_191 {dimension_numbers = #tpu.dot_dimension_numbers<[1], [0], [0], [1], [0, 0, 1, 1], [], []>} : vector<8x16xf32>, vector<16x512xf32>, vector<8x512xf32> -> vector<8x512xf32>
      %cst_192 = arith.constant dense<0.000000e+00> : vector<8x512xf32>
      %982 = tpu.matmul %292, %181, %cst_192 {dimension_numbers = #tpu.dot_dimension_numbers<[1], [0], [0], [1], [0, 0, 1, 1], [], []>} : vector<8x16xf32>, vector<16x512xf32>, vector<8x512xf32> -> vector<8x512xf32>
      %983 = tpu.concatenate %275, %275, %275, %275 in 1 : vector<8x128xf32>, vector<8x128xf32>, vector<8x128xf32>, vector<8x128xf32> -> vector<8x512xf32>
      %984 = vector.broadcast %976 : vector<1x512xf32> to vector<8x512xf32>
      %985 = arith.mulf %983, %984 : vector<8x512xf32>
      %986 = math.exp %985 : vector<8x512xf32>
      %987 = tpu.concatenate %285, %285, %285, %285 in 1 : vector<8x128xf32>, vector<8x128xf32>, vector<8x128xf32>, vector<8x128xf32> -> vector<8x512xf32>
      %988 = vector.broadcast %978 : vector<1x512xf32> to vector<8x512xf32>
      %989 = arith.mulf %987, %988 : vector<8x512xf32>
      %990 = math.exp %989 : vector<8x512xf32>
      %991 = tpu.concatenate %278, %278, %278, %278 in 1 : vector<8x128xf32>, vector<8x128xf32>, vector<8x128xf32>, vector<8x128xf32> -> vector<8x512xf32>
      %992 = arith.mulf %991, %979 : vector<8x512xf32>
      %993 = tpu.concatenate %288, %288, %288, %288 in 1 : vector<8x128xf32>, vector<8x128xf32>, vector<8x128xf32>, vector<8x128xf32> -> vector<8x512xf32>
      %994 = arith.mulf %993, %981 : vector<8x512xf32>
      %995 = vector.extract_strided_slice %986 {offsets = [0, 0], sizes = [1, 512], strides = [1, 1]} : vector<8x512xf32> to vector<1x512xf32>
      %996 = arith.mulf %995, %arg25 : vector<1x512xf32>
      %997 = vector.extract_strided_slice %992 {offsets = [0, 0], sizes = [1, 512], strides = [1, 1]} : vector<8x512xf32> to vector<1x512xf32>
      %998 = arith.addf %996, %997 : vector<1x512xf32>
      %999 = vector.extract_strided_slice %990 {offsets = [7, 0], sizes = [1, 512], strides = [1, 1]} : vector<8x512xf32> to vector<1x512xf32>
      %1000 = arith.mulf %999, %arg29 : vector<1x512xf32>
      %1001 = vector.extract_strided_slice %994 {offsets = [7, 0], sizes = [1, 512], strides = [1, 1]} : vector<8x512xf32> to vector<1x512xf32>
      %1002 = arith.addf %1000, %1001 : vector<1x512xf32>
      %1003 = vector.extract_strided_slice %980 {offsets = [0, 0], sizes = [1, 512], strides = [1, 1]} : vector<8x512xf32> to vector<1x512xf32>
      %1004 = arith.mulf %998, %1003 : vector<1x512xf32>
      %1005 = vector.extract_strided_slice %982 {offsets = [7, 0], sizes = [1, 512], strides = [1, 1]} : vector<8x512xf32> to vector<1x512xf32>
      %1006 = arith.mulf %1002, %1005 : vector<1x512xf32>
      %1007 = vector.extract_strided_slice %1004 {offsets = [0, 0], sizes = [1, 128], strides = [1, 1]} : vector<1x512xf32> to vector<1x128xf32>
      %1008 = vector.extract_strided_slice %1006 {offsets = [0, 0], sizes = [1, 128], strides = [1, 1]} : vector<1x512xf32> to vector<1x128xf32>
      %1009 = vector.extract_strided_slice %1004 {offsets = [0, 128], sizes = [1, 128], strides = [1, 1]} : vector<1x512xf32> to vector<1x128xf32>
      %1010 = arith.addf %1007, %1009 : vector<1x128xf32>
      %1011 = vector.extract_strided_slice %1006 {offsets = [0, 128], sizes = [1, 128], strides = [1, 1]} : vector<1x512xf32> to vector<1x128xf32>
      %1012 = arith.addf %1008, %1011 : vector<1x128xf32>
      %1013 = vector.extract_strided_slice %1004 {offsets = [0, 256], sizes = [1, 128], strides = [1, 1]} : vector<1x512xf32> to vector<1x128xf32>
      %1014 = arith.addf %1010, %1013 : vector<1x128xf32>
      %1015 = vector.extract_strided_slice %1006 {offsets = [0, 256], sizes = [1, 128], strides = [1, 1]} : vector<1x512xf32> to vector<1x128xf32>
      %1016 = arith.addf %1012, %1015 : vector<1x128xf32>
      %1017 = vector.extract_strided_slice %1004 {offsets = [0, 384], sizes = [1, 128], strides = [1, 1]} : vector<1x512xf32> to vector<1x128xf32>
      %1018 = arith.addf %1014, %1017 : vector<1x128xf32>
      %1019 = vector.extract_strided_slice %1006 {offsets = [0, 384], sizes = [1, 128], strides = [1, 1]} : vector<1x512xf32> to vector<1x128xf32>
      %1020 = arith.addf %1016, %1019 : vector<1x128xf32>
      %c0_i32_193 = arith.constant 0 : i32
      %1021 = vector.broadcast %c0_i32_193 : i32 to vector<8x1xi32>
      %1022 = arith.cmpi eq, %196, %1021 : vector<8x1xi32>
      %1023 = vector.broadcast %1018 : vector<1x128xf32> to vector<8x128xf32>
      %1024 = arith.addf %967, %1023 : vector<8x128xf32>
      %1025 = vector.shape_cast %1022 : vector<8x1xi1> to vector<8x1xi1>
      %1026 = vector.broadcast %1025 : vector<8x1xi1> to vector<8x128xi1>
      %1027 = arith.select %1026, %1024, %967 : vector<8x128xi1>, vector<8x128xf32>
      %c7_i32_194 = arith.constant 7 : i32
      %1028 = vector.broadcast %c7_i32_194 : i32 to vector<8x1xi32>
      %1029 = arith.cmpi eq, %196, %1028 : vector<8x1xi32>
      %1030 = vector.broadcast %1020 : vector<1x128xf32> to vector<8x128xf32>
      %1031 = arith.addf %974, %1030 : vector<8x128xf32>
      %1032 = vector.shape_cast %1029 : vector<8x1xi1> to vector<8x1xi1>
      %1033 = vector.broadcast %1032 : vector<8x1xi1> to vector<8x128xi1>
      %1034 = arith.select %1033, %1031, %974 : vector<8x128xi1>, vector<8x128xf32>
      %1035 = vector.extract_strided_slice %986 {offsets = [1, 0], sizes = [1, 512], strides = [1, 1]} : vector<8x512xf32> to vector<1x512xf32>
      %1036 = arith.mulf %1035, %998 : vector<1x512xf32>
      %1037 = vector.extract_strided_slice %992 {offsets = [1, 0], sizes = [1, 512], strides = [1, 1]} : vector<8x512xf32> to vector<1x512xf32>
      %1038 = arith.addf %1036, %1037 : vector<1x512xf32>
      %1039 = vector.extract_strided_slice %990 {offsets = [6, 0], sizes = [1, 512], strides = [1, 1]} : vector<8x512xf32> to vector<1x512xf32>
      %1040 = arith.mulf %1039, %1002 : vector<1x512xf32>
      %1041 = vector.extract_strided_slice %994 {offsets = [6, 0], sizes = [1, 512], strides = [1, 1]} : vector<8x512xf32> to vector<1x512xf32>
      %1042 = arith.addf %1040, %1041 : vector<1x512xf32>
      %1043 = vector.extract_strided_slice %980 {offsets = [1, 0], sizes = [1, 512], strides = [1, 1]} : vector<8x512xf32> to vector<1x512xf32>
      %1044 = arith.mulf %1038, %1043 : vector<1x512xf32>
      %1045 = vector.extract_strided_slice %982 {offsets = [6, 0], sizes = [1, 512], strides = [1, 1]} : vector<8x512xf32> to vector<1x512xf32>
      %1046 = arith.mulf %1042, %1045 : vector<1x512xf32>
      %1047 = vector.extract_strided_slice %1044 {offsets = [0, 0], sizes = [1, 128], strides = [1, 1]} : vector<1x512xf32> to vector<1x128xf32>
      %1048 = vector.extract_strided_slice %1046 {offsets = [0, 0], sizes = [1, 128], strides = [1, 1]} : vector<1x512xf32> to vector<1x128xf32>
      %1049 = vector.extract_strided_slice %1044 {offsets = [0, 128], sizes = [1, 128], strides = [1, 1]} : vector<1x512xf32> to vector<1x128xf32>
      %1050 = arith.addf %1047, %1049 : vector<1x128xf32>
      %1051 = vector.extract_strided_slice %1046 {offsets = [0, 128], sizes = [1, 128], strides = [1, 1]} : vector<1x512xf32> to vector<1x128xf32>
      %1052 = arith.addf %1048, %1051 : vector<1x128xf32>
      %1053 = vector.extract_strided_slice %1044 {offsets = [0, 256], sizes = [1, 128], strides = [1, 1]} : vector<1x512xf32> to vector<1x128xf32>
      %1054 = arith.addf %1050, %1053 : vector<1x128xf32>
      %1055 = vector.extract_strided_slice %1046 {offsets = [0, 256], sizes = [1, 128], strides = [1, 1]} : vector<1x512xf32> to vector<1x128xf32>
      %1056 = arith.addf %1052, %1055 : vector<1x128xf32>
      %1057 = vector.extract_strided_slice %1044 {offsets = [0, 384], sizes = [1, 128], strides = [1, 1]} : vector<1x512xf32> to vector<1x128xf32>
      %1058 = arith.addf %1054, %1057 : vector<1x128xf32>
      %1059 = vector.extract_strided_slice %1046 {offsets = [0, 384], sizes = [1, 128], strides = [1, 1]} : vector<1x512xf32> to vector<1x128xf32>
      %1060 = arith.addf %1056, %1059 : vector<1x128xf32>
      %c1_i32_195 = arith.constant 1 : i32
      %1061 = vector.broadcast %c1_i32_195 : i32 to vector<8x1xi32>
      %1062 = arith.cmpi eq, %196, %1061 : vector<8x1xi32>
      %1063 = vector.broadcast %1058 : vector<1x128xf32> to vector<8x128xf32>
      %1064 = arith.addf %1027, %1063 : vector<8x128xf32>
      %1065 = vector.shape_cast %1062 : vector<8x1xi1> to vector<8x1xi1>
      %1066 = vector.broadcast %1065 : vector<8x1xi1> to vector<8x128xi1>
      %1067 = arith.select %1066, %1064, %1027 : vector<8x128xi1>, vector<8x128xf32>
      %c6_i32_196 = arith.constant 6 : i32
      %1068 = vector.broadcast %c6_i32_196 : i32 to vector<8x1xi32>
      %1069 = arith.cmpi eq, %196, %1068 : vector<8x1xi32>
      %1070 = vector.broadcast %1060 : vector<1x128xf32> to vector<8x128xf32>
      %1071 = arith.addf %1034, %1070 : vector<8x128xf32>
      %1072 = vector.shape_cast %1069 : vector<8x1xi1> to vector<8x1xi1>
      %1073 = vector.broadcast %1072 : vector<8x1xi1> to vector<8x128xi1>
      %1074 = arith.select %1073, %1071, %1034 : vector<8x128xi1>, vector<8x128xf32>
      %1075 = vector.extract_strided_slice %986 {offsets = [2, 0], sizes = [1, 512], strides = [1, 1]} : vector<8x512xf32> to vector<1x512xf32>
      %1076 = arith.mulf %1075, %1038 : vector<1x512xf32>
      %1077 = vector.extract_strided_slice %992 {offsets = [2, 0], sizes = [1, 512], strides = [1, 1]} : vector<8x512xf32> to vector<1x512xf32>
      %1078 = arith.addf %1076, %1077 : vector<1x512xf32>
      %1079 = vector.extract_strided_slice %990 {offsets = [5, 0], sizes = [1, 512], strides = [1, 1]} : vector<8x512xf32> to vector<1x512xf32>
      %1080 = arith.mulf %1079, %1042 : vector<1x512xf32>
      %1081 = vector.extract_strided_slice %994 {offsets = [5, 0], sizes = [1, 512], strides = [1, 1]} : vector<8x512xf32> to vector<1x512xf32>
      %1082 = arith.addf %1080, %1081 : vector<1x512xf32>
      %1083 = vector.extract_strided_slice %980 {offsets = [2, 0], sizes = [1, 512], strides = [1, 1]} : vector<8x512xf32> to vector<1x512xf32>
      %1084 = arith.mulf %1078, %1083 : vector<1x512xf32>
      %1085 = vector.extract_strided_slice %982 {offsets = [5, 0], sizes = [1, 512], strides = [1, 1]} : vector<8x512xf32> to vector<1x512xf32>
      %1086 = arith.mulf %1082, %1085 : vector<1x512xf32>
      %1087 = vector.extract_strided_slice %1084 {offsets = [0, 0], sizes = [1, 128], strides = [1, 1]} : vector<1x512xf32> to vector<1x128xf32>
      %1088 = vector.extract_strided_slice %1086 {offsets = [0, 0], sizes = [1, 128], strides = [1, 1]} : vector<1x512xf32> to vector<1x128xf32>
      %1089 = vector.extract_strided_slice %1084 {offsets = [0, 128], sizes = [1, 128], strides = [1, 1]} : vector<1x512xf32> to vector<1x128xf32>
      %1090 = arith.addf %1087, %1089 : vector<1x128xf32>
      %1091 = vector.extract_strided_slice %1086 {offsets = [0, 128], sizes = [1, 128], strides = [1, 1]} : vector<1x512xf32> to vector<1x128xf32>
      %1092 = arith.addf %1088, %1091 : vector<1x128xf32>
      %1093 = vector.extract_strided_slice %1084 {offsets = [0, 256], sizes = [1, 128], strides = [1, 1]} : vector<1x512xf32> to vector<1x128xf32>
      %1094 = arith.addf %1090, %1093 : vector<1x128xf32>
      %1095 = vector.extract_strided_slice %1086 {offsets = [0, 256], sizes = [1, 128], strides = [1, 1]} : vector<1x512xf32> to vector<1x128xf32>
      %1096 = arith.addf %1092, %1095 : vector<1x128xf32>
      %1097 = vector.extract_strided_slice %1084 {offsets = [0, 384], sizes = [1, 128], strides = [1, 1]} : vector<1x512xf32> to vector<1x128xf32>
      %1098 = arith.addf %1094, %1097 : vector<1x128xf32>
      %1099 = vector.extract_strided_slice %1086 {offsets = [0, 384], sizes = [1, 128], strides = [1, 1]} : vector<1x512xf32> to vector<1x128xf32>
      %1100 = arith.addf %1096, %1099 : vector<1x128xf32>
      %c2_i32_197 = arith.constant 2 : i32
      %1101 = vector.broadcast %c2_i32_197 : i32 to vector<8x1xi32>
      %1102 = arith.cmpi eq, %196, %1101 : vector<8x1xi32>
      %1103 = vector.broadcast %1098 : vector<1x128xf32> to vector<8x128xf32>
      %1104 = arith.addf %1067, %1103 : vector<8x128xf32>
      %1105 = vector.shape_cast %1102 : vector<8x1xi1> to vector<8x1xi1>
      %1106 = vector.broadcast %1105 : vector<8x1xi1> to vector<8x128xi1>
      %1107 = arith.select %1106, %1104, %1067 : vector<8x128xi1>, vector<8x128xf32>
      %c5_i32_198 = arith.constant 5 : i32
      %1108 = vector.broadcast %c5_i32_198 : i32 to vector<8x1xi32>
      %1109 = arith.cmpi eq, %196, %1108 : vector<8x1xi32>
      %1110 = vector.broadcast %1100 : vector<1x128xf32> to vector<8x128xf32>
      %1111 = arith.addf %1074, %1110 : vector<8x128xf32>
      %1112 = vector.shape_cast %1109 : vector<8x1xi1> to vector<8x1xi1>
      %1113 = vector.broadcast %1112 : vector<8x1xi1> to vector<8x128xi1>
      %1114 = arith.select %1113, %1111, %1074 : vector<8x128xi1>, vector<8x128xf32>
      %1115 = vector.extract_strided_slice %986 {offsets = [3, 0], sizes = [1, 512], strides = [1, 1]} : vector<8x512xf32> to vector<1x512xf32>
      %1116 = arith.mulf %1115, %1078 : vector<1x512xf32>
      %1117 = vector.extract_strided_slice %992 {offsets = [3, 0], sizes = [1, 512], strides = [1, 1]} : vector<8x512xf32> to vector<1x512xf32>
      %1118 = arith.addf %1116, %1117 : vector<1x512xf32>
      %1119 = vector.extract_strided_slice %990 {offsets = [4, 0], sizes = [1, 512], strides = [1, 1]} : vector<8x512xf32> to vector<1x512xf32>
      %1120 = arith.mulf %1119, %1082 : vector<1x512xf32>
      %1121 = vector.extract_strided_slice %994 {offsets = [4, 0], sizes = [1, 512], strides = [1, 1]} : vector<8x512xf32> to vector<1x512xf32>
      %1122 = arith.addf %1120, %1121 : vector<1x512xf32>
      %1123 = vector.extract_strided_slice %980 {offsets = [3, 0], sizes = [1, 512], strides = [1, 1]} : vector<8x512xf32> to vector<1x512xf32>
      %1124 = arith.mulf %1118, %1123 : vector<1x512xf32>
      %1125 = vector.extract_strided_slice %982 {offsets = [4, 0], sizes = [1, 512], strides = [1, 1]} : vector<8x512xf32> to vector<1x512xf32>
      %1126 = arith.mulf %1122, %1125 : vector<1x512xf32>
      %1127 = vector.extract_strided_slice %1124 {offsets = [0, 0], sizes = [1, 128], strides = [1, 1]} : vector<1x512xf32> to vector<1x128xf32>
      %1128 = vector.extract_strided_slice %1126 {offsets = [0, 0], sizes = [1, 128], strides = [1, 1]} : vector<1x512xf32> to vector<1x128xf32>
      %1129 = vector.extract_strided_slice %1124 {offsets = [0, 128], sizes = [1, 128], strides = [1, 1]} : vector<1x512xf32> to vector<1x128xf32>
      %1130 = arith.addf %1127, %1129 : vector<1x128xf32>
      %1131 = vector.extract_strided_slice %1126 {offsets = [0, 128], sizes = [1, 128], strides = [1, 1]} : vector<1x512xf32> to vector<1x128xf32>
      %1132 = arith.addf %1128, %1131 : vector<1x128xf32>
      %1133 = vector.extract_strided_slice %1124 {offsets = [0, 256], sizes = [1, 128], strides = [1, 1]} : vector<1x512xf32> to vector<1x128xf32>
      %1134 = arith.addf %1130, %1133 : vector<1x128xf32>
      %1135 = vector.extract_strided_slice %1126 {offsets = [0, 256], sizes = [1, 128], strides = [1, 1]} : vector<1x512xf32> to vector<1x128xf32>
      %1136 = arith.addf %1132, %1135 : vector<1x128xf32>
      %1137 = vector.extract_strided_slice %1124 {offsets = [0, 384], sizes = [1, 128], strides = [1, 1]} : vector<1x512xf32> to vector<1x128xf32>
      %1138 = arith.addf %1134, %1137 : vector<1x128xf32>
      %1139 = vector.extract_strided_slice %1126 {offsets = [0, 384], sizes = [1, 128], strides = [1, 1]} : vector<1x512xf32> to vector<1x128xf32>
      %1140 = arith.addf %1136, %1139 : vector<1x128xf32>
      %c3_i32_199 = arith.constant 3 : i32
      %1141 = vector.broadcast %c3_i32_199 : i32 to vector<8x1xi32>
      %1142 = arith.cmpi eq, %196, %1141 : vector<8x1xi32>
      %1143 = vector.broadcast %1138 : vector<1x128xf32> to vector<8x128xf32>
      %1144 = arith.addf %1107, %1143 : vector<8x128xf32>
      %1145 = vector.shape_cast %1142 : vector<8x1xi1> to vector<8x1xi1>
      %1146 = vector.broadcast %1145 : vector<8x1xi1> to vector<8x128xi1>
      %1147 = arith.select %1146, %1144, %1107 : vector<8x128xi1>, vector<8x128xf32>
      %c4_i32_200 = arith.constant 4 : i32
      %1148 = vector.broadcast %c4_i32_200 : i32 to vector<8x1xi32>
      %1149 = arith.cmpi eq, %196, %1148 : vector<8x1xi32>
      %1150 = vector.broadcast %1140 : vector<1x128xf32> to vector<8x128xf32>
      %1151 = arith.addf %1114, %1150 : vector<8x128xf32>
      %1152 = vector.shape_cast %1149 : vector<8x1xi1> to vector<8x1xi1>
      %1153 = vector.broadcast %1152 : vector<8x1xi1> to vector<8x128xi1>
      %1154 = arith.select %1153, %1151, %1114 : vector<8x128xi1>, vector<8x128xf32>
      %1155 = vector.extract_strided_slice %986 {offsets = [4, 0], sizes = [1, 512], strides = [1, 1]} : vector<8x512xf32> to vector<1x512xf32>
      %1156 = arith.mulf %1155, %1118 : vector<1x512xf32>
      %1157 = vector.extract_strided_slice %992 {offsets = [4, 0], sizes = [1, 512], strides = [1, 1]} : vector<8x512xf32> to vector<1x512xf32>
      %1158 = arith.addf %1156, %1157 : vector<1x512xf32>
      %1159 = vector.extract_strided_slice %990 {offsets = [3, 0], sizes = [1, 512], strides = [1, 1]} : vector<8x512xf32> to vector<1x512xf32>
      %1160 = arith.mulf %1159, %1122 : vector<1x512xf32>
      %1161 = vector.extract_strided_slice %994 {offsets = [3, 0], sizes = [1, 512], strides = [1, 1]} : vector<8x512xf32> to vector<1x512xf32>
      %1162 = arith.addf %1160, %1161 : vector<1x512xf32>
      %1163 = vector.extract_strided_slice %980 {offsets = [4, 0], sizes = [1, 512], strides = [1, 1]} : vector<8x512xf32> to vector<1x512xf32>
      %1164 = arith.mulf %1158, %1163 : vector<1x512xf32>
      %1165 = vector.extract_strided_slice %982 {offsets = [3, 0], sizes = [1, 512], strides = [1, 1]} : vector<8x512xf32> to vector<1x512xf32>
      %1166 = arith.mulf %1162, %1165 : vector<1x512xf32>
      %1167 = vector.extract_strided_slice %1164 {offsets = [0, 0], sizes = [1, 128], strides = [1, 1]} : vector<1x512xf32> to vector<1x128xf32>
      %1168 = vector.extract_strided_slice %1166 {offsets = [0, 0], sizes = [1, 128], strides = [1, 1]} : vector<1x512xf32> to vector<1x128xf32>
      %1169 = vector.extract_strided_slice %1164 {offsets = [0, 128], sizes = [1, 128], strides = [1, 1]} : vector<1x512xf32> to vector<1x128xf32>
      %1170 = arith.addf %1167, %1169 : vector<1x128xf32>
      %1171 = vector.extract_strided_slice %1166 {offsets = [0, 128], sizes = [1, 128], strides = [1, 1]} : vector<1x512xf32> to vector<1x128xf32>
      %1172 = arith.addf %1168, %1171 : vector<1x128xf32>
      %1173 = vector.extract_strided_slice %1164 {offsets = [0, 256], sizes = [1, 128], strides = [1, 1]} : vector<1x512xf32> to vector<1x128xf32>
      %1174 = arith.addf %1170, %1173 : vector<1x128xf32>
      %1175 = vector.extract_strided_slice %1166 {offsets = [0, 256], sizes = [1, 128], strides = [1, 1]} : vector<1x512xf32> to vector<1x128xf32>
      %1176 = arith.addf %1172, %1175 : vector<1x128xf32>
      %1177 = vector.extract_strided_slice %1164 {offsets = [0, 384], sizes = [1, 128], strides = [1, 1]} : vector<1x512xf32> to vector<1x128xf32>
      %1178 = arith.addf %1174, %1177 : vector<1x128xf32>
      %1179 = vector.extract_strided_slice %1166 {offsets = [0, 384], sizes = [1, 128], strides = [1, 1]} : vector<1x512xf32> to vector<1x128xf32>
      %1180 = arith.addf %1176, %1179 : vector<1x128xf32>
      %c4_i32_201 = arith.constant 4 : i32
      %1181 = vector.broadcast %c4_i32_201 : i32 to vector<8x1xi32>
      %1182 = arith.cmpi eq, %196, %1181 : vector<8x1xi32>
      %1183 = vector.broadcast %1178 : vector<1x128xf32> to vector<8x128xf32>
      %1184 = arith.addf %1147, %1183 : vector<8x128xf32>
      %1185 = vector.shape_cast %1182 : vector<8x1xi1> to vector<8x1xi1>
      %1186 = vector.broadcast %1185 : vector<8x1xi1> to vector<8x128xi1>
      %1187 = arith.select %1186, %1184, %1147 : vector<8x128xi1>, vector<8x128xf32>
      %c3_i32_202 = arith.constant 3 : i32
      %1188 = vector.broadcast %c3_i32_202 : i32 to vector<8x1xi32>
      %1189 = arith.cmpi eq, %196, %1188 : vector<8x1xi32>
      %1190 = vector.broadcast %1180 : vector<1x128xf32> to vector<8x128xf32>
      %1191 = arith.addf %1154, %1190 : vector<8x128xf32>
      %1192 = vector.shape_cast %1189 : vector<8x1xi1> to vector<8x1xi1>
      %1193 = vector.broadcast %1192 : vector<8x1xi1> to vector<8x128xi1>
      %1194 = arith.select %1193, %1191, %1154 : vector<8x128xi1>, vector<8x128xf32>
      %1195 = vector.extract_strided_slice %986 {offsets = [5, 0], sizes = [1, 512], strides = [1, 1]} : vector<8x512xf32> to vector<1x512xf32>
      %1196 = arith.mulf %1195, %1158 : vector<1x512xf32>
      %1197 = vector.extract_strided_slice %992 {offsets = [5, 0], sizes = [1, 512], strides = [1, 1]} : vector<8x512xf32> to vector<1x512xf32>
      %1198 = arith.addf %1196, %1197 : vector<1x512xf32>
      %1199 = vector.extract_strided_slice %990 {offsets = [2, 0], sizes = [1, 512], strides = [1, 1]} : vector<8x512xf32> to vector<1x512xf32>
      %1200 = arith.mulf %1199, %1162 : vector<1x512xf32>
      %1201 = vector.extract_strided_slice %994 {offsets = [2, 0], sizes = [1, 512], strides = [1, 1]} : vector<8x512xf32> to vector<1x512xf32>
      %1202 = arith.addf %1200, %1201 : vector<1x512xf32>
      %1203 = vector.extract_strided_slice %980 {offsets = [5, 0], sizes = [1, 512], strides = [1, 1]} : vector<8x512xf32> to vector<1x512xf32>
      %1204 = arith.mulf %1198, %1203 : vector<1x512xf32>
      %1205 = vector.extract_strided_slice %982 {offsets = [2, 0], sizes = [1, 512], strides = [1, 1]} : vector<8x512xf32> to vector<1x512xf32>
      %1206 = arith.mulf %1202, %1205 : vector<1x512xf32>
      %1207 = vector.extract_strided_slice %1204 {offsets = [0, 0], sizes = [1, 128], strides = [1, 1]} : vector<1x512xf32> to vector<1x128xf32>
      %1208 = vector.extract_strided_slice %1206 {offsets = [0, 0], sizes = [1, 128], strides = [1, 1]} : vector<1x512xf32> to vector<1x128xf32>
      %1209 = vector.extract_strided_slice %1204 {offsets = [0, 128], sizes = [1, 128], strides = [1, 1]} : vector<1x512xf32> to vector<1x128xf32>
      %1210 = arith.addf %1207, %1209 : vector<1x128xf32>
      %1211 = vector.extract_strided_slice %1206 {offsets = [0, 128], sizes = [1, 128], strides = [1, 1]} : vector<1x512xf32> to vector<1x128xf32>
      %1212 = arith.addf %1208, %1211 : vector<1x128xf32>
      %1213 = vector.extract_strided_slice %1204 {offsets = [0, 256], sizes = [1, 128], strides = [1, 1]} : vector<1x512xf32> to vector<1x128xf32>
      %1214 = arith.addf %1210, %1213 : vector<1x128xf32>
      %1215 = vector.extract_strided_slice %1206 {offsets = [0, 256], sizes = [1, 128], strides = [1, 1]} : vector<1x512xf32> to vector<1x128xf32>
      %1216 = arith.addf %1212, %1215 : vector<1x128xf32>
      %1217 = vector.extract_strided_slice %1204 {offsets = [0, 384], sizes = [1, 128], strides = [1, 1]} : vector<1x512xf32> to vector<1x128xf32>
      %1218 = arith.addf %1214, %1217 : vector<1x128xf32>
      %1219 = vector.extract_strided_slice %1206 {offsets = [0, 384], sizes = [1, 128], strides = [1, 1]} : vector<1x512xf32> to vector<1x128xf32>
      %1220 = arith.addf %1216, %1219 : vector<1x128xf32>
      %c5_i32_203 = arith.constant 5 : i32
      %1221 = vector.broadcast %c5_i32_203 : i32 to vector<8x1xi32>
      %1222 = arith.cmpi eq, %196, %1221 : vector<8x1xi32>
      %1223 = vector.broadcast %1218 : vector<1x128xf32> to vector<8x128xf32>
      %1224 = arith.addf %1187, %1223 : vector<8x128xf32>
      %1225 = vector.shape_cast %1222 : vector<8x1xi1> to vector<8x1xi1>
      %1226 = vector.broadcast %1225 : vector<8x1xi1> to vector<8x128xi1>
      %1227 = arith.select %1226, %1224, %1187 : vector<8x128xi1>, vector<8x128xf32>
      %c2_i32_204 = arith.constant 2 : i32
      %1228 = vector.broadcast %c2_i32_204 : i32 to vector<8x1xi32>
      %1229 = arith.cmpi eq, %196, %1228 : vector<8x1xi32>
      %1230 = vector.broadcast %1220 : vector<1x128xf32> to vector<8x128xf32>
      %1231 = arith.addf %1194, %1230 : vector<8x128xf32>
      %1232 = vector.shape_cast %1229 : vector<8x1xi1> to vector<8x1xi1>
      %1233 = vector.broadcast %1232 : vector<8x1xi1> to vector<8x128xi1>
      %1234 = arith.select %1233, %1231, %1194 : vector<8x128xi1>, vector<8x128xf32>
      %1235 = vector.extract_strided_slice %986 {offsets = [6, 0], sizes = [1, 512], strides = [1, 1]} : vector<8x512xf32> to vector<1x512xf32>
      %1236 = arith.mulf %1235, %1198 : vector<1x512xf32>
      %1237 = vector.extract_strided_slice %992 {offsets = [6, 0], sizes = [1, 512], strides = [1, 1]} : vector<8x512xf32> to vector<1x512xf32>
      %1238 = arith.addf %1236, %1237 : vector<1x512xf32>
      %1239 = vector.extract_strided_slice %990 {offsets = [1, 0], sizes = [1, 512], strides = [1, 1]} : vector<8x512xf32> to vector<1x512xf32>
      %1240 = arith.mulf %1239, %1202 : vector<1x512xf32>
      %1241 = vector.extract_strided_slice %994 {offsets = [1, 0], sizes = [1, 512], strides = [1, 1]} : vector<8x512xf32> to vector<1x512xf32>
      %1242 = arith.addf %1240, %1241 : vector<1x512xf32>
      %1243 = vector.extract_strided_slice %980 {offsets = [6, 0], sizes = [1, 512], strides = [1, 1]} : vector<8x512xf32> to vector<1x512xf32>
      %1244 = arith.mulf %1238, %1243 : vector<1x512xf32>
      %1245 = vector.extract_strided_slice %982 {offsets = [1, 0], sizes = [1, 512], strides = [1, 1]} : vector<8x512xf32> to vector<1x512xf32>
      %1246 = arith.mulf %1242, %1245 : vector<1x512xf32>
      %1247 = vector.extract_strided_slice %1244 {offsets = [0, 0], sizes = [1, 128], strides = [1, 1]} : vector<1x512xf32> to vector<1x128xf32>
      %1248 = vector.extract_strided_slice %1246 {offsets = [0, 0], sizes = [1, 128], strides = [1, 1]} : vector<1x512xf32> to vector<1x128xf32>
      %1249 = vector.extract_strided_slice %1244 {offsets = [0, 128], sizes = [1, 128], strides = [1, 1]} : vector<1x512xf32> to vector<1x128xf32>
      %1250 = arith.addf %1247, %1249 : vector<1x128xf32>
      %1251 = vector.extract_strided_slice %1246 {offsets = [0, 128], sizes = [1, 128], strides = [1, 1]} : vector<1x512xf32> to vector<1x128xf32>
      %1252 = arith.addf %1248, %1251 : vector<1x128xf32>
      %1253 = vector.extract_strided_slice %1244 {offsets = [0, 256], sizes = [1, 128], strides = [1, 1]} : vector<1x512xf32> to vector<1x128xf32>
      %1254 = arith.addf %1250, %1253 : vector<1x128xf32>
      %1255 = vector.extract_strided_slice %1246 {offsets = [0, 256], sizes = [1, 128], strides = [1, 1]} : vector<1x512xf32> to vector<1x128xf32>
      %1256 = arith.addf %1252, %1255 : vector<1x128xf32>
      %1257 = vector.extract_strided_slice %1244 {offsets = [0, 384], sizes = [1, 128], strides = [1, 1]} : vector<1x512xf32> to vector<1x128xf32>
      %1258 = arith.addf %1254, %1257 : vector<1x128xf32>
      %1259 = vector.extract_strided_slice %1246 {offsets = [0, 384], sizes = [1, 128], strides = [1, 1]} : vector<1x512xf32> to vector<1x128xf32>
      %1260 = arith.addf %1256, %1259 : vector<1x128xf32>
      %c6_i32_205 = arith.constant 6 : i32
      %1261 = vector.broadcast %c6_i32_205 : i32 to vector<8x1xi32>
      %1262 = arith.cmpi eq, %196, %1261 : vector<8x1xi32>
      %1263 = vector.broadcast %1258 : vector<1x128xf32> to vector<8x128xf32>
      %1264 = arith.addf %1227, %1263 : vector<8x128xf32>
      %1265 = vector.shape_cast %1262 : vector<8x1xi1> to vector<8x1xi1>
      %1266 = vector.broadcast %1265 : vector<8x1xi1> to vector<8x128xi1>
      %1267 = arith.select %1266, %1264, %1227 : vector<8x128xi1>, vector<8x128xf32>
      %c1_i32_206 = arith.constant 1 : i32
      %1268 = vector.broadcast %c1_i32_206 : i32 to vector<8x1xi32>
      %1269 = arith.cmpi eq, %196, %1268 : vector<8x1xi32>
      %1270 = vector.broadcast %1260 : vector<1x128xf32> to vector<8x128xf32>
      %1271 = arith.addf %1234, %1270 : vector<8x128xf32>
      %1272 = vector.shape_cast %1269 : vector<8x1xi1> to vector<8x1xi1>
      %1273 = vector.broadcast %1272 : vector<8x1xi1> to vector<8x128xi1>
      %1274 = arith.select %1273, %1271, %1234 : vector<8x128xi1>, vector<8x128xf32>
      %1275 = vector.extract_strided_slice %986 {offsets = [7, 0], sizes = [1, 512], strides = [1, 1]} : vector<8x512xf32> to vector<1x512xf32>
      %1276 = arith.mulf %1275, %1238 : vector<1x512xf32>
      %1277 = vector.extract_strided_slice %992 {offsets = [7, 0], sizes = [1, 512], strides = [1, 1]} : vector<8x512xf32> to vector<1x512xf32>
      %1278 = arith.addf %1276, %1277 : vector<1x512xf32>
      %1279 = vector.extract_strided_slice %990 {offsets = [0, 0], sizes = [1, 512], strides = [1, 1]} : vector<8x512xf32> to vector<1x512xf32>
      %1280 = arith.mulf %1279, %1242 : vector<1x512xf32>
      %1281 = vector.extract_strided_slice %994 {offsets = [0, 0], sizes = [1, 512], strides = [1, 1]} : vector<8x512xf32> to vector<1x512xf32>
      %1282 = arith.addf %1280, %1281 : vector<1x512xf32>
      %1283 = vector.extract_strided_slice %980 {offsets = [7, 0], sizes = [1, 512], strides = [1, 1]} : vector<8x512xf32> to vector<1x512xf32>
      %1284 = arith.mulf %1278, %1283 : vector<1x512xf32>
      %1285 = vector.extract_strided_slice %982 {offsets = [0, 0], sizes = [1, 512], strides = [1, 1]} : vector<8x512xf32> to vector<1x512xf32>
      %1286 = arith.mulf %1282, %1285 : vector<1x512xf32>
      %1287 = vector.extract_strided_slice %1284 {offsets = [0, 0], sizes = [1, 128], strides = [1, 1]} : vector<1x512xf32> to vector<1x128xf32>
      %1288 = vector.extract_strided_slice %1286 {offsets = [0, 0], sizes = [1, 128], strides = [1, 1]} : vector<1x512xf32> to vector<1x128xf32>
      %1289 = vector.extract_strided_slice %1284 {offsets = [0, 128], sizes = [1, 128], strides = [1, 1]} : vector<1x512xf32> to vector<1x128xf32>
      %1290 = arith.addf %1287, %1289 : vector<1x128xf32>
      %1291 = vector.extract_strided_slice %1286 {offsets = [0, 128], sizes = [1, 128], strides = [1, 1]} : vector<1x512xf32> to vector<1x128xf32>
      %1292 = arith.addf %1288, %1291 : vector<1x128xf32>
      %1293 = vector.extract_strided_slice %1284 {offsets = [0, 256], sizes = [1, 128], strides = [1, 1]} : vector<1x512xf32> to vector<1x128xf32>
      %1294 = arith.addf %1290, %1293 : vector<1x128xf32>
      %1295 = vector.extract_strided_slice %1286 {offsets = [0, 256], sizes = [1, 128], strides = [1, 1]} : vector<1x512xf32> to vector<1x128xf32>
      %1296 = arith.addf %1292, %1295 : vector<1x128xf32>
      %1297 = vector.extract_strided_slice %1284 {offsets = [0, 384], sizes = [1, 128], strides = [1, 1]} : vector<1x512xf32> to vector<1x128xf32>
      %1298 = arith.addf %1294, %1297 : vector<1x128xf32>
      %1299 = vector.extract_strided_slice %1286 {offsets = [0, 384], sizes = [1, 128], strides = [1, 1]} : vector<1x512xf32> to vector<1x128xf32>
      %1300 = arith.addf %1296, %1299 : vector<1x128xf32>
      %c7_i32_207 = arith.constant 7 : i32
      %1301 = vector.broadcast %c7_i32_207 : i32 to vector<8x1xi32>
      %1302 = arith.cmpi eq, %196, %1301 : vector<8x1xi32>
      %1303 = vector.broadcast %1298 : vector<1x128xf32> to vector<8x128xf32>
      %1304 = arith.addf %1267, %1303 : vector<8x128xf32>
      %1305 = vector.shape_cast %1302 : vector<8x1xi1> to vector<8x1xi1>
      %1306 = vector.broadcast %1305 : vector<8x1xi1> to vector<8x128xi1>
      %1307 = arith.select %1306, %1304, %1267 : vector<8x128xi1>, vector<8x128xf32>
      %c0_i32_208 = arith.constant 0 : i32
      %1308 = vector.broadcast %c0_i32_208 : i32 to vector<8x1xi32>
      %1309 = arith.cmpi eq, %196, %1308 : vector<8x1xi32>
      %1310 = vector.broadcast %1300 : vector<1x128xf32> to vector<8x128xf32>
      %1311 = arith.addf %1274, %1310 : vector<8x128xf32>
      %1312 = vector.shape_cast %1309 : vector<8x1xi1> to vector<8x1xi1>
      %1313 = vector.broadcast %1312 : vector<8x1xi1> to vector<8x128xi1>
      %1314 = arith.select %1313, %1311, %1274 : vector<8x128xi1>, vector<8x128xf32>
      %c0_209 = arith.constant 0 : index
      %c0_210 = arith.constant 0 : index
      %c1536 = arith.constant 1536 : index
      %1315 = vector.load %arg9[%c0_209, %c0_210, %c1536] : memref<2x1x2048xf32, #tpu.memory_space<vmem>>, vector<1x1x512xf32>
      %1316 = vector.shape_cast %1315 : vector<1x1x512xf32> to vector<1x512xf32>
      %c1_211 = arith.constant 1 : index
      %c0_212 = arith.constant 0 : index
      %c1536_213 = arith.constant 1536 : index
      %1317 = vector.load %arg9[%c1_211, %c0_212, %c1536_213] : memref<2x1x2048xf32, #tpu.memory_space<vmem>>, vector<1x1x512xf32>
      %1318 = vector.shape_cast %1317 : vector<1x1x512xf32> to vector<1x512xf32>
      %cst_214 = arith.constant dense<0.000000e+00> : vector<8x512xf32>
      %1319 = tpu.matmul %281, %195, %cst_214 {dimension_numbers = #tpu.dot_dimension_numbers<[1], [0], [0], [1], [0, 0, 1, 1], [], []>} : vector<8x16xf32>, vector<16x512xf32>, vector<8x512xf32> -> vector<8x512xf32>
      %cst_215 = arith.constant dense<0.000000e+00> : vector<8x512xf32>
      %1320 = tpu.matmul %282, %195, %cst_215 {dimension_numbers = #tpu.dot_dimension_numbers<[1], [0], [0], [1], [0, 0, 1, 1], [], []>} : vector<8x16xf32>, vector<16x512xf32>, vector<8x512xf32> -> vector<8x512xf32>
      %cst_216 = arith.constant dense<0.000000e+00> : vector<8x512xf32>
      %1321 = tpu.matmul %291, %195, %cst_216 {dimension_numbers = #tpu.dot_dimension_numbers<[1], [0], [0], [1], [0, 0, 1, 1], [], []>} : vector<8x16xf32>, vector<16x512xf32>, vector<8x512xf32> -> vector<8x512xf32>
      %cst_217 = arith.constant dense<0.000000e+00> : vector<8x512xf32>
      %1322 = tpu.matmul %292, %195, %cst_217 {dimension_numbers = #tpu.dot_dimension_numbers<[1], [0], [0], [1], [0, 0, 1, 1], [], []>} : vector<8x16xf32>, vector<16x512xf32>, vector<8x512xf32> -> vector<8x512xf32>
      %1323 = tpu.concatenate %275, %275, %275, %275 in 1 : vector<8x128xf32>, vector<8x128xf32>, vector<8x128xf32>, vector<8x128xf32> -> vector<8x512xf32>
      %1324 = vector.broadcast %1316 : vector<1x512xf32> to vector<8x512xf32>
      %1325 = arith.mulf %1323, %1324 : vector<8x512xf32>
      %1326 = math.exp %1325 : vector<8x512xf32>
      %1327 = tpu.concatenate %285, %285, %285, %285 in 1 : vector<8x128xf32>, vector<8x128xf32>, vector<8x128xf32>, vector<8x128xf32> -> vector<8x512xf32>
      %1328 = vector.broadcast %1318 : vector<1x512xf32> to vector<8x512xf32>
      %1329 = arith.mulf %1327, %1328 : vector<8x512xf32>
      %1330 = math.exp %1329 : vector<8x512xf32>
      %1331 = tpu.concatenate %278, %278, %278, %278 in 1 : vector<8x128xf32>, vector<8x128xf32>, vector<8x128xf32>, vector<8x128xf32> -> vector<8x512xf32>
      %1332 = arith.mulf %1331, %1319 : vector<8x512xf32>
      %1333 = tpu.concatenate %288, %288, %288, %288 in 1 : vector<8x128xf32>, vector<8x128xf32>, vector<8x128xf32>, vector<8x128xf32> -> vector<8x512xf32>
      %1334 = arith.mulf %1333, %1321 : vector<8x512xf32>
      %1335 = vector.extract_strided_slice %1326 {offsets = [0, 0], sizes = [1, 512], strides = [1, 1]} : vector<8x512xf32> to vector<1x512xf32>
      %1336 = arith.mulf %1335, %arg26 : vector<1x512xf32>
      %1337 = vector.extract_strided_slice %1332 {offsets = [0, 0], sizes = [1, 512], strides = [1, 1]} : vector<8x512xf32> to vector<1x512xf32>
      %1338 = arith.addf %1336, %1337 : vector<1x512xf32>
      %1339 = vector.extract_strided_slice %1330 {offsets = [7, 0], sizes = [1, 512], strides = [1, 1]} : vector<8x512xf32> to vector<1x512xf32>
      %1340 = arith.mulf %1339, %arg30 : vector<1x512xf32>
      %1341 = vector.extract_strided_slice %1334 {offsets = [7, 0], sizes = [1, 512], strides = [1, 1]} : vector<8x512xf32> to vector<1x512xf32>
      %1342 = arith.addf %1340, %1341 : vector<1x512xf32>
      %1343 = vector.extract_strided_slice %1320 {offsets = [0, 0], sizes = [1, 512], strides = [1, 1]} : vector<8x512xf32> to vector<1x512xf32>
      %1344 = arith.mulf %1338, %1343 : vector<1x512xf32>
      %1345 = vector.extract_strided_slice %1322 {offsets = [7, 0], sizes = [1, 512], strides = [1, 1]} : vector<8x512xf32> to vector<1x512xf32>
      %1346 = arith.mulf %1342, %1345 : vector<1x512xf32>
      %1347 = vector.extract_strided_slice %1344 {offsets = [0, 0], sizes = [1, 128], strides = [1, 1]} : vector<1x512xf32> to vector<1x128xf32>
      %1348 = vector.extract_strided_slice %1346 {offsets = [0, 0], sizes = [1, 128], strides = [1, 1]} : vector<1x512xf32> to vector<1x128xf32>
      %1349 = vector.extract_strided_slice %1344 {offsets = [0, 128], sizes = [1, 128], strides = [1, 1]} : vector<1x512xf32> to vector<1x128xf32>
      %1350 = arith.addf %1347, %1349 : vector<1x128xf32>
      %1351 = vector.extract_strided_slice %1346 {offsets = [0, 128], sizes = [1, 128], strides = [1, 1]} : vector<1x512xf32> to vector<1x128xf32>
      %1352 = arith.addf %1348, %1351 : vector<1x128xf32>
      %1353 = vector.extract_strided_slice %1344 {offsets = [0, 256], sizes = [1, 128], strides = [1, 1]} : vector<1x512xf32> to vector<1x128xf32>
      %1354 = arith.addf %1350, %1353 : vector<1x128xf32>
      %1355 = vector.extract_strided_slice %1346 {offsets = [0, 256], sizes = [1, 128], strides = [1, 1]} : vector<1x512xf32> to vector<1x128xf32>
      %1356 = arith.addf %1352, %1355 : vector<1x128xf32>
      %1357 = vector.extract_strided_slice %1344 {offsets = [0, 384], sizes = [1, 128], strides = [1, 1]} : vector<1x512xf32> to vector<1x128xf32>
      %1358 = arith.addf %1354, %1357 : vector<1x128xf32>
      %1359 = vector.extract_strided_slice %1346 {offsets = [0, 384], sizes = [1, 128], strides = [1, 1]} : vector<1x512xf32> to vector<1x128xf32>
      %1360 = arith.addf %1356, %1359 : vector<1x128xf32>
      %c0_i32_218 = arith.constant 0 : i32
      %1361 = vector.broadcast %c0_i32_218 : i32 to vector<8x1xi32>
      %1362 = arith.cmpi eq, %196, %1361 : vector<8x1xi32>
      %1363 = vector.broadcast %1358 : vector<1x128xf32> to vector<8x128xf32>
      %1364 = arith.addf %1307, %1363 : vector<8x128xf32>
      %1365 = vector.shape_cast %1362 : vector<8x1xi1> to vector<8x1xi1>
      %1366 = vector.broadcast %1365 : vector<8x1xi1> to vector<8x128xi1>
      %1367 = arith.select %1366, %1364, %1307 : vector<8x128xi1>, vector<8x128xf32>
      %c7_i32_219 = arith.constant 7 : i32
      %1368 = vector.broadcast %c7_i32_219 : i32 to vector<8x1xi32>
      %1369 = arith.cmpi eq, %196, %1368 : vector<8x1xi32>
      %1370 = vector.broadcast %1360 : vector<1x128xf32> to vector<8x128xf32>
      %1371 = arith.addf %1314, %1370 : vector<8x128xf32>
      %1372 = vector.shape_cast %1369 : vector<8x1xi1> to vector<8x1xi1>
      %1373 = vector.broadcast %1372 : vector<8x1xi1> to vector<8x128xi1>
      %1374 = arith.select %1373, %1371, %1314 : vector<8x128xi1>, vector<8x128xf32>
      %1375 = vector.extract_strided_slice %1326 {offsets = [1, 0], sizes = [1, 512], strides = [1, 1]} : vector<8x512xf32> to vector<1x512xf32>
      %1376 = arith.mulf %1375, %1338 : vector<1x512xf32>
      %1377 = vector.extract_strided_slice %1332 {offsets = [1, 0], sizes = [1, 512], strides = [1, 1]} : vector<8x512xf32> to vector<1x512xf32>
      %1378 = arith.addf %1376, %1377 : vector<1x512xf32>
      %1379 = vector.extract_strided_slice %1330 {offsets = [6, 0], sizes = [1, 512], strides = [1, 1]} : vector<8x512xf32> to vector<1x512xf32>
      %1380 = arith.mulf %1379, %1342 : vector<1x512xf32>
      %1381 = vector.extract_strided_slice %1334 {offsets = [6, 0], sizes = [1, 512], strides = [1, 1]} : vector<8x512xf32> to vector<1x512xf32>
      %1382 = arith.addf %1380, %1381 : vector<1x512xf32>
      %1383 = vector.extract_strided_slice %1320 {offsets = [1, 0], sizes = [1, 512], strides = [1, 1]} : vector<8x512xf32> to vector<1x512xf32>
      %1384 = arith.mulf %1378, %1383 : vector<1x512xf32>
      %1385 = vector.extract_strided_slice %1322 {offsets = [6, 0], sizes = [1, 512], strides = [1, 1]} : vector<8x512xf32> to vector<1x512xf32>
      %1386 = arith.mulf %1382, %1385 : vector<1x512xf32>
      %1387 = vector.extract_strided_slice %1384 {offsets = [0, 0], sizes = [1, 128], strides = [1, 1]} : vector<1x512xf32> to vector<1x128xf32>
      %1388 = vector.extract_strided_slice %1386 {offsets = [0, 0], sizes = [1, 128], strides = [1, 1]} : vector<1x512xf32> to vector<1x128xf32>
      %1389 = vector.extract_strided_slice %1384 {offsets = [0, 128], sizes = [1, 128], strides = [1, 1]} : vector<1x512xf32> to vector<1x128xf32>
      %1390 = arith.addf %1387, %1389 : vector<1x128xf32>
      %1391 = vector.extract_strided_slice %1386 {offsets = [0, 128], sizes = [1, 128], strides = [1, 1]} : vector<1x512xf32> to vector<1x128xf32>
      %1392 = arith.addf %1388, %1391 : vector<1x128xf32>
      %1393 = vector.extract_strided_slice %1384 {offsets = [0, 256], sizes = [1, 128], strides = [1, 1]} : vector<1x512xf32> to vector<1x128xf32>
      %1394 = arith.addf %1390, %1393 : vector<1x128xf32>
      %1395 = vector.extract_strided_slice %1386 {offsets = [0, 256], sizes = [1, 128], strides = [1, 1]} : vector<1x512xf32> to vector<1x128xf32>
      %1396 = arith.addf %1392, %1395 : vector<1x128xf32>
      %1397 = vector.extract_strided_slice %1384 {offsets = [0, 384], sizes = [1, 128], strides = [1, 1]} : vector<1x512xf32> to vector<1x128xf32>
      %1398 = arith.addf %1394, %1397 : vector<1x128xf32>
      %1399 = vector.extract_strided_slice %1386 {offsets = [0, 384], sizes = [1, 128], strides = [1, 1]} : vector<1x512xf32> to vector<1x128xf32>
      %1400 = arith.addf %1396, %1399 : vector<1x128xf32>
      %c1_i32_220 = arith.constant 1 : i32
      %1401 = vector.broadcast %c1_i32_220 : i32 to vector<8x1xi32>
      %1402 = arith.cmpi eq, %196, %1401 : vector<8x1xi32>
      %1403 = vector.broadcast %1398 : vector<1x128xf32> to vector<8x128xf32>
      %1404 = arith.addf %1367, %1403 : vector<8x128xf32>
      %1405 = vector.shape_cast %1402 : vector<8x1xi1> to vector<8x1xi1>
      %1406 = vector.broadcast %1405 : vector<8x1xi1> to vector<8x128xi1>
      %1407 = arith.select %1406, %1404, %1367 : vector<8x128xi1>, vector<8x128xf32>
      %c6_i32_221 = arith.constant 6 : i32
      %1408 = vector.broadcast %c6_i32_221 : i32 to vector<8x1xi32>
      %1409 = arith.cmpi eq, %196, %1408 : vector<8x1xi32>
      %1410 = vector.broadcast %1400 : vector<1x128xf32> to vector<8x128xf32>
      %1411 = arith.addf %1374, %1410 : vector<8x128xf32>
      %1412 = vector.shape_cast %1409 : vector<8x1xi1> to vector<8x1xi1>
      %1413 = vector.broadcast %1412 : vector<8x1xi1> to vector<8x128xi1>
      %1414 = arith.select %1413, %1411, %1374 : vector<8x128xi1>, vector<8x128xf32>
      %1415 = vector.extract_strided_slice %1326 {offsets = [2, 0], sizes = [1, 512], strides = [1, 1]} : vector<8x512xf32> to vector<1x512xf32>
      %1416 = arith.mulf %1415, %1378 : vector<1x512xf32>
      %1417 = vector.extract_strided_slice %1332 {offsets = [2, 0], sizes = [1, 512], strides = [1, 1]} : vector<8x512xf32> to vector<1x512xf32>
      %1418 = arith.addf %1416, %1417 : vector<1x512xf32>
      %1419 = vector.extract_strided_slice %1330 {offsets = [5, 0], sizes = [1, 512], strides = [1, 1]} : vector<8x512xf32> to vector<1x512xf32>
      %1420 = arith.mulf %1419, %1382 : vector<1x512xf32>
      %1421 = vector.extract_strided_slice %1334 {offsets = [5, 0], sizes = [1, 512], strides = [1, 1]} : vector<8x512xf32> to vector<1x512xf32>
      %1422 = arith.addf %1420, %1421 : vector<1x512xf32>
      %1423 = vector.extract_strided_slice %1320 {offsets = [2, 0], sizes = [1, 512], strides = [1, 1]} : vector<8x512xf32> to vector<1x512xf32>
      %1424 = arith.mulf %1418, %1423 : vector<1x512xf32>
      %1425 = vector.extract_strided_slice %1322 {offsets = [5, 0], sizes = [1, 512], strides = [1, 1]} : vector<8x512xf32> to vector<1x512xf32>
      %1426 = arith.mulf %1422, %1425 : vector<1x512xf32>
      %1427 = vector.extract_strided_slice %1424 {offsets = [0, 0], sizes = [1, 128], strides = [1, 1]} : vector<1x512xf32> to vector<1x128xf32>
      %1428 = vector.extract_strided_slice %1426 {offsets = [0, 0], sizes = [1, 128], strides = [1, 1]} : vector<1x512xf32> to vector<1x128xf32>
      %1429 = vector.extract_strided_slice %1424 {offsets = [0, 128], sizes = [1, 128], strides = [1, 1]} : vector<1x512xf32> to vector<1x128xf32>
      %1430 = arith.addf %1427, %1429 : vector<1x128xf32>
      %1431 = vector.extract_strided_slice %1426 {offsets = [0, 128], sizes = [1, 128], strides = [1, 1]} : vector<1x512xf32> to vector<1x128xf32>
      %1432 = arith.addf %1428, %1431 : vector<1x128xf32>
      %1433 = vector.extract_strided_slice %1424 {offsets = [0, 256], sizes = [1, 128], strides = [1, 1]} : vector<1x512xf32> to vector<1x128xf32>
      %1434 = arith.addf %1430, %1433 : vector<1x128xf32>
      %1435 = vector.extract_strided_slice %1426 {offsets = [0, 256], sizes = [1, 128], strides = [1, 1]} : vector<1x512xf32> to vector<1x128xf32>
      %1436 = arith.addf %1432, %1435 : vector<1x128xf32>
      %1437 = vector.extract_strided_slice %1424 {offsets = [0, 384], sizes = [1, 128], strides = [1, 1]} : vector<1x512xf32> to vector<1x128xf32>
      %1438 = arith.addf %1434, %1437 : vector<1x128xf32>
      %1439 = vector.extract_strided_slice %1426 {offsets = [0, 384], sizes = [1, 128], strides = [1, 1]} : vector<1x512xf32> to vector<1x128xf32>
      %1440 = arith.addf %1436, %1439 : vector<1x128xf32>
      %c2_i32_222 = arith.constant 2 : i32
      %1441 = vector.broadcast %c2_i32_222 : i32 to vector<8x1xi32>
      %1442 = arith.cmpi eq, %196, %1441 : vector<8x1xi32>
      %1443 = vector.broadcast %1438 : vector<1x128xf32> to vector<8x128xf32>
      %1444 = arith.addf %1407, %1443 : vector<8x128xf32>
      %1445 = vector.shape_cast %1442 : vector<8x1xi1> to vector<8x1xi1>
      %1446 = vector.broadcast %1445 : vector<8x1xi1> to vector<8x128xi1>
      %1447 = arith.select %1446, %1444, %1407 : vector<8x128xi1>, vector<8x128xf32>
      %c5_i32_223 = arith.constant 5 : i32
      %1448 = vector.broadcast %c5_i32_223 : i32 to vector<8x1xi32>
      %1449 = arith.cmpi eq, %196, %1448 : vector<8x1xi32>
      %1450 = vector.broadcast %1440 : vector<1x128xf32> to vector<8x128xf32>
      %1451 = arith.addf %1414, %1450 : vector<8x128xf32>
      %1452 = vector.shape_cast %1449 : vector<8x1xi1> to vector<8x1xi1>
      %1453 = vector.broadcast %1452 : vector<8x1xi1> to vector<8x128xi1>
      %1454 = arith.select %1453, %1451, %1414 : vector<8x128xi1>, vector<8x128xf32>
      %1455 = vector.extract_strided_slice %1326 {offsets = [3, 0], sizes = [1, 512], strides = [1, 1]} : vector<8x512xf32> to vector<1x512xf32>
      %1456 = arith.mulf %1455, %1418 : vector<1x512xf32>
      %1457 = vector.extract_strided_slice %1332 {offsets = [3, 0], sizes = [1, 512], strides = [1, 1]} : vector<8x512xf32> to vector<1x512xf32>
      %1458 = arith.addf %1456, %1457 : vector<1x512xf32>
      %1459 = vector.extract_strided_slice %1330 {offsets = [4, 0], sizes = [1, 512], strides = [1, 1]} : vector<8x512xf32> to vector<1x512xf32>
      %1460 = arith.mulf %1459, %1422 : vector<1x512xf32>
      %1461 = vector.extract_strided_slice %1334 {offsets = [4, 0], sizes = [1, 512], strides = [1, 1]} : vector<8x512xf32> to vector<1x512xf32>
      %1462 = arith.addf %1460, %1461 : vector<1x512xf32>
      %1463 = vector.extract_strided_slice %1320 {offsets = [3, 0], sizes = [1, 512], strides = [1, 1]} : vector<8x512xf32> to vector<1x512xf32>
      %1464 = arith.mulf %1458, %1463 : vector<1x512xf32>
      %1465 = vector.extract_strided_slice %1322 {offsets = [4, 0], sizes = [1, 512], strides = [1, 1]} : vector<8x512xf32> to vector<1x512xf32>
      %1466 = arith.mulf %1462, %1465 : vector<1x512xf32>
      %1467 = vector.extract_strided_slice %1464 {offsets = [0, 0], sizes = [1, 128], strides = [1, 1]} : vector<1x512xf32> to vector<1x128xf32>
      %1468 = vector.extract_strided_slice %1466 {offsets = [0, 0], sizes = [1, 128], strides = [1, 1]} : vector<1x512xf32> to vector<1x128xf32>
      %1469 = vector.extract_strided_slice %1464 {offsets = [0, 128], sizes = [1, 128], strides = [1, 1]} : vector<1x512xf32> to vector<1x128xf32>
      %1470 = arith.addf %1467, %1469 : vector<1x128xf32>
      %1471 = vector.extract_strided_slice %1466 {offsets = [0, 128], sizes = [1, 128], strides = [1, 1]} : vector<1x512xf32> to vector<1x128xf32>
      %1472 = arith.addf %1468, %1471 : vector<1x128xf32>
      %1473 = vector.extract_strided_slice %1464 {offsets = [0, 256], sizes = [1, 128], strides = [1, 1]} : vector<1x512xf32> to vector<1x128xf32>
      %1474 = arith.addf %1470, %1473 : vector<1x128xf32>
      %1475 = vector.extract_strided_slice %1466 {offsets = [0, 256], sizes = [1, 128], strides = [1, 1]} : vector<1x512xf32> to vector<1x128xf32>
      %1476 = arith.addf %1472, %1475 : vector<1x128xf32>
      %1477 = vector.extract_strided_slice %1464 {offsets = [0, 384], sizes = [1, 128], strides = [1, 1]} : vector<1x512xf32> to vector<1x128xf32>
      %1478 = arith.addf %1474, %1477 : vector<1x128xf32>
      %1479 = vector.extract_strided_slice %1466 {offsets = [0, 384], sizes = [1, 128], strides = [1, 1]} : vector<1x512xf32> to vector<1x128xf32>
      %1480 = arith.addf %1476, %1479 : vector<1x128xf32>
      %c3_i32_224 = arith.constant 3 : i32
      %1481 = vector.broadcast %c3_i32_224 : i32 to vector<8x1xi32>
      %1482 = arith.cmpi eq, %196, %1481 : vector<8x1xi32>
      %1483 = vector.broadcast %1478 : vector<1x128xf32> to vector<8x128xf32>
      %1484 = arith.addf %1447, %1483 : vector<8x128xf32>
      %1485 = vector.shape_cast %1482 : vector<8x1xi1> to vector<8x1xi1>
      %1486 = vector.broadcast %1485 : vector<8x1xi1> to vector<8x128xi1>
      %1487 = arith.select %1486, %1484, %1447 : vector<8x128xi1>, vector<8x128xf32>
      %c4_i32_225 = arith.constant 4 : i32
      %1488 = vector.broadcast %c4_i32_225 : i32 to vector<8x1xi32>
      %1489 = arith.cmpi eq, %196, %1488 : vector<8x1xi32>
      %1490 = vector.broadcast %1480 : vector<1x128xf32> to vector<8x128xf32>
      %1491 = arith.addf %1454, %1490 : vector<8x128xf32>
      %1492 = vector.shape_cast %1489 : vector<8x1xi1> to vector<8x1xi1>
      %1493 = vector.broadcast %1492 : vector<8x1xi1> to vector<8x128xi1>
      %1494 = arith.select %1493, %1491, %1454 : vector<8x128xi1>, vector<8x128xf32>
      %1495 = vector.extract_strided_slice %1326 {offsets = [4, 0], sizes = [1, 512], strides = [1, 1]} : vector<8x512xf32> to vector<1x512xf32>
      %1496 = arith.mulf %1495, %1458 : vector<1x512xf32>
      %1497 = vector.extract_strided_slice %1332 {offsets = [4, 0], sizes = [1, 512], strides = [1, 1]} : vector<8x512xf32> to vector<1x512xf32>
      %1498 = arith.addf %1496, %1497 : vector<1x512xf32>
      %1499 = vector.extract_strided_slice %1330 {offsets = [3, 0], sizes = [1, 512], strides = [1, 1]} : vector<8x512xf32> to vector<1x512xf32>
      %1500 = arith.mulf %1499, %1462 : vector<1x512xf32>
      %1501 = vector.extract_strided_slice %1334 {offsets = [3, 0], sizes = [1, 512], strides = [1, 1]} : vector<8x512xf32> to vector<1x512xf32>
      %1502 = arith.addf %1500, %1501 : vector<1x512xf32>
      %1503 = vector.extract_strided_slice %1320 {offsets = [4, 0], sizes = [1, 512], strides = [1, 1]} : vector<8x512xf32> to vector<1x512xf32>
      %1504 = arith.mulf %1498, %1503 : vector<1x512xf32>
      %1505 = vector.extract_strided_slice %1322 {offsets = [3, 0], sizes = [1, 512], strides = [1, 1]} : vector<8x512xf32> to vector<1x512xf32>
      %1506 = arith.mulf %1502, %1505 : vector<1x512xf32>
      %1507 = vector.extract_strided_slice %1504 {offsets = [0, 0], sizes = [1, 128], strides = [1, 1]} : vector<1x512xf32> to vector<1x128xf32>
      %1508 = vector.extract_strided_slice %1506 {offsets = [0, 0], sizes = [1, 128], strides = [1, 1]} : vector<1x512xf32> to vector<1x128xf32>
      %1509 = vector.extract_strided_slice %1504 {offsets = [0, 128], sizes = [1, 128], strides = [1, 1]} : vector<1x512xf32> to vector<1x128xf32>
      %1510 = arith.addf %1507, %1509 : vector<1x128xf32>
      %1511 = vector.extract_strided_slice %1506 {offsets = [0, 128], sizes = [1, 128], strides = [1, 1]} : vector<1x512xf32> to vector<1x128xf32>
      %1512 = arith.addf %1508, %1511 : vector<1x128xf32>
      %1513 = vector.extract_strided_slice %1504 {offsets = [0, 256], sizes = [1, 128], strides = [1, 1]} : vector<1x512xf32> to vector<1x128xf32>
      %1514 = arith.addf %1510, %1513 : vector<1x128xf32>
      %1515 = vector.extract_strided_slice %1506 {offsets = [0, 256], sizes = [1, 128], strides = [1, 1]} : vector<1x512xf32> to vector<1x128xf32>
      %1516 = arith.addf %1512, %1515 : vector<1x128xf32>
      %1517 = vector.extract_strided_slice %1504 {offsets = [0, 384], sizes = [1, 128], strides = [1, 1]} : vector<1x512xf32> to vector<1x128xf32>
      %1518 = arith.addf %1514, %1517 : vector<1x128xf32>
      %1519 = vector.extract_strided_slice %1506 {offsets = [0, 384], sizes = [1, 128], strides = [1, 1]} : vector<1x512xf32> to vector<1x128xf32>
      %1520 = arith.addf %1516, %1519 : vector<1x128xf32>
      %c4_i32_226 = arith.constant 4 : i32
      %1521 = vector.broadcast %c4_i32_226 : i32 to vector<8x1xi32>
      %1522 = arith.cmpi eq, %196, %1521 : vector<8x1xi32>
      %1523 = vector.broadcast %1518 : vector<1x128xf32> to vector<8x128xf32>
      %1524 = arith.addf %1487, %1523 : vector<8x128xf32>
      %1525 = vector.shape_cast %1522 : vector<8x1xi1> to vector<8x1xi1>
      %1526 = vector.broadcast %1525 : vector<8x1xi1> to vector<8x128xi1>
      %1527 = arith.select %1526, %1524, %1487 : vector<8x128xi1>, vector<8x128xf32>
      %c3_i32_227 = arith.constant 3 : i32
      %1528 = vector.broadcast %c3_i32_227 : i32 to vector<8x1xi32>
      %1529 = arith.cmpi eq, %196, %1528 : vector<8x1xi32>
      %1530 = vector.broadcast %1520 : vector<1x128xf32> to vector<8x128xf32>
      %1531 = arith.addf %1494, %1530 : vector<8x128xf32>
      %1532 = vector.shape_cast %1529 : vector<8x1xi1> to vector<8x1xi1>
      %1533 = vector.broadcast %1532 : vector<8x1xi1> to vector<8x128xi1>
      %1534 = arith.select %1533, %1531, %1494 : vector<8x128xi1>, vector<8x128xf32>
      %1535 = vector.extract_strided_slice %1326 {offsets = [5, 0], sizes = [1, 512], strides = [1, 1]} : vector<8x512xf32> to vector<1x512xf32>
      %1536 = arith.mulf %1535, %1498 : vector<1x512xf32>
      %1537 = vector.extract_strided_slice %1332 {offsets = [5, 0], sizes = [1, 512], strides = [1, 1]} : vector<8x512xf32> to vector<1x512xf32>
      %1538 = arith.addf %1536, %1537 : vector<1x512xf32>
      %1539 = vector.extract_strided_slice %1330 {offsets = [2, 0], sizes = [1, 512], strides = [1, 1]} : vector<8x512xf32> to vector<1x512xf32>
      %1540 = arith.mulf %1539, %1502 : vector<1x512xf32>
      %1541 = vector.extract_strided_slice %1334 {offsets = [2, 0], sizes = [1, 512], strides = [1, 1]} : vector<8x512xf32> to vector<1x512xf32>
      %1542 = arith.addf %1540, %1541 : vector<1x512xf32>
      %1543 = vector.extract_strided_slice %1320 {offsets = [5, 0], sizes = [1, 512], strides = [1, 1]} : vector<8x512xf32> to vector<1x512xf32>
      %1544 = arith.mulf %1538, %1543 : vector<1x512xf32>
      %1545 = vector.extract_strided_slice %1322 {offsets = [2, 0], sizes = [1, 512], strides = [1, 1]} : vector<8x512xf32> to vector<1x512xf32>
      %1546 = arith.mulf %1542, %1545 : vector<1x512xf32>
      %1547 = vector.extract_strided_slice %1544 {offsets = [0, 0], sizes = [1, 128], strides = [1, 1]} : vector<1x512xf32> to vector<1x128xf32>
      %1548 = vector.extract_strided_slice %1546 {offsets = [0, 0], sizes = [1, 128], strides = [1, 1]} : vector<1x512xf32> to vector<1x128xf32>
      %1549 = vector.extract_strided_slice %1544 {offsets = [0, 128], sizes = [1, 128], strides = [1, 1]} : vector<1x512xf32> to vector<1x128xf32>
      %1550 = arith.addf %1547, %1549 : vector<1x128xf32>
      %1551 = vector.extract_strided_slice %1546 {offsets = [0, 128], sizes = [1, 128], strides = [1, 1]} : vector<1x512xf32> to vector<1x128xf32>
      %1552 = arith.addf %1548, %1551 : vector<1x128xf32>
      %1553 = vector.extract_strided_slice %1544 {offsets = [0, 256], sizes = [1, 128], strides = [1, 1]} : vector<1x512xf32> to vector<1x128xf32>
      %1554 = arith.addf %1550, %1553 : vector<1x128xf32>
      %1555 = vector.extract_strided_slice %1546 {offsets = [0, 256], sizes = [1, 128], strides = [1, 1]} : vector<1x512xf32> to vector<1x128xf32>
      %1556 = arith.addf %1552, %1555 : vector<1x128xf32>
      %1557 = vector.extract_strided_slice %1544 {offsets = [0, 384], sizes = [1, 128], strides = [1, 1]} : vector<1x512xf32> to vector<1x128xf32>
      %1558 = arith.addf %1554, %1557 : vector<1x128xf32>
      %1559 = vector.extract_strided_slice %1546 {offsets = [0, 384], sizes = [1, 128], strides = [1, 1]} : vector<1x512xf32> to vector<1x128xf32>
      %1560 = arith.addf %1556, %1559 : vector<1x128xf32>
      %c5_i32_228 = arith.constant 5 : i32
      %1561 = vector.broadcast %c5_i32_228 : i32 to vector<8x1xi32>
      %1562 = arith.cmpi eq, %196, %1561 : vector<8x1xi32>
      %1563 = vector.broadcast %1558 : vector<1x128xf32> to vector<8x128xf32>
      %1564 = arith.addf %1527, %1563 : vector<8x128xf32>
      %1565 = vector.shape_cast %1562 : vector<8x1xi1> to vector<8x1xi1>
      %1566 = vector.broadcast %1565 : vector<8x1xi1> to vector<8x128xi1>
      %1567 = arith.select %1566, %1564, %1527 : vector<8x128xi1>, vector<8x128xf32>
      %c2_i32_229 = arith.constant 2 : i32
      %1568 = vector.broadcast %c2_i32_229 : i32 to vector<8x1xi32>
      %1569 = arith.cmpi eq, %196, %1568 : vector<8x1xi32>
      %1570 = vector.broadcast %1560 : vector<1x128xf32> to vector<8x128xf32>
      %1571 = arith.addf %1534, %1570 : vector<8x128xf32>
      %1572 = vector.shape_cast %1569 : vector<8x1xi1> to vector<8x1xi1>
      %1573 = vector.broadcast %1572 : vector<8x1xi1> to vector<8x128xi1>
      %1574 = arith.select %1573, %1571, %1534 : vector<8x128xi1>, vector<8x128xf32>
      %1575 = vector.extract_strided_slice %1326 {offsets = [6, 0], sizes = [1, 512], strides = [1, 1]} : vector<8x512xf32> to vector<1x512xf32>
      %1576 = arith.mulf %1575, %1538 : vector<1x512xf32>
      %1577 = vector.extract_strided_slice %1332 {offsets = [6, 0], sizes = [1, 512], strides = [1, 1]} : vector<8x512xf32> to vector<1x512xf32>
      %1578 = arith.addf %1576, %1577 : vector<1x512xf32>
      %1579 = vector.extract_strided_slice %1330 {offsets = [1, 0], sizes = [1, 512], strides = [1, 1]} : vector<8x512xf32> to vector<1x512xf32>
      %1580 = arith.mulf %1579, %1542 : vector<1x512xf32>
      %1581 = vector.extract_strided_slice %1334 {offsets = [1, 0], sizes = [1, 512], strides = [1, 1]} : vector<8x512xf32> to vector<1x512xf32>
      %1582 = arith.addf %1580, %1581 : vector<1x512xf32>
      %1583 = vector.extract_strided_slice %1320 {offsets = [6, 0], sizes = [1, 512], strides = [1, 1]} : vector<8x512xf32> to vector<1x512xf32>
      %1584 = arith.mulf %1578, %1583 : vector<1x512xf32>
      %1585 = vector.extract_strided_slice %1322 {offsets = [1, 0], sizes = [1, 512], strides = [1, 1]} : vector<8x512xf32> to vector<1x512xf32>
      %1586 = arith.mulf %1582, %1585 : vector<1x512xf32>
      %1587 = vector.extract_strided_slice %1584 {offsets = [0, 0], sizes = [1, 128], strides = [1, 1]} : vector<1x512xf32> to vector<1x128xf32>
      %1588 = vector.extract_strided_slice %1586 {offsets = [0, 0], sizes = [1, 128], strides = [1, 1]} : vector<1x512xf32> to vector<1x128xf32>
      %1589 = vector.extract_strided_slice %1584 {offsets = [0, 128], sizes = [1, 128], strides = [1, 1]} : vector<1x512xf32> to vector<1x128xf32>
      %1590 = arith.addf %1587, %1589 : vector<1x128xf32>
      %1591 = vector.extract_strided_slice %1586 {offsets = [0, 128], sizes = [1, 128], strides = [1, 1]} : vector<1x512xf32> to vector<1x128xf32>
      %1592 = arith.addf %1588, %1591 : vector<1x128xf32>
      %1593 = vector.extract_strided_slice %1584 {offsets = [0, 256], sizes = [1, 128], strides = [1, 1]} : vector<1x512xf32> to vector<1x128xf32>
      %1594 = arith.addf %1590, %1593 : vector<1x128xf32>
      %1595 = vector.extract_strided_slice %1586 {offsets = [0, 256], sizes = [1, 128], strides = [1, 1]} : vector<1x512xf32> to vector<1x128xf32>
      %1596 = arith.addf %1592, %1595 : vector<1x128xf32>
      %1597 = vector.extract_strided_slice %1584 {offsets = [0, 384], sizes = [1, 128], strides = [1, 1]} : vector<1x512xf32> to vector<1x128xf32>
      %1598 = arith.addf %1594, %1597 : vector<1x128xf32>
      %1599 = vector.extract_strided_slice %1586 {offsets = [0, 384], sizes = [1, 128], strides = [1, 1]} : vector<1x512xf32> to vector<1x128xf32>
      %1600 = arith.addf %1596, %1599 : vector<1x128xf32>
      %c6_i32_230 = arith.constant 6 : i32
      %1601 = vector.broadcast %c6_i32_230 : i32 to vector<8x1xi32>
      %1602 = arith.cmpi eq, %196, %1601 : vector<8x1xi32>
      %1603 = vector.broadcast %1598 : vector<1x128xf32> to vector<8x128xf32>
      %1604 = arith.addf %1567, %1603 : vector<8x128xf32>
      %1605 = vector.shape_cast %1602 : vector<8x1xi1> to vector<8x1xi1>
      %1606 = vector.broadcast %1605 : vector<8x1xi1> to vector<8x128xi1>
      %1607 = arith.select %1606, %1604, %1567 : vector<8x128xi1>, vector<8x128xf32>
      %c1_i32_231 = arith.constant 1 : i32
      %1608 = vector.broadcast %c1_i32_231 : i32 to vector<8x1xi32>
      %1609 = arith.cmpi eq, %196, %1608 : vector<8x1xi32>
      %1610 = vector.broadcast %1600 : vector<1x128xf32> to vector<8x128xf32>
      %1611 = arith.addf %1574, %1610 : vector<8x128xf32>
      %1612 = vector.shape_cast %1609 : vector<8x1xi1> to vector<8x1xi1>
      %1613 = vector.broadcast %1612 : vector<8x1xi1> to vector<8x128xi1>
      %1614 = arith.select %1613, %1611, %1574 : vector<8x128xi1>, vector<8x128xf32>
      %1615 = vector.extract_strided_slice %1326 {offsets = [7, 0], sizes = [1, 512], strides = [1, 1]} : vector<8x512xf32> to vector<1x512xf32>
      %1616 = arith.mulf %1615, %1578 : vector<1x512xf32>
      %1617 = vector.extract_strided_slice %1332 {offsets = [7, 0], sizes = [1, 512], strides = [1, 1]} : vector<8x512xf32> to vector<1x512xf32>
      %1618 = arith.addf %1616, %1617 : vector<1x512xf32>
      %1619 = vector.extract_strided_slice %1330 {offsets = [0, 0], sizes = [1, 512], strides = [1, 1]} : vector<8x512xf32> to vector<1x512xf32>
      %1620 = arith.mulf %1619, %1582 : vector<1x512xf32>
      %1621 = vector.extract_strided_slice %1334 {offsets = [0, 0], sizes = [1, 512], strides = [1, 1]} : vector<8x512xf32> to vector<1x512xf32>
      %1622 = arith.addf %1620, %1621 : vector<1x512xf32>
      %1623 = vector.extract_strided_slice %1320 {offsets = [7, 0], sizes = [1, 512], strides = [1, 1]} : vector<8x512xf32> to vector<1x512xf32>
      %1624 = arith.mulf %1618, %1623 : vector<1x512xf32>
      %1625 = vector.extract_strided_slice %1322 {offsets = [0, 0], sizes = [1, 512], strides = [1, 1]} : vector<8x512xf32> to vector<1x512xf32>
      %1626 = arith.mulf %1622, %1625 : vector<1x512xf32>
      %1627 = vector.extract_strided_slice %1624 {offsets = [0, 0], sizes = [1, 128], strides = [1, 1]} : vector<1x512xf32> to vector<1x128xf32>
      %1628 = vector.extract_strided_slice %1626 {offsets = [0, 0], sizes = [1, 128], strides = [1, 1]} : vector<1x512xf32> to vector<1x128xf32>
      %1629 = vector.extract_strided_slice %1624 {offsets = [0, 128], sizes = [1, 128], strides = [1, 1]} : vector<1x512xf32> to vector<1x128xf32>
      %1630 = arith.addf %1627, %1629 : vector<1x128xf32>
      %1631 = vector.extract_strided_slice %1626 {offsets = [0, 128], sizes = [1, 128], strides = [1, 1]} : vector<1x512xf32> to vector<1x128xf32>
      %1632 = arith.addf %1628, %1631 : vector<1x128xf32>
      %1633 = vector.extract_strided_slice %1624 {offsets = [0, 256], sizes = [1, 128], strides = [1, 1]} : vector<1x512xf32> to vector<1x128xf32>
      %1634 = arith.addf %1630, %1633 : vector<1x128xf32>
      %1635 = vector.extract_strided_slice %1626 {offsets = [0, 256], sizes = [1, 128], strides = [1, 1]} : vector<1x512xf32> to vector<1x128xf32>
      %1636 = arith.addf %1632, %1635 : vector<1x128xf32>
      %1637 = vector.extract_strided_slice %1624 {offsets = [0, 384], sizes = [1, 128], strides = [1, 1]} : vector<1x512xf32> to vector<1x128xf32>
      %1638 = arith.addf %1634, %1637 : vector<1x128xf32>
      %1639 = vector.extract_strided_slice %1626 {offsets = [0, 384], sizes = [1, 128], strides = [1, 1]} : vector<1x512xf32> to vector<1x128xf32>
      %1640 = arith.addf %1636, %1639 : vector<1x128xf32>
      %c7_i32_232 = arith.constant 7 : i32
      %1641 = vector.broadcast %c7_i32_232 : i32 to vector<8x1xi32>
      %1642 = arith.cmpi eq, %196, %1641 : vector<8x1xi32>
      %1643 = vector.broadcast %1638 : vector<1x128xf32> to vector<8x128xf32>
      %1644 = arith.addf %1607, %1643 : vector<8x128xf32>
      %1645 = vector.shape_cast %1642 : vector<8x1xi1> to vector<8x1xi1>
      %1646 = vector.broadcast %1645 : vector<8x1xi1> to vector<8x128xi1>
      %1647 = arith.select %1646, %1644, %1607 : vector<8x128xi1>, vector<8x128xf32>
      %c0_i32_233 = arith.constant 0 : i32
      %1648 = vector.broadcast %c0_i32_233 : i32 to vector<8x1xi32>
      %1649 = arith.cmpi eq, %196, %1648 : vector<8x1xi32>
      %1650 = vector.broadcast %1640 : vector<1x128xf32> to vector<8x128xf32>
      %1651 = arith.addf %1614, %1650 : vector<8x128xf32>
      %1652 = vector.shape_cast %1649 : vector<8x1xi1> to vector<8x1xi1>
      %1653 = vector.broadcast %1652 : vector<8x1xi1> to vector<8x128xi1>
      %1654 = arith.select %1653, %1651, %1614 : vector<8x128xi1>, vector<8x128xf32>
      %1655 = arith.index_cast %269 : i32 to index
      %c0_234 = arith.constant 0 : index
      %1656 = vector.load %arg21[%1655, %c0_234] : memref<64x128xf32, #tpu.memory_space<vmem>>, vector<8x128xf32>
      %1657 = arith.addf %1656, %1647 : vector<8x128xf32>
      %1658 = arith.index_cast %269 : i32 to index
      %c0_235 = arith.constant 0 : index
      %1659 = vector.load %arg21[%1658, %c0_235] : memref<64x128xf32, #tpu.memory_space<vmem>>, vector<8x128xf32>
      tpu.vector_store %arg21[%1658, %c0_235], %1657 {strides = array<i32>} : memref<64x128xf32, #tpu.memory_space<vmem>>, vector<8x128xf32>,
      %1660 = arith.index_cast %272 : i32 to index
      %c0_236 = arith.constant 0 : index
      %1661 = vector.load %arg21[%1660, %c0_236] : memref<64x128xf32, #tpu.memory_space<vmem>>, vector<8x128xf32>
      %1662 = arith.addf %1661, %1654 : vector<8x128xf32>
      %1663 = arith.index_cast %272 : i32 to index
      %c0_237 = arith.constant 0 : index
      %1664 = vector.load %arg21[%1663, %c0_237] : memref<64x128xf32, #tpu.memory_space<vmem>>, vector<8x128xf32>
      tpu.vector_store %arg21[%1663, %c0_237], %1662 {strides = array<i32>} : memref<64x128xf32, #tpu.memory_space<vmem>>, vector<8x128xf32>,
      scf.yield %598, %938, %1278, %1618, %602, %942, %1282, %1622 : vector<1x512xf32>, vector<1x512xf32>, vector<1x512xf32>, vector<1x512xf32>, vector<1x512xf32>, vector<1x512xf32>, vector<1x512xf32>, vector<1x512xf32>
    }
    %c8_i32_91 = arith.constant 8 : i32
    %c0_92 = arith.constant 0 : index
    %c0_93 = arith.constant 0 : index
    %203 = vector.load %arg21[%c0_92, %c0_93] : memref<64x128xf32, #tpu.memory_space<vmem>>, vector<64x128xf32>
    %204 = vector.extract_strided_slice %203 {offsets = [0, 0], sizes = [64, 8], strides = [1, 1]} : vector<64x128xf32> to vector<64x8xf32>
    %c0_94 = arith.constant 0 : index
    %c0_95 = arith.constant 0 : index
    %205 = vector.load %arg11[%c0_94, %c0_95] : memref<1x8xf32, #tpu.memory_space<vmem>>, vector<1x8xf32>
    %c0_96 = arith.constant 0 : index
    %c0_97 = arith.constant 0 : index
    %206 = vector.load %arg12[%c0_96, %c0_97] : memref<1x8xf32, #tpu.memory_space<vmem>>, vector<1x8xf32>
    %cst_98 = arith.constant dense<0.000000e+00> : vector<64xf32>
    %207 = vector.multi_reduction <add>, %204, %cst_98 [1] : vector<64x8xf32> to vector<64xf32>
    %208 = vector.shape_cast %207 : vector<64xf32> to vector<64x1xf32>
    %cst_99 = arith.constant 8.000000e+00 : f32
    %209 = vector.broadcast %cst_99 : f32 to vector<64x1xf32>
    %210 = arith.divf %208, %209 : vector<64x1xf32>
    %211 = vector.broadcast %210 : vector<64x1xf32> to vector<64x8xf32>
    %212 = arith.subf %204, %211 : vector<64x8xf32>
    %213 = arith.mulf %212, %212 : vector<64x8xf32>
    %cst_100 = arith.constant dense<0.000000e+00> : vector<64xf32>
    %214 = vector.multi_reduction <add>, %213, %cst_100 [1] : vector<64x8xf32> to vector<64xf32>
    %215 = vector.shape_cast %214 : vector<64xf32> to vector<64x1xf32>
    %cst_101 = arith.constant 8.000000e+00 : f32
    %216 = vector.broadcast %cst_101 : f32 to vector<64x1xf32>
    %217 = arith.divf %215, %216 : vector<64x1xf32>
    %218 = vector.broadcast %210 : vector<64x1xf32> to vector<64x8xf32>
    %219 = arith.subf %204, %218 : vector<64x8xf32>
    %cst_102 = arith.constant 9.99999974E-6 : f32
    %220 = vector.broadcast %cst_102 : f32 to vector<64x1xf32>
    %221 = arith.addf %217, %220 : vector<64x1xf32>
    %222 = math.rsqrt %221 : vector<64x1xf32>
    %223 = vector.broadcast %222 : vector<64x1xf32> to vector<64x8xf32>
    %224 = arith.mulf %219, %223 : vector<64x8xf32>
    %225 = vector.broadcast %205 : vector<1x8xf32> to vector<64x8xf32>
    %226 = arith.mulf %224, %225 : vector<64x8xf32>
    %227 = vector.broadcast %206 : vector<1x8xf32> to vector<64x8xf32>
    %228 = arith.addf %226, %227 : vector<64x8xf32>
    %c0_103 = arith.constant 0 : index
    %c0_104 = arith.constant 0 : index
    %c0_105 = arith.constant 0 : index
    %229 = vector.load %arg2[%c0_103, %c0_104, %c0_105] : memref<1x64x128xbf16, #tpu.memory_space<vmem>>, vector<1x64x128xbf16>
    %230 = vector.shape_cast %229 : vector<1x64x128xbf16> to vector<64x128xbf16>
    %231 = arith.extf %230 : vector<64x128xbf16> to vector<64x128xf32>
    %c0_106 = arith.constant 0 : index
    %c0_107 = arith.constant 0 : index
    %232 = vector.load %arg18[%c0_106, %c0_107] : memref<64x128xf32, #tpu.memory_space<vmem>>, vector<64x128xf32>
    %233 = arith.mulf %231, %232 : vector<64x128xf32>
    %234 = arith.truncf %233 : vector<64x128xf32> to vector<64x128xbf16>
    %c0_108 = arith.constant 0 : index
    %c0_109 = arith.constant 0 : index
    %235 = vector.load %arg13[%c0_108, %c0_109] : memref<128x8xbf16, #tpu.memory_space<vmem>>, vector<128x8xbf16>
    %cst_110 = arith.constant dense<0.000000e+00> : vector<64x8xf32>
    %236 = tpu.matmul %234, %235, %cst_110 {dimension_numbers = #tpu.dot_dimension_numbers<[1], [0], [0], [1], [0, 0, 1, 1], [], []>} : vector<64x128xbf16>, vector<128x8xbf16>, vector<64x8xf32> -> vector<64x8xf32>
    %c0_111 = arith.constant 0 : index
    %c0_112 = arith.constant 0 : index
    %237 = vector.load %arg14[%c0_111, %c0_112] : memref<1x8xf32, #tpu.memory_space<vmem>>, vector<1x8xf32>
    %c0_113 = arith.constant 0 : index
    %c0_114 = arith.constant 0 : index
    %238 = vector.load %arg15[%c0_113, %c0_114] : memref<1x8xf32, #tpu.memory_space<vmem>>, vector<1x8xf32>
    %cst_115 = arith.constant dense<0.000000e+00> : vector<64xf32>
    %239 = vector.multi_reduction <add>, %236, %cst_115 [1] : vector<64x8xf32> to vector<64xf32>
    %240 = vector.shape_cast %239 : vector<64xf32> to vector<64x1xf32>
    %cst_116 = arith.constant 8.000000e+00 : f32
    %241 = vector.broadcast %cst_116 : f32 to vector<64x1xf32>
    %242 = arith.divf %240, %241 : vector<64x1xf32>
    %243 = vector.broadcast %242 : vector<64x1xf32> to vector<64x8xf32>
    %244 = arith.subf %236, %243 : vector<64x8xf32>
    %245 = arith.mulf %244, %244 : vector<64x8xf32>
    %cst_117 = arith.constant dense<0.000000e+00> : vector<64xf32>
    %246 = vector.multi_reduction <add>, %245, %cst_117 [1] : vector<64x8xf32> to vector<64xf32>
    %247 = vector.shape_cast %246 : vector<64xf32> to vector<64x1xf32>
    %cst_118 = arith.constant 8.000000e+00 : f32
    %248 = vector.broadcast %cst_118 : f32 to vector<64x1xf32>
    %249 = arith.divf %247, %248 : vector<64x1xf32>
    %250 = vector.broadcast %242 : vector<64x1xf32> to vector<64x8xf32>
    %251 = arith.subf %236, %250 : vector<64x8xf32>
    %cst_119 = arith.constant 9.99999974E-6 : f32
    %252 = vector.broadcast %cst_119 : f32 to vector<64x1xf32>
    %253 = arith.addf %249, %252 : vector<64x1xf32>
    %254 = math.rsqrt %253 : vector<64x1xf32>
    %255 = vector.broadcast %254 : vector<64x1xf32> to vector<64x8xf32>
    %256 = arith.mulf %251, %255 : vector<64x8xf32>
    %257 = vector.broadcast %237 : vector<1x8xf32> to vector<64x8xf32>
    %258 = arith.mulf %256, %257 : vector<64x8xf32>
    %259 = vector.broadcast %238 : vector<1x8xf32> to vector<64x8xf32>
    %260 = arith.addf %258, %259 : vector<64x8xf32>
    %261 = arith.mulf %228, %260 : vector<64x8xf32>
    %262 = arith.truncf %261 : vector<64x8xf32> to vector<64x8xbf16>
    %c0_120 = arith.constant 0 : index
    %c0_121 = arith.constant 0 : index
    %263 = vector.load %arg16[%c0_120, %c0_121] : memref<8x128xbf16, #tpu.memory_space<vmem>>, vector<8x128xbf16>
    %cst_122 = arith.constant dense<0.000000e+00> : vector<64x128xf32>
    %264 = tpu.matmul %262, %263, %cst_122 {dimension_numbers = #tpu.dot_dimension_numbers<[1], [0], [0], [1], [0, 0, 1, 1], [], []>} : vector<64x8xbf16>, vector<8x128xbf16>, vector<64x128xf32> -> vector<64x128xf32>
    %c0_123 = arith.constant 0 : index
    %c0_124 = arith.constant 0 : index
    %c0_125 = arith.constant 0 : index
    %265 = vector.load %arg17[%c0_123, %c0_124, %c0_125] : memref<1x64x128xf32, #tpu.memory_space<vmem>>, vector<1x64x128xf32>
    %266 = vector.shape_cast %265 : vector<1x64x128xf32> to vector<64x128xf32>
    %267 = vector.shape_cast %264 : vector<64x128xf32> to vector<1x64x128xf32>
    tpu.vector_store %arg17[%c0_123, %c0_124, %c0_125], %267 {strides = array<i32>} : memref<1x64x128xf32, #tpu.memory_space<vmem>>, vector<1x64x128xf32>,
    return
  }
  func.func @transform_0(%arg0: i32) -> (i32, i32, i32) {
    %c0_i32 = arith.constant 0 : i32
    %c0_i32_0 = arith.constant 0 : i32
    %c0_i32_1 = arith.constant 0 : i32
    return %arg0, %c0_i32, %c0_i32_0 : i32, i32, i32
  }
  func.func @transform_1(%arg0: i32) -> (i32, i32, i32) {
    %c0_i32 = arith.constant 0 : i32
    %c0_i32_0 = arith.constant 0 : i32
    %c0_i32_1 = arith.constant 0 : i32
    return %arg0, %c0_i32, %c0_i32_0 : i32, i32, i32
  }
  func.func @transform_2(%arg0: i32) -> (i32, i32, i32) {
    %c0_i32 = arith.constant 0 : i32
    %c0_i32_0 = arith.constant 0 : i32
    %c0_i32_1 = arith.constant 0 : i32
    %c0_i32_2 = arith.constant 0 : i32
    return %c0_i32, %c0_i32_0, %c0_i32_1 : i32, i32, i32
  }
  func.func @transform_3(%arg0: i32) -> (i32, i32, i32) {
    %c0_i32 = arith.constant 0 : i32
    %c0_i32_0 = arith.constant 0 : i32
    %c0_i32_1 = arith.constant 0 : i32
    %c0_i32_2 = arith.constant 0 : i32
    return %c0_i32, %c0_i32_0, %c0_i32_1 : i32, i32, i32
  }
  func.func @transform_4(%arg0: i32) -> (i32, i32) {
    %c0_i32 = arith.constant 0 : i32
    %c0_i32_0 = arith.constant 0 : i32
    %c0_i32_1 = arith.constant 0 : i32
    return %c0_i32, %c0_i32_0 : i32, i32
  }
  func.func @transform_5(%arg0: i32) -> (i32, i32) {
    %c0_i32 = arith.constant 0 : i32
    %c0_i32_0 = arith.constant 0 : i32
    %c0_i32_1 = arith.constant 0 : i32
    return %c0_i32, %c0_i32_0 : i32, i32
  }
  func.func @transform_6(%arg0: i32) -> (i32, i32, i32) {
    %c0_i32 = arith.constant 0 : i32
    %c0_i32_0 = arith.constant 0 : i32
    %c0_i32_1 = arith.constant 0 : i32
    %c0_i32_2 = arith.constant 0 : i32
    return %c0_i32, %c0_i32_0, %c0_i32_1 : i32, i32, i32
  }
  func.func @transform_7(%arg0: i32) -> (i32, i32, i32) {
    %c0_i32 = arith.constant 0 : i32
    %c0_i32_0 = arith.constant 0 : i32
    %c0_i32_1 = arith.constant 0 : i32
    %c0_i32_2 = arith.constant 0 : i32
    return %c0_i32, %c0_i32_0, %c0_i32_1 : i32, i32, i32
  }
  func.func @transform_8(%arg0: i32) -> (i32, i32, i32) {
    %c0_i32 = arith.constant 0 : i32
    %c0_i32_0 = arith.constant 0 : i32
    %c0_i32_1 = arith.constant 0 : i32
    %c0_i32_2 = arith.constant 0 : i32
    return %c0_i32, %c0_i32_0, %c0_i32_1 : i32, i32, i32
  }
  func.func @transform_9(%arg0: i32) -> (i32, i32, i32) {
    %c0_i32 = arith.constant 0 : i32
    %c0_i32_0 = arith.constant 0 : i32
    %c0_i32_1 = arith.constant 0 : i32
    %c0_i32_2 = arith.constant 0 : i32
    return %c0_i32, %c0_i32_0, %c0_i32_1 : i32, i32, i32
  }
  func.func @transform_10(%arg0: i32) -> (i32, i32) {
    %c0_i32 = arith.constant 0 : i32
    %c0_i32_0 = arith.constant 0 : i32
    %c0_i32_1 = arith.constant 0 : i32
    return %c0_i32, %c0_i32_0 : i32, i32
  }
  func.func @transform_11(%arg0: i32) -> (i32, i32) {
    %c0_i32 = arith.constant 0 : i32
    %c0_i32_0 = arith.constant 0 : i32
    %c0_i32_1 = arith.constant 0 : i32
    return %c0_i32, %c0_i32_0 : i32, i32
  }
  func.func @transform_12(%arg0: i32) -> (i32, i32) {
    %c0_i32 = arith.constant 0 : i32
    %c0_i32_0 = arith.constant 0 : i32
    %c0_i32_1 = arith.constant 0 : i32
    return %c0_i32, %c0_i32_0 : i32, i32
  }
  func.func @transform_13(%arg0: i32) -> (i32, i32) {
    %c0_i32 = arith.constant 0 : i32
    %c0_i32_0 = arith.constant 0 : i32
    %c0_i32_1 = arith.constant 0 : i32
    return %c0_i32, %c0_i32_0 : i32, i32
  }
  func.func @transform_14(%arg0: i32) -> (i32, i32) {
    %c0_i32 = arith.constant 0 : i32
    %c0_i32_0 = arith.constant 0 : i32
    %c0_i32_1 = arith.constant 0 : i32
    return %c0_i32, %c0_i32_0 : i32, i32
  }
  func.func @transform_15(%arg0: i32) -> (i32, i32) {
    %c0_i32 = arith.constant 0 : i32
    %c0_i32_0 = arith.constant 0 : i32
    %c0_i32_1 = arith.constant 0 : i32
    return %c0_i32, %c0_i32_0 : i32, i32
  }
  func.func @transform_16(%arg0: i32) -> (i32, i32, i32) {
    %c0_i32 = arith.constant 0 : i32
    %c0_i32_0 = arith.constant 0 : i32
    %c0_i32_1 = arith.constant 0 : i32
    return %arg0, %c0_i32, %c0_i32_0 : i32, i32, i32
  }
}

</mosaic_0001>

<bundles_post_ra>
// kernel: lcp_mamba_forward.2
= control target key start
LH: loop header
LB: loop body
LE: loop exit
PB: predicated region body
PF: predicated region fallthrough
CT: control target
= control target key end

     0   :  { %s611_s12 = smov 0   ;;  %s642_s0 = inlined_call_operand.vmem [shape: f32[128,4], index: 0, kind: input, shape index: {}]   ;;  %s643_s1 = inlined_call_operand.vmem [shape: bf16[4,256], index: 1, kind: input, shape index: {}]   ;;  %s644_s2 = inlined_call_operand.vmem [shape: bf16[128,128], index: 2, kind: output, shape index: {0}]   ;;  %s645_s3 = inlined_call_operand.vmem [shape: bf16[128,128], index: 3, kind: output, shape index: {1}]  }
   0x1 LB: > { %s474_s13 = sadd.s32 4294967295, %s588_s12   ;;  %p478_p0 = scmp.ge.s32.totalorder %s588_s12, 1  ;;  %s588_s12 = sphi %s611_s12, %s14_s12  }
   0x2   : > { %p141_p1 = scmp.lt.s32.totalorder %s588_s12, 3 }
   0x4   : > { %p142_p2 = pnand %p478_p0, %p141_p1 }
   0x5   : > { %s479_s16 = sshll.u32 (!%p142_p2), %s474_s13, 3 }
   0x6   : > { %145 = sbr.rel (%p142_p2) target bundleno = 229 (0xe5), region = 28  ;;  %p171_p3 = scmp.lt.s32.totalorder (!%p142_p2), %s479_s16, 15 }
   0xb   : > { %v485_v0 = vld.sshfl [vmem:[%s643_s1] sm:$0x33 pattern:$0x76325410]  ;;  %vm224_vm0 = vcmask 1041408   ;;  %v590_v3 = vmov 0  }
   0xc   : > { %v210_v1 = vcombine.high %v485_v0, %v485_v0  ;;  %v226_v2 = vsel %vm224_vm0, %v485_v0, 0  ;;  %263 = vmatprep.mubr.bf16.mxu0 %v590_v3  ;;  %283 = vmatprep.mubr.bf16.mxu1 %v590_v3  ;;  %s647_s16 = smov (!%p171_p3, %s479_s16), 15  ;;  %vm211_vm1 = vcmask 31744  }
   0xd   : > { %s480_s17 = sshll.u32 %s647_s16, 3  ;;  %s482_s21 = sshll.u32 %s647_s16, 2 }
   0xe   : > { %486 = vmatprep.subr.msk.bf16.mxu0 %vm224_vm0, %v210_v1  ;;  %571 = vmatprep.subr.msk.bf16.mxu1 %vm224_vm0, %v210_v1  ;;  %s174_s20 = scalar_lea.vmem %s642_s0, %s480_s17  ;;  %s180_s24 = scalar_lea.vmem %s644_s2, %s482_s21 }
   0xf   : > { %246 = vmatpush1.bf16.msra.mxu0 %v226_v2  ;;  %572 = vmatpush1.bf16.msra.mxu1 %v226_v2  ;;  %v189_v4 = vld [vmem:[%s174_s20] sm:$0xff]  ;;  %v190_v5 = vld [vmem:[%s174_s20 + $0x8] sm:$0xff]  ;;  %v191_v10 = vld [vmem:[%s174_s20 + $0x10] sm:$0xff]  ;;  %s186_s27 = scalar_lea.vmem %s645_s3, %s482_s21 }
  0x10   : > { %v193_v6 = vld [vmem:[%s174_s20 + $0x20] sm:$0xff]  ;;  %v197_v7 = vpack.c.bf16 %v190_v5, %v189_v4  ;;  %v194_v8 = vld [vmem:[%s174_s20 + $0x28] sm:$0xff]  ;;  %v192_v11 = vld [vmem:[%s174_s20 + $0x18] sm:$0xff] }
  0x11   : > { %v199_v9 = vpack.c.bf16 %v194_v8, %v193_v6  ;;  %v195_v12 = vld [vmem:[%s174_s20 + $0x30] sm:$0xff]  ;;  %v196_v13 = vld [vmem:[%s174_s20 + $0x38] sm:$0xff]  ;;  %v198_v14 = vpack.c.bf16 %v192_v11, %v191_v10 }
  0x12   : > { %487 = vmatmul.mubr.msk.bf16.vlgmr.msra.gmra.mxu0 %vm211_vm1, %v197_v7  ;;  %v200_v15 = vpack.c.bf16 %v196_v13, %v195_v12 }
  0x13   : > { %489 = vmatmul.mubr.msk.bf16.vlgmr.msra.gmra.mxu1 %vm211_vm1, %v199_v9  ;;  %273 = vmatprep.mubr.bf16.mxu0 %v590_v3 }
  0x14   : > { %293 = vmatprep.mubr.bf16.mxu1 %v590_v3 }
  0x1a   : > { %488 = vmatmul.mubr.msk.bf16.gmra.mxu0 %vm211_vm1, %v198_v14 }
  0x1b   : > { %490 = vmatmul.mubr.msk.bf16.gmra.mxu1 %vm211_vm1, %v200_v15 }
  0xd2   : > { %v265_v16 = vpop.f32.mrf.mxu0 }
  0xd3   : > { %v285_v17 = vpop.f32.mrf.mxu1 }
  0xd4   : > { %v267_v18 = vpop.f32.mrf.mxu0 }
  0xd5   : > { %v287_v19 = vpop.f32.mrf.mxu1 }
  0xd6   : > { %v269_v20 = vpop.f32.mrf.mxu0 }
  0xd7   : > { %v528_v21 = vpack.c.bf16 %v269_v20, %v265_v16  ;;  %v289_v22 = vpop.f32.mrf.mxu1 }
  0xd8   : > { %v538_v23 = vpack.c.bf16 %v289_v22, %v285_v17  ;;  %v271_v24 = vpop.f32.mrf.mxu0 }
  0xd9   : > { %529 = vst [vmem:[%s180_s24] sm:$0xff] %v528_v21   ;;  %v548_v25 = vpack.c.bf16 %v271_v24, %v267_v18  ;;  %v291_v26 = vpop.f32.mrf.mxu1 }
  0xda   : > { %566 = vst [vmem:[%s180_s24 + $0x10] sm:$0xff] %v538_v23   ;;  %v558_v27 = vpack.c.bf16 %v291_v26, %v287_v19  ;;  %v275_v28 = vpop.f32.mrf.mxu0 }
  0xdb   : > { %549 = vst [vmem:[%s186_s27] sm:$0xff] %v548_v25   ;;  %v295_v29 = vpop.f32.mrf.mxu1 }
  0xdc   : > { %569 = vst [vmem:[%s186_s27 + $0x10] sm:$0xff] %v558_v27   ;;  %v277_v30 = vpop.f32.mrf.mxu0 }
  0xdd   : > { %v297_v31 = vpop.f32.mrf.mxu1 }
  0xde   : > { %v279_v32 = vpop.f32.mrf.mxu0 }
  0xdf   : > { %v533_v33 = vpack.c.bf16 %v279_v32, %v275_v28  ;;  %v299_v34 = vpop.f32.mrf.mxu1 }
  0xe0   : > { %v543_v35 = vpack.c.bf16 %v299_v34, %v295_v29  ;;  %v281_v36 = vpop.f32.mrf.mxu0 }
  0xe1   : > { %565 = vst [vmem:[%s180_s24 + $0x8] sm:$0xff] %v533_v33   ;;  %v553_v37 = vpack.c.bf16 %v281_v36, %v277_v30  ;;  %v301_v38 = vpop.f32.mrf.mxu1 }
  0xe2   : > { %567 = vst [vmem:[%s180_s24 + $0x18] sm:$0xff] %v543_v35   ;;  %v563_v39 = vpack.c.bf16 %v301_v38, %v297_v31 }
  0xe3   : > { %568 = vst [vmem:[%s186_s27 + $0x8] sm:$0xff] %v553_v37  }
  0xe4   : > { %570 = vst [vmem:[%s186_s27 + $0x18] sm:$0xff] %v563_v39  }
  0xe5 PF: > { %s14_s12 = sadd.s32 1, %s588_s12  }
  0xe6   : > { %p11_p4 = scmp.ge.s32.totalorder %s14_s12, 4  }
  0xe8   :  { %13 = sbr.rel (!%p11_p4) target bundleno = 1 (0x1), region = 70 }

// kernel: lcp_mamba_forward.3
= control target key start
LH: loop header
LB: loop body
LE: loop exit
PB: predicated region body
PF: predicated region fallthrough
CT: control target
= control target key end

     0   :  { %s9029_s21 = smov 0   ;;  %s13013_s0 = inlined_call_operand.vmem [shape: bf16[2,64,128], index: 0, kind: input, shape index: {}]   ;;  %s13014_s1 = inlined_call_operand.vmem [shape: bf16[2,64,128], index: 1, kind: input, shape index: {}]   ;;  %s13015_s2 = inlined_call_operand.vmem [shape: f32[2,64,1], index: 2, kind: input, shape index: {}]   ;;  %s13016_s3 = inlined_call_operand.vmem [shape: f32[9,1,128], index: 3, kind: input, shape index: {}]   ;;  %s13017_s4 = inlined_call_operand.vmem [shape: f32[1,128], index: 4, kind: input, shape index: {}]   ;;  %s13018_s5 = inlined_call_operand.vmem [shape: bf16[128,256], index: 5, kind: input, shape index: {}]   ;;  %s13019_s6 = inlined_call_operand.vmem [shape: f32[2,128,128], index: 6, kind: input, shape index: {}]   ;;  %s13020_s7 = inlined_call_operand.vmem [shape: f32[2,1,128], index: 7, kind: input, shape index: {}]   ;;  %s13021_s8 = inlined_call_operand.vmem [shape: f32[2,1,2048], index: 8, kind: input, shape index: {}]   ;;  %s13022_s9 = inlined_call_operand.vmem [shape: f32[2,1,128], index: 9, kind: input, shape index: {}]   ;;  %s13023_s10 = inlined_call_operand.vmem [shape: f32[1,8], index: 10, kind: input, shape index: {}]   ;;  %s13024_s11 = inlined_call_operand.vmem [shape: f32[1,8], index: 11, kind: input, shape index: {}]   ;;  %s13025_s12 = inlined_call_operand.vmem [shape: bf16[128,8], index: 12, kind: input, shape index: {}]   ;;  %s13026_s13 = inlined_call_operand.vmem [shape: f32[1,8], index: 13, kind: input, shape index: {}]   ;;  %s13027_s14 = inlined_call_operand.vmem [shape: f32[1,8], index: 14, kind: input, shape index: {}]   ;;  %s13028_s15 = inlined_call_operand.vmem [shape: bf16[8,128], index: 15, kind: input, shape index: {}]   ;;  %s13029_s16 = inlined_call_operand.vmem [shape: f32[2,64,128], index: 16, kind: output, shape index: {}]  }
   0x1   :  { %13223 = sst [smem:[#allocation116_spill]] %s13013_s0 }
   0x2   :  { %13224 = sst [smem:[#allocation117_spill]] %s13014_s1 }
   0x3 LB: > { %s7605_s22 = sadd.s32 4294967295, %s8805_s21   ;;  %p7609_p0 = scmp.ge.s32.totalorder %s8805_s21, 1  ;;  %s8805_s21 = sphi %s9029_s21, %s26_s21  }
   0x4   : > { %p472_p1 = scmp.lt.s32.totalorder %s8805_s21, 3 }
   0x6   : > { %p473_p2 = pnand %p7609_p0, %p472_p1 }
   0x8   : > { %476 = sbr.rel (%p473_p2) target bundleno = 2145 (0x861), region = 84 }
   0xd   : > { %v7618_v0 = vld [vmem:[%s13015_s2 + $0x50] sm:$0xff]  ;;  %v7616_v1 = vld [vmem:[%s13015_s2 + $0x40] sm:$0xff]  ;;  %p527_p3 = scmp.lt.s32.totalorder %s7605_s22, 1  ;;  %v13031_v2 = vmov 0   ;;  %v7617_v3 = vld [vmem:[%s13015_s2 + $0x48] sm:$0xff]  ;;  %s13225_s1 = sld [smem:[#allocation117_spill]] }
   0xe   : > { %8442 = vset.pattern.permute.xlu1 %v13031_v2  ;;  %8441 = vset.pattern.permute.xlu0 %v13031_v2  ;;  %v594_v4 = vld [vmem:[%s13015_s2] sm:$0xff]  ;;  %v595_v5 = vld [vmem:[%s13015_s2 + $0x8] sm:$0xff]  ;;  %v7619_v6 = vld [vmem:[%s13015_s2 + $0x58] sm:$0xff]  ;;  %vm13036_vm0 = vcmask 1040384   ;;  %vm13037_vm1 = vcmask 1046528  }
   0xf   : > { %769 = vperm.xlu1 %8442, %v7618_v0   ;;  %761 = vperm.xlu0 %8441, %v7616_v1   ;;  %s13735_s22 = smov (!%p527_p3, %s7605_s22), 1  ;;  %v7620_v7 = vld [vmem:[%s13015_s2 + $0x60] sm:$0xff]  ;;  %v596_v8 = vld [vmem:[%s13015_s2 + $0x10] sm:$0xff]  ;;  %v597_v9 = vld [vmem:[%s13015_s2 + $0x18] sm:$0xff] }
  0x10   : > { %1397 = vmatprep.mubr.bf16.mxu0 %v13031_v2  ;;  %s13030_s0 = sshll.u32 %s13735_s22, 5  ;;  %s7903_s17 = sshll.u32 %s13735_s22, 6  ;;  %v7621_v10 = vld [vmem:[%s13015_s2 + $0x68] sm:$0xff]  ;;  %v7622_v11 = vld [vmem:[%s13015_s2 + $0x70] sm:$0xff]  ;;  %v598_v12 = vld [vmem:[%s13015_s2 + $0x20] sm:$0xff] }
  0x11   : > { %s9066_s25 = scalar_lea.vmem %s13029_s16, %s7903_s17  ;;  %v599_v13 = vld [vmem:[%s13015_s2 + $0x28] sm:$0xff]  ;;  %v7623_v14 = vld [vmem:[%s13015_s2 + $0x78] sm:$0xff]  ;;  %v600_v15 = vld [vmem:[%s13015_s2 + $0x30] sm:$0xff]  ;;  %s13226_s24 = sshll.u32 %s13735_s22, 5 }
  0x12   : > { %v601_v16 = vld [vmem:[%s13015_s2 + $0x38] sm:$0xff]  ;;  %v8446_v19 = vld [vmem:[%s13018_s5 + $0x64] ss:$8 sps:$4 sm:$0xff]   ;;  %v8448_v20 = vld [vmem:[%s13018_s5 + $0x60] ss:$8 sps:$4 sm:$0xff]  }
  0x13   : > { %s9061_s20 = scalar_lea.vmem %s13225_s1, %s13030_s0  ;;  %765 = vperm.xlu0 %8441, %v7617_v3   ;;  %628 = vperm.xlu1 %8442, %v594_v4   ;;  %v8443_v17 = vld [vmem:[%s13018_s5 + $0x74] ss:$8 sps:$4 sm:$0xff]   ;;  %v8445_v18 = vld [vmem:[%s13018_s5 + $0x70] ss:$8 sps:$4 sm:$0xff]   ;;  %s13227_s1 = sld [smem:[#allocation116_spill]] }
  0x14   : > { %1365 = vmatprep.subr.bf16.mxu0 %v8443_v17  ;;  %v8449_v21 = vld [vmem:[%s13018_s5 + $0x54] ss:$8 sps:$4 sm:$0xff]   ;;  %v8451_v23 = vld [vmem:[%s13018_s5 + $0x50] ss:$8 sps:$4 sm:$0xff]   ;;  %v8452_v25 = vld [vmem:[%s13018_s5 + $0x44] ss:$8 sps:$4 sm:$0xff]  }
  0x15   : > { %1366 = vmatpush1.bf16.msra.mxu0 %v8445_v18  ;;  %v8454_v27 = vld [vmem:[%s13018_s5 + $0x40] ss:$8 sps:$4 sm:$0xff]   ;;  %v8455_v33 = vld [vmem:[%s13018_s5 + $0x34] ss:$8 sps:$4 sm:$0xff]   ;;  %v8457_v35 = vld [vmem:[%s13018_s5 + $0x30] ss:$8 sps:$4 sm:$0xff]  }
  0x16   : > { %1367 = vmatprep.subr.bf16.mxu0 %v8446_v19  ;;  %v9141_v32 = vld [vmem:[%s13016_s3 + $0x1] ss:$0 sm:$0xff]  ;;  %v9152_v37 = vld [vmem:[%s13016_s3 + $0x2] ss:$0 sm:$0xff]  ;;  %v9157_v39 = vld [vmem:[%s13016_s3] ss:$0 sm:$0xff] }
  0x17   : > { %633 = vperm.xlu0 %8441, %v595_v5   ;;  %773 = vperm.xlu1 %8442, %v7619_v6   ;;  %v690_v40 = vmul.f32 0.0, %v9141_v32  ;;  %v9164_v44 = vld [vmem:[%s13016_s3 + $0x4] ss:$0 sm:$0xff]  ;;  %v8460_v47 = vld [vmem:[%s13018_s5 + $0x20] ss:$8 sps:$4 sm:$0xff]   ;;  %v9173_v48 = vmul.f32 0.0, %v9152_v37 }
  0x18   : > { %v8458_v45 = vld [vmem:[%s13018_s5 + $0x24] ss:$8 sps:$4 sm:$0xff]   ;;  %v9183_v50 = vld [vmem:[%s13016_s3 + $0x8] ss:$0 sm:$0xff]  ;;  %v9189_v52 = vmul.f32 0.0, %v9157_v39  ;;  %s10451_s0 = smov 0  }
  0x19   : > { %s9121_s28 = scalar_lea.vmem %s13227_s1, %s13226_s24  ;;  %1368 = vmatpush1.bf16.msra.mxu0 %v8448_v20  ;;  %v9178_v49 = vld [vmem:[%s13016_s3 + $0x5] ss:$0 sm:$0xff]  ;;  %v9194_v54 = vld [vmem:[%s13016_s3 + $0x7] ss:$0 sm:$0xff]  ;;  %v709_v60 = vrot.slane %v690_v40, 1 }
  0x1a   : > { %v7907_v22 = vld [vmem:[%s9121_s28] sm:$0xff]   ;;  %1369 = vmatprep.subr.bf16.mxu0 %v8449_v21  ;;  %v7938_v26 = vld [vmem:[%s9121_s28 + $0x8] sm:$0xff]   ;;  %v7939_v30 = vld [vmem:[%s9121_s28 + $0x10] sm:$0xff]  }
  0x1b   : > { %777 = vperm.xlu0 %8441, %v7620_v7   ;;  %638 = vperm.xlu1 %8442, %v596_v8   ;;  %v7908_v24 = vunpack.c.l.bf16 %v7907_v22  ;;  %v7909_v28 = vunpack.c.h.bf16 %v7907_v22  ;;  %v7912_v29 = vunpack.c.l.bf16 %v7938_v26  ;;  %v7913_v34 = vunpack.c.h.bf16 %v7938_v26  ;;  %v8461_v62 = vld [vmem:[%s13018_s5 + $0x14] ss:$8 sps:$4 sm:$0xff]   ;;  %v8463_v4 = vld [vmem:[%s13018_s5 + $0x10] ss:$8 sps:$4 sm:$0xff]   ;;  %v9239_v7 = vld [vmem:[%s13016_s3 + $0x3] ss:$0 sm:$0xff] }
  0x1c   : > { %v7916_v38 = vunpack.c.l.bf16 %v7939_v30  ;;  %v7917_v41 = vunpack.c.h.bf16 %v7939_v30  ;;  %v9244_v8 = vld [vmem:[%s13016_s3 + $0x6] ss:$0 sm:$0xff] }
  0x1d   : > { %1370 = vmatpush1.bf16.msra.mxu0 %v8451_v23  ;;  %v568_v31 = vrot.slane %v7908_v24, 7  ;;  %v569_v36 = vrot.slane %v7909_v28, 7  ;;  %v571_v42 = vrot.slane %v7912_v29, 7  ;;  %v573_v46 = vrot.slane %v7913_v34, 7  ;;  %v8464_v19 = vld [vmem:[%s13018_s5 + $0x4] ss:$8 sps:$4 sm:$0xff]  }
  0x1e   : > { %1371 = vmatprep.subr.bf16.mxu0 %v8452_v25  ;;  %v575_v53 = vrot.slane %v7916_v38, 7  ;;  %v9203_v59 = vrot.slane %v7917_v41, 7  ;;  %v8466_v24 = vld [vmem:[%s13018_s5] ss:$8 sps:$4 sm:$0xff]   ;;  %v1862_v38 = vlaneseq }
  0x1f   : > { %643 = vperm.xlu0 %8441, %v597_v9   ;;  %781 = vperm.xlu1 %8442, %v7621_v10   ;;  %v592_v43 = vsel %vm13036_vm0, 0.0, %v568_v31  ;;  %v9186_v51 = vsel %vm13036_vm0, %v568_v31, %v569_v36  ;;  %v9201_v58 = vsel %vm13036_vm0, %v569_v36, %v571_v42  ;;  %v9220_v1 = vsel %vm13036_vm0, %v571_v42, %v573_v46 }
  0x20   : > { %v691_v55 = vmul.f32 %v9141_v32, %v592_v43  ;;  %v908_v56 = vmul.f32 %v9164_v44, %v592_v43  ;;  %v909_v57 = vmul.f32 %v9164_v44, %v9186_v51  ;;  %v9207_v61 = vmul.f32 %v9141_v32, %v9186_v51 }
  0x21   : > { %1372 = vmatpush1.bf16.msra.mxu0 %v8454_v27  ;;  %v9213_v63 = vmul.f32 %v9178_v49, %v592_v43  ;;  %v9217_v0 = vmul.f32 %v9183_v50, %v9186_v51  ;;  %v9224_v3 = vmul.f32 %v9164_v44, %v9201_v58  ;;  %v9230_v5 = vmul.f32 %v9152_v37, %v592_v43 }
  0x22   : > { %1373 = vmatprep.subr.bf16.mxu0 %v8455_v33  ;;  %v9234_v6 = vmul.f32 %v9152_v37, %v9186_v51  ;;  %v1067_v9 = vmul.f32 %v9194_v54, %v9186_v51  ;;  %v1068_v10 = vmul.f32 %v9194_v54, %v9201_v58  ;;  %v13035_v17 = vrot.slane %v9207_v61, 1 }
  0x23   : > { %785 = vperm.xlu0 %8441, %v7622_v11   ;;  %648 = vperm.xlu1 %8442, %v598_v12   ;;  %v9252_v11 = vmul.f32 %v9178_v49, %v9186_v51  ;;  %v710_v12 = vrot.slane %v691_v55, 1  ;;  %v9265_v18 = vmul.f32 %v9194_v54, %v9220_v1  ;;  %v9272_v20 = vmul.f32 %v9183_v50, %v9220_v1 }
  0x24   : > { %v9275_v21 = vmul.f32 %v9239_v7, %v592_v43  ;;  %v9279_v22 = vmul.f32 %v9244_v8, %v9186_v51  ;;  %v13034_v23 = vrot.slane %v9224_v3, 1  ;;  %v1085_v25 = vrot.slane %v1067_v9, 1 }
  0x25   : > { %1374 = vmatpush1.bf16.msra.mxu0 %v8457_v35  ;;  %v1086_v26 = vrot.slane %v1068_v10, 1  ;;  %v9286_v27 = vmul.f32 %v9157_v39, %v592_v43  ;;  %v9290_v28 = vmul.f32 %v9239_v7, %v9186_v51  ;;  %v9293_v29 = vsel %vm13037_vm1, %v709_v60, %v710_v12 }
  0x26   : > { %1375 = vmatprep.subr.bf16.mxu0 %v8458_v45  ;;  %v9300_v31 = vmul.f32 %v9244_v8, %v9201_v58  ;;  %v9303_v33 = vsel %vm13036_vm0, %v573_v46, %v575_v53  ;;  %v9308_v34 = vsel %vm13037_vm1, %v710_v12, %v13035_v17  ;;  %v13033_v35 = vrot.slane %v9265_v18, 1 }
  0x27   : > { %653 = vperm.xlu0 %8441, %v599_v13   ;;  %789 = vperm.xlu1 %8442, %v7623_v14   ;;  %v926_v13 = vrot.slane %v908_v56, 1  ;;  %v927_v14 = vrot.slane %v909_v57, 1  ;;  %13228 = vst [vmem:[#allocation6_spill] sm:$0xff] %v9290_v28  ;;  %v9313_v36 = vsel %vm13036_vm0, %v575_v53, %v9203_v59  ;;  %v9322_v41 = vmul.f32 %v9152_v37, %v9201_v58 }
  0x28   : > { %13230 = vst [vmem:[#allocation8_spill] sm:$0xff] %v9300_v31  ;;  %v9326_v42 = vmul.f32 %v9141_v32, %v9201_v58  ;;  %v9330_v43 = vmul.f32 %v9164_v44, %v9220_v1  ;;  %v9333_v45 = vsel %vm13037_vm1, %v1085_v25, %v1086_v26  ;;  %v9337_v46 = vmul.f32 %v9178_v49, %v9220_v1 }
  0x29   : > { %1376 = vmatpush1.bf16.msra.mxu0 %v8460_v47  ;;  %v9296_v30 = vsel %vm13037_vm1, %v926_v13, %v927_v14  ;;  %v9318_v40 = vsel %vm13037_vm1, %v927_v14, %v13034_v23  ;;  %13232 = vst [vmem:[#allocation10_spill] sm:$0xff] %v9322_v41  ;;  %13233 = vst [vmem:[#allocation11_spill] sm:$0xff] %v9333_v45  ;;  %v9341_v47 = vmul.f32 %v9183_v50, %v9303_v33 }
  0x2a   : > { %1377 = vmatprep.subr.bf16.mxu0 %v8461_v62  ;;  %13229 = vst [vmem:[#allocation7_spill] sm:$0xff] %v9296_v30  ;;  %13231 = vst [vmem:[#allocation9_spill] sm:$0xff] %v9318_v40  ;;  %v9345_v53 = vmul.f32 %v9152_v37, %v9220_v1  ;;  %v9349_v55 = vmul.f32 %v9178_v49, %v9303_v33  ;;  %v9353_v56 = vmul.f32 %v9183_v50, %v9313_v36 }
  0x2b   : > { %658 = vperm.xlu0 %8441, %v600_v15   ;;  %663 = vperm.xlu1 %8442, %v601_v16   ;;  %v9256_v15 = vmul.f32 %v9178_v49, %v9201_v58  ;;  %v9260_v16 = vmul.f32 %v9183_v50, %v9201_v58  ;;  %13234 = vst [vmem:[#allocation12_spill] sm:$0xff] %v9337_v46  ;;  %13235 = vst [vmem:[#allocation13_spill] sm:$0xff] %v9341_v47  ;;  %v9376_v10 = vshrl.u32 %v1862_v38, 7 }
  0x2c   : > { %13236 = vst [vmem:[#allocation14_spill] sm:$0xff] %v9345_v53  ;;  %13237 = vst [vmem:[#allocation15_spill] sm:$0xff] %v9349_v55  ;;  %v9357_v57 = vmul.f32 %v9157_v39, %v9186_v51  ;;  %v9361_v60 = vmul.f32 %v9141_v32, %v9220_v1  ;;  %v9366_v62 = vsel %vm13037_vm1, %v1086_v26, %v13033_v35  ;;  %v9395_v25 = vand.u32 127, %v1862_v38 }
  0x2d   : > { %1378 = vmatpush1.bf16.msra.mxu0 %v8463_v4  ;;  %13238 = vst [vmem:[#allocation16_spill] sm:$0xff] %v9353_v56  ;;  %13240 = vst [vmem:[#allocation18_spill] sm:$0xff] %v9366_v62  ;;  %v9370_v4 = vmul.f32 %v9239_v7, %v9201_v58  ;;  %v9374_v9 = vmul.f32 %v9244_v8, %v9220_v1  ;;  %v9382_v13 = vmul.f32 %v9157_v39, %v9201_v58 }
  0x2e   : > { %1379 = vmatprep.subr.bf16.mxu0 %v8464_v19  ;;  %13239 = vst [vmem:[#allocation17_spill] sm:$0xff] %v9357_v57  ;;  %13243 = vst [vmem:[#allocation21_spill] sm:$0xff] %v9376_v10  ;;  %v9386_v14 = vmul.f32 %v9239_v7, %v9220_v1  ;;  %v9390_v19 = vmul.f32 %v9194_v54, %v9303_v33  ;;  %v9398_v26 = vadd.s32 8, %v9376_v10  ;;  %v1891_v2 = vmul.u32 128, %v9376_v10 }
  0x2f   : > { %13241 = vst [vmem:[#allocation19_spill] sm:$0xff] %v9370_v4  ;;  %13242 = vst [vmem:[#allocation20_spill] sm:$0xff] %v9374_v9  ;;  %v9404_v35 = vmul.f32 %v9164_v44, %v9303_v33  ;;  %v9408_v23 = vmul.f32 %v9244_v8, %v9303_v33  ;;  %v7686_v12 = vadd.s32 4294967292, %v9376_v10  ;;  %v9412_v38 = vadd.s32 128, %v9395_v25 }
  0x30   : > { %13244 = vst [vmem:[#allocation22_spill] sm:$0xff] %v9382_v13  ;;  %13245 = vst [vmem:[#allocation23_spill] sm:$0xff] %v9386_v14  ;;  %v9415_v17 = vadd.s32 256, %v9395_v25  ;;  %v9418_v51 = vadd.s32 384, %v9395_v25  ;;  %v1892_v58 = vmul.u32 128, %v9398_v26  ;;  %v9424_v62 = vmul.f32 %v9152_v37, %v9303_v33 }
  0x31   : > { %1380 = vmatpush1.bf16.msra.mxu0 %v8466_v24  ;;  %v9393_v24 = vld [vmem:[%s9121_s28 + $0x18] sm:$0xff]   ;;  %13246 = vst [vmem:[#allocation24_spill] sm:$0xff] %v9408_v23  ;;  %v1893_v23 = vsub.s32 %v9395_v25, %v1891_v2  ;;  %v7687_v45 = vadd.s32 4294967292, %v9398_v26  ;;  %v1894_v13 = vsub.s32 %v9412_v38, %v1891_v2  ;;  %v7696_v47 = vadd.s32 4294967288, %v9376_v10 }
  0x32   : > { %13247 = vst [vmem:[#allocation25_spill] sm:$0xff] %v9424_v62  ;;  %v1895_v9 = vsub.s32 %v9415_v17, %v1891_v2  ;;  %v1896_v4 = vsub.s32 %v9418_v51, %v1891_v2  ;;  %v1897_v56 = vsub.s32 %v9395_v25, %v1892_v58  ;;  %v1898_v55 = vsub.s32 %v9412_v38, %v1892_v58 }
  0x33   : > { %v1899_v14 = vsub.s32 %v9415_v17, %v1892_v58  ;;  %v1900_v53 = vsub.s32 %v9418_v51, %v1892_v58  ;;  %vm1901_vm2 = vcmp.ge.s32.totalorder %v1893_v23, 0  ;;  %vm1902_vm3 = vcmp.ge.s32.totalorder %v1894_v13, 0 }
  0x34   : > { %vm1903_vm4 = vcmp.ge.s32.totalorder %v1895_v9, 0  ;;  %v1943_v62 = vmul.u32 128, %v7686_v12  ;;  %vm1904_vm5 = vcmp.ge.s32.totalorder %v1896_v4, 0  ;;  %vm1905_vm6 = vcmp.ge.s32.totalorder %v1897_v56, 0 }
  0x35   : > { %vm1909_vm8 = vcmp.lt.s32.totalorder %v1893_v23, 128  ;;  %vm1907_vm9 = vcmp.ge.s32.totalorder %v1899_v14, 0  ;;  %vm1910_vm10 = vcmp.lt.s32.totalorder %v1894_v13, 128  ;;  %vm1911_vm11 = vcmp.lt.s32.totalorder %v1895_v9, 128 }
  0x36   : > { %vm1912_vm12 = vcmp.lt.s32.totalorder %v1896_v4, 128  ;;  %vm9436_vm13 = vmand %vm1901_vm2, %vm1909_vm8  ;;  %v13248_v2 = vmov 0  ;;  %vm1913_vm14 = vcmp.lt.s32.totalorder %v1897_v56, 128  ;;  %vm1914_vm15 = vcmp.lt.s32.totalorder %v1898_v55, 128 }
  0x37   : > { %v13249_v2 = vsel %vm9436_vm13, 4294967295, %v13248_v2  ;;  %vm1915_vm0 = vcmp.lt.s32.totalorder %v1899_v14, 128  ;;  %vm9441_vm1 = vmand %vm1902_vm3, %vm1910_vm10  ;;  %v13251_v12 = vmov 0  ;;  %v1944_v58 = vmul.u32 128, %v7687_v45 }
  0x38   : > { %13250 = vst [vmem:[#allocation26_spill] sm:$0xff] %v13249_v2  ;;  %v13252_v12 = vsel %vm9441_vm1, 4294967295, %v13251_v12  ;;  %vm9446_vm7 = vmand %vm1903_vm4, %vm1911_vm11  ;;  %v13254_v23 = vmov 0  ;;  %v1945_v46 = vsub.s32 %v9395_v25, %v1943_v62  ;;  %v1946_v41 = vsub.s32 %v9412_v38, %v1943_v62 }
  0x39   : > { %13253 = vst [vmem:[#allocation27_spill] sm:$0xff] %v13252_v12  ;;  %v13255_v23 = vsel %vm9446_vm7, 4294967295, %v13254_v23  ;;  %v1947_v2 = vsub.s32 %v9415_v17, %v1943_v62  ;;  %v1948_v40 = vsub.s32 %v9418_v51, %v1943_v62  ;;  %vm9455_vm2 = vmand %vm1904_vm5, %vm1912_vm12  ;;  %v13257_v13 = vmov 0 }
  0x3a   : > { %13256 = vst [vmem:[#allocation28_spill] sm:$0xff] %v13255_v23  ;;  %v13258_v13 = vsel %vm9455_vm2, 4294967295, %v13257_v13  ;;  %v1949_v45 = vsub.s32 %v9395_v25, %v1944_v58  ;;  %v1950_v9 = vsub.s32 %v9412_v38, %v1944_v58  ;;  %v1951_v12 = vsub.s32 %v9415_v17, %v1944_v58  ;;  %vm9472_vm8 = vmand %vm1905_vm6, %vm1913_vm14 }
  0x3b   : > { %13259 = vst [vmem:[#allocation29_spill] sm:$0xff] %v13258_v13  ;;  %v1952_v23 = vsub.s32 %v9418_v51, %v1944_v58  ;;  %v13260_v30 = vrot.slane %v9326_v42, 1  ;;  %v13261_v31 = vrot.slane %v9207_v61, 1  ;;  %vm13262_vm3 = vcmask 1046528   ;;  %vm9494_vm14 = vmand %vm1907_vm9, %vm1915_vm0 }
  0x3c   : > { %vm1908_vm4 = vcmp.ge.s32.totalorder %v1900_v53, 0  ;;  %vm1916_vm5 = vcmp.lt.s32.totalorder %v1900_v53, 128  ;;  %v13263_v62 = vmov 0  ;;  %v1994_v4 = vmul.u32 128, %v7696_v47  ;;  %vm13268_vm10 = vmmov %vm13262_vm3 }
  0x3d   : > { %v9468_v57 = vsel %vm13262_vm3, %v13261_v31, %v13260_v30  ;;  %v13264_v62 = vsel %vm9472_vm8, 4294967295, %v13263_v62  ;;  %v13266_v13 = vrot.slane %v9330_v43, 1  ;;  %v13267_v58 = vrot.slane %v9224_v3, 1  ;;  %vm9498_vm13 = vmand %vm1908_vm4, %vm1916_vm5 }
  0x3e   : > { %13265 = vst [vmem:[#allocation30_spill] sm:$0xff] %v13264_v62  ;;  %vm13269_vm11 = vcmp.ge.s32.totalorder %v1898_v55, 0  ;;  %v13270_v30 = vmov 0  ;;  %vm1953_vm6 = vcmp.ge.s32.totalorder %v1945_v46, 0  ;;  %v7701_v31 = vadd.s32 4294967284, %v9376_v10 }
  0x3f   : > { %v9481_v28 = vsel %vm13268_vm10, %v13267_v58, %v13266_v13  ;;  %vm9486_vm12 = vmand %vm13269_vm11, %vm1914_vm15  ;;  %v13273_v3 = vmov 0  ;;  %vm1954_vm3 = vcmp.ge.s32.totalorder %v1946_v41, 0  ;;  %vm1961_vm10 = vcmp.lt.s32.totalorder %v1945_v46, 128 }
  0x40   : > { %v13271_v30 = vsel %vm9486_vm12, 4294967295, %v13270_v30  ;;  %v13274_v3 = vsel %vm9494_vm14, 4294967295, %v13273_v3  ;;  %vm1962_vm7 = vcmp.lt.s32.totalorder %v1946_v41, 128  ;;  %v13276_v53 = vmov 0  ;;  %vm9502_vm8 = vmand %vm1953_vm6, %vm1961_vm10 }
  0x41   : > { %13272 = vst [vmem:[#allocation31_spill] sm:$0xff] %v13271_v30  ;;  %13275 = vst [vmem:[#allocation32_spill] sm:$0xff] %v13274_v3  ;;  %v13277_v53 = vsel %vm9498_vm13, 4294967295, %v13276_v53  ;;  %vm1955_vm15 = vcmp.ge.s32.totalorder %v1947_v2, 0  ;;  %vm1963_vm2 = vcmp.lt.s32.totalorder %v1947_v2, 128  ;;  %v13279_v55 = vmov 0 }
  0x42   : > { %13278 = vst [vmem:[#allocation33_spill] sm:$0xff] %v13277_v53  ;;  %v13280_v55 = vsel %vm9502_vm8, 4294967295, %v13279_v55  ;;  %v1995_v56 = vsub.s32 %v9395_v25, %v1994_v4  ;;  %v1996_v14 = vsub.s32 %v9412_v38, %v1994_v4  ;;  %v1997_v13 = vsub.s32 %v9415_v17, %v1994_v4  ;;  %vm9511_vm4 = vmand %vm1954_vm3, %vm1962_vm7 }
  0x43   : > { %13281 = vst [vmem:[#allocation34_spill] sm:$0xff] %v13280_v55  ;;  %v1998_v46 = vsub.s32 %v9418_v51, %v1994_v4  ;;  %vm1965_vm9 = vcmp.lt.s32.totalorder %v1949_v45, 128  ;;  %v13282_v58 = vmov 0  ;;  %v7702_v47 = vadd.s32 4294967284, %v9398_v26  ;;  %vm9519_vm11 = vmand %vm1955_vm15, %vm1963_vm2 }
  0x44   : > { %v13283_v58 = vsel %vm9511_vm4, 4294967295, %v13282_v58  ;;  %v2021_v61 = vmul.u32 128, %v7701_v31  ;;  %v7921_v55 = vunpack.c.h.bf16 %v9393_v24  ;;  %vm1958_vm5 = vcmp.ge.s32.totalorder %v1950_v9, 0 }
  0x45   : > { %13284 = vst [vmem:[#allocation35_spill] sm:$0xff] %v13283_v58  ;;  %vm1959_vm6 = vcmp.ge.s32.totalorder %v1951_v12, 0  ;;  %vm1966_vm10 = vcmp.lt.s32.totalorder %v1950_v9, 128  ;;  %v13285_v3 = vmov 0  ;;  %vm1960_vm0 = vcmp.ge.s32.totalorder %v1952_v23, 0 }
  0x46   : > { %v13286_v3 = vsel %vm9519_vm11, 4294967295, %v13285_v3  ;;  %vm1967_vm1 = vcmp.lt.s32.totalorder %v1951_v12, 128  ;;  %vm1968_vm7 = vcmp.lt.s32.totalorder %v1952_v23, 128  ;;  %vm13288_vm3 = vcmp.lt.s32.totalorder %v1948_v40, 128  ;;  %vm9537_vm2 = vmand %vm1958_vm5, %vm1966_vm10  ;;  %v1469_v23 = vld [vmem:[%s13019_s6 + $0x78] sm:$0xff] }
  0x47   : > { %13287 = vst [vmem:[#allocation36_spill] sm:$0xff] %v13286_v3  ;;  %vm13289_vm8 = vcmp.ge.s32.totalorder %v1948_v40, 0  ;;  %v13290_v41 = vmov 0  ;;  %vm1999_vm14 = vcmp.ge.s32.totalorder %v1995_v56, 0  ;;  %vm13293_vm13 = vcmp.ge.s32.totalorder %v1949_v45, 0  ;;  %8009 = vmatprep.subr.mxu1 %v1469_v23 }
  0x48   : > { %vm9525_vm4 = vmand %vm13289_vm8, %vm13288_vm3  ;;  %v13294_v26 = vmov 0  ;;  %v2022_v2 = vmul.u32 128, %v7702_v47  ;;  %v2023_v9 = vsub.s32 %v9395_v25, %v2021_v61  ;;  %v2024_v4 = vsub.s32 %v9412_v38, %v2021_v61  ;;  %8010 = vmatpush3.msra.mxu1 %v1469_v23 }
  0x49   : > { %v13291_v41 = vsel %vm9525_vm4, 4294967295, %v13290_v41  ;;  %vm9530_vm12 = vmand %vm13293_vm13, %vm1965_vm9  ;;  %v2025_v31 = vsub.s32 %v9415_v17, %v2021_v61  ;;  %v13297_v3 = vmov 0  ;;  %vm2003_vm15 = vcmp.lt.s32.totalorder %v1995_v56, 128 }
  0x4a   : > { %13292 = vst [vmem:[#allocation37_spill] sm:$0xff] %v13291_v41  ;;  %v13295_v26 = vsel %vm9530_vm12, 4294967295, %v13294_v26  ;;  %v13298_v3 = vsel %vm9537_vm2, 4294967295, %v13297_v3  ;;  %vm2004_vm3 = vcmp.lt.s32.totalorder %v1996_v14, 128  ;;  %v9542_v40 = vsub.s32 %v9418_v51, %v2021_v61  ;;  %vm9545_vm13 = vmand %vm1959_vm6, %vm1967_vm1 }
  0x4b   : > { %13296 = vst [vmem:[#allocation38_spill] sm:$0xff] %v13295_v26  ;;  %13299 = vst [vmem:[#allocation39_spill] sm:$0xff] %v13298_v3  ;;  %v13300_v45 = vmov 0  ;;  %v9550_v47 = vsub.s32 %v9395_v25, %v2022_v2  ;;  %v9553_v41 = vsub.s32 %v9412_v38, %v2022_v2  ;;  %v9556_v58 = vsub.s32 %v9415_v17, %v2022_v2 }
  0x4c   : > { %v13301_v45 = vsel %vm9545_vm13, 4294967295, %v13300_v45  ;;  %v9559_v26 = vsub.s32 %v9418_v51, %v2022_v2  ;;  %v13303_v61 = vrot.slane %v9361_v60, 1  ;;  %v13304_v12 = vrot.slane %v9326_v42, 1  ;;  %vm9572_vm9 = vmand %vm1960_vm0, %vm1968_vm7 }
  0x4d   : > { %13302 = vst [vmem:[#allocation40_spill] sm:$0xff] %v13301_v45  ;;  %vm13305_vm1 = vcmask 1046528   ;;  %v13306_v45 = vunpack.c.l.bf16 %v9393_v24  ;;  %v13307_v38 = vmov 0  ;;  %vm2001_vm5 = vcmp.ge.s32.totalorder %v1997_v13, 0  ;;  %vm9589_vm0 = vmand %vm1999_vm14, %vm2003_vm15 }
  0x4e   : > { %v9566_v3 = vsel %vm13305_vm1, %v13304_v12, %v13303_v61  ;;  %v13308_v38 = vsel %vm9572_vm9, 4294967295, %v13307_v38  ;;  %vm2005_vm6 = vcmp.lt.s32.totalorder %v1997_v13, 128  ;;  %v13310_v17 = vrot.slane %v9390_v19, 1  ;;  %vm13312_vm10 = vmmov %vm13305_vm1 }
  0x4f   : > { %v579_v25 = vrot.slane %v13306_v45, 7  ;;  %13309 = vst [vmem:[#allocation41_spill] sm:$0xff] %v13308_v38  ;;  %v13311_v51 = vrot.slane %v9265_v18, 1  ;;  %v9585_v2 = vmul.f32 %v9178_v49, %v9313_v36  ;;  %vm2006_vm8 = vcmp.lt.s32.totalorder %v1998_v46, 128  ;;  %v1468_v18 = vld [vmem:[%s13019_s6 + $0x70] sm:$0xff]  ;;  %vm13318_vm7 = vmmov %vm13305_vm1 }
  0x50   : > { %v13313_v24 = vmov 0  ;;  %v13316_v45 = vrot.slane %v9404_v35, 1  ;;  %v13317_v61 = vrot.slane %v9330_v43, 1  ;;  %v9608_v56 = vmul.f32 %v9194_v54, %v9313_v36  ;;  %v9619_v43 = vld [vmem:[%s13019_s6 + $0xf8] sm:$0xff]  ;;  %8011 = vmatprep.subr.mxu1 %v1468_v18 }
  0x51   : > { %v9581_v42 = vsel %vm13312_vm10, %v13311_v51, %v13310_v17  ;;  %v13314_v24 = vsel %vm9589_vm0, 4294967295, %v13313_v24  ;;  %vm13319_vm14 = vcmp.ge.s32.totalorder %v1996_v14, 0  ;;  %v13320_v17 = vmov 0  ;;  %13323 = vst [vmem:[#allocation44_spill] sm:$0xff] %v9619_v43  ;;  %8053 = vmatprep.subr.mxu0 %v9619_v43  ;;  %8012 = vmatpush3.msra.mxu1 %v1468_v18 }
  0x52   : > { %13315 = vst [vmem:[#allocation42_spill] sm:$0xff] %v13314_v24  ;;  %v9604_v12 = vsel %vm13318_vm7, %v13317_v61, %v13316_v45  ;;  %vm9612_vm15 = vmand %vm13319_vm14, %vm2004_vm3  ;;  %v9621_v51 = vrot.slane %v7921_v55, 7  ;;  %v9625_v45 = vmul.f32 %v9141_v32, %v9303_v33  ;;  %v13324_v14 = vmov 0  ;;  %v1467_v55 = vld [vmem:[%s13019_s6 + $0x68] sm:$0xff] }
  0x53   : > { %v13321_v17 = vsel %vm9612_vm15, 4294967295, %v13320_v17  ;;  %vm9629_vm3 = vmand %vm2001_vm5, %vm2005_vm6  ;;  %v9639_v61 = vmul.f32 %v9152_v37, %v9313_v36  ;;  %v9643_v13 = vmul.f32 %v9164_v44, %v9313_v36  ;;  %vm13327_vm5 = vcmp.ge.s32.totalorder %v1998_v46, 0  ;;  %8013 = vmatprep.subr.mxu1 %v1467_v55 }
  0x54   : > { %13322 = vst [vmem:[#allocation43_spill] sm:$0xff] %v13321_v17  ;;  %v13325_v14 = vsel %vm9629_vm3, 4294967295, %v13324_v14  ;;  %vm9647_vm6 = vmand %vm13327_vm5, %vm2006_vm8  ;;  %vm13331_vm10 = vcmask 1040384   ;;  %v9657_v24 = vmul.f32 %v9157_v39, %v9220_v1  ;;  %vm13332_vm0 = vcmp.lt.s32.totalorder %v2023_v9, 128  ;;  %8014 = vmatpush3.msra.mxu1 %v1467_v55 }
  0x55   : > { %13326 = vst [vmem:[#allocation45_spill] sm:$0xff] %v13325_v14  ;;  %v13328_v14 = vmov 0  ;;  %v9653_v23 = vsel %vm13331_vm10, %v9203_v59, %v579_v25  ;;  %vm13333_vm8 = vcmp.ge.s32.totalorder %v2023_v9, 0  ;;  %v13334_v46 = vmov 0  ;;  %v1466_v59 = vld [vmem:[%s13019_s6 + $0x60] sm:$0xff]  ;;  %vm13342_vm7 = vmmov %vm13331_vm10 }
  0x56   : > { %v13329_v14 = vsel %vm9647_vm6, 4294967295, %v13328_v14  ;;  %vm9663_vm5 = vmand %vm13333_vm8, %vm13332_vm0  ;;  %v9673_v1 = vmul.f32 %v9141_v32, %v9313_v36  ;;  %vm13337_vm3 = vcmp.lt.s32.totalorder %v2024_v4, 128  ;;  %vm13338_vm0 = vcmp.ge.s32.totalorder %v2024_v4, 0  ;;  %v1465_v4 = vld [vmem:[%s13019_s6 + $0x58] sm:$0xff]  ;;  %8015 = vmatprep.subr.mxu1 %v1466_v59 }
  0x57   : > { %13330 = vst [vmem:[#allocation46_spill] sm:$0xff] %v13329_v14  ;;  %v13335_v46 = vsel %vm9663_vm5, 4294967295, %v13334_v46  ;;  %vm9679_vm8 = vmand %vm13338_vm0, %vm13337_vm3  ;;  %v13339_v9 = vmov 0  ;;  %v9685_v18 = vsel %vm13342_vm7, %v579_v25, %v9621_v51  ;;  %v718_v14 = vrot.slane %v9625_v45, 1  ;;  %8016 = vmatpush3.msra.mxu1 %v1466_v59 }
  0x58   : > { %13336 = vst [vmem:[#allocation47_spill] sm:$0xff] %v13335_v46  ;;  %v13340_v9 = vsel %vm9679_vm8, 4294967295, %v13339_v9  ;;  %vm2044_vm5 = vcmp.lt.s32.totalorder %v9553_v41, 128  ;;  %vm13343_vm10 = vcmp.lt.s32.totalorder %v2025_v31, 128  ;;  %vm13344_vm6 = vcmp.ge.s32.totalorder %v2025_v31, 0  ;;  %8017 = vmatprep.subr.mxu1 %v1465_v4 }
  0x59   : > { %13341 = vst [vmem:[#allocation48_spill] sm:$0xff] %v13340_v9  ;;  %vm9692_vm1 = vmand %vm13344_vm6, %vm13343_vm10  ;;  %v13345_v46 = vmov 0  ;;  %v935_v25 = vrot.slane %v9643_v13, 1  ;;  %v9702_v45 = vmul.f32 %v9164_v44, %v9653_v23  ;;  %vm13348_vm6 = vcmp.lt.s32.totalorder %v9542_v40, 128  ;;  %8018 = vmatpush3.msra.mxu1 %v1465_v4 }
  0x5a   : > { %v13346_v46 = vsel %vm9692_vm1, 4294967295, %v13345_v46  ;;  %vm13349_vm10 = vcmp.ge.s32.totalorder %v9542_v40, 0  ;;  %v13350_v31 = vmov 0  ;;  %v9716_v55 = vmul.f32 %v9183_v50, %v9653_v23 }
  0x5b   : > { %13347 = vst [vmem:[#allocation49_spill] sm:$0xff] %v13346_v46  ;;  %vm9710_vm0 = vmand %vm13349_vm10, %vm13348_vm6  ;;  %v9720_v13 = vmul.f32 %v9178_v49, %v9653_v23  ;;  %vm13353_vm14 = vcmp.lt.s32.totalorder %v9550_v47, 128  ;;  %vm13354_vm6 = vcmp.ge.s32.totalorder %v9550_v47, 0  ;;  %v13355_v40 = vmov 0  ;;  %v1464_v46 = vld [vmem:[%s13019_s6 + $0x50] sm:$0xff] }
  0x5c   : > { %v13351_v31 = vsel %vm9710_vm0, 4294967295, %v13350_v31  ;;  %vm9728_vm10 = vmand %vm13354_vm6, %vm13353_vm14  ;;  %v9741_v9 = vmul.f32 %v9239_v7, %v9303_v33  ;;  %v9745_v47 = vmul.f32 %v9244_v8, %v9313_v36  ;;  %vm13358_vm14 = vcmp.ge.s32.totalorder %v9553_v41, 0  ;;  %8019 = vmatprep.subr.mxu1 %v1464_v46 }
  0x5d   : > { %13352 = vst [vmem:[#allocation50_spill] sm:$0xff] %v13351_v31  ;;  %v13356_v40 = vsel %vm9728_vm10, 4294967295, %v13355_v40  ;;  %v9737_v31 = vmul.f32 %v9183_v50, %v9685_v18  ;;  %vm9752_vm6 = vmand %vm13358_vm14, %vm2044_vm5  ;;  %v13359_v59 = vmov 0  ;;  %v13363_v38 = vrot.slane %v9390_v19, 1  ;;  %8020 = vmatpush3.msra.mxu1 %v1464_v46 }
  0x5e   : > { %13357 = vst [vmem:[#allocation51_spill] sm:$0xff] %v13356_v40  ;;  %v13360_v59 = vsel %vm9752_vm6, 4294967295, %v13359_v59  ;;  %v13362_v40 = vrot.slane %v9608_v56, 1  ;;  %vm13364_vm3 = vcmask 1046528   ;;  %v13366_v53 = vrot.slane %v9361_v60, 1  ;;  %v1463_v60 = vld [vmem:[%s13019_s6 + $0x48] sm:$0xff] }
  0x5f   : > { %13361 = vst [vmem:[#allocation52_spill] sm:$0xff] %v13360_v59  ;;  %vm13367_vm7 = vmmov %vm13364_vm3  ;;  %v9770_v41 = vmul.f32 %v9157_v39, %v9303_v33  ;;  %v9774_v59 = vmul.f32 %v9239_v7, %v9313_v36  ;;  %vm13368_vm5 = vcmp.lt.s32.totalorder %v9556_v58, 128  ;;  %vm13369_vm14 = vcmp.ge.s32.totalorder %v9556_v58, 0  ;;  %8021 = vmatprep.subr.mxu1 %v1463_v60 }
  0x60   : > { %v9761_v62 = vsel %vm13364_vm3, %v13363_v38, %v13362_v40  ;;  %v9766_v17 = vsel %vm13367_vm7, %v13366_v53, %v718_v14  ;;  %vm9780_vm1 = vmand %vm13369_vm14, %vm13368_vm5  ;;  %v13370_v19 = vmov 0  ;;  %v13373_v33 = vrot.slane %v9404_v35, 1  ;;  %8022 = vmatpush3.msra.mxu1 %v1463_v60 }
  0x61   : > { %13365 = vst [vmem:[#allocation53_spill] sm:$0xff] %v9761_v62  ;;  %v13371_v19 = vsel %vm9780_vm1, 4294967295, %v13370_v19  ;;  %v9794_v38 = vmul.f32 %v9194_v54, %v9653_v23  ;;  %v9799_v40 = vmul.f32 %v9244_v8, %v9653_v23  ;;  %vm13375_vm7 = vcmp.lt.s32.totalorder %v9559_v26, 128 }
  0x62   : > { %13372 = vst [vmem:[#allocation54_spill] sm:$0xff] %v13371_v19  ;;  %v9790_v53 = vsel %vm13364_vm3, %v13373_v33, %v935_v25  ;;  %vm13376_vm5 = vcmp.ge.s32.totalorder %v9559_v26, 0  ;;  %v13377_v4 = vmov 0  ;;  %v9810_v35 = vmul.f32 0.0, %v9183_v50  ;;  %v1462_v26 = vld [vmem:[%s13019_s6 + $0x40] sm:$0xff] }
  0x63   : > { %13374 = vst [vmem:[#allocation55_spill] sm:$0xff] %v9790_v53  ;;  %vm9805_vm14 = vmand %vm13376_vm5, %vm13375_vm7  ;;  %vm13381_vm0 = vcmask 1040384   ;;  %v697_v58 = vmul.f32 %v9141_v32, %v9653_v23  ;;  %v698_v19 = vmul.f32 %v9141_v32, %v9685_v18  ;;  %v1073_v43 = vmul.f32 %v9194_v54, %v9685_v18  ;;  %8023 = vmatprep.subr.mxu1 %v1462_v26 }
  0x64   : > { %v13378_v4 = vsel %vm9805_vm14, 4294967295, %v13377_v4  ;;  %13380 = vst [vmem:[#allocation57_spill] sm:$0xff] %v9810_v35  ;;  %v593_v33 = vsel %vm13381_vm0, %v9621_v51, 0.0  ;;  %vm13383_vm7 = vmmov %vm13364_vm3  ;;  %v9830_v51 = vmul.f32 %v9152_v37, %v9653_v23  ;;  %v915_v32 = vmul.f32 %v9164_v44, %v9685_v18  ;;  %v1461_v35 = vld [vmem:[%s13019_s6 + $0x38] sm:$0xff]  ;;  %8024 = vmatpush3.msra.mxu1 %v1462_v26 }
  0x65   : > { %13379 = vst [vmem:[#allocation56_spill] sm:$0xff] %v13378_v4  ;;  %v13382_v4 = vrot.slane %v9673_v1, 1  ;;  %v9836_v46 = vmul.f32 %v9152_v37, %v9685_v18  ;;  %v1074_v10 = vmul.f32 %v9194_v54, %v593_v33  ;;  %v13386_v53 = vrot.slane %v9702_v45, 1  ;;  %vm13387_vm0 = vmmov %vm13364_vm3  ;;  %8025 = vmatprep.subr.mxu1 %v1461_v35 }
  0x66   : > { %13384 = vst [vmem:[#allocation58_spill] sm:$0xff] %v9830_v51  ;;  %v1094_v51 = vrot.slane %v9794_v38, 1  ;;  %v9852_v37 = vmul.f32 %v9178_v49, %v9685_v18  ;;  %v9864_v38 = vmul.f32 %v9157_v39, %v9313_v36  ;;  %v9875_v36 = vmul.f32 %v9244_v8, %v9685_v18  ;;  %8026 = vmatpush3.msra.mxu1 %v1461_v35  ;;  %vm13397_vm5 = vmmov %vm13387_vm0 }
  0x67   : > { %v9824_v30 = vsel %vm13383_vm7, %v718_v14, %v13382_v4  ;;  %13385 = vst [vmem:[#allocation59_spill] sm:$0xff] %v9836_v46  ;;  %v1075_v14 = vmul.f32 0.0, %v9194_v54  ;;  %v916_v4 = vmul.f32 %v9164_v44, %v593_v33  ;;  %v9848_v62 = vsel %vm13387_vm0, %v935_v25, %v13386_v53  ;;  %vm13395_vm7 = vmmov %vm13387_vm0 }
  0x68   : > { %13388 = vst [vmem:[#allocation60_spill] sm:$0xff] %v9848_v62  ;;  %13389 = vst [vmem:[#allocation61_spill] sm:$0xff] %v9852_v37  ;;  %v9855_v54 = vmul.f32 %v9178_v49, %v593_v33  ;;  %v9860_v46 = vmul.f32 %v9183_v50, %v593_v33  ;;  %v722_v25 = vrot.slane %v697_v58, 1  ;;  %v724_v53 = vrot.slane %v698_v19, 1  ;;  %v1460_v37 = vld [vmem:[%s13019_s6 + $0x30] sm:$0xff] }
  0x69   : > { %v9871_v62 = vmul.f32 %v9239_v7, %v9653_v23  ;;  %v939_v50 = vrot.slane %v915_v32, 1  ;;  %13393 = vst [vmem:[#allocation65_spill] sm:$0xff] %v9875_v36  ;;  %v1098_v58 = vrot.slane %v1074_v10, 1  ;;  %v1100_v19 = vrot.slane %v1075_v14, 1  ;;  %8027 = vmatprep.subr.mxu1 %v1460_v37  ;;  %vm13402_vm3 = vmmov %vm13387_vm0 }
  0x6a   : > { %13390 = vst [vmem:[#allocation62_spill] sm:$0xff] %v9855_v54  ;;  %13391 = vst [vmem:[#allocation63_spill] sm:$0xff] %v9860_v46  ;;  %v1096_v54 = vrot.slane %v1073_v43, 1  ;;  %v941_v26 = vrot.slane %v916_v4, 1  ;;  %v9889_v36 = vmul.f32 %v9157_v39, %v9653_v23  ;;  %v13396_v14 = vrot.slane %v9673_v1, 1  ;;  %8028 = vmatpush3.msra.mxu1 %v1460_v37  ;;  %v1458_v39 = vld [vmem:[%s13019_s6 + $0x20] sm:$0xff] }
  0x6b   : > { %13392 = vst [vmem:[#allocation64_spill] sm:$0xff] %v9871_v62  ;;  %v13394_v62 = vrot.slane %v9608_v56, 1  ;;  %v9897_v43 = vsel %vm13397_vm5, %v722_v25, %v724_v53  ;;  %vm13400_vm5 = vmmov %vm13387_vm0 }
  0x6c   : > { %v9894_v4 = vsel %vm13387_vm0, %v13396_v14, %v722_v25  ;;  %v13399_v25 = vrot.slane %v9702_v45, 1  ;;  %vm13403_vm8 = vmmov %vm13387_vm0  ;;  %v1457_v45 = vld [vmem:[%s13019_s6 + $0x18] sm:$0xff] }
  0x6d   : > { %v9885_v32 = vsel %vm13395_vm7, %v13394_v62, %v1094_v51  ;;  %v9904_v62 = vmul.f32 %v9244_v8, %v593_v33  ;;  %vm13398_vm7 = vmmov %vm13387_vm0  ;;  %v9920_v8 = vsel %vm13387_vm0, %v1096_v54, %v1098_v58 }
  0x6e   : > { %v9911_v1 = vsel %vm13398_vm7, %v1094_v51, %v1096_v54  ;;  %v9916_v53 = vsel %vm13400_vm5, %v13399_v25, %v939_v50  ;;  %13401 = vst [vmem:[#allocation66_spill] sm:$0xff] %v9920_v8  ;;  %vm13405_vm7 = vcmask 1041408  }
  0x6f   : > { %vm13407_vm5 = vmmov %vm13405_vm7 }
  0x8a   : > { %v9857_v44 = vpop.permute.xlu1 %769  ;;  %v762_v60 = vpop.permute.xlu0 %761 }
  0x8b   : > { %v792_v49 = vrot.slane %v762_v60, 6  ;;  %v1459_v60 = vld [vmem:[%s13019_s6 + $0x28] sm:$0xff]  ;;  %v13406_v37 = vrot.slane %v9857_v44, 6 }
  0x8c   : > { %8029 = vmatprep.subr.mxu1 %v1459_v60 }
  0x8d   : > { %v816_v46 = vmul.f32 %v792_v49, %v9173_v48  ;;  %v9901_v48 = vmul.f32 %v9239_v7, %v9685_v18  ;;  %v976_v56 = vmul.f32 %v9213_v63, %v792_v49  ;;  %v1135_v7 = vmul.f32 %v9217_v0, %v792_v49  ;;  %8030 = vmatpush3.msra.mxu1 %v1459_v60 }
  0x8e   : > { %v766_v10 = vpop.permute.xlu0 %765  ;;  %v629_v35 = vpop.permute.xlu1 %628  ;;  %v9923_v18 = vsel %vm13402_vm3, %v939_v50, %v941_v26  ;;  %v9926_v63 = vsel %vm13403_vm8, %v1098_v58, %v1100_v19  ;;  %8031 = vmatprep.subr.mxu1 %v1458_v39  ;;  %vm13408_vm8 = vcmask 1045504  }
  0x8f   : > { %v793_v23 = vrot.slane %v766_v10, 6  ;;  %13404 = vst [vmem:[#allocation67_spill] sm:$0xff] %v9926_v63  ;;  %v835_v33 = vrot.slane %v816_v46, 2  ;;  %v666_v54 = vmul.f32 %v629_v35, %v9189_v52  ;;  %8032 = vmatpush3.msra.mxu1 %v1458_v39  ;;  %v994_v10 = vrot.slane %v976_v56, 2  ;;  %vm13409_vm3 = vmmov %vm13408_vm8  ;;  %v13427_v63 = vld [vmem:[#allocation19_spill] sm:$0xff] }
  0x90   : > { %8033 = vmatprep.subr.mxu1 %v1457_v45  ;;  %vm13411_vm0 = vmmov %vm13409_vm3 }
  0x91   : > { %v794_v51 = vsel %vm13405_vm7, %v792_v49, %v793_v23  ;;  %v796_v0 = vsel %vm13407_vm5, %v793_v23, %v13406_v37  ;;  %v1456_v49 = vld [vmem:[%s13019_s6 + $0x10] sm:$0xff]  ;;  %8034 = vmatpush3.msra.mxu1 %v1457_v45  ;;  %v734_v37 = vadd.f32 %v9293_v29, %v666_v54  ;;  %v13410_v29 = vld [vmem:[#allocation6_spill] sm:$0xff]  ;;  %vm13413_vm7 = vmmov %vm13411_vm0 }
  0x92   : > { %v817_v50 = vmul.f32 %v794_v51, %v9230_v5  ;;  %v9938_v58 = vmul.f32 %v796_v0, %v9234_v6  ;;  %v977_v19 = vmul.f32 %v9252_v11, %v794_v51  ;;  %v9942_v26 = vmul.f32 %v9256_v15, %v796_v0  ;;  %v634_v46 = vpop.permute.xlu0 %633  ;;  %v774_v60 = vpop.permute.xlu1 %773  ;;  %8035 = vmatprep.subr.mxu1 %v1456_v49  ;;  %vm13414_vm5 = vmmov %vm13411_vm0 }
  0x93   : > { %v1136_v52 = vmul.f32 %v9260_v16, %v794_v51  ;;  %v9949_v5 = vmul.f32 %v9272_v20, %v796_v0  ;;  %v667_v6 = vmul.f32 %v634_v46, %v9286_v27  ;;  %v1153_v11 = vrot.slane %v1135_v7, 2  ;;  %8036 = vmatpush3.msra.mxu1 %v1456_v49  ;;  %v13415_v49 = vld [vmem:[#allocation8_spill] sm:$0xff] }
  0x94   : > { %v836_v14 = vrot.slane %v817_v50, 2  ;;  %v838_v15 = vrot.slane %v9938_v58, 2  ;;  %v995_v23 = vrot.slane %v977_v19, 2  ;;  %v997_v39 = vrot.slane %v9942_v26, 2 }
  0x95   : > { %v1154_v25 = vrot.slane %v1136_v52, 2  ;;  %v735_v56 = vadd.f32 %v9308_v34, %v667_v6  ;;  %v884_v20 = vmul.f32 %v9275_v21, %v629_v35  ;;  %v1043_v27 = vmul.f32 %v9279_v22, %v629_v35  ;;  %v13412_v21 = vld [vmem:[#allocation17_spill] sm:$0xff] }
  0x96   : > { %v837_v16 = vsel %vm13408_vm8, %v835_v33, %v836_v14  ;;  %v839_v7 = vsel %vm13409_vm3, %v836_v14, %v838_v15  ;;  %v9960_v51 = vpop.permute.xlu0 %777  ;;  %v639_v0 = vpop.permute.xlu1 %638  ;;  %v1156_v45 = vrot.slane %v9949_v5, 2  ;;  %v885_v54 = vmul.f32 %v13410_v29, %v634_v46 }
  0x97   : > { %v860_v50 = vadd.f32 %v837_v16, %v734_v37  ;;  %v861_v58 = vadd.f32 %v839_v7, %v735_v56  ;;  %v996_v34 = vsel %vm13411_vm0, %v994_v10, %v995_v23  ;;  %v797_v19 = vrot.slane %v774_v60, 6  ;;  %v13419_v16 = vld [vmem:[#allocation7_spill] sm:$0xff] }
  0x98   : > { %v799_v33 = vrot.slane %v9960_v51, 6  ;;  %v668_v26 = vmul.f32 %v639_v0, %v13412_v21  ;;  %v1155_v35 = vsel %vm13413_vm7, %v1153_v11, %v1154_v25  ;;  %v998_v6 = vsel %vm13414_vm5, %v995_v23, %v997_v39  ;;  %v13420_v51 = vld [vmem:[#allocation9_spill] sm:$0xff]  ;;  %v13424_v21 = vld [vmem:[#allocation14_spill] sm:$0xff]  ;;  %vm13428_vm7 = vmmov %vm13411_vm0 }
  0x99   : > { %v892_v22 = vadd.f32 %v884_v20, %v860_v50  ;;  %v893_v52 = vadd.f32 %v885_v54, %v861_v58  ;;  %v1044_v14 = vmul.f32 %v13415_v49, %v634_v46  ;;  %v13416_v5 = vrot.slane %v9857_v44, 6  ;;  %v13421_v50 = vld [vmem:[#allocation10_spill] sm:$0xff]  ;;  %v13422_v58 = vld [vmem:[#allocation12_spill] sm:$0xff]  ;;  %v13423_v54 = vld [vmem:[#allocation13_spill] sm:$0xff] }
  0x9a   : > { %vm13417_vm8 = vcmask 1041408   ;;  %v736_v60 = vadd.f32 %v9468_v57, %v668_v26  ;;  %v644_v10 = vpop.permute.xlu0 %643  ;;  %v782_v23 = vpop.permute.xlu1 %781  ;;  %v13425_v49 = vld [vmem:[#allocation15_spill] sm:$0xff]  ;;  %vm13432_vm5 = vmmov %vm13411_vm0 }
  0x9b   : > { %v798_v37 = vsel %vm13417_vm8, %v13416_v5, %v797_v19  ;;  %vm13418_vm3 = vmmov %vm13417_vm8  ;;  %v951_v7 = vadd.f32 %v13419_v16, %v892_v22  ;;  %v952_v20 = vadd.f32 %v13420_v51, %v893_v52  ;;  %v1157_v51 = vsel %vm13411_vm0, %v1154_v25, %v1156_v45 }
  0x9c   : > { %v800_v56 = vsel %vm13418_vm3, %v797_v19, %v799_v33  ;;  %v819_v11 = vmul.f32 %v798_v37, %v13421_v50  ;;  %v979_v29 = vmul.f32 %v13422_v58, %v798_v37  ;;  %v1138_v46 = vmul.f32 %v13423_v54, %v798_v37  ;;  %v13426_v19 = vld [vmem:[#allocation16_spill] sm:$0xff]  ;;  %vm13433_vm8 = vmmov %vm13411_vm0 }
  0x9d   : > { %v9981_v44 = vmul.f32 %v800_v56, %v13424_v21  ;;  %v9984_v5 = vmul.f32 %v13425_v49, %v800_v56  ;;  %v9987_v57 = vmul.f32 %v13426_v19, %v800_v56  ;;  %v1019_v26 = vadd.f32 %v996_v34, %v951_v7  ;;  %v13429_v7 = vld [vmem:[#allocation20_spill] sm:$0xff]  ;;  %vm13434_vm3 = vmmov %vm13411_vm0  ;;  %v13435_v19 = vld [vmem:[#allocation18_spill] sm:$0xff] }
  0x9e   : > { %v1020_v22 = vadd.f32 %v998_v6, %v952_v20  ;;  %v840_v16 = vrot.slane %v819_v11, 2  ;;  %v999_v52 = vrot.slane %v979_v29, 2  ;;  %v1158_v50 = vrot.slane %v1138_v46, 2  ;;  %v9992_v54 = vpop.permute.xlu0 %785  ;;  %v13430_v11 = vld [vmem:[#allocation22_spill] sm:$0xff]  ;;  %v13431_v29 = vld [vmem:[#allocation11_spill] sm:$0xff] }
  0x9f   : > { %v842_v58 = vrot.slane %v9981_v44, 2  ;;  %v886_v37 = vmul.f32 %v13427_v63, %v639_v0  ;;  %v1051_v21 = vadd.f32 %v1043_v27, %v1019_v26  ;;  %v1001_v49 = vrot.slane %v9984_v5, 2 }
  0xa0   : > { %v1052_v8 = vadd.f32 %v1044_v14, %v1020_v22  ;;  %v841_v56 = vsel %vm13428_vm7, %v838_v15, %v840_v16  ;;  %v1160_v34 = vrot.slane %v9987_v57, 2  ;;  %v1045_v20 = vmul.f32 %v13429_v7, %v639_v0  ;;  %v649_v14 = vpop.permute.xlu1 %648  ;;  %v13436_v57 = vld [vmem:[#allocation23_spill] sm:$0xff]  ;;  %vm13438_vm7 = vmmov %vm13411_vm0 }
  0xa1   : > { %v862_v6 = vadd.f32 %v841_v56, %v736_v60  ;;  %v669_v25 = vmul.f32 %v644_v10, %v13430_v11  ;;  %v1110_v46 = vadd.f32 %v13431_v29, %v1051_v21  ;;  %v1000_v44 = vsel %vm13432_vm5, %v997_v39, %v999_v52  ;;  %v13437_v56 = vld [vmem:[#allocation24_spill] sm:$0xff] }
  0xa2   : > { %v1159_v63 = vsel %vm13433_vm8, %v1156_v45, %v1158_v50  ;;  %v843_v27 = vsel %vm13434_vm3, %v840_v16, %v842_v58  ;;  %v1111_v5 = vadd.f32 %v13435_v19, %v1052_v8  ;;  %v887_v60 = vmul.f32 %v13436_v57, %v644_v10  ;;  %v654_v22 = vpop.permute.xlu0 %653  ;;  %vm13442_vm3 = vmmov %vm13411_vm0 }
  0xa3   : > { %v894_v26 = vadd.f32 %v886_v37, %v862_v6  ;;  %v737_v15 = vadd.f32 %v9566_v3, %v669_v25  ;;  %v1002_v0 = vsel %vm13411_vm0, %v999_v52, %v1001_v49  ;;  %v1046_v7 = vmul.f32 %v13437_v56, %v644_v10  ;;  %v13441_v25 = vld [vmem:[#allocation25_spill] sm:$0xff] }
  0xa4   : > { %v801_v21 = vrot.slane %v782_v23, 6  ;;  %v803_v39 = vrot.slane %v9992_v54, 6  ;;  %v10009_v11 = vadd.f32 %v1155_v35, %v1110_v46  ;;  %v10013_v8 = vsel %vm13438_vm7, %v1158_v50, %v1160_v34  ;;  %v790_v46 = vpop.permute.xlu1 %789  ;;  %vm13443_vm7 = vmmov %vm13411_vm0 }
  0xa5   : > { %v953_v45 = vadd.f32 %v9481_v28, %v894_v26  ;;  %v863_v16 = vadd.f32 %v843_v27, %v737_v15  ;;  %vm13439_vm5 = vcmask 1041408   ;;  %v670_v6 = vmul.f32 %v649_v14, %v9657_v24 }
  0xa6   : > { %v802_v3 = vsel %vm13439_vm5, %v799_v33, %v801_v21  ;;  %vm13440_vm8 = vmmov %vm13439_vm5  ;;  %v671_v52 = vmul.f32 %v654_v22, %v9770_v41  ;;  %v10030_v19 = vadd.f32 %v1157_v51, %v1111_v5 }
  0xa7   : > { %v804_v37 = vsel %vm13440_vm8, %v801_v21, %v803_v39  ;;  %v1021_v10 = vadd.f32 %v1000_v44, %v953_v45  ;;  %v895_v23 = vadd.f32 %v887_v60, %v863_v16  ;;  %v821_v54 = vmul.f32 %v802_v3, %v13441_v25  ;;  %vm13444_vm5 = vmmov %vm13411_vm0  ;;  %v13451_v25 = vld [vmem:[#allocation60_spill] sm:$0xff] }
  0xa8   : > { %v981_v35 = vmul.f32 %v9585_v2, %v802_v3  ;;  %v1140_v28 = vmul.f32 %v9716_v55, %v802_v3  ;;  %v822_v29 = vmul.f32 %v804_v37, %v9639_v61  ;;  %v10024_v50 = vmul.f32 %v9720_v13, %v804_v37  ;;  %v664_v16 = vpop.permute.xlu1 %663  ;;  %vm13445_vm8 = vmmov %vm13411_vm0 }
  0xa9   : > { %v10027_v33 = vmul.f32 %v9737_v31, %v804_v37  ;;  %v1053_v24 = vadd.f32 %v1045_v20, %v1021_v10  ;;  %v954_v41 = vadd.f32 %v9604_v12, %v895_v23  ;;  %v844_v44 = vrot.slane %v821_v54, 2 }
  0xaa   : > { %v1003_v27 = vrot.slane %v981_v35, 2  ;;  %v1162_v26 = vrot.slane %v1140_v28, 2  ;;  %v846_v2 = vrot.slane %v822_v29, 2  ;;  %v1005_v55 = vrot.slane %v10024_v50, 2  ;;  %v13453_v35 = vld [vmem:[#allocation61_spill] sm:$0xff]  ;;  %v13454_v29 = vld [vmem:[#allocation62_spill] sm:$0xff] }
  0xab   : > { %v1112_v61 = vadd.f32 %v9581_v42, %v1053_v24  ;;  %v1022_v15 = vadd.f32 %v1002_v0, %v954_v41  ;;  %v738_v13 = vadd.f32 %v9766_v17, %v670_v6  ;;  %v845_v31 = vsel %vm13442_vm3, %v842_v58, %v844_v44  ;;  %v659_v42 = vpop.permute.xlu0 %658  ;;  %vm13447_vm3 = vmmov %vm13411_vm0  ;;  %v13455_v41 = vld [vmem:[#allocation63_spill] sm:$0xff] }
  0xac   : > { %v1164_v57 = vrot.slane %v10027_v33, 2  ;;  %v888_v20 = vmul.f32 %v9741_v9, %v649_v14  ;;  %v739_v12 = vadd.f32 %v9824_v30, %v671_v52  ;;  %v847_v51 = vsel %vm13411_vm0, %v844_v44, %v846_v2  ;;  %v13456_v44 = vld [vmem:[#allocation64_spill] sm:$0xff] }
  0xad   : > { %v1054_v5 = vadd.f32 %v1046_v7, %v1022_v15  ;;  %v864_v60 = vadd.f32 %v845_v31, %v738_v13  ;;  %v1004_v56 = vsel %vm13443_vm7, %v1001_v49, %v1003_v27  ;;  %v1047_v21 = vmul.f32 %v9745_v47, %v649_v14  ;;  %v13446_v7 = vld [vmem:[#allocation53_spill] sm:$0xff]  ;;  %v13450_v14 = vld [vmem:[#allocation59_spill] sm:$0xff]  ;;  %vm13458_vm7 = vmmov %vm13447_vm3 }
  0xae   : > { %v1180_v0 = vadd.f32 %v1159_v63, %v1112_v61  ;;  %v1163_v17 = vsel %vm13444_vm5, %v1160_v34, %v1162_v26  ;;  %v865_v45 = vadd.f32 %v847_v51, %v739_v12  ;;  %v889_v58 = vmul.f32 %v9774_v59, %v654_v22  ;;  %v13448_v34 = vld [vmem:[#allocation55_spill] sm:$0xff]  ;;  %vm13459_vm5 = vmmov %vm13447_vm3 }
  0xaf   : > { %v896_v3 = vadd.f32 %v888_v20, %v864_v60  ;;  %v1006_v9 = vsel %vm13445_vm8, %v1003_v27, %v1005_v55  ;;  %v1048_v30 = vmul.f32 %v9799_v40, %v654_v22  ;;  %v805_v37 = vrot.slane %v790_v46, 6  ;;  %v13452_v22 = vld [vmem:[#allocation58_spill] sm:$0xff]  ;;  %vm13461_vm8 = vmmov %vm13447_vm3 }
  0xb0   : > { %v1113_v6 = vadd.f32 %v13446_v7, %v1054_v5  ;;  %v897_v52 = vadd.f32 %v889_v58, %v865_v45  ;;  %v1165_v47 = vsel %vm13447_vm3, %v1162_v26, %v1164_v57  ;;  %v672_v49 = vmul.f32 %v659_v42, %v9864_v38  ;;  %v13460_v58 = vld [vmem:[#allocation57_spill] sm:$0xff] }
  0xb1   : > { %v955_v63 = vadd.f32 %v13448_v34, %v896_v3  ;;  %vm13449_vm0 = vcmask 1041408   ;;  %v824_v10 = vmul.f32 %v805_v37, %v13450_v14  ;;  %v673_v23 = vmul.f32 %v664_v16, %v9889_v36  ;;  %v13457_v36 = vld [vmem:[#allocation65_spill] sm:$0xff] }
  0xb2   : > { %v806_v59 = vsel %vm13449_vm0, %v803_v39, %v805_v37  ;;  %v956_v40 = vadd.f32 %v13451_v25, %v897_v52  ;;  %v984_v50 = vmul.f32 %v13454_v29, %v805_v37  ;;  %v890_v27 = vmul.f32 %v13456_v44, %v659_v42  ;;  %vm13463_vm0 = vmmov %vm13447_vm3 }
  0xb3   : > { %v823_v54 = vmul.f32 %v806_v59, %v13452_v22  ;;  %v983_v28 = vmul.f32 %v13453_v35, %v806_v59  ;;  %v1023_v46 = vadd.f32 %v1004_v56, %v955_v63  ;;  %v850_v24 = vrot.slane %v824_v10, 2 }
  0xb4   : > { %v10060_v38 = vmul.f32 %v13455_v41, %v806_v59  ;;  %v1024_v39 = vadd.f32 %v1006_v9, %v956_v40  ;;  %v740_v26 = vadd.f32 %v9894_v4, %v672_v49  ;;  %v1049_v15 = vmul.f32 %v13457_v36, %v659_v42 }
  0xb5   : > { %v848_v61 = vrot.slane %v823_v54, 2  ;;  %v1181_v13 = vadd.f32 %v10013_v8, %v1113_v6  ;;  %v1055_v31 = vadd.f32 %v1047_v21, %v1023_v46  ;;  %v1009_v20 = vrot.slane %v984_v50, 2  ;;  %v7641_v8 = vld [vmem:[%s13017_s4] ss:$0 sm:$0xff] }
  0xb6   : > { %v1007_v12 = vrot.slane %v983_v28, 2  ;;  %v1056_v51 = vadd.f32 %v1048_v30, %v1024_v39  ;;  %v741_v60 = vadd.f32 %v9897_v43, %v673_v23  ;;  %v1143_v3 = vmul.f32 %v13460_v58, %v805_v37  ;;  %v13462_v28 = vld [vmem:[#allocation66_spill] sm:$0xff] }
  0xb7   : > { %v849_v5 = vsel %vm13458_vm7, %v846_v2, %v848_v61  ;;  %v851_v56 = vsel %vm13459_vm5, %v848_v61, %v850_v24  ;;  %v1114_v45 = vadd.f32 %v9885_v32, %v1055_v31  ;;  %v1166_v4 = vrot.slane %v10060_v38, 2  ;;  %v13464_v24 = vld [vmem:[#allocation67_spill] sm:$0xff]  ;;  %vm13465_vm7 = vmmov %vm13463_vm0 }
  0xb8   : > { %v866_v21 = vadd.f32 %v849_v5, %v740_v26  ;;  %v1115_v42 = vadd.f32 %v9911_v1, %v1056_v51  ;;  %v1008_v9 = vsel %vm13461_vm8, %v1005_v55, %v1007_v12  ;;  %v867_v2 = vadd.f32 %v851_v56, %v741_v60 }
  0xb9   : > { %v891_v43 = vmul.f32 %v9901_v48, %v664_v16  ;;  %v1182_v30 = vadd.f32 %v1163_v17, %v1114_v45  ;;  %v1010_v32 = vsel %vm13447_vm3, %v1007_v12, %v1009_v20  ;;  %v1050_v37 = vmul.f32 %v9904_v62, %v664_v16 }
  0xba   : > { %v898_v7 = vadd.f32 %v890_v27, %v866_v21  ;;  %v1183_v6 = vadd.f32 %v1165_v47, %v1115_v42  ;;  %v10081_v49 = vadd.f32 %v7641_v8, %v10009_v11  ;;  %v10084_v34 = vadd.f32 %v7641_v8, %v10030_v19 }
  0xbb   : > { %v899_v52 = vadd.f32 %v891_v43, %v867_v2  ;;  %v10087_v55 = vadd.f32 %v7641_v8, %v1180_v0  ;;  %v10089_v63 = vadd.f32 %v7641_v8, %v1181_v13  ;;  %v10091_v48 = vadd.f32 %v7641_v8, %v1182_v30 }
  0xbc   : > { %v957_v1 = vadd.f32 %v9916_v53, %v898_v7  ;;  %v1201_v62 = vsub.f32 0.0, %v10081_v49  ;;  %v1202_v16 = vsub.f32 0.0, %v10084_v34  ;;  %v10096_v47 = vadd.f32 %v7641_v8, %v1183_v6 }
  0xbd   : > { %v958_v17 = vadd.f32 %v9923_v18, %v899_v52  ;;  %v1203_v19 = vsub.f32 0.0, %v10087_v55  ;;  %v1204_v59 = vsub.f32 0.0, %v10089_v63  ;;  %v1205_v53 = vsub.f32 0.0, %v10091_v48 }
  0xbe   : > { %v1025_v11 = vadd.f32 %v1008_v9, %v957_v1  ;;  %v1209_v14 = vmul.f32 1.442695, %v1201_v62  ;;  %v1211_v10 = vmul.f32 1.442695, %v1202_v16  ;;  %v1206_v23 = vsub.f32 0.0, %v10096_v47  ;;  %v13466_v9 = vld [vmem:[#allocation21_spill] sm:$0xff] }
  0xbf   : > { %v1026_v0 = vadd.f32 %v1010_v32, %v958_v17  ;;  %v1168_v25 = vrot.slane %v1143_v3, 2  ;;  %v1213_v40 = vmul.f32 1.442695, %v1203_v19  ;;  %v1215_v22 = vmul.f32 1.442695, %v1204_v59 }
  0xc0   : > { %v1057_v18 = vadd.f32 %v1049_v15, %v1025_v11  ;;  %8467 = vpow2.f32 %v1209_v14  ;;  %v1217_v35 = vmul.f32 1.442695, %v1205_v53  ;;  %v1219_v50 = vmul.f32 1.442695, %v1206_v23 }
  0xc1   : > { %v1058_v54 = vadd.f32 %v1050_v37, %v1026_v0  ;;  %8469 = vpow2.f32 %v1211_v10  ;;  %v1167_v46 = vsel %vm13463_vm0, %v1164_v57, %v1166_v4  ;;  %v1169_v44 = vsel %vm13465_vm7, %v1166_v4, %v1168_v25  ;;  %v1857_v4 = vld [vmem:[%s13022_s9] sm:$0x1] }
  0xc2   : > { %v1116_v29 = vadd.f32 %v13462_v28, %v1057_v18  ;;  %8471 = vpow2.f32 %v1213_v40  ;;  %v10121_v2 = vsub.s32 0, %v13466_v9  ;;  %v13468_v25 = vmov 0   ;;  %v13469_v18 = vld [vmem:[#allocation44_spill] sm:$0xff] }
  0xc3   : > { %v1117_v41 = vadd.f32 %v13464_v24, %v1058_v54  ;;  %8473 = vpow2.f32 %v1215_v22 }
  0xc4   : > { %v1184_v38 = vadd.f32 %v1167_v46, %v1116_v29  ;;  %8475 = vpow2.f32 %v1217_v35  ;;  %13467 = vst [vmem:[#allocation6_spill] sm:$0xff] %v10121_v2  ;;  %v10154_v35 = vld [vmem:[%s13019_s6 + $0xd8] sm:$0xff]  ;;  %v10163_v46 = vld [vmem:[%s13019_s6 + $0xd0] sm:$0xff] }
  0xc5   : > { %v1185_v27 = vadd.f32 %v1169_v44, %v1117_v41  ;;  %8477 = vpow2.f32 %v1219_v50  ;;  %v10178_v44 = vld [vmem:[%s13019_s6 + $0xc0] sm:$0xff] }
  0xc6   : > { %v10108_v39 = vadd.f32 %v7641_v8, %v1184_v38  ;;  %v10171_v38 = vld [vmem:[%s13019_s6 + $0xc8] sm:$0xff] }
  0xc7   : > { %v10110_v26 = vadd.f32 %v7641_v8, %v1185_v27  ;;  %v7677_v8 = vld [vmem:[%s13022_s9 + $0x1] sm:$0x1] }
  0xc8   : > { %v1207_v61 = vsub.f32 0.0, %v10108_v39  ;;  %v1860_v42 = vadd.f32 %v7677_v8, %v1857_v4 }
  0xc9   : > { %v1208_v33 = vsub.f32 0.0, %v10110_v26 }
  0xca   : > { %v1221_v36 = vmul.f32 1.442695, %v1207_v61  ;;  %v1865_v32 = vrot.slane %v1860_v42, %v10121_v2  ;;  %v10200_v61 = vld [vmem:[%s13019_s6 + $0xa8] sm:$0xff] }
  0xcb   : > { %v1223_v57 = vmul.f32 1.442695, %v1208_v33  ;;  %v10207_v33 = vld [vmem:[%s13019_s6 + $0xa0] sm:$0xff] }
  0xcc   : > { %8479 = vpow2.f32 %v1221_v36  ;;  %v10214_v36 = vld [vmem:[%s13019_s6 + $0x98] sm:$0xff] }
  0xcd   : > { %8481 = vpow2.f32 %v1223_v57  ;;  %v8468_v15 = vpop.eup %8467 }
  0xce   : > { %v8470_v13 = vpop.eup %8469  ;;  %v1225_v31 = vadd.f32 1.0, %v8468_v15  ;;  %v1455_v15 = vld [vmem:[%s13019_s6 + $0x8] sm:$0xff] }
  0xcf   : > { %v8472_v20 = vpop.eup %8471  ;;  %v1226_v12 = vadd.f32 1.0, %v8470_v13  ;;  %8037 = vmatprep.subr.mxu1 %v1455_v15  ;;  %v10226_v13 = vld [vmem:[%s13019_s6 + $0x90] sm:$0xff] }
  0xd0   : > { %v8474_v51 = vpop.eup %8473  ;;  %8483 = vrcp.f32 %v1225_v31  ;;  %v1227_v5 = vadd.f32 1.0, %v8472_v20  ;;  %8038 = vmatpush3.msra.mxu1 %v1455_v15  ;;  %v1454_v31 = vld [vmem:[%s13019_s6] sm:$0xff]  ;;  %v10236_v20 = vld [vmem:[%s13019_s6 + $0x88] sm:$0xff] }
  0xd1   : > { %v8476_v60 = vpop.eup %8475  ;;  %8485 = vrcp.f32 %v1226_v12  ;;  %v1228_v56 = vadd.f32 1.0, %v8474_v51  ;;  %8039 = vmatprep.subr.mxu1 %v1454_v31  ;;  %v10244_v12 = vld [vmem:[%s13019_s6 + $0x80] sm:$0xff] }
  0xd2   : > { %v8478_v45 = vpop.eup %8477  ;;  %8487 = vrcp.f32 %v1227_v5  ;;  %v1229_v58 = vadd.f32 1.0, %v8476_v60  ;;  %8040 = vmatpush3.msra.mxu1 %v1454_v31 }
  0xd3   : > { %8489 = vrcp.f32 %v1228_v56  ;;  %v1230_v3 = vadd.f32 1.0, %v8478_v45  ;;  %8131 = vmatprep.subr.mxu1 %v13469_v18 }
  0xd4   : > { %8491 = vrcp.f32 %v1229_v58 }
  0xd5   : > { %8493 = vrcp.f32 %v1230_v3 }
  0xd9   : > { %v8480_v21 = vpop.eup %8479 }
  0xda   : > { %v8482_v43 = vpop.eup %8481  ;;  %v1231_v30 = vadd.f32 1.0, %v8480_v21 }
  0xdb   : > { %v1232_v7 = vadd.f32 1.0, %v8482_v43 }
  0xdc   : > { %8495 = vrcp.f32 %v1231_v30 }
  0xdd   : > { %8497 = vrcp.f32 %v1232_v7  ;;  %v8484_v37 = vpop.eup %8483 }
  0xde   : > { %v8486_v6 = vpop.eup %8485  ;;  %v1249_v52 = vmul.f32 %v8484_v37, %v10081_v49  ;;  %v10282_v37 = vld [vmem:[%s13020_s7] ss:$0 sm:$0xff] }
  0xdf   : > { %v8488_v1 = vpop.eup %8487  ;;  %v1250_v17 = vmul.f32 %v8486_v6, %v10084_v34  ;;  %v10132_v34 = vld [vmem:[%s13019_s6 + $0xf0] sm:$0xff] }
  0xe0   : > { %v8490_v62 = vpop.eup %8489  ;;  %1257 = vst [vmem:[#allocation2] sm:$0xff] %v1249_v52  ;;  %v1867_v16 = vmul.f32 %v1865_v32, %v1249_v52  ;;  %v1251_v11 = vmul.f32 %v8488_v1, %v10087_v55 }
  0xe1   : > { %v8492_v19 = vpop.eup %8491  ;;  %1258 = vst [vmem:[#allocation2 + $0x8] sm:$0xff] %v1250_v17  ;;  %v1265_v59 = vpack.c.bf16 %v1250_v17, %v1249_v52  ;;  %v1868_v53 = vmul.f32 %v1865_v32, %v1250_v17  ;;  %v1252_v0 = vmul.f32 %v8490_v62, %v10089_v63  ;;  %v10287_v52 = vld [vmem:[%s13020_s7 + $0x1] ss:$0 sm:$0xff] }
  0xe2   : > { %v8494_v14 = vpop.eup %8493  ;;  %1875 = vst [vmem:[#allocation5] sm:$0xff] %v1867_v16  ;;  %1259 = vst [vmem:[#allocation2 + $0x10] sm:$0xff] %v1251_v11  ;;  %v1869_v10 = vmul.f32 %v1865_v32, %v1251_v11  ;;  %v1253_v49 = vmul.f32 %v8492_v19, %v10091_v48  ;;  %v10140_v48 = vld [vmem:[%s13019_s6 + $0xe8] sm:$0xff] }
  0xe3   : > { %1398 = vmatmul.mubr.bf16.vlgmr.msra.gmra.mxu0 %v1265_v59  ;;  %1876 = vst [vmem:[#allocation5 + $0x8] sm:$0xff] %v1868_v53  ;;  %1260 = vst [vmem:[#allocation2 + $0x18] sm:$0xff] %v1252_v0  ;;  %v1870_v55 = vmul.f32 %v1865_v32, %v1252_v0  ;;  %v1254_v23 = vmul.f32 %v8494_v14, %v10096_v47  ;;  %v10147_v47 = vld [vmem:[%s13019_s6 + $0xe0] sm:$0xff]  ;;  %v1266_v22 = vpack.c.bf16 %v1252_v0, %v1251_v11 }
  0xe4   : > { %1407 = vmatprep.mubr.bf16.mxu0 %v13468_v25  ;;  %1877 = vst [vmem:[#allocation5 + $0x10] sm:$0xff] %v1869_v10  ;;  %1261 = vst [vmem:[#allocation2 + $0x20] sm:$0xff] %v1253_v49  ;;  %v1871_v63 = vmul.f32 %v1865_v32, %v1253_v49  ;;  %8054 = vmatpush3.msra.mxu0 %v13469_v18 }
  0xe5   : > { %1878 = vst [vmem:[#allocation5 + $0x18] sm:$0xff] %v1870_v55  ;;  %1262 = vst [vmem:[#allocation2 + $0x28] sm:$0xff] %v1254_v23  ;;  %v1872_v40 = vmul.f32 %v1865_v32, %v1254_v23  ;;  %8055 = vmatprep.subr.mxu0 %v10132_v34  ;;  %v1267_v27 = vpack.c.bf16 %v1254_v23, %v1253_v49 }
  0xe6   : > { %1879 = vst [vmem:[#allocation5 + $0x20] sm:$0xff] %v1871_v63  ;;  %8056 = vmatpush3.msra.mxu0 %v10132_v34 }
  0xe7   : > { %1880 = vst [vmem:[#allocation5 + $0x28] sm:$0xff] %v1872_v40  ;;  %8057 = vmatprep.subr.mxu0 %v10140_v48 }
  0xe8   : > { %8058 = vmatpush3.msra.mxu0 %v10140_v48 }
  0xe9   : > { %v8496_v54 = vpop.eup %8495  ;;  %8059 = vmatprep.subr.mxu0 %v10147_v47 }
  0xea   : > { %v8498_v28 = vpop.eup %8497  ;;  %v1255_v29 = vmul.f32 %v8496_v54, %v10108_v39  ;;  %8060 = vmatpush3.msra.mxu0 %v10147_v47  ;;  %v10185_v39 = vld [vmem:[%s13019_s6 + $0xb8] sm:$0xff] }
  0xeb   : > { %v1256_v50 = vmul.f32 %v8498_v28, %v10110_v26  ;;  %1408 = vmatmul.mubr.bf16.gmra.mxu0 %v1266_v22  ;;  %8061 = vmatprep.subr.mxu0 %v10154_v35  ;;  %v10192_v26 = vld [vmem:[%s13019_s6 + $0xb0] sm:$0xff] }
  0xec   : > { %1263 = vst [vmem:[#allocation2 + $0x30] sm:$0xff] %v1255_v29  ;;  %v1873_v24 = vmul.f32 %v1865_v32, %v1255_v29  ;;  %1417 = vmatprep.mubr.bf16.mxu0 %v13468_v25  ;;  %8062 = vmatpush3.msra.mxu0 %v10154_v35 }
  0xed   : > { %1264 = vst [vmem:[#allocation2 + $0x38] sm:$0xff] %v1256_v50  ;;  %v1874_v41 = vmul.f32 %v1865_v32, %v1256_v50  ;;  %8063 = vmatprep.subr.mxu0 %v10163_v46  ;;  %v1268_v57 = vpack.c.bf16 %v1256_v50, %v1255_v29 }
  0xee   : > { %1881 = vst [vmem:[#allocation5 + $0x30] sm:$0xff] %v1873_v24  ;;  %8064 = vmatpush3.msra.mxu0 %v10163_v46 }
  0xef   : > { %1882 = vst [vmem:[#allocation5 + $0x38] sm:$0xff] %v1874_v41  ;;  %8065 = vmatprep.subr.mxu0 %v10171_v38 }
  0xf0   : > { %8066 = vmatpush3.msra.mxu0 %v10171_v38 }
  0xf1   : > { %8067 = vmatprep.subr.mxu0 %v10178_v44 }
  0xf2   : > { %8068 = vmatpush3.msra.mxu0 %v10178_v44 }
  0xf3   : > { %1418 = vmatmul.mubr.bf16.gmra.mxu0 %v1267_v27  ;;  %8069 = vmatprep.subr.mxu0 %v10185_v39 }
  0xf4   : > { %1427 = vmatprep.mubr.bf16.mxu0 %v13468_v25  ;;  %8070 = vmatpush3.msra.mxu0 %v10185_v39 }
  0xf5   : > { %8071 = vmatprep.subr.mxu0 %v10192_v26 }
  0xf6   : > { %8072 = vmatpush3.msra.mxu0 %v10192_v26 }
  0xf7   : > { %8073 = vmatprep.subr.mxu0 %v10200_v61 }
  0xf8   : > { %8074 = vmatpush3.msra.mxu0 %v10200_v61 }
  0xf9   : > { %8075 = vmatprep.subr.mxu0 %v10207_v33 }
  0xfa   : > { %8076 = vmatpush3.msra.mxu0 %v10207_v33 }
  0xfb   : > { %1428 = vmatmul.mubr.bf16.gmra.mxu0 %v1268_v57  ;;  %8077 = vmatprep.subr.mxu0 %v10214_v36 }
  0xfc   : > { %8078 = vmatpush3.msra.mxu0 %v10214_v36 }
  0xfd   : > { %8079 = vmatprep.subr.mxu0 %v10226_v13 }
  0xfe   : > { %8080 = vmatpush3.msra.mxu0 %v10226_v13 }
  0xff   : > { %8081 = vmatprep.subr.mxu0 %v10236_v20 }
 0x100   : > { %8082 = vmatpush3.msra.mxu0 %v10236_v20 }
 0x101   : > { %8083 = vmatprep.subr.mxu0 %v10244_v12 }
 0x102   : > { %8084 = vmatpush3.msra.mxu0 %v10244_v12 }
 0x1a3   : > { %v1399_v51 = vpop.f32.mrf.mxu0 }
 0x1a4   : > { %1438 = vst [vmem:[#allocation3] sm:$0xff] %v1399_v51  ;;  %8041 = vmatprep.mubr.f32.mxu1 %v1399_v51 }
 0x1a5   : > { %v1401_v5 = vpop.f32.mrf.mxu0 }
 0x1a6   : > { %1439 = vst [vmem:[#allocation3 + $0x8] sm:$0xff] %v1401_v5  ;;  %8085 = vmatprep.mubr.f32.mxu0 %v1401_v5 }
 0x1a7   : > { %v1403_v60 = vpop.f32.mrf.mxu0 }
 0x1a8   : > { %1440 = vst [vmem:[#allocation3 + $0x10] sm:$0xff] %v1403_v60  ;;  %8042 = vmatmul.mubr.f32.vlgmr.msra.gmra.mxu1 %v1403_v60 }
 0x1a9   : > { %8147 = vmatpush3.msra.mxu1 %v13469_v18  ;;  %v1405_v56 = vpop.f32.mrf.mxu0 }
 0x1aa   : > { %1441 = vst [vmem:[#allocation3 + $0x18] sm:$0xff] %v1405_v56  ;;  %8132 = vmatprep.subr.mxu1 %v10132_v34  ;;  %8086 = vmatmul.mubr.f32.vlgmr.msra.gmra.mxu0 %v1405_v56 }
 0x1ab   : > { %8148 = vmatpush3.msra.mxu1 %v10132_v34  ;;  %v1409_v45 = vpop.f32.mrf.mxu0 }
 0x1ac   : > { %1442 = vst [vmem:[#allocation3 + $0x20] sm:$0xff] %v1409_v45  ;;  %8133 = vmatprep.subr.mxu1 %v10140_v48  ;;  %8044 = vmatprep.mubr.f32.mxu1 %v1409_v45 }
 0x1ad   : > { %8149 = vmatpush3.msra.mxu1 %v10140_v48  ;;  %v1411_v58 = vpop.f32.mrf.mxu0 }
 0x1ae   : > { %1443 = vst [vmem:[#allocation3 + $0x28] sm:$0xff] %v1411_v58  ;;  %8134 = vmatprep.subr.mxu1 %v10147_v47  ;;  %8088 = vmatprep.mubr.f32.mxu0 %v1411_v58 }
 0x1af   : > { %8150 = vmatpush3.msra.mxu1 %v10147_v47  ;;  %v1413_v3 = vpop.f32.mrf.mxu0 }
 0x1b0   : > { %1444 = vst [vmem:[#allocation3 + $0x30] sm:$0xff] %v1413_v3  ;;  %8135 = vmatprep.subr.mxu1 %v10154_v35  ;;  %8045 = vmatmul.mubr.f32.gmra.mxu1 %v1413_v3 }
 0x1b1   : > { %8151 = vmatpush3.msra.mxu1 %v10154_v35  ;;  %v1415_v4 = vpop.f32.mrf.mxu0 }
 0x1b2   : > { %1445 = vst [vmem:[#allocation3 + $0x38] sm:$0xff] %v1415_v4  ;;  %8136 = vmatprep.subr.mxu1 %v10163_v46  ;;  %8089 = vmatmul.mubr.f32.gmra.mxu0 %v1415_v4 }
 0x1b3   : > { %8152 = vmatpush3.msra.mxu1 %v10163_v46  ;;  %v1419_v8 = vpop.f32.mrf.mxu0 }
 0x1b4   : > { %1446 = vst [vmem:[#allocation3 + $0x40] sm:$0xff] %v1419_v8  ;;  %8137 = vmatprep.subr.mxu1 %v10171_v38  ;;  %8047 = vmatprep.mubr.f32.mxu1 %v1419_v8 }
 0x1b5   : > { %8153 = vmatpush3.msra.mxu1 %v10171_v38  ;;  %v1421_v21 = vpop.f32.mrf.mxu0 }
 0x1b6   : > { %1447 = vst [vmem:[#allocation3 + $0x48] sm:$0xff] %v1421_v21  ;;  %8138 = vmatprep.subr.mxu1 %v10178_v44 }
 0x1b7   : > { %8154 = vmatpush3.msra.mxu1 %v10178_v44  ;;  %v1423_v42 = vpop.f32.mrf.mxu0 }
 0x1b8   : > { %1448 = vst [vmem:[#allocation3 + $0x50] sm:$0xff] %v1423_v42  ;;  %8139 = vmatprep.subr.mxu1 %v10185_v39  ;;  %8048 = vmatmul.mubr.f32.gmra.mxu1 %v1423_v42 }
 0x1b9   : > { %8155 = vmatpush3.msra.mxu1 %v10185_v39  ;;  %v1425_v9 = vpop.f32.mrf.mxu0 }
 0x1ba   : > { %1449 = vst [vmem:[#allocation3 + $0x58] sm:$0xff] %v1425_v9  ;;  %8140 = vmatprep.subr.mxu1 %v10192_v26 }
 0x1bb   : > { %8156 = vmatpush3.msra.mxu1 %v10192_v26  ;;  %v1429_v43 = vpop.f32.mrf.mxu0 }
 0x1bc   : > { %1450 = vst [vmem:[#allocation3 + $0x60] sm:$0xff] %v1429_v43  ;;  %8141 = vmatprep.subr.mxu1 %v10200_v61  ;;  %8050 = vmatprep.mubr.f32.mxu1 %v1429_v43 }
 0x1bd   : > { %8157 = vmatpush3.msra.mxu1 %v10200_v61  ;;  %v1431_v30 = vpop.f32.mrf.mxu0 }
 0x1be   : > { %1451 = vst [vmem:[#allocation3 + $0x68] sm:$0xff] %v1431_v30  ;;  %8142 = vmatprep.subr.mxu1 %v10207_v33 }
 0x1bf   : > { %8158 = vmatpush3.msra.mxu1 %v10207_v33  ;;  %v1433_v7 = vpop.f32.mrf.mxu0 }
 0x1c0   : > { %1452 = vst [vmem:[#allocation3 + $0x70] sm:$0xff] %v1433_v7  ;;  %8143 = vmatprep.subr.mxu1 %v10214_v36  ;;  %8051 = vmatmul.mubr.f32.gmra.mxu1 %v1433_v7 }
 0x1c1   : > { %8159 = vmatpush3.msra.mxu1 %v10214_v36  ;;  %v1435_v32 = vpop.f32.mrf.mxu0  ;;  %8091 = vmatprep.mubr.f32.mxu1 %v1421_v21 }
 0x1c2   : > { %1453 = vst [vmem:[#allocation3 + $0x78] sm:$0xff] %v1435_v32  ;;  %8144 = vmatprep.subr.mxu1 %v10226_v13 }
 0x1c3   : > { %8160 = vmatpush3.msra.mxu1 %v10226_v13 }
 0x1c4   : > { %8145 = vmatprep.subr.mxu1 %v10236_v20 }
 0x1c5   : > { %8161 = vmatpush3.msra.mxu1 %v10236_v20 }
 0x1c6   : > { %8146 = vmatprep.subr.mxu1 %v10244_v12 }
 0x1c7   : > { %8162 = vmatpush3.msra.mxu1 %v10244_v12 }
 0x1c8   : > { %8092 = vmatmul.mubr.f32.vlgmr.msra.gmra.mxu1 %v1425_v9 }
 0x1c9   : > { %8094 = vmatprep.mubr.f32.mxu1 %v1431_v30 }
 0x1cc   : > { %8095 = vmatmul.mubr.f32.gmra.mxu1 %v1435_v32 }
 0x268   : > { %v8043_v6 = vpop.f32.mrf.mxu1 }
 0x269   : > { %v10290_v1 = vadd.f32 %v8043_v6, %v10282_v37 }
 0x26a   : > { %v1543_v17 = vpop.f32.mrf.mxu1  ;;  %v8087_v62 = vpop.f32.mrf.mxu0 }
 0x26b   : > { %v1591_v16 = vmin.f32 %v10290_v1, 20.0  ;;  %v10294_v11 = vadd.f32 %v10282_v37, %v1543_v17  ;;  %v10297_v19 = vadd.f32 %v8087_v62, %v10287_v52  ;;  %vm1583_vm5 = vcmp.gt.f32.partialorder %v10290_v1, 20.0 }
 0x26c   : > { %v1745_v59 = vpop.f32.mrf.mxu0 }
 0x26d   : > { %v1600_v53 = vmul.f32 1.442695, %v1591_v16  ;;  %v1590_v0 = vmin.f32 %v10294_v11, 20.0  ;;  %v1793_v14 = vmin.f32 %v10297_v19, 20.0  ;;  %v10302_v10 = vadd.f32 %v10287_v52, %v1745_v59 }
 0x26e   : > { %vm1582_vm8 = vcmp.gt.f32.partialorder %v10294_v11, 20.0  ;;  %vm1785_vm3 = vcmp.gt.f32.partialorder %v10297_v19, 20.0 }
 0x26f   : > { %8499 = vpow2.f32 %v1600_v53  ;;  %v1598_v49 = vmul.f32 1.442695, %v1590_v0  ;;  %v1802_v34 = vmul.f32 1.442695, %v1793_v14  ;;  %v1792_v55 = vmin.f32 %v10302_v10, 20.0 }
 0x270   : > { %v8046_v23 = vpop.f32.mrf.mxu1  ;;  %vm1784_vm0 = vcmp.gt.f32.partialorder %v10302_v10, 20.0 }
 0x271   : > { %8501 = vpow2.f32 %v1598_v49  ;;  %v10306_v25 = vadd.f32 %v8046_v23, %v10282_v37  ;;  %v1800_v63 = vmul.f32 1.442695, %v1792_v55 }
 0x272   : > { %8503 = vpow2.f32 %v1802_v34  ;;  %v1553_v18 = vpop.f32.mrf.mxu1  ;;  %v8090_v48 = vpop.f32.mrf.mxu0 }
 0x273   : > { %v1593_v40 = vmin.f32 %v10306_v25, 20.0  ;;  %v10310_v47 = vadd.f32 %v10282_v37, %v1553_v18  ;;  %v10313_v22 = vadd.f32 %v8090_v48, %v10287_v52  ;;  %8505 = vpow2.f32 %v1800_v63 }
 0x274   : > { %v1755_v54 = vpop.f32.mrf.mxu0  ;;  %vm1585_vm7 = vcmp.gt.f32.partialorder %v10306_v25, 20.0 }
 0x275   : > { %v1604_v35 = vmul.f32 1.442695, %v1593_v40  ;;  %v1592_v28 = vmin.f32 %v10310_v47, 20.0  ;;  %v1795_v29 = vmin.f32 %v10313_v22, 20.0  ;;  %v10318_v50 = vadd.f32 %v10287_v52, %v1755_v54 }
 0x277   : > { %8507 = vpow2.f32 %v1604_v35  ;;  %v1602_v46 = vmul.f32 1.442695, %v1592_v28  ;;  %v1806_v24 = vmul.f32 1.442695, %v1795_v29  ;;  %v1794_v41 = vmin.f32 %v10318_v50, 20.0 }
 0x278   : > { %v8049_v38 = vpop.f32.mrf.mxu1 }
 0x279   : > { %8509 = vpow2.f32 %v1602_v46  ;;  %v10322_v44 = vadd.f32 %v8049_v38, %v10282_v37  ;;  %v1804_v27 = vmul.f32 1.442695, %v1794_v41 }
 0x27a   : > { %8511 = vpow2.f32 %v1806_v24  ;;  %v1563_v39 = vpop.f32.mrf.mxu1 }
 0x27b   : > { %v1595_v26 = vmin.f32 %v10322_v44, 20.0  ;;  %v10326_v61 = vadd.f32 %v10282_v37, %v1563_v39  ;;  %8513 = vpow2.f32 %v1804_v27 }
 0x27c   : > { %v8500_v33 = vpop.eup %8499 }
 0x27d   : > { %v1615_v36 = vadd.f32 1.0, %v8500_v33  ;;  %v1608_v57 = vmul.f32 1.442695, %v1595_v26  ;;  %v1594_v15 = vmin.f32 %v10326_v61, 20.0 }
 0x27e   : > { %v8502_v13 = vpop.eup %8501 }
 0x27f   : > { %v8504_v31 = vpop.eup %8503  ;;  %8515 = vlog2.f32 %v1615_v36  ;;  %v1614_v20 = vadd.f32 1.0, %v8502_v13  ;;  %v1606_v12 = vmul.f32 1.442695, %v1594_v15 }
 0x280   : > { %v1817_v51 = vadd.f32 1.0, %v8504_v31  ;;  %8517 = vpow2.f32 %v1608_v57  ;;  %v8052_v5 = vpop.f32.mrf.mxu1  ;;  %v8506_v60 = vpop.eup %8505 }
 0x281   : > { %8519 = vlog2.f32 %v1614_v20  ;;  %v10330_v56 = vadd.f32 %v8052_v5, %v10282_v37  ;;  %v1816_v45 = vadd.f32 1.0, %v8506_v60 }
 0x282   : > { %8521 = vlog2.f32 %v1817_v51  ;;  %v1573_v58 = vpop.f32.mrf.mxu1 }
 0x283   : > { %8523 = vpow2.f32 %v1606_v12  ;;  %v1597_v3 = vmin.f32 %v10330_v56, 20.0  ;;  %v10334_v4 = vadd.f32 %v10282_v37, %v1573_v58 }
 0x284   : > { %v8508_v8 = vpop.eup %8507  ;;  %8525 = vlog2.f32 %v1816_v45 }
 0x285   : > { %v1617_v21 = vadd.f32 1.0, %v8508_v8  ;;  %v1612_v42 = vmul.f32 1.442695, %v1597_v3  ;;  %v1596_v9 = vmin.f32 %v10334_v4, 20.0 }
 0x286   : > { %v8510_v43 = vpop.eup %8509 }
 0x287   : > { %v8512_v30 = vpop.eup %8511  ;;  %8527 = vlog2.f32 %v1617_v21  ;;  %v1616_v7 = vadd.f32 1.0, %v8510_v43  ;;  %v1610_v32 = vmul.f32 1.442695, %v1596_v9 }
 0x288   : > { %v1819_v6 = vadd.f32 1.0, %v8512_v30  ;;  %8529 = vpow2.f32 %v1612_v42  ;;  %v8093_v17 = vpop.f32.mrf.mxu1  ;;  %v8514_v62 = vpop.eup %8513 }
 0x289   : > { %8531 = vlog2.f32 %v1616_v7  ;;  %v10338_v16 = vadd.f32 %v8093_v17, %v10287_v52  ;;  %v1818_v37 = vadd.f32 1.0, %v8514_v62 }
 0x28a   : > { %8533 = vlog2.f32 %v1819_v6  ;;  %v1765_v59 = vpop.f32.mrf.mxu1 }
 0x28b   : > { %8535 = vpow2.f32 %v1610_v32  ;;  %v1797_v53 = vmin.f32 %v10338_v16, 20.0  ;;  %v10342_v0 = vadd.f32 %v10287_v52, %v1765_v59 }
 0x28c   : > { %v8516_v14 = vpop.eup %8515  ;;  %8537 = vlog2.f32 %v1818_v37  ;;  %v8096_v49 = vpop.f32.mrf.mxu1 }
 0x28d   : > { %v8518_v34 = vpop.eup %8517  ;;  %v1625_v55 = vmul.f32 0.6931472, %v8516_v14  ;;  %v1810_v23 = vmul.f32 1.442695, %v1797_v53  ;;  %v1796_v63 = vmin.f32 %v10342_v0, 20.0  ;;  %v10348_v40 = vadd.f32 %v8096_v49, %v10287_v52 }
 0x28e   : > { %v8520_v18 = vpop.eup %8519  ;;  %v1619_v48 = vadd.f32 1.0, %v8518_v34  ;;  %v1775_v54 = vpop.f32.mrf.mxu1 }
 0x28f   : > { %v8522_v35 = vpop.eup %8521  ;;  %v1639_v28 = vsel %vm1583_vm5, %v10290_v1, %v1625_v55  ;;  %v1623_v29 = vmul.f32 0.6931472, %v8520_v18  ;;  %8539 = vpow2.f32 %v1810_v23  ;;  %v1808_v46 = vmul.f32 1.442695, %v1796_v63 }
 0x290   : > { %v8524_v24 = vpop.eup %8523  ;;  %1647 = vst [vmem:[#allocation4 + $0x8] sm:$0xff] %v1639_v28  ;;  %v1827_v41 = vmul.f32 0.6931472, %v8522_v35  ;;  %8541 = vlog2.f32 %v1619_v48  ;;  %v1799_v38 = vmin.f32 %v10348_v40, 20.0  ;;  %v10357_v1 = vadd.f32 %v10287_v52, %v1775_v54 }
 0x291   : > { %v8526_v27 = vpop.eup %8525  ;;  %v1638_v39 = vsel %vm1582_vm8, %v10294_v11, %v1623_v29  ;;  %v1618_v26 = vadd.f32 1.0, %v8524_v24  ;;  %8543 = vpow2.f32 %v1808_v46  ;;  %vm1584_vm5 = vcmp.gt.f32.partialorder %v10310_v47, 20.0 }
 0x292   : > { %1646 = vst [vmem:[#allocation4] sm:$0xff] %v1638_v39  ;;  %v1841_v33 = vsel %vm1785_vm3, %v10297_v19, %v1827_v41  ;;  %v1825_v36 = vmul.f32 0.6931472, %v8526_v27  ;;  %v1814_v57 = vmul.f32 1.442695, %v1799_v38  ;;  %v1798_v15 = vmin.f32 %v10357_v1, 20.0 }
 0x293   : > { %1850 = vst [vmem:[#allocation4 + $0x48] sm:$0xff] %v1841_v33  ;;  %8545 = vlog2.f32 %v1618_v26  ;;  %vm1787_vm8 = vcmp.gt.f32.partialorder %v10313_v22, 20.0  ;;  %vm1786_vm3 = vcmp.gt.f32.partialorder %v10318_v50, 20.0  ;;  %v10387_v24 = vmov 0.0  }
 0x294   : > { %v8528_v13 = vpop.eup %8527  ;;  %v1840_v31 = vsel %vm1784_vm0, %v10302_v10, %v1825_v36  ;;  %8547 = vpow2.f32 %v1814_v57  ;;  %v1812_v52 = vmul.f32 1.442695, %v1798_v15  ;;  %vm1587_vm0 = vcmp.gt.f32.partialorder %v10322_v44, 20.0 }
 0x295   : > { %v8530_v11 = vpop.eup %8529  ;;  %1849 = vst [vmem:[#allocation4 + $0x40] sm:$0xff] %v1840_v31  ;;  %v1629_v20 = vmul.f32 0.6931472, %v8528_v13  ;;  %v10389_v41 = vmov 0.0   ;;  %v10391_v38 = vmov 0.0   ;;  %v10395_v27 = vmov 0.0  }
 0x296   : > { %v8532_v12 = vpop.eup %8531  ;;  %v1621_v19 = vadd.f32 1.0, %v8530_v11  ;;  %8549 = vpow2.f32 %v1812_v52  ;;  %v10397_v39 = vmov 0.0   ;;  %v10401_v26 = vmov 0.0  }
 0x297   : > { %v8534_v51 = vpop.eup %8533  ;;  %v1641_v5 = vsel %vm1585_vm7, %v10306_v25, %v1629_v20  ;;  %v1627_v60 = vmul.f32 0.6931472, %v8532_v12  ;;  %vm1586_vm7 = vcmp.gt.f32.partialorder %v10326_v61, 20.0  ;;  %v10403_v33 = vmov 0.0  }
 0x298   : > { %v8536_v45 = vpop.eup %8535  ;;  %1649 = vst [vmem:[#allocation4 + $0x18] sm:$0xff] %v1641_v5  ;;  %v1831_v58 = vmul.f32 0.6931472, %v8534_v51  ;;  %8551 = vlog2.f32 %v1621_v19  ;;  %v10407_v36 = vmov 0.0   ;;  %v10409_v57 = vmov 0.0  }
 0x299   : > { %v8538_v10 = vpop.eup %8537  ;;  %v1640_v3 = vsel %vm1584_vm5, %v10310_v47, %v1627_v60  ;;  %v1620_v8 = vadd.f32 1.0, %v8536_v45  ;;  %vm1589_vm5 = vcmp.gt.f32.partialorder %v10330_v56, 20.0  ;;  %v10411_v15 = vmov 0.0  }
 0x29a   : > { %1648 = vst [vmem:[#allocation4 + $0x10] sm:$0xff] %v1640_v3  ;;  %v1843_v21 = vsel %vm1787_vm8, %v10313_v22, %v1831_v58  ;;  %v1829_v42 = vmul.f32 0.6931472, %v8538_v10  ;;  %vm1588_vm8 = vcmp.gt.f32.partialorder %v10334_v4, 20.0  ;;  %v10413_v13 = vmov 0.0  }
 0x29b   : > { %1852 = vst [vmem:[#allocation4 + $0x58] sm:$0xff] %v1843_v21  ;;  %8553 = vlog2.f32 %v1620_v8  ;;  %v10415_v31 = vmov 0.0   ;;  %v10417_v11 = vmov 0.0   ;;  %v10419_v20 = vmov 0.0  }
 0x29c   : > { %v8540_v25 = vpop.eup %8539  ;;  %v1842_v9 = vsel %vm1786_vm3, %v10318_v50, %v1829_v42  ;;  %vm1789_vm3 = vcmp.gt.f32.partialorder %v10338_v16, 20.0  ;;  %v10421_v52 = vmov 0.0   ;;  %v10423_v12 = vmov 0.0  }
 0x29d   : > { %v8542_v43 = vpop.eup %8541  ;;  %1851 = vst [vmem:[#allocation4 + $0x50] sm:$0xff] %v1842_v9  ;;  %v1821_v30 = vadd.f32 1.0, %v8540_v25  ;;  %v10425_v19 = vmov 0.0   ;;  %v10427_v51 = vmov 0.0   ;;  %v10429_v5 = vmov 0.0  }
 0x29e   : > { %v8544_v7 = vpop.eup %8543  ;;  %v1633_v32 = vmul.f32 0.6931472, %v8542_v43  ;;  %v10431_v60 = vmov 0.0   ;;  %v10433_v45 = vmov 0.0   ;;  %v10435_v58 = vmov 0.0  }
 0x29f   : > { %8555 = vlog2.f32 %v1821_v30  ;;  %v1820_v47 = vadd.f32 1.0, %v8544_v7  ;;  %v10437_v10 = vmov 0.0   ;;  %v10439_v3 = vmov 0.0  }
 0x2a0   : > { %v8546_v6 = vpop.eup %8545  ;;  %v1643_v22 = vsel %vm1587_vm0, %v10322_v44, %v1633_v32  ;;  %vm1788_vm0 = vcmp.gt.f32.partialorder %v10342_v0, 20.0  ;;  %v10441_v8 = vmov 0.0   ;;  %v10443_v21 = vmov 0.0  }
 0x2a1   : > { %v8548_v17 = vpop.eup %8547  ;;  %1651 = vst [vmem:[#allocation4 + $0x28] sm:$0xff] %v1643_v22  ;;  %v1631_v62 = vmul.f32 0.6931472, %v8546_v6  ;;  %8557 = vlog2.f32 %v1820_v47  ;;  %v10445_v42 = vmov 0.0   ;;  %v10447_v25 = vmov 0.0  }
 0x2a2   : > { %v1823_v37 = vadd.f32 1.0, %v8548_v17  ;;  %v10449_v9 = vmov 0.0  }
 0x2a3   : > { %v1642_v50 = vsel %vm1586_vm7, %v10326_v61, %v1631_v62  ;;  %v8550_v59 = vpop.eup %8549  ;;  %vm1791_vm7 = vcmp.gt.f32.partialorder %v10348_v40, 20.0 }
 0x2a4   : > { %1650 = vst [vmem:[#allocation4 + $0x20] sm:$0xff] %v1642_v50  ;;  %8559 = vlog2.f32 %v1823_v37  ;;  %v1822_v14 = vadd.f32 1.0, %v8550_v59 }
 0x2a5   : > { %v8552_v53 = vpop.eup %8551 }
 0x2a6   : > { %v1637_v49 = vmul.f32 0.6931472, %v8552_v53  ;;  %8561 = vlog2.f32 %v1822_v14 }
 0x2a8   : > { %v8554_v34 = vpop.eup %8553  ;;  %v1645_v44 = vsel %vm1589_vm5, %v10330_v56, %v1637_v49  ;;  %vm1790_vm5 = vcmp.gt.f32.partialorder %v10357_v1, 20.0 }
 0x2a9   : > { %1653 = vst [vmem:[#allocation4 + $0x38] sm:$0xff] %v1645_v44  ;;  %v1635_v55 = vmul.f32 0.6931472, %v8554_v34 }
 0x2ab   : > { %v1644_v23 = vsel %vm1588_vm8, %v10334_v4, %v1635_v55 }
 0x2ac   : > { %v8556_v63 = vpop.eup %8555  ;;  %1652 = vst [vmem:[#allocation4 + $0x30] sm:$0xff] %v1644_v23 }
 0x2ad   : > { %v1835_v61 = vmul.f32 0.6931472, %v8556_v63 }
 0x2ae   : > { %v8558_v18 = vpop.eup %8557 }
 0x2af   : > { %v1845_v48 = vsel %vm1789_vm3, %v10338_v16, %v1835_v61  ;;  %v1833_v54 = vmul.f32 0.6931472, %v8558_v18 }
 0x2b0   : > { %1854 = vst [vmem:[#allocation4 + $0x68] sm:$0xff] %v1845_v48 }
 0x2b1   : > { %v8560_v35 = vpop.eup %8559  ;;  %v1844_v56 = vsel %vm1788_vm0, %v10342_v0, %v1833_v54  ;;  %v10393_v0 = vmov 0.0  }
 0x2b2   : > { %1853 = vst [vmem:[#allocation4 + $0x60] sm:$0xff] %v1844_v56  ;;  %v1839_v28 = vmul.f32 0.6931472, %v8560_v35 }
 0x2b3   : > { %v8562_v4 = vpop.eup %8561 }
 0x2b4   : > { %v1847_v29 = vsel %vm1791_vm7, %v10348_v40, %v1839_v28  ;;  %v1837_v46 = vmul.f32 0.6931472, %v8562_v4  ;;  %v10399_v40 = vmov 0.0  }
 0x2b5   : > { %1856 = vst [vmem:[#allocation4 + $0x78] sm:$0xff] %v1847_v29 }
 0x2b6   : > { %v1846_v16 = vsel %vm1790_vm5, %v10357_v1, %v1837_v46  ;;  %v10405_v1 = vmov 0.0  }
 0x2b7   : > { %1855 = vst [vmem:[#allocation4 + $0x70] sm:$0xff] %v1846_v16 }
 0x2b8 LB: >> { %v13470_v2 = vld [vmem:[#allocation6_spill] sm:$0xff]  ;;  %13471 = vst [vmem:[#allocation68_spill] sm:$0xff] %v8809_v24  ;;  %13472 = vst [vmem:[#allocation69_spill] sm:$0xff] %v8813_v41  ;;  %s10553_s18 = sshll.u32 %s8937_s0, 3  ;;  %s2110_s19 = ssub.s32 7, %s8937_s0  ;;  %v8942_v7 = vmov 1.0   ;;  %v8809_v24 = vphi %v10387_v24, %v6840_v24   ;;  %s8937_s0 = sphi %s10451_s0, %s13733_s0   ;;  %v8933_v9 = vphi %v10449_v9, %v13732_v9   ;;  %v8929_v25 = vphi %v10447_v25, %v13731_v25   ;;  %v8925_v42 = vphi %v10445_v42, %v13730_v42   ;;  %v8921_v21 = vphi %v10443_v21, %v13729_v21   ;;  %v8917_v8 = vphi %v10441_v8, %v13728_v8   ;;  %v8913_v3 = vphi %v10439_v3, %v13727_v3   ;;  %v8909_v10 = vphi %v10437_v10, %v13726_v10   ;;  %v8905_v58 = vphi %v10435_v58, %v13725_v58   ;;  %v8901_v45 = vphi %v10433_v45, %v13724_v45   ;;  %v8897_v60 = vphi %v10431_v60, %v13723_v60   ;;  %v8893_v5 = vphi %v10429_v5, %v13722_v5   ;;  %v8889_v51 = vphi %v10427_v51, %v13721_v51   ;;  %v8885_v19 = vphi %v10425_v19, %v13720_v19   ;;  %v8881_v12 = vphi %v10423_v12, %v13719_v12   ;;  %v8877_v52 = vphi %v10421_v52, %v12483_v52   ;;  %v8873_v20 = vphi %v10419_v20, %v12556_v20   ;;  %v8869_v11 = vphi %v10417_v11, %v13718_v11   ;;  %v8865_v31 = vphi %v10415_v31, %v13717_v31   ;;  %v8861_v13 = vphi %v10413_v13, %v13716_v13   ;;  %v8857_v15 = vphi %v10411_v15, %v13715_v15   ;;  %v8853_v57 = vphi %v10409_v57, %v11940_v57   ;;  %v8849_v36 = vphi %v10407_v36, %v11979_v36   ;;  %v8845_v1 = vphi %v10405_v1, %v11972_v1   ;;  %v8841_v33 = vphi %v10403_v33, %v12039_v33   ;;  %v8837_v26 = vphi %v10401_v26, %v13714_v26   ;;  %v8833_v40 = vphi %v10399_v40, %v12331_v40   ;;  %v8829_v39 = vphi %v10397_v39, %v13713_v39   ;;  %v8825_v27 = vphi %v10395_v27, %v13712_v27   ;;  %v8821_v0 = vphi %v10393_v0, %v13711_v0   ;;  %v8817_v38 = vphi %v10391_v38, %v13710_v38   ;;  %v8813_v41 = vphi %v10389_v41, %v6839_v41  }
 0x2b9   : >> { %13473 = vst [vmem:[#allocation70_spill] sm:$0xff] %v8817_v38  ;;  %13474 = vst [vmem:[#allocation71_spill] sm:$0xff] %v8821_v0  ;;  %s2117_s22 = sshra.s32 %s10553_s18, 3  ;;  %s8940_s17 = smov 127   ;;  %v13487_v32 = vld [vmem:[#allocation31_spill] sm:$0xff]  ;;  %v13489_v47 = vld [vmem:[#allocation33_spill] sm:$0xff] }
 0x2ba   : >> { %13475 = vst [vmem:[#allocation72_spill] sm:$0xff] %v8825_v27  ;;  %13476 = vst [vmem:[#allocation73_spill] sm:$0xff] %v8829_v39  ;;  %s7904_s1 = sshll.u32 %s2117_s22, 4  ;;  %s10557_s23 = sshll.u32 %s2110_s19, 3  ;;  %vm13488_vm8 = vnez %v13487_v32  ;;  %vm13490_vm3 = vnez %v13489_v47  ;;  %v13491_v6 = vld [vmem:[#allocation30_spill] sm:$0xff]  ;;  %v13493_v22 = vld [vmem:[#allocation32_spill] sm:$0xff] }
 0x2bb   : >> { %13477 = vst [vmem:[#allocation74_spill] sm:$0xff] %v8833_v40  ;;  %13478 = vst [vmem:[#allocation75_spill] sm:$0xff] %v8837_v26  ;;  %s2121_s28 = scalar_lea.vmem [#allocation3], %s7904_s1  ;;  %s2129_s24 = sshra.s32 %s10557_s23, 3  ;;  %7720 = vmatprep.subr.msk.mxu0 %vm13488_vm8, %v8942_v7  ;;  %7725 = vmatprep.subr.msk.mxu1 %vm13490_vm3, %v8942_v7  ;;  %vm13492_vm0 = vnez %v13491_v6  ;;  %vm13494_vm7 = vnez %v13493_v22  ;;  %v13495_v17 = vld [vmem:[#allocation27_spill] sm:$0xff]  ;;  %v13497_v62 = vld [vmem:[#allocation29_spill] sm:$0xff] }
 0x2bc   : >> { %13479 = vst [vmem:[#allocation76_spill] sm:$0xff] %v8873_v20  ;;  %13480 = vst [vmem:[#allocation77_spill] sm:$0xff] %v8877_v52  ;;  %v2122_v43 = vld [vmem:[%s2121_s28] sm:$0xff]  ;;  %s8941_s26 = smov 111   ;;  %s7905_s27 = sshll.u32 %s2129_s24, 4  ;;  %7721 = vmatpush1.msk.msra.mxu0 %vm13492_vm0, %v8942_v7  ;;  %7726 = vmatpush1.msk.msra.mxu1 %vm13494_vm7, %v8942_v7  ;;  %vm13496_vm5 = vnez %v13495_v17  ;;  %vm13498_vm1 = vnez %v13497_v62  ;;  %v13128_v50 = vmov 0.0  }
 0x2bd   : >> { %13481 = vst [vmem:[#allocation78_spill] sm:$0xff] %v8881_v12  ;;  %13482 = vst [vmem:[#allocation79_spill] sm:$0xff] %v8885_v19  ;;  %2139 = vrot.lane.b32.xlu0 %v2122_v43, %s8940_s17  ;;  %s2133_s29 = scalar_lea.vmem [#allocation3], %s7905_s27  ;;  %7722 = vmatprep.subr.msk.mxu0 %vm13496_vm5, %v8942_v7  ;;  %v13499_v37 = vld [vmem:[#allocation26_spill] sm:$0xff]  ;;  %v13501_v59 = vld [vmem:[#allocation28_spill] sm:$0xff]  ;;  %vm13120_vm6 = vcmask 130048  }
 0x2be   : >> { %13483 = vst [vmem:[#allocation80_spill] sm:$0xff] %v8889_v51  ;;  %13484 = vst [vmem:[#allocation81_spill] sm:$0xff] %v8893_v5  ;;  %v2134_v30 = vld [vmem:[%s2133_s29 + $0x8] sm:$0xff]  ;;  %7727 = vmatprep.subr.msk.mxu1 %vm13498_vm1, %v8942_v7  ;;  %vm13500_vm10 = vnez %v13499_v37  ;;  %2208 = vmatprep.mubr.f32.mxu0 %v13128_v50  ;;  %vm13502_vm14 = vnez %v13501_v59  ;;  %v13505_v55 = vld [vmem:[#allocation41_spill] sm:$0xff]  ;;  %v13547_v6 = vmov 0.0   ;;  %s2112_s19 = scalar_lea.vmem [#allocation4], %s10553_s18 }
 0x2bf   : >> { %13485 = vst [vmem:[#allocation82_spill] sm:$0xff] %v8897_v60  ;;  %13486 = vst [vmem:[#allocation83_spill] sm:$0xff] %v8901_v45  ;;  %2433 = vrot.lane.b32.xlu1 %v2134_v30, %s8940_s17  ;;  %7723 = vmatpush1.msk.msra.mxu0 %vm13500_vm10, %v8942_v7  ;;  %v13503_v44 = vld [vmem:[#allocation39_spill] sm:$0xff]  ;;  %vm13506_vm9 = vnez %v13505_v55  ;;  %v13511_v18 = vld [vmem:[#allocation37_spill] sm:$0xff]  ;;  %s7464_s28 = scalar_lea.vmem [#allocation4], %s10557_s23  ;;  %s2114_s27 = scalar_lea.vmem [#allocation2], %s10553_s18 }
 0x2c0   : >> { %7728 = vmatpush1.msk.msra.mxu1 %vm13502_vm14, %v8942_v7  ;;  %2279 = vmatprep.mubr.f32.mxu1 %v13128_v50  ;;  %vm13504_vm2 = vnez %v13503_v44  ;;  %v13509_v61 = vld [vmem:[#allocation35_spill] sm:$0xff]  ;;  %vm13512_vm4 = vnez %v13511_v18  ;;  %v13513_v48 = vld [vmem:[#allocation34_spill] sm:$0xff]  ;;  %v13526_v4 = vld [vmem:[#allocation45_spill] sm:$0xff]  ;;  %s2126_s29 = scalar_lea.vmem [#allocation2], %s10557_s23  ;;  %v2824_v12 = vrot.slane %v8865_v31, 1  ;;  %v4001_v19 = vrot.slane %v8909_v10, 7 }
 0x2c1   : >> { %2286 = vrot.lane.b32.xlu0 %v2122_v43, %s8941_s26  ;;  %7730 = vmatprep.subr.msk.mxu0 %vm13488_vm8, %v8942_v7  ;;  %v13522_v56 = vld [vmem:[#allocation46_spill] sm:$0xff]  ;;  %v13533_v29 = vld [vmem:[#allocation52_spill] sm:$0xff]  ;;  %v13537_v16 = vld [vmem:[#allocation51_spill] sm:$0xff]  ;;  %s6867_s30 = scalar_lea.vmem [#allocation5], %s10553_s18  ;;  %s6871_s18 = scalar_lea.vmem [#allocation5], %s10557_s23 }
 0x2c2   : >> { %7735 = vmatprep.subr.msk.mxu1 %vm13490_vm3, %v8942_v7  ;;  %v13524_v28 = vld [vmem:[#allocation42_spill] sm:$0xff]  ;;  %v13535_v46 = vld [vmem:[#allocation56_spill] sm:$0xff]  ;;  %v13548_v17 = vld [vmem:[#allocation49_spill] sm:$0xff]  ;;  %s2076_s22 = sadd.s32 1, %s8937_s0  }
 0x2c3   : >> { %2579 = vrot.lane.b32.xlu1 %v2134_v30, %s8941_s26  ;;  %v13539_v43 = vld [vmem:[#allocation54_spill] sm:$0xff]  ;;  %v13541_v30 = vld [vmem:[#allocation48_spill] sm:$0xff]  ;;  %p12677_p4 = scmp.ge.s32.totalorder %s2076_s22, 8   ;;  %s13733_s0 = smov %s2076_s22 }
 0x32f   : >> { %v10592_v53 = vpop.permute.xlu0 %2139 }
 0x330   : >> { %7724 = vmatmul.mubr.msk.f32.vlgmr.msra.gmra.mxu0 %vm13120_vm6, %v10592_v53  ;;  %7729 = vmatmul.mubr.msk.f32.vlgmr.msra.gmra.mxu1 %vm13120_vm6, %v10592_v53 }
 0x331   : >> { %7731 = vmatpush1.msk.msra.mxu0 %vm13492_vm0, %v8942_v7  ;;  %7736 = vmatpush1.msk.msra.mxu1 %vm13494_vm7, %v8942_v7  ;;  %v10642_v49 = vpop.permute.xlu1 %2433 }
 0x332   : >> { %7732 = vmatprep.subr.msk.mxu0 %vm13496_vm5, %v8942_v7  ;;  %7737 = vmatprep.subr.msk.mxu1 %vm13498_vm1, %v8942_v7 }
 0x333   : >> { %7733 = vmatpush1.msk.msra.mxu0 %vm13500_vm10, %v8942_v7  ;;  %2354 = vmatprep.mubr.f32.mxu0 %v13128_v50  ;;  %v10614_v14 = vpop.permute.xlu0 %2286 }
 0x334   : >> { %7738 = vmatpush1.msk.msra.mxu1 %vm13502_vm14, %v8942_v7  ;;  %2425 = vmatprep.mubr.f32.mxu1 %v13128_v50 }
 0x335   : >> { %7734 = vmatmul.mubr.msk.f32.vlgmr.msra.gmra.mxu0 %vm13120_vm6, %v10614_v14  ;;  %7739 = vmatmul.mubr.msk.f32.vlgmr.msra.gmra.mxu1 %vm13120_vm6, %v10614_v14  ;;  %v10674_v34 = vpop.permute.xlu1 %2579 }
 0x336   : >> { %7740 = vmatprep.subr.msk.mxu0 %vm13488_vm8, %v8942_v7  ;;  %7745 = vmatprep.subr.msk.mxu1 %vm13490_vm3, %v8942_v7 }
 0x337   : >> { %7741 = vmatpush1.msk.msra.mxu0 %vm13492_vm0, %v8942_v7  ;;  %7746 = vmatpush1.msk.msra.mxu1 %vm13494_vm7, %v8942_v7 }
 0x338   : >> { %7742 = vmatprep.subr.msk.mxu0 %vm13496_vm5, %v8942_v7  ;;  %7747 = vmatprep.subr.msk.mxu1 %vm13498_vm1, %v8942_v7 }
 0x339   : >> { %7743 = vmatpush1.msk.msra.mxu0 %vm13500_vm10, %v8942_v7  ;;  %2501 = vmatprep.mubr.f32.mxu0 %v13128_v50 }
 0x33a   : >> { %7748 = vmatpush1.msk.msra.mxu1 %vm13502_vm14, %v8942_v7  ;;  %2572 = vmatprep.mubr.f32.mxu1 %v13128_v50 }
 0x33b   : >> { %7744 = vmatmul.mubr.msk.f32.vlgmr.msra.gmra.mxu0 %vm13120_vm6, %v10642_v49  ;;  %7749 = vmatmul.mubr.msk.f32.vlgmr.msra.gmra.mxu1 %vm13120_vm6, %v10642_v49 }
 0x33c   : >> { %7750 = vmatprep.subr.msk.mxu0 %vm13488_vm8, %v8942_v7  ;;  %7755 = vmatprep.subr.msk.mxu1 %vm13490_vm3, %v8942_v7  ;;  %vm13516_vm3 = vcmask 130048   ;;  %vm13550_vm8 = vcmask 130048  }
 0x33d   : >> { %7751 = vmatpush1.msk.msra.mxu0 %vm13492_vm0, %v8942_v7  ;;  %7756 = vmatpush1.msk.msra.mxu1 %vm13494_vm7, %v8942_v7  ;;  %vm13510_vm0 = vnez %v13509_v61  ;;  %vm13517_vm7 = vmmov %vm13516_vm3 }
 0x33e   : >> { %7752 = vmatprep.subr.msk.mxu0 %vm13496_vm5, %v8942_v7  ;;  %7757 = vmatprep.subr.msk.mxu1 %vm13498_vm1, %v8942_v7 }
 0x33f   : >> { %7753 = vmatpush1.msk.msra.mxu0 %vm13500_vm10, %v8942_v7  ;;  %2647 = vmatprep.mubr.f32.mxu0 %v13128_v50 }
 0x340   : >> { %7758 = vmatpush1.msk.msra.mxu1 %vm13502_vm14, %v8942_v7  ;;  %2718 = vmatprep.mubr.f32.mxu1 %v13128_v50 }
 0x341   : >> { %7754 = vmatmul.mubr.msk.f32.vlgmr.msra.gmra.mxu0 %vm13120_vm6, %v10674_v34  ;;  %7759 = vmatmul.mubr.msk.f32.vlgmr.msra.gmra.mxu1 %vm13120_vm6, %v10674_v34  ;;  %vm13514_vm6 = vnez %v13513_v48  ;;  %v5695_v48 = vld [vmem:[%s13021_s8 + $0xc] sm:$0xf] }
 0x342   : >> { %7761 = vmatprep.subr.msk.mxu0 %vm13504_vm2, %v8942_v7  ;;  %7766 = vmatprep.subr.msk.mxu1 %vm13506_vm9, %v8942_v7 }
 0x343   : >> { %7762 = vmatpush1.msk.msra.mxu0 %vm9530_vm12, %v8942_v7  ;;  %7767 = vmatpush1.msk.msra.mxu1 %vm9545_vm13, %v8942_v7 }
 0x344   : >> { %7763 = vmatprep.subr.msk.mxu0 %vm13510_vm0, %v8942_v7  ;;  %7768 = vmatprep.subr.msk.mxu1 %vm13512_vm4, %v8942_v7 }
 0x345   : >> { %7764 = vmatpush1.msk.msra.mxu0 %vm13514_vm6, %v8942_v7  ;;  %3417 = vmatprep.mubr.f32.mxu0 %v13128_v50 }
 0x346   : >> { %7769 = vmatpush1.msk.msra.mxu1 %vm9519_vm11, %v8942_v7  ;;  %3488 = vmatprep.mubr.f32.mxu1 %v13128_v50 }
 0x347   : >> { %7765 = vmatmul.mubr.msk.f32.vlgmr.msra.gmra.mxu0 %vm13516_vm3, %v10592_v53  ;;  %7770 = vmatmul.mubr.msk.f32.vlgmr.msra.gmra.mxu1 %vm13517_vm7, %v10592_v53  ;;  %vm13518_vm7 = vmmov %vm13516_vm3 }
 0x348   : >> { %7771 = vmatprep.subr.msk.mxu0 %vm13504_vm2, %v8942_v7  ;;  %7776 = vmatprep.subr.msk.mxu1 %vm13506_vm9, %v8942_v7 }
 0x349   : >> { %7772 = vmatpush1.msk.msra.mxu0 %vm9530_vm12, %v8942_v7  ;;  %7777 = vmatpush1.msk.msra.mxu1 %vm9545_vm13, %v8942_v7 }
 0x34a   : >> { %7773 = vmatprep.subr.msk.mxu0 %vm13510_vm0, %v8942_v7  ;;  %7778 = vmatprep.subr.msk.mxu1 %vm13512_vm4, %v8942_v7 }
 0x34b   : >> { %7774 = vmatpush1.msk.msra.mxu0 %vm13514_vm6, %v8942_v7  ;;  %3559 = vmatprep.mubr.f32.mxu0 %v13128_v50 }
 0x34c   : >> { %7779 = vmatpush1.msk.msra.mxu1 %vm9519_vm11, %v8942_v7  ;;  %3630 = vmatprep.mubr.f32.mxu1 %v13128_v50 }
 0x34d   : >> { %7775 = vmatmul.mubr.msk.f32.vlgmr.msra.gmra.mxu0 %vm13516_vm3, %v10614_v14  ;;  %7780 = vmatmul.mubr.msk.f32.vlgmr.msra.gmra.mxu1 %vm13518_vm7, %v10614_v14  ;;  %vm13519_vm7 = vmmov %vm13516_vm3 }
 0x34e   : >> { %7781 = vmatprep.subr.msk.mxu0 %vm13504_vm2, %v8942_v7  ;;  %7786 = vmatprep.subr.msk.mxu1 %vm13506_vm9, %v8942_v7 }
 0x34f   : >> { %7782 = vmatpush1.msk.msra.mxu0 %vm9530_vm12, %v8942_v7  ;;  %7787 = vmatpush1.msk.msra.mxu1 %vm9545_vm13, %v8942_v7 }
 0x350   : >> { %7783 = vmatprep.subr.msk.mxu0 %vm13510_vm0, %v8942_v7  ;;  %7788 = vmatprep.subr.msk.mxu1 %vm13512_vm4, %v8942_v7 }
 0x351   : >> { %7784 = vmatpush1.msk.msra.mxu0 %vm13514_vm6, %v8942_v7  ;;  %3701 = vmatprep.mubr.f32.mxu0 %v13128_v50 }
 0x352   : >> { %7789 = vmatpush1.msk.msra.mxu1 %vm9519_vm11, %v8942_v7  ;;  %3772 = vmatprep.mubr.f32.mxu1 %v13128_v50 }
 0x353   : >> { %7785 = vmatmul.mubr.msk.f32.vlgmr.msra.gmra.mxu0 %vm13516_vm3, %v10642_v49  ;;  %7790 = vmatmul.mubr.msk.f32.vlgmr.msra.gmra.mxu1 %vm13519_vm7, %v10642_v49  ;;  %vm13520_vm7 = vmmov %vm13516_vm3 }
 0x354   : >> { %7791 = vmatprep.subr.msk.mxu0 %vm13504_vm2, %v8942_v7  ;;  %7796 = vmatprep.subr.msk.mxu1 %vm13506_vm9, %v8942_v7  ;;  %vm13528_vm2 = vcmask 130048   ;;  %vm13551_vm9 = vmmov %vm13550_vm8 }
 0x355   : >> { %7792 = vmatpush1.msk.msra.mxu0 %vm9530_vm12, %v8942_v7  ;;  %7797 = vmatpush1.msk.msra.mxu1 %vm9545_vm13, %v8942_v7  ;;  %vm6885_vm12 = vcmask (%p12677_p4), 64512  }
 0x356   : >> { %7793 = vmatprep.subr.msk.mxu0 %vm13510_vm0, %v8942_v7  ;;  %7798 = vmatprep.subr.msk.mxu1 %vm13512_vm4, %v8942_v7  ;;  %vm13527_vm0 = vnez %v13526_v4  ;;  %vm13529_vm4 = vmmov %vm13528_vm2  ;;  %v13545_v4 = vld [vmem:[#allocation47_spill] sm:$0xff] }
 0x357   : >> { %7794 = vmatpush1.msk.msra.mxu0 %vm13514_vm6, %v8942_v7  ;;  %3843 = vmatprep.mubr.f32.mxu0 %v13128_v50  ;;  %vm13546_vm6 = vnez %v13545_v4 }
 0x358   : >> { %7799 = vmatpush1.msk.msra.mxu1 %vm9519_vm11, %v8942_v7  ;;  %3914 = vmatprep.mubr.f32.mxu1 %v13128_v50  ;;  %vm7343_vm11 = vcmask (%p12677_p4), 1043456  }
 0x359   : >> { %7795 = vmatmul.mubr.msk.f32.vlgmr.msra.gmra.mxu0 %vm13516_vm3, %v10674_v34  ;;  %7800 = vmatmul.mubr.msk.f32.vlgmr.msra.gmra.mxu1 %vm13520_vm7, %v10674_v34  ;;  %vm13523_vm3 = vnez %v13522_v56  ;;  %vm13525_vm7 = vnez %v13524_v28 }
 0x35a   : >> { %7802 = vmatprep.subr.msk.mxu0 %vm13496_vm5, %v8942_v7  ;;  %7807 = vmatprep.subr.msk.mxu1 %vm13498_vm1, %v8942_v7 }
 0x35b   : >> { %7803 = vmatpush1.msk.msra.mxu0 %vm13500_vm10, %v8942_v7  ;;  %7808 = vmatpush1.msk.msra.mxu1 %vm13502_vm14, %v8942_v7 }
 0x35c   : >> { %7804 = vmatprep.subr.msk.mxu0 %vm9612_vm15, %v8942_v7  ;;  %7809 = vmatprep.subr.msk.mxu1 %vm13523_vm3, %v8942_v7 }
 0x35d   : >> { %7805 = vmatpush1.msk.msra.mxu0 %vm13525_vm7, %v8942_v7  ;;  %4589 = vmatprep.mubr.f32.mxu0 %v13128_v50 }
 0x35e   : >> { %7810 = vmatpush1.msk.msra.mxu1 %vm13527_vm0, %v8942_v7  ;;  %4660 = vmatprep.mubr.f32.mxu1 %v13128_v50 }
 0x35f   : >> { %7806 = vmatmul.mubr.msk.f32.vlgmr.msra.gmra.mxu0 %vm13528_vm2, %v10592_v53  ;;  %7811 = vmatmul.mubr.msk.f32.vlgmr.msra.gmra.mxu1 %vm13529_vm4, %v10592_v53  ;;  %vm13530_vm4 = vmmov %vm13528_vm2 }
 0x360   : >> { %7812 = vmatprep.subr.msk.mxu0 %vm13496_vm5, %v8942_v7  ;;  %7817 = vmatprep.subr.msk.mxu1 %vm13498_vm1, %v8942_v7 }
 0x361   : >> { %7813 = vmatpush1.msk.msra.mxu0 %vm13500_vm10, %v8942_v7  ;;  %7818 = vmatpush1.msk.msra.mxu1 %vm13502_vm14, %v8942_v7 }
 0x362   : >> { %7814 = vmatprep.subr.msk.mxu0 %vm9612_vm15, %v8942_v7  ;;  %7819 = vmatprep.subr.msk.mxu1 %vm13523_vm3, %v8942_v7 }
 0x363   : >> { %7815 = vmatpush1.msk.msra.mxu0 %vm13525_vm7, %v8942_v7  ;;  %4731 = vmatprep.mubr.f32.mxu0 %v13128_v50 }
 0x364   : >> { %7820 = vmatpush1.msk.msra.mxu1 %vm13527_vm0, %v8942_v7  ;;  %4802 = vmatprep.mubr.f32.mxu1 %v13128_v50 }
 0x365   : >> { %7816 = vmatmul.mubr.msk.f32.vlgmr.msra.gmra.mxu0 %vm13530_vm4, %v10614_v14  ;;  %7821 = vmatmul.mubr.msk.f32.vlgmr.msra.gmra.mxu1 %vm13528_vm2, %v10614_v14  ;;  %vm13531_vm4 = vmmov %vm13528_vm2 }
 0x366   : >> { %7822 = vmatprep.subr.msk.mxu0 %vm13496_vm5, %v8942_v7  ;;  %7827 = vmatprep.subr.msk.mxu1 %vm13498_vm1, %v8942_v7 }
 0x367   : >> { %7823 = vmatpush1.msk.msra.mxu0 %vm13500_vm10, %v8942_v7  ;;  %7828 = vmatpush1.msk.msra.mxu1 %vm13502_vm14, %v8942_v7 }
 0x368   : >> { %7824 = vmatprep.subr.msk.mxu0 %vm9612_vm15, %v8942_v7  ;;  %7829 = vmatprep.subr.msk.mxu1 %vm13523_vm3, %v8942_v7 }
 0x369   : >> { %7825 = vmatpush1.msk.msra.mxu0 %vm13525_vm7, %v8942_v7  ;;  %4873 = vmatprep.mubr.f32.mxu0 %v13128_v50 }
 0x36a   : >> { %7830 = vmatpush1.msk.msra.mxu1 %vm13527_vm0, %v8942_v7  ;;  %4944 = vmatprep.mubr.f32.mxu1 %v13128_v50 }
 0x36b   : >> { %7826 = vmatmul.mubr.msk.f32.vlgmr.msra.gmra.mxu0 %vm13531_vm4, %v10642_v49  ;;  %7831 = vmatmul.mubr.msk.f32.vlgmr.msra.gmra.mxu1 %vm13528_vm2, %v10642_v49  ;;  %vm13532_vm4 = vmmov %vm13528_vm2 }
 0x36c   : >> { %7832 = vmatprep.subr.msk.mxu0 %vm13496_vm5, %v8942_v7  ;;  %7837 = vmatprep.subr.msk.mxu1 %vm13498_vm1, %v8942_v7  ;;  %vm13534_vm1 = vnez %v13533_v29  ;;  %vm13538_vm5 = vnez %v13537_v16 }
 0x36d   : >> { %7833 = vmatpush1.msk.msra.mxu0 %vm13500_vm10, %v8942_v7  ;;  %7838 = vmatpush1.msk.msra.mxu1 %vm13502_vm14, %v8942_v7 }
 0x36e   : >> { %7834 = vmatprep.subr.msk.mxu0 %vm9612_vm15, %v8942_v7  ;;  %7839 = vmatprep.subr.msk.mxu1 %vm13523_vm3, %v8942_v7  ;;  %vm13536_vm3 = vnez %v13535_v46 }
 0x36f   : >> { %7835 = vmatpush1.msk.msra.mxu0 %vm13525_vm7, %v8942_v7  ;;  %5015 = vmatprep.mubr.f32.mxu0 %v13128_v50  ;;  %vm13549_vm7 = vnez %v13548_v17  ;;  %v11066_v17 = vld [vmem:[%s2112_s19] sm:$0xff] }
 0x370   : >> { %7840 = vmatpush1.msk.msra.mxu1 %vm13527_vm0, %v8942_v7  ;;  %5086 = vmatprep.mubr.f32.mxu1 %v13128_v50  ;;  %vm13540_vm0 = vnez %v13539_v43  ;;  %v13543_v50 = vld [vmem:[#allocation50_spill] sm:$0xff] }
 0x371   : >> { %7836 = vmatmul.mubr.msk.f32.vlgmr.msra.gmra.mxu0 %vm13532_vm4, %v10674_v34  ;;  %7841 = vmatmul.mubr.msk.f32.vlgmr.msra.gmra.mxu1 %vm13528_vm2, %v10674_v34  ;;  %vm13542_vm4 = vnez %v13541_v30  ;;  %vm13544_vm2 = vnez %v13543_v50  ;;  %v4523_v30 = vld [vmem:[%s13021_s8 + $0x8] sm:$0xf] }
 0x372   : >> { %7843 = vmatprep.subr.msk.mxu0 %vm13534_vm1, %v8942_v7  ;;  %7848 = vmatprep.subr.msk.mxu1 %vm13536_vm3, %v8942_v7  ;;  %v5097_v44 = vrot.slane %v4523_v30, %v13470_v2 }
 0x373   : >> { %7844 = vmatpush1.msk.msra.mxu0 %vm13538_vm5, %v8942_v7  ;;  %7849 = vmatpush1.msk.msra.mxu1 %vm13540_vm0, %v8942_v7 }
 0x374   : >> { %7845 = vmatprep.subr.msk.mxu0 %vm13542_vm4, %v8942_v7  ;;  %7850 = vmatprep.subr.msk.mxu1 %vm13544_vm2, %v8942_v7  ;;  %v5114_v59 = vmul.f32 %v5097_v44, %v11066_v17 }
 0x375   : >> { %7846 = vmatpush1.msk.msra.mxu0 %vm13546_vm6, %v8942_v7  ;;  %5761 = vmatprep.mubr.f32.mxu0 %v13547_v6 }
 0x376   : >> { %7851 = vmatpush1.msk.msra.mxu1 %vm13549_vm7, %v8942_v7  ;;  %5832 = vmatprep.mubr.f32.mxu1 %v13547_v6 }
 0x377   : >> { %7847 = vmatmul.mubr.msk.f32.vlgmr.msra.gmra.mxu0 %vm13550_vm8, %v10592_v53  ;;  %7852 = vmatmul.mubr.msk.f32.vlgmr.msra.gmra.mxu1 %vm13551_vm9, %v10592_v53  ;;  %vm13552_vm9 = vmmov %vm13550_vm8  ;;  %v2135_v53 = vld [vmem:[%s13021_s8] sm:$0xf] }
 0x378   : >> { %7853 = vmatprep.subr.msk.mxu0 %vm13534_vm1, %v8942_v7  ;;  %7858 = vmatprep.subr.msk.mxu1 %vm13536_vm3, %v8942_v7 }
 0x379   : >> { %7854 = vmatpush1.msk.msra.mxu0 %vm13538_vm5, %v8942_v7  ;;  %7859 = vmatpush1.msk.msra.mxu1 %vm13540_vm0, %v8942_v7 }
 0x37a   : >> { %7855 = vmatprep.subr.msk.mxu0 %vm13542_vm4, %v8942_v7  ;;  %7860 = vmatprep.subr.msk.mxu1 %vm13544_vm2, %v8942_v7 }
 0x37b   : >> { %7856 = vmatpush1.msk.msra.mxu0 %vm13546_vm6, %v8942_v7  ;;  %5903 = vmatprep.mubr.f32.mxu0 %v13547_v6 }
 0x37c   : >> { %7861 = vmatpush1.msk.msra.mxu1 %vm13549_vm7, %v8942_v7  ;;  %5974 = vmatprep.mubr.f32.mxu1 %v13547_v6 }
 0x37d   : >> { %7857 = vmatmul.mubr.msk.f32.vlgmr.msra.gmra.mxu0 %vm13552_vm9, %v10614_v14  ;;  %7862 = vmatmul.mubr.msk.f32.vlgmr.msra.gmra.mxu1 %vm13550_vm8, %v10614_v14  ;;  %vm13553_vm9 = vmmov %vm13550_vm8  ;;  %v13555_v14 = vld [vmem:[#allocation21_spill] sm:$0xff] }
 0x37e   : >> { %7863 = vmatprep.subr.msk.mxu0 %vm13534_vm1, %v8942_v7  ;;  %7868 = vmatprep.subr.msk.mxu1 %vm13536_vm3, %v8942_v7  ;;  %v11055_v4 = vsub.s32 2, %v13555_v14 }
 0x37f   : >> { %7864 = vmatpush1.msk.msra.mxu0 %vm13538_vm5, %v8942_v7  ;;  %7869 = vmatpush1.msk.msra.mxu1 %vm13540_vm0, %v8942_v7 }
 0x380   : >> { %7865 = vmatprep.subr.msk.mxu0 %vm13542_vm4, %v8942_v7  ;;  %7870 = vmatprep.subr.msk.mxu1 %vm13544_vm2, %v8942_v7  ;;  %13557 = vst [vmem:[#allocation85_spill] sm:$0xff] %v11055_v4  ;;  %v2737_v18 = vrot.slane %v2135_v53, %v11055_v4 }
 0x381   : >> { %7866 = vmatpush1.msk.msra.mxu0 %vm13546_vm6, %v8942_v7  ;;  %6045 = vmatprep.mubr.f32.mxu0 %v13547_v6 }
 0x382   : >> { %7871 = vmatpush1.msk.msra.mxu1 %vm13549_vm7, %v8942_v7  ;;  %6116 = vmatprep.mubr.f32.mxu1 %v13547_v6  ;;  %v2748_v37 = vmul.f32 %v2737_v18, %v11066_v17  ;;  %v5105_v18 = vrot.slane %v4523_v30, %v11055_v4 }
 0x383   : >> { %7867 = vmatmul.mubr.msk.f32.vlgmr.msra.gmra.mxu0 %vm13553_vm9, %v10642_v49  ;;  %7872 = vmatmul.mubr.msk.f32.vlgmr.msra.gmra.mxu1 %vm13550_vm8, %v10642_v49  ;;  %vm13554_vm9 = vmmov %vm13550_vm8  ;;  %v11052_v49 = vsub.s32 1, %v13555_v14 }
 0x384   : >> { %7873 = vmatprep.subr.msk.mxu0 %vm13534_vm1, %v8942_v7  ;;  %7878 = vmatprep.subr.msk.mxu1 %vm13536_vm3, %v8942_v7  ;;  %v2754_v54 = vmul.f32 1.442695, %v2748_v37  ;;  %v7719_v37 = vld [vmem:[%s13021_s8 + $0x10] sm:$0xf] }
 0x385   : >> { %7874 = vmatpush1.msk.msra.mxu0 %vm13538_vm5, %v8942_v7  ;;  %7879 = vmatpush1.msk.msra.mxu1 %vm13540_vm0, %v8942_v7  ;;  %13556 = vst [vmem:[#allocation84_spill] sm:$0xff] %v11052_v49  ;;  %v2733_v16 = vrot.slane %v2135_v53, %v11052_v49  ;;  %v5101_v47 = vrot.slane %v4523_v30, %v11052_v49 }
 0x386   : >> { %7875 = vmatprep.subr.msk.mxu0 %vm13542_vm4, %v8942_v7  ;;  %7880 = vmatprep.subr.msk.mxu1 %vm13544_vm2, %v8942_v7 }
 0x387   : >> { %7876 = vmatpush1.msk.msra.mxu0 %vm13546_vm6, %v8942_v7  ;;  %6187 = vmatprep.mubr.f32.mxu0 %v13547_v6  ;;  %v2747_v32 = vmul.f32 %v2733_v16, %v11066_v17  ;;  %v5115_v61 = vmul.f32 %v5101_v47, %v11066_v17 }
 0x388   : >> { %7881 = vmatpush1.msk.msra.mxu1 %vm13549_vm7, %v8942_v7  ;;  %6258 = vmatprep.mubr.f32.mxu1 %v13547_v6  ;;  %v11058_v7 = vsub.s32 3, %v13555_v14  ;;  %v2729_v6 = vrot.slane %v2135_v53, %v13470_v2 }
 0x389   : >> { %7877 = vmatmul.mubr.msk.f32.vlgmr.msra.gmra.mxu0 %vm13554_vm9, %v10674_v34  ;;  %7882 = vmatmul.mubr.msk.f32.vlgmr.msra.gmra.mxu1 %vm13550_vm8, %v10674_v34  ;;  %v3351_v34 = vld [vmem:[%s13021_s8 + $0x4] sm:$0xf]  ;;  %v2752_v16 = vmul.f32 1.442695, %v2747_v32  ;;  %v6273_v32 = vrot.slane %v5695_v48, %v11052_v49  ;;  %vm13191_vm9 = vcmp.eq.s32.totalorder %v13555_v14, 0  ;;  %vm13201_vm8 = vcmp.eq.s32.totalorder %v13555_v14, 2 }
 0x38a   : >> { %13558 = vst [vmem:[#allocation86_spill] sm:$0xff] %v11058_v7  ;;  %v2741_v22 = vrot.slane %v2135_v53, %v11058_v7  ;;  %v3925_v23 = vrot.slane %v3351_v34, %v13470_v2  ;;  %v2746_v28 = vmul.f32 %v2729_v6, %v11066_v17  ;;  %v3929_v29 = vrot.slane %v3351_v34, %v11052_v49 }
 0x38b   : >> { %v3933_v35 = vrot.slane %v3351_v34, %v11055_v4  ;;  %v3937_v43 = vrot.slane %v3351_v34, %v11058_v7 }
 0x38c   : >> { %v2749_v53 = vmul.f32 %v2741_v22, %v11066_v17  ;;  %v2750_v46 = vmul.f32 1.442695, %v2746_v28  ;;  %v3942_v6 = vmul.f32 %v3925_v23, %v11066_v17  ;;  %v3943_v50 = vmul.f32 %v3929_v29, %v11066_v17 }
 0x38d   : >> { %v3944_v34 = vmul.f32 %v3933_v35, %v11066_v17  ;;  %v5109_v22 = vrot.slane %v4523_v30, %v11058_v7  ;;  %v3945_v28 = vmul.f32 %v3937_v43, %v11066_v17  ;;  %v6269_v23 = vrot.slane %v5695_v48, %v13470_v2 }
 0x38e   : >> { %v2756_v55 = vmul.f32 1.442695, %v2749_v53  ;;  %8563 = vpow2.f32 %v2750_v46  ;;  %v3946_v56 = vmul.f32 1.442695, %v3942_v6  ;;  %v3948_v29 = vmul.f32 1.442695, %v3943_v50 }
 0x38f   : >> { %8565 = vpow2.f32 %v2752_v16  ;;  %v6277_v35 = vrot.slane %v5695_v48, %v11055_v4  ;;  %v3950_v43 = vmul.f32 1.442695, %v3944_v34  ;;  %v5116_v46 = vmul.f32 %v5105_v18, %v11066_v17 }
 0x390   : >> { %8567 = vpow2.f32 %v2754_v54  ;;  %v6281_v30 = vrot.slane %v5695_v48, %v11058_v7  ;;  %v3952_v44 = vmul.f32 1.442695, %v3945_v28  ;;  %v5117_v53 = vmul.f32 %v5109_v22, %v11066_v17  ;;  %v7760_v48 = vld [vmem:[%s13021_s8 + $0x14] sm:$0xf] }
 0x391   : >> { %8569 = vpow2.f32 %v2756_v55  ;;  %v5118_v50 = vmul.f32 1.442695, %v5114_v59  ;;  %v6286_v47 = vmul.f32 %v6269_v23, %v11066_v17  ;;  %v2762_v6 = vrot.slane %v7719_v37, %v13470_v2  ;;  %v11111_v55 = vld [vmem:[%s7464_s28 + $0x40] sm:$0xff] }
 0x392   : >> { %8571 = vpow2.f32 %v3946_v56  ;;  %v5120_v16 = vmul.f32 1.442695, %v5115_v61  ;;  %v6287_v54 = vmul.f32 %v6273_v32, %v11066_v17  ;;  %v2766_v34 = vrot.slane %v7719_v37, %v11052_v49 }
 0x393   : >> { %8573 = vpow2.f32 %v3948_v29  ;;  %v5122_v56 = vmul.f32 1.442695, %v5116_v46  ;;  %v6288_v59 = vmul.f32 %v6277_v35, %v11066_v17  ;;  %v2770_v18 = vrot.slane %v7719_v37, %v11055_v4  ;;  %v7801_v35 = vld [vmem:[%s13021_s8 + $0x18] sm:$0xf] }
 0x394   : >> { %8575 = vpow2.f32 %v3950_v43  ;;  %v5124_v22 = vmul.f32 1.442695, %v5117_v53  ;;  %v6289_v61 = vmul.f32 %v6281_v30, %v11066_v17  ;;  %v2774_v28 = vrot.slane %v7719_v37, %v11058_v7 }
 0x395   : >> { %8577 = vpow2.f32 %v3952_v44  ;;  %v6290_v23 = vmul.f32 1.442695, %v6286_v47  ;;  %v3958_v32 = vrot.slane %v7760_v48, %v13470_v2  ;;  %v2779_v29 = vmul.f32 %v11111_v55, %v2762_v6 }
 0x396   : >> { %8579 = vpow2.f32 %v5118_v50  ;;  %v6292_v62 = vmul.f32 1.442695, %v6287_v54  ;;  %v3962_v43 = vrot.slane %v7760_v48, %v11052_v49  ;;  %v2780_v46 = vmul.f32 %v11111_v55, %v2766_v34 }
 0x397   : >> { %8581 = vpow2.f32 %v5120_v16  ;;  %v6294_v30 = vmul.f32 1.442695, %v6288_v59  ;;  %v3966_v37 = vrot.slane %v7760_v48, %v11055_v4  ;;  %v2781_v44 = vmul.f32 %v11111_v55, %v2770_v18 }
 0x398   : >> { %8583 = vpow2.f32 %v5122_v56  ;;  %v6296_v53 = vmul.f32 1.442695, %v6289_v61  ;;  %v3970_v50 = vrot.slane %v7760_v48, %v11058_v7  ;;  %v2782_v47 = vmul.f32 %v11111_v55, %v2774_v28  ;;  %v7842_v48 = vld [vmem:[%s13021_s8 + $0x1c] sm:$0xf] }
 0x399   : >> { %8585 = vpow2.f32 %v5124_v22  ;;  %v5130_v6 = vrot.slane %v7801_v35, %v13470_v2  ;;  %v2783_v16 = vmul.f32 1.442695, %v2779_v29  ;;  %v3975_v54 = vmul.f32 %v11111_v55, %v3958_v32 }
 0x39a   : >> { %8587 = vpow2.f32 %v6290_v23  ;;  %v5134_v34 = vrot.slane %v7801_v35, %v11052_v49  ;;  %v2785_v56 = vmul.f32 1.442695, %v2780_v46  ;;  %v3976_v59 = vmul.f32 %v11111_v55, %v3962_v43 }
 0x39b   : >> { %v11130_v63 = vpop.eup %8563  ;;  %8589 = vpow2.f32 %v6292_v62  ;;  %v2787_v22 = vmul.f32 1.442695, %v2781_v44  ;;  %v3977_v61 = vmul.f32 %v11111_v55, %v3966_v37  ;;  %v5138_v62 = vrot.slane %v7801_v35, %v11055_v4 }
 0x39c   : >> { %v11134_v18 = vpop.eup %8565  ;;  %8591 = vpow2.f32 %v6294_v30  ;;  %v2789_v23 = vmul.f32 1.442695, %v2782_v47  ;;  %v3978_v32 = vmul.f32 %v11111_v55, %v3970_v50  ;;  %v5142_v43 = vrot.slane %v7801_v35, %v11058_v7 }
 0x39d   : >> { %v11140_v28 = vpop.eup %8567  ;;  %8593 = vpow2.f32 %v6296_v53  ;;  %v3979_v46 = vmul.f32 1.442695, %v3975_v54  ;;  %v5147_v30 = vmul.f32 %v11111_v55, %v5130_v6  ;;  %v6302_v37 = vrot.slane %v7842_v48, %v13470_v2 }
 0x39e   : >> { %v11144_v29 = vpop.eup %8569  ;;  %8595 = vpow2.f32 %v2783_v16  ;;  %v3981_v44 = vmul.f32 1.442695, %v3976_v59  ;;  %v5148_v53 = vmul.f32 %v11111_v55, %v5134_v34  ;;  %v3983_v50 = vmul.f32 1.442695, %v3977_v61 }
 0x39f   : >> { %v11148_v24 = vpop.eup %8571  ;;  %8597 = vpow2.f32 %v2785_v56  ;;  %v6306_v35 = vrot.slane %v7842_v48, %v11052_v49  ;;  %v3985_v16 = vmul.f32 1.442695, %v3978_v32  ;;  %v5149_v6 = vmul.f32 %v11111_v55, %v5138_v62 }
 0x3a0   : >> { %v11152_v38 = vpop.eup %8573  ;;  %8599 = vpow2.f32 %v2787_v22  ;;  %v6310_v0 = vrot.slane %v7842_v48, %v11055_v4  ;;  %v5150_v56 = vmul.f32 %v11111_v55, %v5142_v43  ;;  %v5151_v34 = vmul.f32 1.442695, %v5147_v30 }
 0x3a1   : >> { %13559 = vst [vmem:[#allocation87_spill] sm:$0xff] %v11152_v38  ;;  %v11154_v47 = vpop.eup %8575  ;;  %8601 = vpow2.f32 %v2789_v23  ;;  %v6314_v22 = vrot.slane %v7842_v48, %v11058_v7  ;;  %v5153_v61 = vmul.f32 1.442695, %v5148_v53  ;;  %v6319_v41 = vmul.f32 %v11111_v55, %v6302_v37 }
 0x3a2   : >> { %13560 = vst [vmem:[#allocation88_spill] sm:$0xff] %v11154_v47  ;;  %v11158_v54 = vpop.eup %8577  ;;  %8603 = vpow2.f32 %v3979_v46  ;;  %v5155_v32 = vmul.f32 1.442695, %v5149_v6  ;;  %v6320_v46 = vmul.f32 %v11111_v55, %v6306_v35  ;;  %v5157_v43 = vmul.f32 1.442695, %v5150_v56 }
 0x3a3   : >> { %13561 = vst [vmem:[#allocation89_spill] sm:$0xff] %v11158_v54  ;;  %v11162_v59 = vpop.eup %8579  ;;  %8605 = vpow2.f32 %v3981_v44  ;;  %v6321_v30 = vmul.f32 %v11111_v55, %v6310_v0  ;;  %v6322_v37 = vmul.f32 %v11111_v55, %v6314_v22  ;;  %v6323_v44 = vmul.f32 1.442695, %v6319_v41 }
 0x3a4   : >> { %13562 = vst [vmem:[#allocation90_spill] sm:$0xff] %v11162_v59  ;;  %v11166_v23 = vpop.eup %8581  ;;  %8607 = vpow2.f32 %v3983_v50  ;;  %v6325_v35 = vmul.f32 1.442695, %v6320_v46  ;;  %v2803_v46 = vrot.slane %v8933_v9, 7 }
 0x3a5   : >> { %13563 = vst [vmem:[#allocation91_spill] sm:$0xff] %v11166_v23  ;;  %v11168_v62 = vpop.eup %8583  ;;  %8609 = vpow2.f32 %v3985_v16  ;;  %v6327_v6 = vmul.f32 1.442695, %v6321_v30  ;;  %v6329_v41 = vmul.f32 1.442695, %v6322_v37  ;;  %v2804_v30 = vrot.slane %v8929_v25, 7 }
 0x3a6   : >> { %13564 = vst [vmem:[#allocation92_spill] sm:$0xff] %v11168_v62  ;;  %v11171_v20 = vpop.eup %8585  ;;  %8611 = vpow2.f32 %v5151_v34  ;;  %v2825_v37 = vrot.slane %v8861_v13, 1 }
 0x3a7   : >> { %13565 = vst [vmem:[#allocation93_spill] sm:$0xff] %v11171_v20  ;;  %v11174_v48 = vpop.eup %8587  ;;  %8613 = vpow2.f32 %v5153_v61  ;;  %v2115_v61 = vld [vmem:[%s2114_s27] sm:$0xff] }
 0x3a8   : >> { %13566 = vst [vmem:[#allocation94_spill] sm:$0xff] %v11174_v48  ;;  %v11177_v53 = vpop.eup %8589  ;;  %8615 = vpow2.f32 %v5155_v32  ;;  %v2127_v32 = vld [vmem:[%s2126_s29] sm:$0xff]  ;;  %v3999_v48 = vrot.slane %v8917_v8, 7 }
 0x3a9   : >> { %13567 = vst [vmem:[#allocation95_spill] sm:$0xff] %v11177_v53  ;;  %v11179_v50 = vpop.eup %8591  ;;  %8617 = vpow2.f32 %v5157_v43  ;;  %v2805_v43 = vrot.slane %v8925_v42, 7  ;;  %v11208_v42 = vmul.f32 %v2115_v61, %v11066_v17  ;;  %v11233_v61 = vsub.s32 6, %v13555_v14 }
 0x3aa   : >> { %13568 = vst [vmem:[#allocation96_spill] sm:$0xff] %v11179_v50  ;;  %v11181_v16 = vpop.eup %8593  ;;  %8619 = vpow2.f32 %v6323_v44  ;;  %v2823_v44 = vrot.slane %v8869_v11, 1  ;;  %v2826_v50 = vrot.slane %v8857_v15, 1  ;;  %v2811_v11 = vmul.f32 %v11130_v63, %v2803_v46 }
 0x3ab   : >> { %13569 = vst [vmem:[#allocation97_spill] sm:$0xff] %v11181_v16  ;;  %v11183_v56 = vpop.eup %8595  ;;  %8621 = vpow2.f32 %v6325_v35  ;;  %v2806_v16 = vrot.slane %v8921_v21, 7  ;;  %v11211_v21 = vmul.f32 %v11111_v55, %v2127_v32  ;;  %v2813_v13 = vmul.f32 %v11140_v28, %v2805_v43 }
 0x3ac   : >> { %v11185_v0 = vpop.eup %8597  ;;  %8623 = vpow2.f32 %v6327_v6  ;;  %v2812_v6 = vmul.f32 %v11134_v18, %v2804_v30  ;;  %v11222_v52 = vmul.f32 %v11183_v56, %v2823_v44  ;;  %v11244_v44 = vsub.s32 5, %v13555_v14 }
 0x3ad   : >> { %v11187_v34 = vpop.eup %8599  ;;  %13573 = vst [vmem:[#allocation101_spill] sm:$0xff] %v11211_v21  ;;  %8625 = vpow2.f32 %v6329_v41  ;;  %v2814_v31 = vmul.f32 %v11144_v29, %v2806_v16  ;;  %v11230_v41 = vsub.s32 7, %v13555_v14  ;;  %v11236_v32 = vmul.f32 %v11185_v0, %v2824_v12 }
 0x3ae   : >> { %v11189_v22 = vpop.eup %8601  ;;  %v11225_v17 = vmul.f32 %v11187_v34, %v2825_v37  ;;  %v11247_v37 = vsub.s32 4, %v13555_v14 }
 0x3af   : >> { %v11197_v53 = vpop.eup %8603  ;;  %v11239_v16 = vmul.f32 %v11189_v22, %v2826_v50 }
 0x3b0   : >> { %13570 = vst [vmem:[#allocation98_spill] sm:$0xff] %v11197_v53  ;;  %v11201_v35 = vpop.eup %8605 }
 0x3b1   : >> { %13571 = vst [vmem:[#allocation99_spill] sm:$0xff] %v11201_v35  ;;  %v11205_v9 = vpop.eup %8607 }
 0x3b2   : >> { %13572 = vst [vmem:[#allocation100_spill] sm:$0xff] %v11205_v9  ;;  %v11213_v25 = vpop.eup %8609 }
 0x3b3   : >> { %13574 = vst [vmem:[#allocation102_spill] sm:$0xff] %v11213_v25  ;;  %v11219_v15 = vpop.eup %8611 }
 0x3b4   : >> { %13575 = vst [vmem:[#allocation103_spill] sm:$0xff] %v11219_v15  ;;  %v11227_v55 = vpop.eup %8613 }
 0x3b5   : >> { %13576 = vst [vmem:[#allocation104_spill] sm:$0xff] %v11227_v55  ;;  %v11241_v46 = vpop.eup %8615 }
 0x3b6   : >> { %13577 = vst [vmem:[#allocation105_spill] sm:$0xff] %v11241_v46  ;;  %v11251_v27 = vpop.eup %8617 }
 0x3b7   : >> { %13578 = vst [vmem:[#allocation106_spill] sm:$0xff] %v11251_v27  ;;  %v11259_v46 = vpop.eup %8619 }
 0x3b8   : >> { %13579 = vst [vmem:[#allocation107_spill] sm:$0xff] %v11259_v46  ;;  %v11269_v27 = vpop.eup %8621 }
 0x3b9   : >> { %13580 = vst [vmem:[#allocation108_spill] sm:$0xff] %v11269_v27  ;;  %v11283_v51 = vpop.eup %8623  ;;  %v4019_v27 = vrot.slane %v8853_v57, 1  ;;  %v4022_v57 = vrot.slane %v8841_v33, 1 }
 0x3ba   : >> { %13581 = vst [vmem:[#allocation109_spill] sm:$0xff] %v11283_v51  ;;  %v11293_v5 = vpop.eup %8625 }
 0x3bb   : >> { %13582 = vst [vmem:[#allocation110_spill] sm:$0xff] %v11293_v5 }
 0x3f0   : >> { %v2210_v43 = vpop.f32.mrf.mxu0  ;;  %v2281_v30 = vpop.f32.mrf.mxu1 }
 0x3f1   : >> { %v11254_v12 = vmul.f32 %v2210_v43, %v11208_v42  ;;  %v11257_v50 = vmul.f32 %v2281_v30, %v11208_v42  ;;  %v11272_v43 = vmul.f32 %v11148_v24, %v3999_v48  ;;  %v11275_v30 = vmul.f32 %v11154_v47, %v4001_v19 }
 0x3f2   : >> { %v2212_v55 = vpop.f32.mrf.mxu0  ;;  %v2283_v40 = vpop.f32.mrf.mxu1  ;;  %v4002_v48 = vrot.slane %v8905_v58, 7  ;;  %v4021_v19 = vrot.slane %v8845_v1, 1  ;;  %v4020_v58 = vrot.slane %v8849_v36, 1 }
 0x3f3   : >> { %v11262_v39 = vmul.f32 %v2212_v55, %v11208_v42  ;;  %v11265_v15 = vmul.f32 %v2283_v40, %v11208_v42  ;;  %v2815_v10 = vadd.f32 %v2811_v11, %v11254_v12  ;;  %v2817_v8 = vadd.f32 %v2813_v13, %v11257_v50 }
 0x3f4   : >> { %v4000_v13 = vrot.slane %v8913_v3, 7  ;;  %v11310_v36 = vmul.f32 %v11158_v54, %v4002_v48 }
 0x3f5   : >> { %v11277_v26 = vpop.f32.mrf.mxu0  ;;  %v2875_v46 = vrot.slane %v2815_v10, 7  ;;  %v11279_v55 = vpop.f32.mrf.mxu1  ;;  %v2877_v20 = vrot.slane %v2817_v8, 7  ;;  %v2816_v40 = vadd.f32 %v2812_v6, %v11262_v39  ;;  %v2818_v11 = vadd.f32 %v2814_v31, %v11265_v15 }
 0x3f6   : >> { %v2839_v31 = vmul.f32 %v2815_v10, %v11277_v26  ;;  %v2841_v5 = vmul.f32 %v2817_v8, %v11279_v55  ;;  %v11307_v10 = vmul.f32 %v11152_v38, %v4000_v13  ;;  %13583 = vst [vmem:[#allocation111_spill] sm:$0xff] %v11310_v36 }
 0x3f7   : >> { %v2883_v23 = vmul.f32 %v11130_v63, %v2875_v46  ;;  %v2885_v60 = vmul.f32 %v11140_v28, %v2877_v20  ;;  %v11291_v62 = vpop.f32.mrf.mxu0  ;;  %v2876_v59 = vrot.slane %v2816_v40, 7  ;;  %v2878_v6 = vrot.slane %v2818_v11, 7  ;;  %v11302_v51 = vpop.f32.mrf.mxu1 }
 0x3f8   : >> { %v2840_v3 = vmul.f32 %v2816_v40, %v11291_v62  ;;  %v2842_v8 = vmul.f32 %v2818_v11, %v11302_v51 }
 0x3f9   : >> { %v2887_v1 = vadd.f32 %v2883_v23, %v11254_v12  ;;  %v2889_v46 = vadd.f32 %v2885_v60, %v11257_v50  ;;  %v2884_v20 = vmul.f32 %v11134_v18, %v2876_v59  ;;  %v2886_v45 = vmul.f32 %v11144_v29, %v2878_v6 }
 0x3fa   : >> { %v2847_v47 = vadd.f32 %v2840_v3, %v2839_v31  ;;  %v11313_v60 = vmul.f32 %v11197_v53, %v4019_v27  ;;  %v11316_v59 = vmul.f32 %v11205_v9, %v4021_v19  ;;  %v11325_v27 = vmul.f32 %v11201_v35, %v4020_v58 }
 0x3fb   : >> { %v2947_v33 = vrot.slane %v2887_v1, 7  ;;  %v2949_v40 = vrot.slane %v2889_v46, 7  ;;  %v2503_v23 = vpop.f32.mrf.mxu0  ;;  %v2888_v6 = vadd.f32 %v2884_v20, %v11262_v39  ;;  %v2890_v13 = vadd.f32 %v2886_v45, %v11265_v15  ;;  %v2574_v54 = vpop.f32.mrf.mxu1 }
 0x3fc   : >> { %13584 = vst [vmem:[#allocation112_spill] sm:$0xff] %v11313_v60  ;;  %13585 = vst [vmem:[#allocation113_spill] sm:$0xff] %v11316_v59  ;;  %v2849_v31 = vadd.f32 %v2847_v47, %v2841_v5  ;;  %v11328_v19 = vmul.f32 %v11213_v25, %v4022_v57  ;;  %v2911_v20 = vmul.f32 %v2887_v1, %v11277_v26 }
 0x3fd   : >> { %v2955_v48 = vmul.f32 %v11130_v63, %v2947_v33  ;;  %v2957_v3 = vmul.f32 %v11140_v28, %v2949_v40  ;;  %13586 = vst [vmem:[#allocation114_spill] sm:$0xff] %v11325_v27  ;;  %v2912_v11 = vmul.f32 %v2888_v6, %v11291_v62  ;;  %v2948_v5 = vrot.slane %v2888_v6, 7  ;;  %v2505_v9 = vpop.f32.mrf.mxu0 }
 0x3fe   : >> { %13587 = vst [vmem:[#allocation115_spill] sm:$0xff] %v11328_v19  ;;  %v2851_v47 = vadd.f32 %v2849_v31, %v2842_v8  ;;  %v2950_v59 = vrot.slane %v2890_v13, 7  ;;  %v11335_v40 = vmul.f32 %v2503_v23, %v11211_v21  ;;  %v2913_v58 = vmul.f32 %v2889_v46, %v11279_v55 }
 0x3ff   : >> { %v2959_v45 = vadd.f32 %v2955_v48, %v11254_v12  ;;  %v2961_v33 = vadd.f32 %v2957_v3, %v11257_v50  ;;  %v2919_v35 = vadd.f32 %v2912_v11, %v2911_v20  ;;  %v2956_v57 = vmul.f32 %v11134_v18, %v2948_v5  ;;  %v2576_v20 = vpop.f32.mrf.mxu1 }
 0x400   : >> { %v11340_v1 = vmul.f32 %v2574_v54, %v11211_v21  ;;  %v2914_v8 = vmul.f32 %v2890_v13, %v11302_v51  ;;  %v11344_v31 = vmul.f32 %v2505_v9, %v11211_v21  ;;  %v2857_v23 = vrot.slane %v2851_v47, %v13470_v2 }
 0x401   : >> { %v3019_v25 = vrot.slane %v2959_v45, 7  ;;  %v3021_v6 = vrot.slane %v2961_v33, 7  ;;  %v2960_v48 = vadd.f32 %v2956_v57, %v11262_v39  ;;  %v2921_v3 = vadd.f32 %v2919_v35, %v2913_v58 }
 0x402   : >> { %v2958_v46 = vmul.f32 %v11144_v29, %v2950_v59  ;;  %v2983_v54 = vmul.f32 %v2959_v45, %v11277_v26  ;;  %v2835_v9 = vadd.f32 %v11222_v52, %v11335_v40  ;;  %v11360_v58 = vmul.f32 %v2576_v20, %v11211_v21 }
 0x403   : >> { %v3027_v11 = vmul.f32 %v11130_v63, %v3019_v25  ;;  %v3029_v5 = vmul.f32 %v11140_v28, %v3021_v6  ;;  %v2984_v13 = vmul.f32 %v2960_v48, %v11291_v62  ;;  %v3020_v57 = vrot.slane %v2960_v48, 7 }
 0x404   : >> { %v2923_v19 = vadd.f32 %v2921_v3, %v2914_v8  ;;  %v2962_v35 = vadd.f32 %v2958_v46, %v11265_v15  ;;  %v2895_v45 = vrot.slane %v2835_v9, 1  ;;  %v2985_v25 = vmul.f32 %v2961_v33, %v11279_v55 }
 0x405   : >> { %v3031_v47 = vadd.f32 %v3027_v11, %v11254_v12  ;;  %v3033_v59 = vadd.f32 %v3029_v5, %v11257_v50  ;;  %v2991_v6 = vadd.f32 %v2984_v13, %v2983_v54  ;;  %v3028_v27 = vmul.f32 %v11134_v18, %v3020_v57 }
 0x406   : >> { %v2929_v52 = vrot.slane %v2923_v19, %v11052_v49  ;;  %v2861_v8 = vsel %vm13191_vm9, %v2857_v23, 0.0  ;;  %v2837_v3 = vadd.f32 %v11225_v17, %v11340_v1  ;;  %v2986_v20 = vmul.f32 %v2962_v35, %v11302_v51 }
 0x407   : >> { %v3091_v53 = vrot.slane %v3031_v47, 7  ;;  %v3093_v48 = vrot.slane %v3033_v59, 7  ;;  %v3032_v46 = vadd.f32 %v3028_v27, %v11262_v39  ;;  %v2993_v11 = vadd.f32 %v2991_v6, %v2985_v25 }
 0x408   : >> { %v3022_v5 = vrot.slane %v2962_v35, 7  ;;  %v2930_v13 = vadd.f32 %v2929_v52, %v2861_v8  ;;  %v2903_v19 = vmul.f32 %v11183_v56, %v2895_v45  ;;  %v3055_v23 = vmul.f32 %v3031_v47, %v11277_v26  ;;  %v11384_v47 = vpop.f32.mrf.mxu0 }
 0x409   : >> { %v3099_v33 = vmul.f32 %v11130_v63, %v3091_v53  ;;  %v3101_v54 = vmul.f32 %v11140_v28, %v3093_v48  ;;  %v3056_v57 = vmul.f32 %v3032_v46, %v11291_v62  ;;  %v3092_v17 = vrot.slane %v3032_v46, 7 }
 0x40a   : >> { %v2995_v60 = vadd.f32 %v2993_v11, %v2986_v20  ;;  %v3030_v35 = vmul.f32 %v11144_v29, %v3022_v5  ;;  %v2907_v53 = vadd.f32 %v2903_v19, %v11335_v40  ;;  %v3057_v6 = vmul.f32 %v3033_v59, %v11279_v55 }
 0x40b   : >> { %v3103_v27 = vadd.f32 %v3099_v33, %v11254_v12  ;;  %v3105_v25 = vadd.f32 %v3101_v54, %v11257_v50  ;;  %v3063_v52 = vadd.f32 %v3056_v57, %v3055_v23  ;;  %v3100_v48 = vmul.f32 %v11134_v18, %v3092_v17 }
 0x40c   : >> { %v3001_v45 = vrot.slane %v2995_v60, %v11055_v4  ;;  %vm13588_vm9 = vcmp.eq.s32.totalorder %v13555_v14, 1  ;;  %v11389_v11 = vmul.f32 %v2835_v9, %v11384_v47  ;;  %v3034_v33 = vadd.f32 %v3030_v35, %v11265_v15 }
 0x40d   : >> { %v3157_v21 = vrot.slane %v3103_v27, 7  ;;  %v3159_v46 = vrot.slane %v3105_v25, 7  ;;  %v2933_v20 = vsel %vm13588_vm9, %v2930_v13, %v2861_v8  ;;  %v3104_v5 = vadd.f32 %v3100_v48, %v11262_v39 }
 0x40e   : >> { %v3065_v59 = vadd.f32 %v3063_v52, %v3057_v6  ;;  %v2897_v54 = vrot.slane %v2837_v3, 1  ;;  %v3127_v19 = vmul.f32 %v3103_v27, %v11277_v26  ;;  %v2967_v57 = vrot.slane %v2907_v53, 1  ;;  %v11402_v52 = vpop.f32.mrf.mxu1 }
 0x40f   : >> { %v3165_v60 = vmul.f32 %v11130_v63, %v3157_v21  ;;  %v3167_v23 = vmul.f32 %v11140_v28, %v3159_v46  ;;  %v3128_v17 = vmul.f32 %v3104_v5, %v11291_v62  ;;  %v3158_v2 = vrot.slane %v3104_v5, 7 }
 0x410   : >> { %v3002_v8 = vadd.f32 %v3001_v45, %v2933_v20  ;;  %v3058_v9 = vmul.f32 %v3034_v33, %v11302_v51  ;;  %vm13204_vm9 = vcmp.eq.s32.totalorder %v13555_v14, 3  ;;  %v3094_v6 = vrot.slane %v3034_v33, 7 }
 0x411   : >> { %v3169_v13 = vadd.f32 %v3165_v60, %v11254_v12  ;;  %v3171_v35 = vadd.f32 %v3167_v23, %v11257_v50  ;;  %v2975_v27 = vmul.f32 %v11183_v56, %v2967_v57  ;;  %v3135_v21 = vadd.f32 %v3128_v17, %v3127_v19 }
 0x412   : >> { %v3166_v48 = vmul.f32 %v11134_v18, %v3158_v2  ;;  %v3067_v46 = vadd.f32 %v3065_v59, %v3058_v9  ;;  %v11406_v5 = vmul.f32 %v2837_v3, %v11402_v52  ;;  %v3129_v49 = vmul.f32 %v3105_v25, %v11279_v55 }
 0x413   : >> { %v3223_v45 = vrot.slane %v3169_v13, 7  ;;  %v3225_v36 = vrot.slane %v3171_v35, 7  ;;  %v11410_v60 = vmul.f32 %v2907_v53, %v11384_v47  ;;  %v3005_v23 = vsel %vm13201_vm8, %v3002_v8, %v2933_v20 }
 0x414   : >> { %v3170_v33 = vadd.f32 %v3166_v48, %v11262_v39  ;;  %v3073_v19 = vrot.slane %v3067_v46, %v11058_v7  ;;  %v3102_v2 = vmul.f32 %v11144_v29, %v3094_v6  ;;  %v2979_v57 = vadd.f32 %v2975_v27, %v11335_v40 }
 0x415   : >> { %v3231_v59 = vmul.f32 %v11130_v63, %v3223_v45  ;;  %v3233_v3 = vmul.f32 %v11140_v28, %v3225_v36  ;;  %v2905_v25 = vmul.f32 %v11187_v34, %v2897_v54  ;;  %v3137_v48 = vadd.f32 %v3135_v21, %v3129_v49 }
 0x416   : >> { %v3194_v53 = vmul.f32 %v3170_v33, %v11291_v62  ;;  %v3224_v17 = vrot.slane %v3170_v33, 7  ;;  %v3106_v9 = vadd.f32 %v3102_v2, %v11265_v15  ;;  %v3074_v46 = vadd.f32 %v3073_v19, %v3005_v23 }
 0x417   : >> { %v3235_v20 = vadd.f32 %v3231_v59, %v11254_v12  ;;  %v3237_v8 = vadd.f32 %v3233_v3, %v11257_v50  ;;  %v3039_v6 = vrot.slane %v2979_v57, 1  ;;  %v3193_v45 = vmul.f32 %v3169_v13, %v11277_v26 }
 0x418   : >> { %v3195_v36 = vmul.f32 %v3171_v35, %v11279_v55  ;;  %v3232_v27 = vmul.f32 %v11134_v18, %v3224_v17  ;;  %v3130_v54 = vmul.f32 %v3106_v9, %v11302_v51  ;;  %v11430_v33 = vmul.f32 %v2979_v57, %v11384_v47 }
 0x419   : >> { %v3289_v4 = vrot.slane %v3235_v20, 7  ;;  %v3291_v38 = vrot.slane %v3237_v8, 7  ;;  %v2909_v49 = vadd.f32 %v2905_v25, %v11340_v1  ;;  %v3201_v21 = vadd.f32 %v3194_v53, %v3193_v45 }
 0x41a   : >> { %v3236_v2 = vadd.f32 %v3232_v27, %v11262_v39  ;;  %v3139_v19 = vadd.f32 %v3137_v48, %v3130_v54  ;;  %v3160_v59 = vrot.slane %v3106_v9, 7  ;;  %v3077_v3 = vsel %vm13204_vm9, %v3074_v46, %v3005_v23 }
 0x41b   : >> { %v3297_v13 = vmul.f32 %v11130_v63, %v3289_v4  ;;  %v3299_v35 = vmul.f32 %v11140_v28, %v3291_v38  ;;  %vm13205_vm8 = vcmp.eq.s32.totalorder %v13555_v14, 4  ;;  %v3047_v17 = vmul.f32 %v11183_v56, %v3039_v6 }
 0x41c   : >> { %v3260_v57 = vmul.f32 %v3236_v2, %v11291_v62  ;;  %v3290_v7 = vrot.slane %v3236_v2, 7  ;;  %v3144_v25 = vrot.slane %v3139_v19, %v11247_v37  ;;  %v3168_v53 = vmul.f32 %v11144_v29, %v3160_v59  ;;  %v11461_v59 = vpop.f32.mrf.mxu0 }
 0x41d   : >> { %v3259_v9 = vmul.f32 %v3235_v20, %v11277_v26  ;;  %v11445_v63 = vadd.f32 %v3297_v13, %v11254_v12   ;;  %v3051_v38 = vadd.f32 %v3047_v17, %v11335_v40  ;;  %v2969_v4 = vrot.slane %v2909_v49, 1 }
 0x41e   : >> { %v11449_v28 = vadd.f32 %v3299_v35, %v11257_v50   ;;  %v3298_v23 = vmul.f32 %v11134_v18, %v3290_v7  ;;  %v3172_v48 = vadd.f32 %v3168_v53, %v11265_v15  ;;  %v3203_v46 = vadd.f32 %v3201_v21, %v3195_v36 }
 0x41f   : >> { %13589 = vst [vmem:[#allocation17_spill] sm:$0xff] %v11445_v63  ;;  %v3261_v6 = vmul.f32 %v3237_v8, %v11279_v55  ;;  %v3267_v45 = vadd.f32 %v3260_v57, %v3259_v9  ;;  %v3111_v27 = vrot.slane %v3051_v38, 1  ;;  %v11455_v20 = vmul.f32 %v2909_v49, %v11402_v52 }
 0x420   : >> { %13590 = vst [vmem:[#allocation8_spill] sm:$0xff] %v11449_v28  ;;  %v11458_v12 = vadd.f32 %v3298_v23, %v11262_v39   ;;  %v3145_v2 = vadd.f32 %v3144_v25, %v3077_v3  ;;  %v3196_v19 = vmul.f32 %v3172_v48, %v11302_v51  ;;  %v3226_v50 = vrot.slane %v3172_v48, 7  ;;  %v11488_v48 = vpop.f32.mrf.mxu1 }
 0x421   : >> { %v3325_v7 = vmul.f32 %v11445_v63, %v11277_v26  ;;  %v3119_v18 = vmul.f32 %v11183_v56, %v3111_v27  ;;  %v2977_v8 = vmul.f32 %v11187_v34, %v2969_v4  ;;  %v2836_v36 = vadd.f32 %v11236_v32, %v11344_v31 }
 0x422   : >> { %13591 = vst [vmem:[#allocation7_spill] sm:$0xff] %v11458_v12  ;;  %v13592_v54 = vmov %v11458_v12  ;;  %v3327_v39 = vmul.f32 %v11449_v28, %v11279_v55  ;;  %v3205_v21 = vadd.f32 %v3203_v46, %v3196_v19  ;;  %v3234_v13 = vmul.f32 %v11144_v29, %v3226_v50 }
 0x423   : >> { %v3326_v49 = vmul.f32 %v13592_v54, %v11291_v62  ;;  %v3123_v35 = vadd.f32 %v3119_v18, %v11335_v40  ;;  %v2981_v26 = vadd.f32 %v2977_v8, %v11340_v1  ;;  %v2844_v17 = vmul.f32 %v2836_v36, %v11461_v59 }
 0x424   : >> { %v2896_v57 = vrot.slane %v2836_v36, 1  ;;  %v3238_v32 = vadd.f32 %v3234_v13, %v11265_v15  ;;  %v3269_v25 = vadd.f32 %v3267_v45, %v3261_v6  ;;  %v11480_v55 = vmul.f32 %v3051_v38, %v11384_v47 }
 0x425   : >> { %v2838_v62 = vadd.f32 %v11239_v16, %v11360_v58  ;;  %v3210_v53 = vrot.slane %v3205_v21, %v11244_v44  ;;  %v11486_v9 = vmul.f32 %v3123_v35, %v11384_v47  ;;  %v3177_v4 = vrot.slane %v3123_v35, 1 }
 0x426   : >> { %v3041_v23 = vrot.slane %v2981_v26, 1  ;;  %v3333_v46 = vadd.f32 %v3326_v49, %v3325_v7  ;;  %v3146_v27 = vsel %vm13205_vm8, %v3145_v2, %v3077_v3  ;;  %v3262_v6 = vmul.f32 %v3238_v32, %v11302_v51 }
 0x427   : >> { %v3292_v38 = vrot.slane %v3238_v32, 7  ;;  %v3185_v45 = vmul.f32 %v11183_v56, %v3177_v4  ;;  %v2848_v12 = vadd.f32 %v2844_v17, %v11389_v11  ;;  %v2904_v19 = vmul.f32 %v11185_v0, %v2896_v57 }
 0x428   : >> { %v3049_v16 = vmul.f32 %v11187_v34, %v3041_v23  ;;  %v3271_v50 = vadd.f32 %v3269_v25, %v3262_v6  ;;  %v2846_v8 = vmul.f32 %v2838_v62, %v11488_v48  ;;  %v2898_v7 = vrot.slane %v2838_v62, 1 }
 0x429   : >> { %v3300_v18 = vmul.f32 %v11144_v29, %v3292_v38  ;;  %v3211_v36 = vadd.f32 %v3210_v53, %v3146_v27  ;;  %v3189_v3 = vadd.f32 %v3185_v45, %v11335_v40  ;;  %v2908_v49 = vadd.f32 %v2904_v19, %v11344_v31 }
 0x42a   : >> { %v3053_v2 = vadd.f32 %v3049_v16, %v11340_v1  ;;  %v3335_v13 = vadd.f32 %v3333_v46, %v3327_v39  ;;  %v2850_v11 = vadd.f32 %v2848_v12, %v11406_v5  ;;  %v2906_v35 = vmul.f32 %v11189_v22, %v2898_v7  ;;  %v3419_v5 = vpop.f32.mrf.mxu0 }
 0x42b   : >> { %v11503_v21 = vadd.f32 %v3300_v18, %v11265_v15   ;;  %v11509_v29 = vmul.f32 %v3189_v3, %v11384_v47  ;;  %v3243_v17 = vrot.slane %v3189_v3, 1  ;;  %v2989_v57 = vmul.f32 %v2981_v26, %v11402_v52 }
 0x42c   : >> { %v3113_v32 = vrot.slane %v3053_v2, 1  ;;  %v3276_v25 = vrot.slane %v3271_v50, %v11233_v61  ;;  %v2916_v39 = vmul.f32 %v2908_v49, %v11461_v59  ;;  %v2968_v62 = vrot.slane %v2908_v49, 1 }
 0x42d   : >> { %13593 = vst [vmem:[#allocation9_spill] sm:$0xff] %v11503_v21  ;;  %v3328_v15 = vmul.f32 %v11503_v21, %v11302_v51  ;;  %vm13206_vm9 = vcmp.eq.s32.totalorder %v13555_v14, 7  ;;  %vm13594_vm8 = vcmp.eq.s32.totalorder %v13555_v14, 5  ;;  %v3251_v4 = vmul.f32 %v11183_v56, %v3243_v17 }
 0x42e   : >> { %v3212_v53 = vsel %vm13594_vm8, %v3211_v36, %v3146_v27  ;;  %v3121_v23 = vmul.f32 %v11187_v34, %v3113_v32  ;;  %v2910_v26 = vadd.f32 %v2906_v35, %v11360_v58  ;;  %v2920_v6 = vadd.f32 %v2916_v39, %v11410_v60 }
 0x42f   : >> { %v3337_v46 = vadd.f32 %v3335_v13, %v3328_v15  ;;  %v2976_v51 = vmul.f32 %v11185_v0, %v2968_v62  ;;  %v2852_v38 = vadd.f32 %v2850_v11, %v2846_v8  ;;  %v3255_v45 = vadd.f32 %v3251_v4, %v11335_v40 }
 0x430   : >> { %v3061_v16 = vmul.f32 %v3053_v2, %v11402_v52  ;;  %v3125_v12 = vadd.f32 %v3121_v23, %v11340_v1  ;;  %v11528_v27 = vmul.f32 %v3419_v5, %v11208_v42  ;;  %v3277_v19 = vadd.f32 %v3276_v25, %v3212_v53  ;;  %v3490_v5 = vpop.f32.mrf.mxu1 }
 0x431   : >> { %v2980_v50 = vadd.f32 %v2976_v51, %v11344_v31  ;;  %v2922_v18 = vadd.f32 %v2920_v6, %v11455_v20  ;;  %v2970_v7 = vrot.slane %v2910_v26, 1  ;;  %v11533_v60 = vmul.f32 %v3255_v45, %v11384_v47 }
 0x432   : >> { %v3309_v36 = vrot.slane %v3255_v45, 1  ;;  %v3179_v8 = vrot.slane %v3125_v12, 1  ;;  %v2918_v3 = vmul.f32 %v2910_v26, %v11488_v48  ;;  %v3342_v2 = vrot.slane %v3337_v46, %v11230_v41 }
 0x433   : >> { %v2988_v49 = vmul.f32 %v2980_v50, %v11461_v59  ;;  %v3040_v13 = vrot.slane %v2980_v50, 1  ;;  %v2866_v11 = vrot.slane %v2852_v38, %v11230_v41  ;;  %v2978_v32 = vmul.f32 %v11189_v22, %v2970_v7  ;;  %v3492_v7 = vpop.f32.mrf.mxu1 }
 0x434   : >> { %v3317_v35 = vmul.f32 %v11183_v56, %v3309_v36  ;;  %v3187_v17 = vmul.f32 %v11187_v34, %v3179_v8  ;;  %v2924_v20 = vadd.f32 %v2922_v18, %v2918_v3  ;;  %vm13595_vm8 = vcmp.eq.s32.totalorder %v13555_v14, 6  ;;  %v3421_v18 = vpop.f32.mrf.mxu0 }
 0x435   : >> { %v11544_v25 = vsel %vm13595_vm8, %v3277_v19, %v3212_v53  ;;  %v3133_v15 = vmul.f32 %v3125_v12, %v11402_v52  ;;  %v2992_v39 = vadd.f32 %v2988_v49, %v11430_v33  ;;  %v3048_v62 = vmul.f32 %v11185_v0, %v3040_v13 }
 0x436   : >> { %v11550_v4 = vadd.f32 %v3317_v35, %v11335_v40   ;;  %v3191_v56 = vadd.f32 %v3187_v17, %v11340_v1  ;;  %v2938_v23 = vrot.slane %v2924_v20, %v11233_v61  ;;  %v2982_v26 = vadd.f32 %v2978_v32, %v11360_v58 }
 0x437   : >> { %v11556_v46 = vadd.f32 %v3342_v2, %v11544_v25  ;;  %v3052_v53 = vadd.f32 %v3048_v62, %v11344_v31  ;;  %v2994_v6 = vadd.f32 %v2992_v39, %v2989_v57  ;;  %v4011_v33 = vadd.f32 %v11272_v43, %v11528_v27 }
 0x438   : >> { %13596 = vst [vmem:[#allocation10_spill] sm:$0xff] %v11550_v4  ;;  %v11563_v51 = vmul.f32 %v11550_v4, %v11384_v47  ;;  %v11566_v40 = vmul.f32 %v3191_v56, %v11402_v52  ;;  %v3245_v38 = vrot.slane %v3191_v56, 1  ;;  %v2870_v45 = vsel %vm13206_vm9, %v2866_v11, 0.0 }
 0x439   : >> { %v3060_v12 = vmul.f32 %v3052_v53, %v11461_v59  ;;  %v3112_v19 = vrot.slane %v3052_v53, 1  ;;  %v2990_v50 = vmul.f32 %v2982_v26, %v11488_v48  ;;  %v3042_v57 = vrot.slane %v2982_v26, 1 }
 0x43a   : >> { %v3253_v43 = vmul.f32 %v11187_v34, %v3245_v38  ;;  %v2939_v36 = vadd.f32 %v2938_v23, %v2870_v45  ;;  %v11574_v47 = vmul.f32 %v3490_v5, %v11208_v42  ;;  %v4065_v8 = vrot.slane %v4011_v33, 7 }
 0x43b   : >> { %v3064_v3 = vadd.f32 %v3060_v12, %v11480_v55  ;;  %v3120_v2 = vmul.f32 %v11185_v0, %v3112_v19  ;;  %v2996_v49 = vadd.f32 %v2994_v6, %v2990_v50  ;;  %v3050_v13 = vmul.f32 %v11189_v22, %v3042_v57  ;;  %v11600_v19 = vpop.f32.mrf.mxu0 }
 0x43c   : >> { %v3257_v11 = vadd.f32 %v3253_v43, %v11340_v1  ;;  %v11581_v35 = vmul.f32 %v3421_v18, %v11208_v42  ;;  %v11584_v17 = vmul.f32 %v3492_v7, %v11208_v42  ;;  %v4073_v20 = vmul.f32 %v11148_v24, %v4065_v8 }
 0x43d   : >> { %v3124_v32 = vadd.f32 %v3120_v2, %v11344_v31  ;;  %v3010_v39 = vrot.slane %v2996_v49, %v11244_v44  ;;  %v3054_v55 = vadd.f32 %v3050_v13, %v11360_v58  ;;  %v3066_v62 = vadd.f32 %v3064_v3, %v3061_v16  ;;  %v11612_v3 = vpop.f32.mrf.mxu1 }
 0x43e   : >> { %v11591_v5 = vmul.f32 %v3257_v11, %v11402_v52  ;;  %v3311_v56 = vrot.slane %v3257_v11, 1  ;;  %v4077_v23 = vadd.f32 %v4073_v20, %v11528_v27  ;;  %v4013_v26 = vadd.f32 %v11275_v30, %v11574_v47  ;;  %v11617_v11 = vpop.f32.mrf.mxu0 }
 0x43f   : >> { %v3132_v53 = vmul.f32 %v3124_v32, %v11461_v59  ;;  %v3178_v6 = vrot.slane %v3124_v32, 1  ;;  %v2942_v38 = vsel %vm13595_vm8, %v2939_v36, %v2870_v45  ;;  %v3062_v12 = vmul.f32 %v3054_v55, %v11488_v48 }
 0x440   : >> { %v3319_v16 = vmul.f32 %v11187_v34, %v3311_v56  ;;  %v3114_v50 = vrot.slane %v3054_v55, 1  ;;  %v4131_v57 = vrot.slane %v4077_v23, 7  ;;  %v4012_v18 = vadd.f32 %v11307_v10, %v11581_v35 }
 0x441   : >> { %v3136_v7 = vadd.f32 %v3132_v53, %v11486_v9  ;;  %v3186_v30 = vmul.f32 %v11185_v0, %v3178_v6  ;;  %v3011_v43 = vadd.f32 %v3010_v39, %v2942_v38  ;;  %v3068_v8 = vadd.f32 %v3066_v62, %v3062_v12  ;;  %v13598_v39 = vld [vmem:[#allocation88_spill] sm:$0xff] }
 0x442   : >> { %v11608_v13 = vadd.f32 %v3319_v16, %v11340_v1   ;;  %v3122_v45 = vmul.f32 %v11189_v22, %v3114_v50  ;;  %v4139_v36 = vmul.f32 %v11148_v24, %v4131_v57  ;;  %v4067_v34 = vrot.slane %v4013_v26, 7 }
 0x443   : >> { %v3190_v2 = vadd.f32 %v3186_v30, %v11344_v31  ;;  %v3082_v10 = vrot.slane %v3068_v8, %v11247_v37  ;;  %v3138_v49 = vadd.f32 %v3136_v7, %v3133_v15  ;;  %v4035_v9 = vmul.f32 %v4011_v33, %v11600_v19 }
 0x444   : >> { %13597 = vst [vmem:[#allocation12_spill] sm:$0xff] %v11608_v13  ;;  %v11621_v1 = vmul.f32 %v11608_v13, %v11402_v52  ;;  %v3126_v20 = vadd.f32 %v3122_v45, %v11360_v58  ;;  %v4143_v32 = vadd.f32 %v4139_v36, %v11528_v27  ;;  %v4075_v55 = vmul.f32 %v13598_v39, %v4067_v34 }
 0x445   : >> { %v3198_v62 = vmul.f32 %v3190_v2, %v11461_v59  ;;  %v3244_v56 = vrot.slane %v3190_v2, 1  ;;  %vm13599_vm8 = vcmp.eq.s32.totalorder %v13555_v14, 5  ;;  %v11630_v33 = vmul.f32 %v4013_v26, %v11612_v3 }
 0x446   : >> { %v3014_v15 = vsel %vm13599_vm8, %v3011_v43, %v2942_v38  ;;  %v3134_v53 = vmul.f32 %v3126_v20, %v11488_v48  ;;  %v3180_v6 = vrot.slane %v3126_v20, 1  ;;  %v4197_v52 = vrot.slane %v4143_v32, 7 }
 0x447   : >> { %v4036_v12 = vmul.f32 %v4012_v18, %v11617_v11  ;;  %v3202_v16 = vadd.f32 %v3198_v62, %v11509_v29  ;;  %v3252_v50 = vmul.f32 %v11185_v0, %v3244_v56  ;;  %v3083_v57 = vadd.f32 %v3082_v10, %v3014_v15  ;;  %v13600_v29 = vld [vmem:[#allocation86_spill] sm:$0xff] }
 0x448   : >> { %v4079_v7 = vadd.f32 %v4075_v55, %v11574_v47  ;;  %v3140_v30 = vadd.f32 %v3138_v49, %v3134_v53  ;;  %v3188_v8 = vmul.f32 %v11189_v22, %v3180_v6  ;;  %v4205_v38 = vmul.f32 %v11148_v24, %v4197_v52  ;;  %v13601_v49 = vld [vmem:[#allocation87_spill] sm:$0xff] }
 0x449   : >> { %v4066_v26 = vrot.slane %v4012_v18, 7  ;;  %v3256_v43 = vadd.f32 %v3252_v50, %v11344_v31  ;;  %v3204_v45 = vadd.f32 %v3202_v16, %v11566_v40  ;;  %v11642_v36 = vmul.f32 %v4077_v23, %v11600_v19 }
 0x44a   : >> { %v4133_v34 = vrot.slane %v4079_v7, 7  ;;  %v3150_v2 = vrot.slane %v3140_v30, %v13600_v29  ;;  %v3192_v10 = vadd.f32 %v3188_v8, %v11360_v58  ;;  %v4209_v20 = vadd.f32 %v4205_v38, %v11528_v27 }
 0x44b   : >> { %v4074_v55 = vmul.f32 %v13601_v49, %v4066_v26  ;;  %v3264_v62 = vmul.f32 %v3256_v43, %v11461_v59  ;;  %v3310_v56 = vrot.slane %v3256_v43, 1  ;;  %vm13602_vm8 = vcmp.eq.s32.totalorder %v13555_v14, 4 }
 0x44c   : >> { %v3086_v18 = vsel %vm13602_vm8, %v3083_v57, %v3014_v15  ;;  %v4141_v40 = vmul.f32 %v13598_v39, %v4133_v34  ;;  %v3200_v23 = vmul.f32 %v3192_v10, %v11488_v48  ;;  %v3246_v6 = vrot.slane %v3192_v10, 1 }
 0x44d   : >> { %v3151_v53 = vadd.f32 %v3150_v2, %v3086_v18  ;;  %v4043_v52 = vadd.f32 %v4036_v12, %v4035_v9  ;;  %v3268_v16 = vadd.f32 %v3264_v62, %v11533_v60  ;;  %v3318_v50 = vmul.f32 %v11185_v0, %v3310_v56  ;;  %v13605_v12 = vld [vmem:[#allocation85_spill] sm:$0xff] }
 0x44e   : >> { %v4263_v30 = vrot.slane %v4209_v20, 7  ;;  %v4145_v8 = vadd.f32 %v4141_v40, %v11574_v47  ;;  %vm13603_vm9 = vcmp.eq.s32.totalorder %v13555_v14, 3  ;;  %v3206_v26 = vadd.f32 %v3204_v45, %v3200_v23  ;;  %v13607_v23 = vld [vmem:[#allocation111_spill] sm:$0xff] }
 0x44f   : >> { %v3152_v38 = vsel %vm13603_vm9, %v3151_v53, %v3086_v18  ;;  %v3254_v15 = vmul.f32 %v11189_v22, %v3246_v6  ;;  %v4078_v57 = vadd.f32 %v4074_v55, %v11581_v35  ;;  %v11661_v31 = vadd.f32 %v3318_v50, %v11344_v31  }
 0x450   : >> { %v3270_v9 = vadd.f32 %v3268_v16, %v11591_v5  ;;  %v4167_v60 = vmul.f32 %v4143_v32, %v11600_v19  ;;  %v4271_v0 = vmul.f32 %v11148_v24, %v4263_v30  ;;  %v3216_v43 = vrot.slane %v3206_v26, %v13605_v12 }
 0x451   : >> { %13604 = vst [vmem:[#allocation13_spill] sm:$0xff] %v11661_v31  ;;  %v3258_v34 = vadd.f32 %v3254_v15, %v11360_v58  ;;  %v4103_v2 = vmul.f32 %v4079_v7, %v11612_v3  ;;  %v4199_v45 = vrot.slane %v4145_v8, 7  ;;  %v3330_v10 = vmul.f32 %v11661_v31, %v11461_v59  ;;  %v11694_v15 = vpop.f32.mrf.mxu1 }
 0x452   : >> { %v4275_v55 = vadd.f32 %v4271_v0, %v11528_v27  ;;  %v4132_v62 = vrot.slane %v4078_v57, 7  ;;  %vm13606_vm9 = vcmp.eq.s32.totalorder %v13555_v14, 7  ;;  %v3217_v32 = vadd.f32 %v3216_v43, %v3152_v38  ;;  %v13609_v0 = vld [vmem:[#allocation84_spill] sm:$0xff] }
 0x453   : >> { %v11676_v5 = vsel %vm13606_vm9, %v11556_v46, %v11544_v25  ;;  %v3266_v56 = vmul.f32 %v3258_v34, %v11488_v48  ;;  %v3312_v18 = vrot.slane %v3258_v34, 1  ;;  %v4207_v40 = vmul.f32 %v13598_v39, %v4199_v45 }
 0x454   : >> { %v3334_v7 = vadd.f32 %v3330_v10, %v11563_v51  ;;  %v11682_v53 = vmul.f32 %v4209_v20, %v11600_v19  ;;  %v4329_v59 = vrot.slane %v4275_v55, 7  ;;  %v4014_v6 = vadd.f32 %v13607_v23, %v11584_v17 }
 0x455   : >> { %vm13608_vm8 = vcmp.eq.s32.totalorder %v13555_v14, 2  ;;  %v3272_v25 = vadd.f32 %v3270_v9, %v3266_v56  ;;  %v3320_v46 = vmul.f32 %v11189_v22, %v3312_v18  ;;  %v4211_v50 = vadd.f32 %v4207_v40, %v11574_v47 }
 0x456   : >> { %v3218_v16 = vsel %vm13608_vm8, %v3217_v32, %v3152_v38  ;;  %v3336_v30 = vadd.f32 %v3334_v7, %v11621_v1  ;;  %v4337_v26 = vmul.f32 %v11148_v24, %v4329_v59  ;;  %v4102_v51 = vmul.f32 %v4078_v57, %v11617_v11 }
 0x457   : >> { %v4140_v20 = vmul.f32 %v13601_v49, %v4132_v62  ;;  %v3282_v43 = vrot.slane %v3272_v25, %v13609_v0  ;;  %v11698_v34 = vadd.f32 %v3320_v46, %v11360_v58   ;;  %v4169_v38 = vmul.f32 %v4145_v8, %v11612_v3  ;;  %v13612_v25 = vld [vmem:[#allocation89_spill] sm:$0xff]  ;;  %v13613_v46 = vld [vmem:[#allocation6_spill] sm:$0xff] }
 0x458   : >> { %v4265_v22 = vrot.slane %v4211_v50, 7  ;;  %v4341_v9 = vadd.f32 %v4337_v26, %v11528_v27  ;;  %v4045_v45 = vadd.f32 %v4043_v52, %v11630_v33  ;;  %v4068_v10 = vrot.slane %v4014_v6, 7 }
 0x459   : >> { %13610 = vst [vmem:[#allocation14_spill] sm:$0xff] %v11698_v34  ;;  %v4144_v1 = vadd.f32 %v4140_v20, %v11581_v35  ;;  %v3283_v57 = vadd.f32 %v3282_v43, %v3218_v16  ;;  %v3332_v62 = vmul.f32 %v11698_v34, %v11488_v48  ;;  %v4038_v56 = vmul.f32 %v4014_v6, %v11694_v15 }
 0x45a   : >> { %v4273_v32 = vmul.f32 %v13598_v39, %v4265_v22  ;;  %v4395_v58 = vrot.slane %v4341_v9, 7  ;;  %v4109_v18 = vadd.f32 %v4102_v51, %v11642_v36  ;;  %vm13611_vm9 = vcmp.eq.s32.totalorder %v13555_v14, 1 }
 0x45b   : >> { %v4168_v8 = vmul.f32 %v4144_v1, %v11617_v11  ;;  %v4198_v40 = vrot.slane %v4144_v1, 7  ;;  %v11712_v7 = vsel %vm13611_vm9, %v3283_v57, %v3218_v16  ;;  %v3338_v33 = vadd.f32 %v3336_v30, %v3332_v62 }
 0x45c   : >> { %v4277_v52 = vadd.f32 %v4273_v32, %v11574_v47  ;;  %v4047_v59 = vadd.f32 %v4045_v45, %v4038_v56  ;;  %v11716_v48 = vmul.f32 %v4275_v55, %v11600_v19  ;;  %v4403_v23 = vmul.f32 %v11148_v24, %v4395_v58 }
 0x45d   : >> { %v4206_v6 = vmul.f32 %v13601_v49, %v4198_v40  ;;  %v4076_v36 = vmul.f32 %v13612_v25, %v4068_v10  ;;  %v3348_v26 = vrot.slane %v3338_v33, %v13613_v46  ;;  %v4235_v51 = vmul.f32 %v4211_v50, %v11612_v3  ;;  %v3703_v50 = vpop.f32.mrf.mxu0 }
 0x45e   : >> { %v4331_v20 = vrot.slane %v4277_v52, 7  ;;  %v4175_v16 = vadd.f32 %v4168_v8, %v4167_v60  ;;  %v4407_v30 = vadd.f32 %v4403_v23, %v11528_v27  ;;  %v4052_v22 = vrot.slane %v4047_v59, %v13613_v46  ;;  %v3774_v59 = vpop.f32.mrf.mxu1 }
 0x45f   : >> { %v4210_v43 = vadd.f32 %v4206_v6, %v11581_v35  ;;  %v4080_v55 = vadd.f32 %v4076_v36, %v11584_v17  ;;  %v11728_v1 = vadd.f32 %v3348_v26, %v11712_v7  ;;  %v11731_v45 = vmul.f32 %v4341_v9, %v11600_v19 }
 0x460   : >> { %v4339_v10 = vmul.f32 %v13598_v39, %v4331_v20  ;;  %v4111_v57 = vadd.f32 %v4109_v18, %v4103_v2  ;;  %v4461_v62 = vrot.slane %v4407_v30, 7  ;;  %v4053_v56 = vadd.f32 %v4052_v22, %v11676_v5  ;;  %v13614_v18 = vld [vmem:[#allocation101_spill] sm:$0xff] }
 0x461   : >> { %v4234_v60 = vmul.f32 %v4210_v43, %v11617_v11  ;;  %v4264_v32 = vrot.slane %v4210_v43, 7  ;;  %v4301_v58 = vmul.f32 %v4277_v52, %v11612_v3  ;;  %v4104_v40 = vmul.f32 %v4080_v55, %v11694_v15 }
 0x462   : >> { %v4343_v8 = vadd.f32 %v4339_v10, %v11574_v47  ;;  %v4134_v33 = vrot.slane %v4080_v55, 7  ;;  %v4469_v9 = vmul.f32 %v11148_v24, %v4461_v62  ;;  %v4177_v2 = vadd.f32 %v4175_v16, %v4169_v38 }
 0x463   : >> { %v4272_v23 = vmul.f32 %v13601_v49, %v4264_v32  ;;  %v11742_v6 = vmul.f32 %v3703_v50, %v13614_v18  ;;  %v11745_v36 = vmul.f32 %v4407_v30, %v11600_v19  ;;  %v4113_v20 = vadd.f32 %v4111_v57, %v4104_v40  ;;  %v3705_v57 = vpop.f32.mrf.mxu0 }
 0x464   : >> { %v4397_v26 = vrot.slane %v4343_v8, 7  ;;  %v4142_v52 = vmul.f32 %v13612_v25, %v4134_v33  ;;  %v4241_v43 = vadd.f32 %v4234_v60, %v11682_v53  ;;  %vm13615_vm8 = vcmp.eq.s32.totalorder %v13555_v14, 0  ;;  %v13617_v60 = vld [vmem:[#allocation112_spill] sm:$0xff] }
 0x465   : >> { %v4276_v22 = vadd.f32 %v4272_v23, %v11581_v35  ;;  %v4054_v24 = vsel %vm13615_vm8, %v4053_v56, %v11676_v5  ;;  %v11754_v38 = vmul.f32 %v3774_v59, %v13614_v18  ;;  %v11757_v16 = vadd.f32 %v4469_v9, %v11528_v27   ;;  %v3776_v5 = vpop.f32.mrf.mxu1 }
 0x466   : >> { %v4405_v30 = vmul.f32 %v13598_v39, %v4397_v26  ;;  %v4118_v55 = vrot.slane %v4113_v20, %v13609_v0  ;;  %v4146_v10 = vadd.f32 %v4142_v52, %v11584_v17  ;;  %v11763_v53 = vmul.f32 %v4343_v8, %v11612_v3 }
 0x467   : >> { %13616 = vst [vmem:[#allocation15_spill] sm:$0xff] %v11757_v16  ;;  %v4300_v50 = vmul.f32 %v4276_v22, %v11617_v11  ;;  %v4330_v62 = vrot.slane %v4276_v22, 7  ;;  %v4031_v32 = vadd.f32 %v13617_v60, %v11742_v6  ;;  %v4243_v9 = vadd.f32 %v4241_v43, %v4235_v51  ;;  %v11785_v43 = vpop.f32.mrf.mxu0 }
 0x468   : >> { %v4409_v27 = vadd.f32 %v4405_v30, %v11574_v47  ;;  %v4119_v56 = vadd.f32 %v4118_v55, %v4054_v24  ;;  %v4170_v40 = vmul.f32 %v4146_v10, %v11694_v15  ;;  %v4200_v33 = vrot.slane %v4146_v10, 7  ;;  %v13618_v10 = vld [vmem:[#allocation98_spill] sm:$0xff] }
 0x469   : >> { %v4338_v59 = vmul.f32 %v13601_v49, %v4330_v62  ;;  %v11772_v23 = vmul.f32 %v3705_v57, %v13614_v18  ;;  %v4085_v8 = vrot.slane %v4031_v32, 1  ;;  %v11776_v26 = vmul.f32 %v11757_v16, %v11600_v19 }
 0x46a   : >> { %v4463_v20 = vrot.slane %v4409_v27, 7  ;;  %v4179_v52 = vadd.f32 %v4177_v2, %v4170_v40  ;;  %v11779_v22 = vmul.f32 %v3776_v5, %v13614_v18  ;;  %v4120_v55 = vsel %vm13611_vm9, %v4119_v56, %v4054_v24  ;;  %v13619_v5 = vld [vmem:[#allocation113_spill] sm:$0xff] }
 0x46b   : >> { %v4342_v30 = vadd.f32 %v4338_v59, %v11581_v35  ;;  %v4208_v51 = vmul.f32 %v13612_v25, %v4200_v33  ;;  %v4093_v57 = vmul.f32 %v13618_v10, %v4085_v8  ;;  %v4307_v19 = vadd.f32 %v4300_v50, %v11716_v48  ;;  %v11796_v33 = vpop.f32.mrf.mxu1  ;;  %v13620_v48 = vld [vmem:[#allocation114_spill] sm:$0xff] }
 0x46c   : >> { %v4471_v62 = vmul.f32 %v13598_v39, %v4463_v20  ;;  %v4184_v2 = vrot.slane %v4179_v52, %v13605_v12  ;;  %v4033_v60 = vadd.f32 %v13619_v5, %v11754_v38  ;;  %v4039_v8 = vmul.f32 %v4031_v32, %v11785_v43 }
 0x46d   : >> { %v4366_v40 = vmul.f32 %v4342_v30, %v11617_v11  ;;  %v4396_v59 = vrot.slane %v4342_v30, 7  ;;  %v4212_v24 = vadd.f32 %v4208_v51, %v11584_v17  ;;  %v4097_v56 = vadd.f32 %v4093_v57, %v11742_v6 }
 0x46e   : >> { %v4185_v63 = vadd.f32 %v4184_v2, %v4120_v55  ;;  %v4087_v39 = vrot.slane %v4033_v60, 1  ;;  %v4032_v50 = vadd.f32 %v13620_v48, %v11772_v23  ;;  %v4433_v20 = vmul.f32 %v4409_v27, %v11612_v3 }
 0x46f   : >> { %v4404_v52 = vmul.f32 %v13601_v49, %v4396_v59  ;;  %v4236_v5 = vmul.f32 %v4212_v24, %v11694_v15  ;;  %v4266_v30 = vrot.slane %v4212_v24, 7  ;;  %v11805_v51 = vadd.f32 %v4471_v62, %v11574_v47   ;;  %v13624_v24 = vld [vmem:[#allocation100_spill] sm:$0xff] }
 0x470   : >> { %v4309_v57 = vadd.f32 %v4307_v19, %v4301_v58  ;;  %v4151_v28 = vrot.slane %v4097_v56, 1  ;;  %v4041_v2 = vmul.f32 %v4033_v60, %v11796_v33  ;;  %v4373_v32 = vadd.f32 %v4366_v40, %v11731_v45  ;;  %v11818_v60 = vpop.f32.mrf.mxu0 }
 0x471   : >> { %13621 = vst [vmem:[#allocation16_spill] sm:$0xff] %v11805_v51  ;;  %v13622_v54 = vmov %v11805_v51  ;;  %v4408_v21 = vadd.f32 %v4404_v52, %v11581_v35  ;;  %v4245_v16 = vadd.f32 %v4243_v9, %v4236_v5  ;;  %v4274_v48 = vmul.f32 %v13612_v25, %v4266_v30 }
 0x472   : >> { %vm13623_vm8 = vcmp.eq.s32.totalorder %v13555_v14, 2  ;;  %v4159_v59 = vmul.f32 %v13618_v10, %v4151_v28  ;;  %v4095_v4 = vmul.f32 %v13624_v24, %v4087_v39  ;;  %v4086_v47 = vrot.slane %v4032_v50, 1  ;;  %v13625_v28 = vld [vmem:[#allocation99_spill] sm:$0xff] }
 0x473   : >> { %v4186_v27 = vsel %vm13623_vm8, %v4185_v63, %v4120_v55  ;;  %v4432_v58 = vmul.f32 %v4408_v21, %v11617_v11  ;;  %v4462_v62 = vrot.slane %v4408_v21, 7  ;;  %v4250_v19 = vrot.slane %v4245_v16, %v13600_v29 }
 0x474   : >> { %v4278_v45 = vadd.f32 %v4274_v48, %v11584_v17  ;;  %v4499_v9 = vmul.f32 %v13622_v54, %v11612_v3  ;;  %v4163_v40 = vadd.f32 %v4159_v59, %v11742_v6  ;;  %v4099_v63 = vadd.f32 %v4095_v4, %v11754_v38 }
 0x475   : >> { %v4094_v55 = vmul.f32 %v13625_v28, %v4086_v47  ;;  %v4470_v39 = vmul.f32 %v13601_v49, %v4462_v62  ;;  %v4251_v52 = vadd.f32 %v4250_v19, %v4186_v27  ;;  %v4105_v16 = vmul.f32 %v4097_v56, %v11785_v43 }
 0x476   : >> { %v4302_v21 = vmul.f32 %v4278_v45, %v11694_v15  ;;  %v4332_v5 = vrot.slane %v4278_v45, 7  ;;  %v4375_v30 = vadd.f32 %v4373_v32, %v11763_v53  ;;  %v4217_v51 = vrot.slane %v4163_v40, 1 }
 0x477   : >> { %v4040_v48 = vmul.f32 %v4032_v50, %v11818_v60  ;;  %v4439_v3 = vadd.f32 %v4432_v58, %v11745_v36  ;;  %v11832_v59 = vadd.f32 %v4470_v39, %v11581_v35   ;;  %vm13627_vm9 = vcmp.eq.s32.totalorder %v13555_v14, 3  ;;  %v13629_v36 = vld [vmem:[#allocation115_spill] sm:$0xff] }
 0x478   : >> { %v4252_v4 = vsel %vm13627_vm9, %v4251_v52, %v4186_v27  ;;  %v4311_v49 = vadd.f32 %v4309_v57, %v4302_v21  ;;  %v4340_v47 = vmul.f32 %v13612_v25, %v4332_v5  ;;  %v4225_v62 = vmul.f32 %v13618_v10, %v4217_v51 }
 0x479   : >> { %13626 = vst [vmem:[#allocation19_spill] sm:$0xff] %v11832_v59  ;;  %v4153_v56 = vrot.slane %v4099_v63, 1  ;;  %v4098_v19 = vadd.f32 %v4094_v55, %v11772_v23  ;;  %v4498_v53 = vmul.f32 %v11832_v59, %v11617_v11  ;;  %vm13628_vm8 = vcmp.eq.s32.totalorder %v13555_v14, 0  ;;  %v11853_v55 = vpop.f32.mrf.mxu1 }
 0x47a   : >> { %v4316_v50 = vrot.slane %v4311_v49, %v11247_v37  ;;  %v11846_v35 = vsel %vm13628_vm8, %v11728_v1, %v11712_v7  ;;  %v4034_v57 = vadd.f32 %v13629_v36, %v11779_v22  ;;  %v4344_v32 = vadd.f32 %v4340_v47, %v11584_v17 }
 0x47b   : >> { %v4229_v27 = vadd.f32 %v4225_v62, %v11742_v6  ;;  %v4161_v58 = vmul.f32 %v13624_v24, %v4153_v56  ;;  %v4044_v45 = vadd.f32 %v4040_v48, %v4039_v8  ;;  %v4171_v39 = vmul.f32 %v4163_v40, %v11785_v43 }
 0x47c   : >> { %v4317_v11 = vadd.f32 %v4316_v50, %v4252_v4  ;;  %v4107_v52 = vmul.f32 %v4099_v63, %v11796_v33  ;;  %v4152_v21 = vrot.slane %v4098_v19, 1  ;;  %v4368_v7 = vmul.f32 %v4344_v32, %v11694_v15 }
 0x47d   : >> { %v4398_v1 = vrot.slane %v4344_v32, 7  ;;  %v4441_v5 = vadd.f32 %v4439_v3, %v4433_v20  ;;  %v4283_v51 = vrot.slane %v4229_v27, 1  ;;  %v4505_v49 = vadd.f32 %v4498_v53, %v11776_v26 }
 0x47e   : >> { %v4165_v47 = vadd.f32 %v4161_v58, %v11754_v38  ;;  %v4106_v62 = vmul.f32 %v4098_v19, %v11818_v60  ;;  %v4042_v8 = vmul.f32 %v4034_v57, %v11853_v55  ;;  %v4377_v48 = vadd.f32 %v4375_v30, %v4368_v7 }
 0x47f   : >> { %v4406_v56 = vmul.f32 %v13612_v25, %v4398_v1  ;;  %v4291_v40 = vmul.f32 %v13618_v10, %v4283_v51  ;;  %v4160_v63 = vmul.f32 %v13625_v28, %v4152_v21  ;;  %vm13630_vm9 = vcmp.eq.s32.totalorder %v13555_v14, 4 }
 0x480   : >> { %v4318_v50 = vsel %vm13630_vm9, %v4317_v11, %v4252_v4  ;;  %v4219_v20 = vrot.slane %v4165_v47, 1  ;;  %v4046_v3 = vadd.f32 %v4044_v45, %v4041_v2  ;;  %v4088_v36 = vrot.slane %v4034_v57, 1 }
 0x481   : >> { %v4382_v26 = vrot.slane %v4377_v48, %v11244_v44  ;;  %v4410_v53 = vadd.f32 %v4406_v56, %v11584_v17  ;;  %v4295_v19 = vadd.f32 %v4291_v40, %v11742_v6  ;;  %v4164_v30 = vadd.f32 %v4160_v63, %v11772_v23  ;;  %v13631_v48 = vld [vmem:[#allocation102_spill] sm:$0xff] }
 0x482   : >> { %v4507_v32 = vadd.f32 %v4505_v49, %v4499_v9  ;;  %v4237_v58 = vmul.f32 %v4229_v27, %v11785_v43  ;;  %v4227_v7 = vmul.f32 %v13624_v24, %v4219_v20  ;;  %v4048_v21 = vadd.f32 %v4046_v3, %v4042_v8 }
 0x483   : >> { %v4383_v1 = vadd.f32 %v4382_v26, %v4318_v50  ;;  %v4434_v4 = vmul.f32 %v4410_v53, %v11694_v15  ;;  %v4464_v11 = vrot.slane %v4410_v53, 7  ;;  %v4110_v2 = vadd.f32 %v4106_v62, %v4105_v16 }
 0x484   : >> { %v4349_v57 = vrot.slane %v4295_v19, 1  ;;  %v4231_v45 = vadd.f32 %v4227_v7, %v11754_v38  ;;  %v4218_v51 = vrot.slane %v4164_v30, 1  ;;  %v4096_v56 = vmul.f32 %v13631_v48, %v4088_v36 }
 0x485   : >> { %v4443_v40 = vadd.f32 %v4441_v5, %v4434_v4  ;;  %v4472_v63 = vmul.f32 %v13612_v25, %v4464_v11  ;;  %v4172_v9 = vmul.f32 %v4164_v30, %v11818_v60  ;;  %v4058_v27 = vrot.slane %v4048_v21, %v11230_v41 }
 0x486   : >> { %vm13632_vm8 = vcmp.eq.s32.totalorder %v13555_v14, 5  ;;  %v4357_v8 = vmul.f32 %v13618_v10, %v4349_v57  ;;  %v4173_v16 = vmul.f32 %v4165_v47, %v11796_v33  ;;  %v4285_v62 = vrot.slane %v4231_v45, 1 }
 0x487   : >> { %v4384_v49 = vsel %vm13632_vm8, %v4383_v1, %v4318_v50  ;;  %v4448_v20 = vrot.slane %v4443_v40, %v11233_v61  ;;  %v11885_v3 = vadd.f32 %v4472_v63, %v11584_v17   ;;  %v4226_v5 = vmul.f32 %v13625_v28, %v4218_v51 }
 0x488   : >> { %v4059_v25 = vadd.f32 %v4058_v27, %v11846_v35  ;;  %v4361_v36 = vadd.f32 %v4357_v8, %v11742_v6  ;;  %v4293_v26 = vmul.f32 %v13624_v24, %v4285_v62  ;;  %v4100_v50 = vadd.f32 %v4096_v56, %v11779_v22  ;;  %v4591_v62 = vpop.f32.mrf.mxu0 }
 0x489   : >> { %13633 = vst [vmem:[#allocation20_spill] sm:$0xff] %v11885_v3  ;;  %v4112_v53 = vadd.f32 %v4110_v2, %v4107_v52  ;;  %v4449_v30 = vadd.f32 %v4448_v20, %v4384_v49  ;;  %v4176_v7 = vadd.f32 %v4172_v9, %v4171_v39  ;;  %v4230_v47 = vadd.f32 %v4226_v5, %v11772_v23 }
 0x48a   : >> { %vm13634_vm9 = vcmp.eq.s32.totalorder %v13555_v14, 7  ;;  %v4500_v21 = vmul.f32 %v11885_v3, %v11694_v15  ;;  %v4415_v1 = vrot.slane %v4361_v36, 1  ;;  %v4297_v4 = vadd.f32 %v4293_v26, %v11754_v38 }
 0x48b   : >> { %v4060_v17 = vsel %vm13634_vm9, %v4059_v25, %v11846_v35  ;;  %v4108_v11 = vmul.f32 %v4100_v50, %v11853_v55  ;;  %v4303_v57 = vmul.f32 %v4295_v19, %v11785_v43  ;;  %v4239_v52 = vmul.f32 %v4231_v45, %v11796_v33 }
 0x48c   : >> { %v4238_v39 = vmul.f32 %v4230_v47, %v11818_v60  ;;  %v4284_v2 = vrot.slane %v4230_v47, 1  ;;  %v4509_v51 = vadd.f32 %v4507_v32, %v4500_v21  ;;  %v4423_v56 = vmul.f32 %v13618_v10, %v4415_v1  ;;  %v4662_v21 = vpop.f32.mrf.mxu1 }
 0x48d   : >> { %v4351_v40 = vrot.slane %v4297_v4, 1  ;;  %v4114_v35 = vadd.f32 %v4112_v53, %v4108_v11  ;;  %v4369_v63 = vmul.f32 %v4361_v36, %v11785_v43  ;;  %v4154_v9 = vrot.slane %v4100_v50, 1 }
 0x48e   : >> { %v4292_v15 = vmul.f32 %v13625_v28, %v4284_v2  ;;  %v4178_v27 = vadd.f32 %v4176_v7, %v4173_v16  ;;  %vm13635_vm8 = vcmp.eq.s32.totalorder %v13555_v14, 6  ;;  %v4427_v19 = vadd.f32 %v4423_v56, %v11742_v6 }
 0x48f   : >> { %v11908_v8 = vsel %vm13635_vm8, %v4449_v30, %v4384_v49  ;;  %v4359_v45 = vmul.f32 %v13624_v24, %v4351_v40  ;;  %v4124_v32 = vrot.slane %v4114_v35, %v11233_v61  ;;  %v4305_v20 = vmul.f32 %v4297_v4, %v11796_v33  ;;  %vm13636_vm9 = vmmov %vm13635_vm8 }
 0x490   : >> { %v4242_v5 = vadd.f32 %v4238_v39, %v4237_v58  ;;  %v4296_v25 = vadd.f32 %v4292_v15, %v11772_v23  ;;  %v4162_v36 = vmul.f32 %v13631_v48, %v4154_v9  ;;  %v4514_v16 = vrot.slane %v4509_v51, %v11230_v41 }
 0x491   : >> { %v4481_v26 = vrot.slane %v4427_v19, 1  ;;  %v4363_v49 = vadd.f32 %v4359_v45, %v11754_v38  ;;  %v4125_v50 = vadd.f32 %v4124_v32, %v4060_v17  ;;  %v11921_v47 = vmul.f32 %v4591_v62, %v11208_v42 }
 0x492   : >> { %v4304_v53 = vmul.f32 %v4296_v25, %v11818_v60  ;;  %v4350_v30 = vrot.slane %v4296_v25, 1  ;;  %v4166_v7 = vadd.f32 %v4162_v36, %v11779_v22  ;;  %v11924_v58 = vadd.f32 %v4514_v16, %v11908_v8 }
 0x493   : >> { %v4489_v1 = vmul.f32 %v13618_v10, %v4481_v26  ;;  %v4417_v4 = vrot.slane %v4363_v49, 1  ;;  %v4126_v11 = vsel %vm13636_vm9, %v4125_v50, %v4060_v17  ;;  %v4244_v56 = vadd.f32 %v4242_v5, %v4239_v52  ;;  %v4593_v10 = vpop.f32.mrf.mxu0 }
 0x494   : >> { %v4358_v39 = vmul.f32 %v13625_v28, %v4350_v30  ;;  %v4174_v2 = vmul.f32 %v4166_v7, %v11853_v55  ;;  %v4220_v51 = vrot.slane %v4166_v7, 1  ;;  %v4435_v40 = vmul.f32 %v4427_v19, %v11785_v43  ;;  %v4664_v19 = vpop.f32.mrf.mxu1 }
 0x495   : >> { %v4371_v35 = vmul.f32 %v4363_v49, %v11796_v33  ;;  %v4425_v15 = vmul.f32 %v13624_v24, %v4417_v4  ;;  %v11935_v9 = vmul.f32 %v4662_v21, %v11208_v42  ;;  %v4308_v45 = vadd.f32 %v4304_v53, %v4303_v57  ;;  %v13637_v21 = vld [vmem:[#allocation83_spill] sm:$0xff]  ;;  %v13638_v4 = vld [vmem:[#allocation81_spill] sm:$0xff] }
 0x496   : >> { %v4362_v32 = vadd.f32 %v4358_v39, %v11772_v23  ;;  %v4180_v17 = vadd.f32 %v4178_v27, %v4174_v2  ;;  %v4228_v62 = vmul.f32 %v13631_v48, %v4220_v51  ;;  %v11940_v57 = vadd.f32 %v4489_v1, %v11742_v6  }
 0x497   : >> { %v4429_v52 = vadd.f32 %v4425_v15, %v11754_v38  ;;  %v11946_v16 = vmul.f32 %v4593_v10, %v11208_v42  ;;  %v11952_v53 = vmul.f32 %v4664_v19, %v11208_v42  ;;  %v4310_v7 = vadd.f32 %v4308_v45, %v4305_v20 }
 0x498   : >> { %v4416_v5 = vrot.slane %v4362_v32, 1  ;;  %v4190_v25 = vrot.slane %v4180_v17, %v11244_v44  ;;  %v4232_v36 = vadd.f32 %v4228_v62, %v11779_v22  ;;  %v4370_v49 = vmul.f32 %v4362_v32, %v11818_v60  ;;  %v13640_v62 = vld [vmem:[#allocation90_spill] sm:$0xff] }
 0x499   : >> { %v4483_v26 = vrot.slane %v4429_v52, 1  ;;  %v5171_v1 = vrot.slane %v13637_v21, 7  ;;  %v5173_v39 = vrot.slane %v13638_v4, 7  ;;  %vm13639_vm8 = vcmp.eq.s32.totalorder %v13555_v14, 5 }
 0x49a   : >> { %v4424_v27 = vmul.f32 %v13625_v28, %v4416_v5  ;;  %v4191_v50 = vadd.f32 %v4190_v25, %v4126_v11  ;;  %v4240_v6 = vmul.f32 %v4232_v36, %v11853_v55  ;;  %v4286_v30 = vrot.slane %v4232_v36, 1  ;;  %v13641_v5 = vld [vmem:[#allocation92_spill] sm:$0xff] }
 0x49b   : >> { %v4491_v2 = vmul.f32 %v13624_v24, %v4483_v26  ;;  %v4374_v32 = vadd.f32 %v4370_v49, %v4369_v63  ;;  %v5179_v19 = vmul.f32 %v13640_v62, %v5171_v1  ;;  %v5181_v25 = vmul.f32 %v13641_v5, %v5173_v39 }
 0x49c   : >> { %v4428_v51 = vadd.f32 %v4424_v27, %v11772_v23  ;;  %v4192_v15 = vsel %vm13639_vm8, %v4191_v50, %v4126_v11  ;;  %v4246_v10 = vadd.f32 %v4244_v56, %v4240_v6  ;;  %v4294_v17 = vmul.f32 %v13631_v48, %v4286_v30  ;;  %v11976_v30 = vpop.f32.mrf.mxu0 }
 0x49d   : >> { %v4501_v24 = vmul.f32 %v11940_v57, %v11785_v43  ;;  %v5183_v11 = vadd.f32 %v5179_v19, %v11921_v47  ;;  %v5185_v63 = vadd.f32 %v5181_v25, %v11935_v9  ;;  %v4437_v56 = vmul.f32 %v4429_v52, %v11796_v33  ;;  %v7035_v57 = vld [vmem:[#allocation2] sm:$0xff] (%p12677_p4) }
 0x49e   : >> { %v4436_v20 = vmul.f32 %v4428_v51, %v11818_v60  ;;  %v4482_v45 = vrot.slane %v4428_v51, 1  ;;  %v4256_v36 = vrot.slane %v4246_v10, %v11247_v37  ;;  %v4298_v26 = vadd.f32 %v4294_v17, %v11779_v22  ;;  %v11988_v17 = vpop.f32.mrf.mxu1 }
 0x49f   : >> { %v11972_v1 = vadd.f32 %v4491_v2, %v11754_v38   ;;  %v5237_v43 = vrot.slane %v5183_v11, 7  ;;  %vm13642_vm9 = vcmp.eq.s32.totalorder %v13555_v14, 4  ;;  %v4376_v52 = vadd.f32 %v4374_v32, %v4371_v35  ;;  %v11995_v32 = vpop.f32.mrf.mxu0 }
 0x4a0   : >> { %v4490_v49 = vmul.f32 %v13625_v28, %v4482_v45  ;;  %v4257_v27 = vadd.f32 %v4256_v36, %v4192_v15  ;;  %v4306_v50 = vmul.f32 %v4298_v26, %v11853_v55  ;;  %v4352_v6 = vrot.slane %v4298_v26, 1 }
 0x4a1   : >> { %v4440_v21 = vadd.f32 %v4436_v20, %v4435_v40  ;;  %v5245_v28 = vmul.f32 %v13640_v62, %v5237_v43  ;;  %v5239_v2 = vrot.slane %v5185_v63, 7  ;;  %v4503_v51 = vmul.f32 %v11972_v1, %v11796_v33  ;;  %v13643_v40 = vld [vmem:[#allocation82_spill] sm:$0xff]  ;;  %v13644_v20 = vld [vmem:[#allocation91_spill] sm:$0xff] }
 0x4a2   : >> { %v11979_v36 = vadd.f32 %v4490_v49, %v11772_v23   ;;  %v4258_v4 = vsel %vm13642_vm9, %v4257_v27, %v4192_v15  ;;  %v4312_v39 = vadd.f32 %v4310_v7, %v4306_v50  ;;  %v4360_v38 = vmul.f32 %v13631_v48, %v4352_v6  ;;  %v7036_v1 = vld [vmem:[#allocation2 + $0x8] sm:$0xff] (%p12677_p4) }
 0x4a3   : >> { %v5207_v10 = vmul.f32 %v5183_v11, %v11976_v30  ;;  %v5172_v23 = vrot.slane %v13643_v40, 7  ;;  %v5249_v35 = vadd.f32 %v5245_v28, %v11921_v47  ;;  %v5247_v7 = vmul.f32 %v13641_v5, %v5239_v2 }
 0x4a4   : >> { %v4322_v19 = vrot.slane %v4312_v39, %v13600_v29  ;;  %v4364_v15 = vadd.f32 %v4360_v38, %v11779_v22  ;;  %v4502_v25 = vmul.f32 %v11979_v36, %v11818_v60  ;;  %v4442_v33 = vadd.f32 %v4440_v21, %v4437_v56  ;;  %v13647_v38 = vld [vmem:[#allocation80_spill] sm:$0xff] }
 0x4a5   : >> { %v5180_v45 = vmul.f32 %v13644_v20, %v5172_v23  ;;  %v5209_v27 = vmul.f32 %v5185_v63, %v11988_v17  ;;  %v5303_v50 = vrot.slane %v5249_v35, 7  ;;  %v5251_v6 = vadd.f32 %v5247_v7, %v11935_v9  ;;  %v4875_v63 = vpop.f32.mrf.mxu0  ;;  %v13648_v7 = vld [vmem:[#allocation93_spill] sm:$0xff] }
 0x4a6   : >> { %v4323_v26 = vadd.f32 %v4322_v19, %v4258_v4  ;;  %v4372_v11 = vmul.f32 %v4364_v15, %v11853_v55  ;;  %v4418_v49 = vrot.slane %v4364_v15, 1  ;;  %vm13645_vm8 = vcmp.eq.s32.totalorder %v13555_v14, 7 }
 0x4a7   : >> { %v5184_v43 = vadd.f32 %v5180_v45, %v11946_v16  ;;  %v12008_v39 = vsel %vm13645_vm8, %v11924_v58, %v11908_v8  ;;  %vm13646_vm9 = vcmp.eq.s32.totalorder %v13555_v14, 3  ;;  %v5174_v28 = vrot.slane %v13647_v38, 7 }
 0x4a8   : >> { %v4324_v60 = vsel %vm13646_vm9, %v4323_v26, %v4258_v4  ;;  %v4378_v56 = vadd.f32 %v4376_v52, %v4372_v11  ;;  %v4426_v21 = vmul.f32 %v13631_v48, %v4418_v49  ;;  %v4506_v2 = vadd.f32 %v4502_v25, %v4501_v24 }
 0x4a9   : >> { %v5311_v40 = vmul.f32 %v13640_v62, %v5303_v50  ;;  %v5305_v23 = vrot.slane %v5251_v6, 7  ;;  %v5208_v19 = vmul.f32 %v5184_v43, %v11995_v32  ;;  %v5238_v58 = vrot.slane %v5184_v43, 7 }
 0x4aa   : >> { %v4388_v15 = vrot.slane %v4378_v56, %v13605_v12  ;;  %v4430_v8 = vadd.f32 %v4426_v21, %v11779_v22  ;;  %v5182_v45 = vmul.f32 %v13648_v7, %v5174_v28  ;;  %v5273_v4 = vmul.f32 %v5249_v35, %v11976_v30  ;;  %v12027_v56 = vpop.f32.mrf.mxu1 }
 0x4ab   : >> { %v5315_v52 = vadd.f32 %v5311_v40, %v11921_v47  ;;  %v5313_v26 = vmul.f32 %v13641_v5, %v5305_v23  ;;  %v12023_v24 = vmul.f32 %v4875_v63, %v13614_v18  ;;  %v5246_v50 = vmul.f32 %v13644_v20, %v5238_v58 }
 0x4ac   : >> { %v4389_v25 = vadd.f32 %v4388_v15, %v4324_v60  ;;  %v4438_v11 = vmul.f32 %v4430_v8, %v11853_v55  ;;  %v4484_v49 = vrot.slane %v4430_v8, 1  ;;  %v5215_v38 = vadd.f32 %v5208_v19, %v5207_v10 }
 0x4ad   : >> { %v5369_v43 = vrot.slane %v5315_v52, 7  ;;  %v5317_v21 = vadd.f32 %v5313_v26, %v11935_v9  ;;  %v5186_v35 = vadd.f32 %v5182_v45, %v11952_v53  ;;  %vm13649_vm8 = vcmp.eq.s32.totalorder %v13555_v14, 2 }
 0x4ae   : >> { %v4390_v28 = vsel %vm13649_vm8, %v4389_v25, %v4324_v60  ;;  %v4444_v40 = vadd.f32 %v4442_v33, %v4438_v11  ;;  %v4492_v63 = vmul.f32 %v13631_v48, %v4484_v49  ;;  %v5250_v23 = vadd.f32 %v5246_v50, %v11946_v16  ;;  %v4946_v49 = vpop.f32.mrf.mxu1 }
 0x4af   : >> { %v4508_v15 = vadd.f32 %v4506_v2, %v4503_v51  ;;  %v5377_v8 = vmul.f32 %v13640_v62, %v5369_v43  ;;  %v5371_v58 = vrot.slane %v5317_v21, 7  ;;  %v5210_v59 = vmul.f32 %v5186_v35, %v12027_v56 }
 0x4b0   : >> { %v4454_v54 = vrot.slane %v4444_v40, %v13609_v0  ;;  %v12039_v33 = vadd.f32 %v4492_v63, %v11779_v22   ;;  %v5274_v10 = vmul.f32 %v5250_v23, %v11995_v32  ;;  %v5304_v19 = vrot.slane %v5250_v23, 7 }
 0x4b1   : >> { %v5381_v60 = vadd.f32 %v5377_v8, %v11921_v47  ;;  %v5379_v48 = vmul.f32 %v13641_v5, %v5371_v58  ;;  %v5217_v45 = vadd.f32 %v5215_v38, %v5209_v27  ;;  %v5240_v26 = vrot.slane %v5186_v35, 7 }
 0x4b2   : >> { %v4455_v51 = vadd.f32 %v4454_v54, %v4390_v28  ;;  %v4504_v2 = vmul.f32 %v12039_v33, %v11853_v55  ;;  %v5275_v25 = vmul.f32 %v5251_v6, %v11988_v17  ;;  %v5312_v11 = vmul.f32 %v13644_v20, %v5304_v19 }
 0x4b3   : >> { %v5435_v22 = vrot.slane %v5381_v60, 7  ;;  %v5383_v50 = vadd.f32 %v5379_v48, %v11935_v9  ;;  %v5281_v43 = vadd.f32 %v5274_v10, %v5273_v4  ;;  %v5219_v40 = vadd.f32 %v5217_v45, %v5210_v59 }
 0x4b4   : >> { %vm13650_vm9 = vcmp.eq.s32.totalorder %v13555_v14, 1  ;;  %v4510_v27 = vadd.f32 %v4508_v15, %v4504_v2  ;;  %v5316_v54 = vadd.f32 %v5312_v11, %v11946_v16  ;;  %v5248_v38 = vmul.f32 %v13648_v7, %v5240_v26 }
 0x4b5   : >> { %v12051_v63 = vsel %vm13650_vm9, %v4455_v51, %v4390_v28  ;;  %v5443_v55 = vmul.f32 %v13640_v62, %v5435_v22  ;;  %v5437_v6 = vrot.slane %v5383_v50, 7  ;;  %v5224_v35 = vrot.slane %v5219_v40, %v13613_v46 }
 0x4b6   : >> { %v12058_v23 = vmul.f32 %v4946_v49, %v13614_v18  ;;  %v4520_v4 = vrot.slane %v4510_v27, %v13613_v46  ;;  %v5340_v59 = vmul.f32 %v5316_v54, %v11995_v32  ;;  %v5370_v8 = vrot.slane %v5316_v54, 7 }
 0x4b7   : >> { %v5252_v28 = vadd.f32 %v5248_v38, %v11952_v53  ;;  %v5447_v15 = vadd.f32 %v5443_v55, %v11921_v47  ;;  %v5445_v58 = vmul.f32 %v13641_v5, %v5437_v6  ;;  %v5225_v10 = vadd.f32 %v5224_v35, %v12008_v39 }
 0x4b8   : >> { %v5283_v19 = vadd.f32 %v5281_v43, %v5275_v25  ;;  %v12067_v48 = vadd.f32 %v4520_v4, %v12051_v63  ;;  %v5339_v45 = vmul.f32 %v5315_v52, %v11976_v30  ;;  %v5378_v26 = vmul.f32 %v13644_v20, %v5370_v8 }
 0x4b9   : >> { %v5276_v51 = vmul.f32 %v5252_v28, %v12027_v56  ;;  %v5405_v2 = vmul.f32 %v5381_v60, %v11976_v30  ;;  %v5501_v11 = vrot.slane %v5447_v15, 7  ;;  %v5341_v49 = vmul.f32 %v5317_v21, %v11988_v17 }
 0x4ba   : >> { %v5449_v22 = vadd.f32 %v5445_v58, %v11935_v9  ;;  %v5347_v40 = vadd.f32 %v5340_v59, %v5339_v45  ;;  %v5382_v27 = vadd.f32 %v5378_v26, %v11946_v16  ;;  %v5306_v43 = vrot.slane %v5252_v28, 7 }
 0x4bb   : >> { %v5285_v25 = vadd.f32 %v5283_v19, %v5276_v51  ;;  %v5509_v54 = vmul.f32 %v13640_v62, %v5501_v11  ;;  %v5407_v52 = vmul.f32 %v5383_v50, %v11988_v17  ;;  %vm13651_vm8 = vcmp.eq.s32.totalorder %v13555_v14, 0 }
 0x4bc   : >> { %v5503_v38 = vrot.slane %v5449_v22, 7  ;;  %v5226_v55 = vsel %vm13651_vm8, %v5225_v10, %v12008_v39  ;;  %v5406_v60 = vmul.f32 %v5382_v27, %v11995_v32  ;;  %v5436_v6 = vrot.slane %v5382_v27, 7  ;;  %v4877_v39 = vpop.f32.mrf.mxu0  ;;  %v4948_v10 = vpop.f32.mrf.mxu1 }
 0x4bd   : >> { %v5290_v21 = vrot.slane %v5285_v25, %v13609_v0  ;;  %v5314_v35 = vmul.f32 %v13648_v7, %v5306_v43  ;;  %v5471_v4 = vmul.f32 %v5447_v15, %v11976_v30  ;;  %v5513_v59 = vadd.f32 %v5509_v54, %v11921_v47 }
 0x4be   : >> { %v5511_v8 = vmul.f32 %v13641_v5, %v5503_v38  ;;  %v5444_v50 = vmul.f32 %v13644_v20, %v5436_v6  ;;  %v5349_v19 = vadd.f32 %v5347_v40, %v5341_v49  ;;  %v5473_v26 = vmul.f32 %v5449_v22, %v11988_v17 }
 0x4bf   : >> { %v5291_v28 = vadd.f32 %v5290_v21, %v5226_v55  ;;  %v5318_v58 = vadd.f32 %v5314_v35, %v11952_v53  ;;  %v5567_v45 = vrot.slane %v5513_v59, 7  ;;  %v5413_v11 = vadd.f32 %v5406_v60, %v5405_v2 }
 0x4c0   : >> { %v5515_v51 = vadd.f32 %v5511_v8, %v11935_v9  ;;  %v5448_v15 = vadd.f32 %v5444_v50, %v11946_v16  ;;  %v12095_v38 = vmul.f32 %v4877_v39, %v13614_v18  ;;  %v12098_v49 = vmul.f32 %v4948_v10, %v13614_v18  ;;  %v13652_v8 = vld [vmem:[#allocation75_spill] sm:$0xff] }
 0x4c1   : >> { %v5342_v27 = vmul.f32 %v5318_v58, %v12027_v56  ;;  %v5372_v25 = vrot.slane %v5318_v58, 7  ;;  %v5575_v43 = vmul.f32 %v13640_v62, %v5567_v45  ;;  %v5292_v22 = vsel %vm13650_vm9, %v5291_v28, %v5226_v55 }
 0x4c2   : >> { %v5569_v54 = vrot.slane %v5515_v51, 7  ;;  %v5502_v40 = vrot.slane %v5448_v15, 7  ;;  %v5472_v35 = vmul.f32 %v5448_v15, %v11995_v32  ;;  %v5191_v50 = vrot.slane %v13652_v8, 1 }
 0x4c3   : >> { %v5351_v6 = vadd.f32 %v5349_v19, %v5342_v27  ;;  %v5380_v2 = vmul.f32 %v13648_v7, %v5372_v25  ;;  %v5579_v60 = vadd.f32 %v5575_v43, %v11921_v47  ;;  %v5415_v45 = vadd.f32 %v5413_v11, %v5407_v52  ;;  %v13653_v27 = vld [vmem:[#allocation103_spill] sm:$0xff] }
 0x4c4   : >> { %v5577_v21 = vmul.f32 %v13641_v5, %v5569_v54  ;;  %v5510_v58 = vmul.f32 %v13644_v20, %v5502_v40  ;;  %v5537_v55 = vmul.f32 %v5513_v59, %v11976_v30  ;;  %v5199_v25 = vmul.f32 %v13653_v27, %v5191_v50 }
 0x4c5   : >> { %v5356_v39 = vrot.slane %v5351_v6, %v13605_v12  ;;  %v5384_v10 = vadd.f32 %v5380_v2, %v11952_v53  ;;  %v5633_v28 = vrot.slane %v5579_v60, 7  ;;  %v5539_v40 = vmul.f32 %v5515_v51, %v11988_v17 }
 0x4c6   : >> { %v5581_v19 = vadd.f32 %v5577_v21, %v11935_v9  ;;  %v5514_v43 = vadd.f32 %v5510_v58, %v11946_v16  ;;  %v5479_v6 = vadd.f32 %v5472_v35, %v5471_v4  ;;  %vm13654_vm8 = vcmp.eq.s32.totalorder %v13555_v14, 2 }
 0x4c7   : >> { %v5357_v54 = vadd.f32 %v5356_v39, %v5292_v22  ;;  %v5408_v15 = vmul.f32 %v5384_v10, %v12027_v56  ;;  %v5438_v8 = vrot.slane %v5384_v10, 7  ;;  %v5641_v2 = vmul.f32 %v13640_v62, %v5633_v28 }
 0x4c8   : >> { %v5635_v3 = vrot.slane %v5581_v19, 7  ;;  %v5538_v52 = vmul.f32 %v5514_v43, %v11995_v32  ;;  %v5568_v59 = vrot.slane %v5514_v43, 7  ;;  %v5203_v39 = vadd.f32 %v5199_v25, %v12023_v24 }
 0x4c9   : >> { %v5417_v11 = vadd.f32 %v5415_v45, %v5408_v15  ;;  %v5358_v50 = vsel %vm13654_vm8, %v5357_v54, %v5292_v22  ;;  %v5446_v58 = vmul.f32 %v13648_v7, %v5438_v8  ;;  %v5603_v62 = vmul.f32 %v5579_v60, %v11976_v30  ;;  %v13657_v15 = vld [vmem:[#allocation73_spill] sm:$0xff] }
 0x4ca   : >> { %v5643_v21 = vmul.f32 %v13641_v5, %v5635_v3  ;;  %v5545_v10 = vadd.f32 %v5538_v52, %v5537_v55  ;;  %v5576_v51 = vmul.f32 %v13644_v20, %v5568_v59  ;;  %v5605_v35 = vmul.f32 %v5581_v19, %v11988_v17  ;;  %v13658_v59 = vld [vmem:[#allocation105_spill] sm:$0xff] }
 0x4cb   : >> { %v5422_v4 = vrot.slane %v5417_v11, %v13600_v29  ;;  %v5450_v45 = vadd.f32 %v5446_v58, %v11952_v53  ;;  %v5481_v28 = vadd.f32 %v5479_v6, %v5473_v26  ;;  %v12129_v3 = vadd.f32 %v5641_v2, %v11921_v47   ;;  %v12140_v2 = vpop.f32.mrf.mxu0 }
 0x4cc   : >> { %v5580_v5 = vadd.f32 %v5576_v51, %v11946_v16  ;;  %v5257_v43 = vrot.slane %v5203_v39, 1  ;;  %v12133_v55 = vadd.f32 %v5643_v21, %v11935_v9   ;;  %v5193_v60 = vrot.slane %v13657_v15, 1 }
 0x4cd   : >> { %13655 = vst [vmem:[#allocation22_spill] sm:$0xff] %v12129_v3  ;;  %v5423_v22 = vadd.f32 %v5422_v4, %v5358_v50  ;;  %v5474_v25 = vmul.f32 %v5450_v45, %v12027_v56  ;;  %v5504_v54 = vrot.slane %v5450_v45, 7  ;;  %v5547_v52 = vadd.f32 %v5545_v10, %v5539_v40  ;;  %v13660_v4 = vld [vmem:[#allocation74_spill] sm:$0xff] }
 0x4ce   : >> { %13656 = vst [vmem:[#allocation11_spill] sm:$0xff] %v12133_v55  ;;  %v5604_v19 = vmul.f32 %v5580_v5, %v11995_v32  ;;  %v5634_v8 = vrot.slane %v5580_v5, 7  ;;  %v5265_v26 = vmul.f32 %v13653_v27, %v5257_v43  ;;  %v5201_v11 = vmul.f32 %v13658_v59, %v5193_v60 }
 0x4cf   : >> { %v5483_v47 = vadd.f32 %v5481_v28, %v5474_v25  ;;  %v5512_v6 = vmul.f32 %v13648_v7, %v5504_v54  ;;  %vm13659_vm9 = vcmp.eq.s32.totalorder %v13555_v14, 3  ;;  %v5192_v45 = vrot.slane %v13660_v4, 1  ;;  %v12180_v4 = vpop.f32.mrf.mxu1 }
 0x4d0   : >> { %v5642_v9 = vmul.f32 %v13644_v20, %v5634_v8  ;;  %v5424_v21 = vsel %vm13659_vm9, %v5423_v22, %v5358_v50  ;;  %v5269_v58 = vadd.f32 %v5265_v26, %v12023_v24  ;;  %v5205_v10 = vadd.f32 %v5201_v11, %v12058_v23  ;;  %v13662_v26 = vld [vmem:[#allocation104_spill] sm:$0xff]  ;;  %v12169_v11 = vpop.f32.mrf.mxu0 }
 0x4d1   : >> { %v5488_v51 = vrot.slane %v5483_v47, %v11247_v37  ;;  %v5516_v40 = vadd.f32 %v5512_v6, %v11952_v53  ;;  %v5669_v28 = vmul.f32 %v12129_v3, %v11976_v30  ;;  %v5211_v20 = vmul.f32 %v5203_v39, %v12140_v2 }
 0x4d2   : >> { %v12154_v60 = vadd.f32 %v5642_v9, %v11946_v16   ;;  %v5323_v5 = vrot.slane %v5269_v58, 1  ;;  %v5611_v50 = vadd.f32 %v5604_v19, %v5603_v62  ;;  %v5259_v8 = vrot.slane %v5205_v10, 1 }
 0x4d3   : >> { %v5489_v22 = vadd.f32 %v5488_v51, %v5424_v21  ;;  %v5540_v43 = vmul.f32 %v5516_v40, %v12027_v56  ;;  %v5570_v25 = vrot.slane %v5516_v40, 7  ;;  %v5200_v47 = vmul.f32 %v13662_v26, %v5192_v45 }
 0x4d4   : >> { %13661 = vst [vmem:[#allocation18_spill] sm:$0xff] %v12154_v60  ;;  %v5670_v54 = vmul.f32 %v12154_v60, %v11995_v32  ;;  %v5331_v15 = vmul.f32 %v13653_v27, %v5323_v5  ;;  %v5671_v16 = vmul.f32 %v12133_v55, %v11988_v17  ;;  %vm13663_vm8 = vcmp.eq.s32.totalorder %v13555_v14, 4 }
 0x4d5   : >> { %v5549_v30 = vadd.f32 %v5547_v52, %v5540_v43  ;;  %v5578_v39 = vmul.f32 %v13648_v7, %v5570_v25  ;;  %v5490_v62 = vsel %vm13663_vm8, %v5489_v22, %v5424_v21  ;;  %v5267_v6 = vmul.f32 %v13658_v59, %v5259_v8 }
 0x4d6   : >> { %v5335_v19 = vadd.f32 %v5331_v15, %v12023_v24  ;;  %v5204_v32 = vadd.f32 %v5200_v47, %v12095_v38  ;;  %v5613_v40 = vadd.f32 %v5611_v50, %v5605_v35  ;;  %vm13664_vm9 = vcmp.eq.s32.totalorder %v13555_v14, 0 }
 0x4d7   : >> { %v5554_v9 = vrot.slane %v5549_v30, %v11244_v44  ;;  %v5582_v51 = vadd.f32 %v5578_v39, %v11952_v53  ;;  %v12178_v17 = vsel %vm13664_vm9, %v12067_v48, %v12051_v63  ;;  %v5677_v52 = vadd.f32 %v5670_v54, %v5669_v28 }
 0x4d8   : >> { %v5389_v21 = vrot.slane %v5335_v19, 1  ;;  %v5271_v45 = vadd.f32 %v5267_v6, %v12058_v23  ;;  %v5212_v25 = vmul.f32 %v5204_v32, %v12169_v11  ;;  %v5277_v35 = vmul.f32 %v5269_v58, %v12140_v2  ;;  %v12193_v6 = vpop.f32.mrf.mxu1  ;;  %v13666_v58 = vld [vmem:[#allocation72_spill] sm:$0xff] }
 0x4d9   : >> { %v5555_v5 = vadd.f32 %v5554_v9, %v5490_v62  ;;  %v5606_v22 = vmul.f32 %v5582_v51, %v12027_v56  ;;  %v5636_v43 = vrot.slane %v5582_v51, 7  ;;  %v5258_v8 = vrot.slane %v5204_v32, 1 }
 0x4da   : >> { %v5397_v50 = vmul.f32 %v13653_v27, %v5389_v21  ;;  %v5325_v15 = vrot.slane %v5271_v45, 1  ;;  %vm13665_vm8 = vcmp.eq.s32.totalorder %v13555_v14, 5  ;;  %v5216_v54 = vadd.f32 %v5212_v25, %v5211_v20 }
 0x4db   : >> { %v5556_v63 = vsel %vm13665_vm8, %v5555_v5, %v5490_v62  ;;  %v5615_v48 = vadd.f32 %v5613_v40, %v5606_v22  ;;  %v5644_v28 = vmul.f32 %v13648_v7, %v5636_v43  ;;  %v5266_v39 = vmul.f32 %v13662_v26, %v5258_v8  ;;  %v5763_v22 = vpop.f32.mrf.mxu0 }
 0x4dc   : >> { %v5401_v47 = vadd.f32 %v5397_v50, %v12023_v24  ;;  %v5333_v30 = vmul.f32 %v13658_v59, %v5325_v15  ;;  %v5194_v9 = vrot.slane %v13666_v58, 1  ;;  %v5679_v62 = vadd.f32 %v5677_v52, %v5671_v16  ;;  %v13668_v50 = vld [vmem:[#allocation106_spill] sm:$0xff]  ;;  %v5834_v52 = vpop.f32.mrf.mxu1 }
 0x4dd   : >> { %v5620_v51 = vrot.slane %v5615_v48, %v11233_v61  ;;  %v12198_v32 = vadd.f32 %v5644_v28, %v11952_v53   ;;  %v5213_v40 = vmul.f32 %v5205_v10, %v12180_v4  ;;  %v5343_v7 = vmul.f32 %v5335_v19, %v12140_v2 }
 0x4de   : >> { %v5455_v20 = vrot.slane %v5401_v47, 1  ;;  %v5337_v21 = vadd.f32 %v5333_v30, %v12058_v23  ;;  %v5270_v5 = vadd.f32 %v5266_v39, %v12095_v38  ;;  %v5279_v25 = vmul.f32 %v5271_v45, %v12180_v4  ;;  %v5836_v3 = vpop.f32.mrf.mxu1 }
 0x4df   : >> { %13667 = vst [vmem:[#allocation23_spill] sm:$0xff] %v12198_v32  ;;  %v5621_v43 = vadd.f32 %v5620_v51, %v5556_v63  ;;  %v5202_v15 = vmul.f32 %v13668_v50, %v5194_v9  ;;  %v5218_v8 = vadd.f32 %v5216_v54, %v5213_v40  ;;  %v5672_v53 = vmul.f32 %v12198_v32, %v12027_v56  ;;  %v5765_v9 = vpop.f32.mrf.mxu0 }
 0x4e0   : >> { %v5463_v16 = vmul.f32 %v13653_v27, %v5455_v20  ;;  %v5391_v10 = vrot.slane %v5337_v21, 1  ;;  %v5278_v19 = vmul.f32 %v5270_v5, %v12169_v11  ;;  %v5409_v48 = vmul.f32 %v5401_v47, %v12140_v2 }
 0x4e1   : >> { %v5324_v28 = vrot.slane %v5270_v5, 1  ;;  %v5206_v30 = vadd.f32 %v5202_v15, %v12098_v49  ;;  %v12213_v39 = vmul.f32 %v5763_v22, %v11208_v42  ;;  %v5681_v45 = vadd.f32 %v5679_v62, %v5672_v53 }
 0x4e2   : >> { %v5467_v54 = vadd.f32 %v5463_v16, %v12023_v24  ;;  %v5399_v58 = vmul.f32 %v13658_v59, %v5391_v10  ;;  %v5282_v56 = vadd.f32 %v5278_v19, %v5277_v35  ;;  %v12220_v47 = vmul.f32 %v5834_v52, %v11208_v42 }
 0x4e3   : >> { %v5332_v51 = vmul.f32 %v13662_v26, %v5324_v28  ;;  %v5214_v40 = vmul.f32 %v5206_v30, %v12193_v6  ;;  %v5260_v20 = vrot.slane %v5206_v30, 1  ;;  %vm13669_vm9 = vcmp.eq.s32.totalorder %v13555_v14, 6 }
 0x4e4   : >> { %v12224_v5 = vsel %vm13669_vm9, %v5621_v43, %v5556_v63  ;;  %v5521_v22 = vrot.slane %v5467_v54, 1  ;;  %v5345_v62 = vmul.f32 %v5337_v21, %v12180_v4  ;;  %v5403_v15 = vadd.f32 %v5399_v58, %v12058_v23 }
 0x4e5   : >> { %v5336_v35 = vadd.f32 %v5332_v51, %v12095_v38  ;;  %v5220_v53 = vadd.f32 %v5218_v8, %v5214_v40  ;;  %v5268_v16 = vmul.f32 %v13668_v50, %v5260_v20  ;;  %v12231_v10 = vmul.f32 %v5765_v9, %v11208_v42 }
 0x4e6   : >> { %v5686_v19 = vrot.slane %v5681_v45, %v11230_v41  ;;  %v5529_v52 = vmul.f32 %v13653_v27, %v5521_v22  ;;  %v5457_v28 = vrot.slane %v5403_v15, 1  ;;  %v5284_v63 = vadd.f32 %v5282_v56, %v5279_v25 }
 0x4e7   : >> { %v5344_v43 = vmul.f32 %v5336_v35, %v12169_v11  ;;  %v5390_v30 = vrot.slane %v5336_v35, 1  ;;  %v5230_v21 = vrot.slane %v5220_v53, %v11230_v41  ;;  %v5272_v58 = vadd.f32 %v5268_v16, %v12098_v49 }
 0x4e8   : >> { %v12239_v8 = vadd.f32 %v5686_v19, %v12224_v5  ;;  %v5475_v51 = vmul.f32 %v5467_v54, %v12140_v2  ;;  %v5533_v9 = vadd.f32 %v5529_v52, %v12023_v24  ;;  %v5465_v45 = vmul.f32 %v13658_v59, %v5457_v28 }
 0x4e9   : >> { %v5398_v40 = vmul.f32 %v13662_v26, %v5390_v30  ;;  %v5231_v25 = vadd.f32 %v5230_v21, %v12178_v17  ;;  %v5280_v56 = vmul.f32 %v5272_v58, %v12193_v6  ;;  %v5348_v35 = vadd.f32 %v5344_v43, %v5343_v7 }
 0x4ea   : >> { %v5587_v20 = vrot.slane %v5533_v9, 1  ;;  %v5469_v22 = vadd.f32 %v5465_v45, %v12058_v23  ;;  %v5326_v53 = vrot.slane %v5272_v58, 1  ;;  %v5411_v16 = vmul.f32 %v5403_v15, %v12180_v4 }
 0x4eb   : >> { %v5402_v19 = vadd.f32 %v5398_v40, %v12095_v38  ;;  %vm13670_vm8 = vcmp.eq.s32.totalorder %v13555_v14, 7  ;;  %v5286_v52 = vadd.f32 %v5284_v63, %v5280_v56  ;;  %v5350_v40 = vadd.f32 %v5348_v35, %v5345_v62  ;;  %v13671_v56 = vld [vmem:[#allocation79_spill] sm:$0xff] }
 0x4ec   : >> { %v5232_v54 = vsel %vm13670_vm8, %v5231_v25, %v12178_v17  ;;  %v5595_v28 = vmul.f32 %v13653_v27, %v5587_v20  ;;  %v5523_v30 = vrot.slane %v5469_v22, 1  ;;  %v5334_v21 = vmul.f32 %v13668_v50, %v5326_v53 }
 0x4ed   : >> { %v5410_v60 = vmul.f32 %v5402_v19, %v12169_v11  ;;  %v5456_v45 = vrot.slane %v5402_v19, 1  ;;  %v5296_v7 = vrot.slane %v5286_v52, %v11233_v61  ;;  %v12262_v25 = vmul.f32 %v5836_v3, %v11208_v42 }
 0x4ee   : >> { %v5599_v15 = vadd.f32 %v5595_v28, %v12023_v24  ;;  %v5531_v43 = vmul.f32 %v13658_v59, %v5523_v30  ;;  %v5338_v58 = vadd.f32 %v5334_v21, %v12098_v49  ;;  %v6343_v20 = vrot.slane %v13671_v56, 7 }
 0x4ef   : >> { %v5464_v17 = vmul.f32 %v13662_v26, %v5456_v45  ;;  %v5297_v63 = vadd.f32 %v5296_v7, %v5232_v54  ;;  %v5414_v55 = vadd.f32 %v5410_v60, %v5409_v48  ;;  %v5541_v35 = vmul.f32 %v5533_v9, %v12140_v2  ;;  %v13672_v60 = vld [vmem:[#allocation94_spill] sm:$0xff] }
 0x4f0   : >> { %v5653_v53 = vrot.slane %v5599_v15, 1  ;;  %v5535_v19 = vadd.f32 %v5531_v43, %v12058_v23  ;;  %v5346_v52 = vmul.f32 %v5338_v58, %v12193_v6  ;;  %v5392_v62 = vrot.slane %v5338_v58, 1 }
 0x4f1   : >> { %v5468_v28 = vadd.f32 %v5464_v17, %v12095_v38  ;;  %v5298_v30 = vsel %vm13669_vm9, %v5297_v63, %v5232_v54  ;;  %v6351_v48 = vmul.f32 %v13672_v60, %v6343_v20  ;;  %v5416_v32 = vadd.f32 %v5414_v55, %v5411_v16  ;;  %v13673_v54 = vld [vmem:[#allocation77_spill] sm:$0xff] }
 0x4f2   : >> { %v5661_v21 = vmul.f32 %v13653_v27, %v5653_v53  ;;  %v5589_v42 = vrot.slane %v5535_v19, 1  ;;  %v5352_v3 = vadd.f32 %v5350_v40, %v5346_v52  ;;  %v5400_v43 = vmul.f32 %v13668_v50, %v5392_v62 }
 0x4f3   : >> { %v5476_v45 = vmul.f32 %v5468_v28, %v12169_v11  ;;  %v5522_v7 = vrot.slane %v5468_v28, 1  ;;  %v6345_v58 = vrot.slane %v13673_v54, 7  ;;  %v6355_v20 = vadd.f32 %v6351_v48, %v12213_v39  ;;  %v13674_v28 = vld [vmem:[#allocation96_spill] sm:$0xff] }
 0x4f4   : >> { %v5597_v56 = vmul.f32 %v13658_v59, %v5589_v42  ;;  %v5362_v17 = vrot.slane %v5352_v3, %v11244_v44  ;;  %v12279_v9 = vadd.f32 %v5661_v21, %v12023_v24   ;;  %v5404_v63 = vadd.f32 %v5400_v43, %v12098_v49 }
 0x4f5   : >> { %v5480_v27 = vadd.f32 %v5476_v45, %v5475_v51  ;;  %v5530_v40 = vmul.f32 %v13662_v26, %v5522_v7  ;;  %v6353_v62 = vmul.f32 %v13674_v28, %v6345_v58  ;;  %v5477_v42 = vmul.f32 %v5469_v22, %v12180_v4 }
 0x4f6   : >> { %v5601_v53 = vadd.f32 %v5597_v56, %v12058_v23  ;;  %v5363_v52 = vadd.f32 %v5362_v17, %v5298_v30  ;;  %v5412_v16 = vmul.f32 %v5404_v63, %v12193_v6  ;;  %v5458_v24 = vrot.slane %v5404_v63, 1  ;;  %v12298_v56 = vpop.f32.mrf.mxu0 }
 0x4f7   : >> { %v5534_v55 = vadd.f32 %v5530_v40, %v12095_v38  ;;  %v5607_v51 = vmul.f32 %v5599_v15, %v12140_v2  ;;  %v5543_v21 = vmul.f32 %v5535_v19, %v12180_v4  ;;  %vm13675_vm8 = vcmp.eq.s32.totalorder %v13555_v14, 5 }
 0x4f8   : >> { %v5655_v3 = vrot.slane %v5601_v53, 1  ;;  %v5364_v45 = vsel %vm13675_vm8, %v5363_v52, %v5298_v30  ;;  %v12295_v7 = vmul.f32 %v12279_v9, %v12140_v2  ;;  %v5418_v48 = vadd.f32 %v5416_v32, %v5412_v16 }
 0x4f9   : >> { %v5588_v43 = vrot.slane %v5534_v55, 1  ;;  %v5466_v22 = vmul.f32 %v13668_v50, %v5458_v24  ;;  %v5542_v17 = vmul.f32 %v5534_v55, %v12169_v11  ;;  %v5482_v54 = vadd.f32 %v5480_v27, %v5477_v42 }
 0x4fa   : >> { %v6409_v15 = vrot.slane %v6355_v20, 7  ;;  %v6357_v19 = vadd.f32 %v6353_v62, %v12220_v47  ;;  %v5609_v58 = vmul.f32 %v5601_v53, %v12180_v4  ;;  %v5428_v40 = vrot.slane %v5418_v48, %v11247_v37 }
 0x4fb   : >> { %v5596_v30 = vmul.f32 %v13662_v26, %v5588_v43  ;;  %v5470_v2 = vadd.f32 %v5466_v22, %v12098_v49  ;;  %v5663_v32 = vmul.f32 %v13658_v59, %v5655_v3  ;;  %v12308_v63 = vmul.f32 %v6355_v20, %v12298_v56  ;;  %v12314_v43 = vpop.f32.mrf.mxu1 }
 0x4fc   : >> { %v6417_v52 = vmul.f32 %v13672_v60, %v6409_v15  ;;  %v6411_v55 = vrot.slane %v6357_v19, 7  ;;  %v5429_v42 = vadd.f32 %v5428_v40, %v5364_v45  ;;  %v5546_v16 = vadd.f32 %v5542_v17, %v5541_v35 }
 0x4fd   : >> { %v5600_v27 = vadd.f32 %v5596_v30, %v12095_v38  ;;  %v5478_v62 = vmul.f32 %v5470_v2, %v12193_v6  ;;  %v5524_v53 = vrot.slane %v5470_v2, 1  ;;  %vm13676_vm9 = vcmp.eq.s32.totalorder %v13555_v14, 4 }
 0x4fe   : >> { %v6421_v24 = vadd.f32 %v6417_v52, %v12213_v39  ;;  %v6419_v48 = vmul.f32 %v13674_v28, %v6411_v55  ;;  %v5430_v3 = vsel %vm13676_vm9, %v5429_v42, %v5364_v45  ;;  %v12321_v15 = vadd.f32 %v5663_v32, %v12058_v23   ;;  %v13677_v32 = vld [vmem:[#allocation78_spill] sm:$0xff] }
 0x4ff   : >> { %v5608_v59 = vmul.f32 %v5600_v27, %v12169_v11  ;;  %v5654_v20 = vrot.slane %v5600_v27, 1  ;;  %v5484_v22 = vadd.f32 %v5482_v54, %v5478_v62  ;;  %v5532_v30 = vmul.f32 %v13668_v50, %v5524_v53 }
 0x500   : >> { %v6475_v40 = vrot.slane %v6421_v24, 7  ;;  %v6423_v35 = vadd.f32 %v6419_v48, %v12220_v47  ;;  %v6381_v52 = vmul.f32 %v6357_v19, %v12314_v43  ;;  %v5548_v27 = vadd.f32 %v5546_v16, %v5543_v21 }
 0x501   : >> { %v5662_v17 = vmul.f32 %v13662_v26, %v5654_v20  ;;  %v5494_v2 = vrot.slane %v5484_v22, %v13600_v29  ;;  %v5536_v55 = vadd.f32 %v5532_v30, %v12098_v49  ;;  %v5612_v42 = vadd.f32 %v5608_v59, %v5607_v51  ;;  %v13679_v51 = vld [vmem:[#allocation95_spill] sm:$0xff] }
 0x502   : >> { %v6483_v45 = vmul.f32 %v13672_v60, %v6475_v40  ;;  %v6477_v54 = vrot.slane %v6423_v35, 7  ;;  %v6344_v62 = vrot.slane %v13677_v32, 7  ;;  %vm13678_vm8 = vcmp.eq.s32.totalorder %v13555_v14, 3 }
 0x503   : >> { %v12331_v40 = vadd.f32 %v5662_v17, %v12095_v38   ;;  %v5495_v23 = vadd.f32 %v5494_v2, %v5430_v3  ;;  %v5544_v53 = vmul.f32 %v5536_v55, %v12193_v6  ;;  %v5590_v26 = vrot.slane %v5536_v55, 1  ;;  %v12345_v17 = vpop.f32.mrf.mxu0 }
 0x504   : >> { %v6487_v48 = vadd.f32 %v6483_v45, %v12213_v39  ;;  %v6485_v19 = vmul.f32 %v13674_v28, %v6477_v54  ;;  %v6352_v59 = vmul.f32 %v13679_v51, %v6344_v62  ;;  %v5675_v38 = vmul.f32 %v12321_v15, %v12180_v4 }
 0x505   : >> { %v5674_v21 = vmul.f32 %v12331_v40, %v12169_v11  ;;  %v5496_v16 = vsel %vm13678_vm8, %v5495_v23, %v5430_v3  ;;  %v5550_v20 = vadd.f32 %v5548_v27, %v5544_v53  ;;  %v5598_v22 = vmul.f32 %v13668_v50, %v5590_v26  ;;  %v8631_v40 = vld [vmem:[%s13025_s12 + $0x18] sm:$0xff] (%p12677_p4)  }
 0x506   : >> { %v6541_v30 = vrot.slane %v6487_v48, 7  ;;  %v5614_v2 = vadd.f32 %v5612_v42, %v5609_v58  ;;  %v6445_v55 = vmul.f32 %v6421_v24, %v12298_v56  ;;  %v6489_v45 = vadd.f32 %v6485_v19, %v12220_v47 }
 0x507   : >> { %v6356_v11 = vadd.f32 %v6352_v59, %v12231_v10  ;;  %v5560_v3 = vrot.slane %v5550_v20, %v13605_v12  ;;  %v5602_v54 = vadd.f32 %v5598_v22, %v12098_v49  ;;  %v5678_v4 = vadd.f32 %v5674_v21, %v12295_v7  ;;  %v13680_v20 = vld [vmem:[#allocation76_spill] sm:$0xff] }
 0x508   : >> { %v6549_v23 = vmul.f32 %v13672_v60, %v6541_v30  ;;  %v6447_v27 = vmul.f32 %v6423_v35, %v12314_v43  ;;  %v6543_v32 = vrot.slane %v6489_v45, 7  ;;  %v12359_v26 = vmul.f32 %v6487_v48, %v12298_v56  ;;  %v13682_v48 = vld [vmem:[#allocation97_spill] sm:$0xff] }
 0x509   : >> { %v6380_v62 = vmul.f32 %v6356_v11, %v12345_v17  ;;  %v5561_v58 = vadd.f32 %v5560_v3, %v5496_v16  ;;  %v5610_v24 = vmul.f32 %v5602_v54, %v12193_v6  ;;  %v5656_v42 = vrot.slane %v5602_v54, 1 }
 0x50a   : >> { %v6553_v53 = vadd.f32 %v6549_v23, %v12213_v39  ;;  %v6551_v19 = vmul.f32 %v13674_v28, %v6543_v32  ;;  %v6410_v59 = vrot.slane %v6356_v11, 7  ;;  %v6346_v22 = vrot.slane %v13680_v20, 7 }
 0x50b   : >> { %vm13681_vm9 = vcmp.eq.s32.totalorder %v13555_v14, 2  ;;  %v5616_v35 = vadd.f32 %v5614_v2, %v5610_v24  ;;  %v5664_v21 = vmul.f32 %v13668_v50, %v5656_v42  ;;  %v6387_v30 = vadd.f32 %v6380_v62, %v12308_v63 }
 0x50c   : >> { %v5562_v7 = vsel %vm13681_vm9, %v5561_v58, %v5496_v16  ;;  %v6607_v3 = vrot.slane %v6553_v53, 7  ;;  %v6555_v54 = vadd.f32 %v6551_v19, %v12220_v47  ;;  %v6418_v23 = vmul.f32 %v13679_v51, %v6410_v59  ;;  %v12381_v58 = vpop.f32.mrf.mxu1 }
 0x50d   : >> { %v6354_v31 = vmul.f32 %v13682_v48, %v6346_v22  ;;  %v5626_v32 = vrot.slane %v5616_v35, %v13609_v0  ;;  %v12372_v11 = vadd.f32 %v5664_v21, %v12098_v49   ;;  %v5680_v20 = vadd.f32 %v5678_v4, %v5675_v38  ;;  %v6047_v21 = vpop.f32.mrf.mxu0 }
 0x50e   : >> { %vm13683_vm8 = vcmp.eq.s32.totalorder %v13555_v14, 7  ;;  %v6615_v63 = vmul.f32 %v13672_v60, %v6607_v3  ;;  %v6513_v16 = vmul.f32 %v6489_v45, %v12314_v43  ;;  %v6609_v2 = vrot.slane %v6555_v54, 7 }
 0x50f   : >> { %v5688_v50 = vsel %vm13683_vm8, %v12239_v8, %v12224_v5  ;;  %v6422_v62 = vadd.f32 %v6418_v23, %v12231_v10  ;;  %v5627_v24 = vadd.f32 %v5626_v32, %v5562_v7  ;;  %v5676_v49 = vmul.f32 %v12372_v11, %v12193_v6 }
 0x510   : >> { %v6358_v38 = vadd.f32 %v6354_v31, %v12262_v25  ;;  %v6389_v4 = vadd.f32 %v6387_v30, %v6381_v52  ;;  %v6619_v42 = vadd.f32 %v6615_v63, %v12213_v39  ;;  %v6617_v5 = vmul.f32 %v13674_v28, %v6609_v2 }
 0x511   : >> { %v6446_v8 = vmul.f32 %v6422_v62, %v12345_v17  ;;  %v6476_v19 = vrot.slane %v6422_v62, 7  ;;  %vm13684_vm9 = vcmp.eq.s32.totalorder %v13555_v14, 1  ;;  %v5682_v59 = vadd.f32 %v5680_v20, %v5676_v49 }
 0x512   : >> { %v12391_v45 = vsel %vm13684_vm9, %v5627_v24, %v5562_v7  ;;  %v6382_v22 = vmul.f32 %v6358_v38, %v12381_v58  ;;  %v6412_v35 = vrot.slane %v6358_v38, 7  ;;  %v6577_v6 = vmul.f32 %v6553_v53, %v12298_v56  ;;  %v6118_v7 = vpop.f32.mrf.mxu1 }
 0x513   : >> { %v6673_v31 = vrot.slane %v6619_v42, 7  ;;  %v6621_v52 = vadd.f32 %v6617_v5, %v12220_v47  ;;  %v6453_v30 = vadd.f32 %v6446_v8, %v6445_v55  ;;  %v5692_v3 = vrot.slane %v5682_v59, %v13613_v46 }
 0x514   : >> { %v6484_v23 = vmul.f32 %v13679_v51, %v6476_v19  ;;  %v6391_v32 = vadd.f32 %v6389_v4, %v6382_v22  ;;  %v6420_v63 = vmul.f32 %v13682_v48, %v6412_v35  ;;  %v12401_v24 = vmul.f32 %v6047_v21, %v13614_v18 }
 0x515   : >> { %v6681_v20 = vmul.f32 %v13672_v60, %v6673_v31  ;;  %v6675_v2 = vrot.slane %v6621_v52, 7  ;;  %v6455_v62 = vadd.f32 %v6453_v30, %v6447_v27  ;;  %v12404_v53 = vadd.f32 %v5692_v3, %v12391_v45 }
 0x516   : >> { %v6488_v55 = vadd.f32 %v6484_v23, %v12231_v10  ;;  %v6396_v49 = vrot.slane %v6391_v32, %v13613_v46  ;;  %v6424_v38 = vadd.f32 %v6420_v63, %v12262_v25  ;;  %v6579_v5 = vmul.f32 %v6555_v54, %v12314_v43 }
 0x517   : >> { %v6685_v4 = vadd.f32 %v6681_v20, %v12213_v39  ;;  %v6683_v8 = vmul.f32 %v13674_v28, %v6675_v2  ;;  %v12413_v27 = vmul.f32 %v6118_v7, %v13614_v18  ;;  %v6643_v21 = vmul.f32 %v6619_v42, %v12298_v56 }
 0x518   : >> { %v6512_v19 = vmul.f32 %v6488_v55, %v12345_v17  ;;  %v6542_v59 = vrot.slane %v6488_v55, 7  ;;  %v6397_v22 = vadd.f32 %v6396_v49, %v5688_v50  ;;  %v6448_v35 = vmul.f32 %v6424_v38, %v12381_v58 }
 0x519   : >> { %v6739_v31 = vrot.slane %v6685_v4, 7  ;;  %v6687_v30 = vadd.f32 %v6683_v8, %v12220_v47  ;;  %v6478_v3 = vrot.slane %v6424_v38, 7  ;;  %vm13685_vm8 = vcmp.eq.s32.totalorder %v13555_v14, 0  ;;  %v6049_v8 = vpop.f32.mrf.mxu0 }
 0x51a   : >> { %v6519_v23 = vadd.f32 %v6512_v19, %v12359_v26  ;;  %v6550_v54 = vmul.f32 %v13679_v51, %v6542_v59  ;;  %v6398_v32 = vsel %vm13685_vm8, %v6397_v22, %v5688_v50  ;;  %v6457_v63 = vadd.f32 %v6455_v62, %v6448_v35  ;;  %v13686_v35 = vld [vmem:[#allocation69_spill] sm:$0xff] }
 0x51b   : >> { %v6747_v7 = vmul.f32 %v13672_v60, %v6739_v31  ;;  %v6645_v20 = vmul.f32 %v6621_v52, %v12314_v43  ;;  %v6741_v2 = vrot.slane %v6687_v30, 7  ;;  %v6486_v55 = vmul.f32 %v13682_v48, %v6478_v3  ;;  %v6120_v52 = vpop.f32.mrf.mxu1 }
 0x51c   : >> { %v6554_v42 = vadd.f32 %v6550_v54, %v12231_v10  ;;  %v6462_v49 = vrot.slane %v6457_v63, %v13609_v0  ;;  %v6521_v38 = vadd.f32 %v6519_v23, %v6513_v16  ;;  %v6365_v31 = vrot.slane %v13686_v35, 1 }
 0x51d   : >> { %v6751_v26 = vadd.f32 %v6747_v7, %v12213_v39  ;;  %v6749_v19 = vmul.f32 %v13674_v28, %v6741_v2  ;;  %v6490_v50 = vadd.f32 %v6486_v55, %v12262_v25  ;;  %v12436_v16 = vmul.f32 %v6049_v8, %v13614_v18 }
 0x51e   : >> { %v6578_v62 = vmul.f32 %v6554_v42, %v12345_v17  ;;  %v6608_v59 = vrot.slane %v6554_v42, 7  ;;  %v6463_v22 = vadd.f32 %v6462_v49, %v6398_v32  ;;  %v6709_v42 = vmul.f32 %v6685_v4, %v12298_v56 }
 0x51f   : >> { %v6805_v3 = vrot.slane %v6751_v26, 7  ;;  %v6753_v54 = vadd.f32 %v6749_v19, %v12220_v47  ;;  %v6514_v63 = vmul.f32 %v6490_v50, %v12381_v58  ;;  %v6544_v55 = vrot.slane %v6490_v50, 7 }
 0x520   : >> { %v6585_v23 = vadd.f32 %v6578_v62, %v6577_v6  ;;  %v6616_v7 = vmul.f32 %v13679_v51, %v6608_v59  ;;  %v6464_v2 = vsel %vm13684_vm9, %v6463_v22, %v6398_v32  ;;  %v12444_v13 = vmul.f32 %v6120_v52, %v13614_v18  ;;  %v13687_v62 = vld [vmem:[#allocation109_spill] sm:$0xff] }
 0x521   : >> { %v6813_v49 = vmul.f32 %v13672_v60, %v6805_v3  ;;  %v6523_v35 = vadd.f32 %v6521_v38, %v6514_v63  ;;  %v6711_v19 = vmul.f32 %v6687_v30, %v12314_v43  ;;  %v6552_v6 = vmul.f32 %v13682_v48, %v6544_v55 }
 0x522   : >> { %v6620_v8 = vadd.f32 %v6616_v7, %v12231_v10  ;;  %v6373_v59 = vmul.f32 %v13687_v62, %v6365_v31  ;;  %v6807_v32 = vrot.slane %v6753_v54, 7  ;;  %v6587_v50 = vadd.f32 %v6585_v23, %v6579_v5 }
 0x523   : >> { %v12451_v34 = vadd.f32 %v6813_v49, %v12213_v39   ;;  %v6528_v4 = vrot.slane %v6523_v35, %v13605_v12  ;;  %v6556_v18 = vadd.f32 %v6552_v6, %v12262_v25  ;;  %v6775_v22 = vmul.f32 %v6751_v26, %v12298_v56 }
 0x524   : >> { %v6644_v60 = vmul.f32 %v6620_v8, %v12345_v17  ;;  %v6674_v38 = vrot.slane %v6620_v8, 7  ;;  %v12457_v30 = vadd.f32 %v6373_v59, %v12413_v27  ;;  %v6777_v7 = vmul.f32 %v6753_v54, %v12314_v43 }
 0x525   : >> { %v6529_v52 = vadd.f32 %v6528_v4, %v6464_v2  ;;  %v6580_v39 = vmul.f32 %v6556_v18, %v12381_v58  ;;  %v6610_v63 = vrot.slane %v6556_v18, 7  ;;  %v6815_v5 = vmul.f32 %v13674_v28, %v6807_v32 }
 0x526   : >> { %v6651_v3 = vadd.f32 %v6644_v60, %v6643_v21  ;;  %v6682_v31 = vmul.f32 %v13679_v51, %v6674_v38  ;;  %vm13688_vm8 = vcmp.eq.s32.totalorder %v13555_v14, 2  ;;  %v6431_v55 = vrot.slane %v12457_v30, 1  ;;  %v13690_v60 = vld [vmem:[#allocation70_spill] sm:$0xff] }
 0x527   : >> { %v6530_v23 = vsel %vm13688_vm8, %v6529_v52, %v6464_v2  ;;  %v12469_v49 = vmul.f32 %v12451_v34, %v12298_v56  ;;  %v6589_v26 = vadd.f32 %v6587_v50, %v6580_v39  ;;  %v6618_v35 = vmul.f32 %v13682_v48, %v6610_v63  ;;  %v13689_v56 = vld [vmem:[#allocation71_spill] sm:$0xff]  ;;  %v12487_v39 = vpop.f32.mrf.mxu0 }
 0x528   : >> { %v6686_v21 = vadd.f32 %v6682_v31, %v12231_v10  ;;  %v6653_v8 = vadd.f32 %v6651_v3, %v6645_v20  ;;  %v6439_v6 = vmul.f32 %v13687_v62, %v6431_v55  ;;  %v6363_v4 = vrot.slane %v13689_v56, 1  ;;  %v13691_v55 = vld [vmem:[#allocation107_spill] sm:$0xff] }
 0x529   : >> { %v6594_v59 = vrot.slane %v6589_v26, %v13600_v29  ;;  %v6622_v2 = vadd.f32 %v6618_v35, %v12262_v25  ;;  %v6364_v38 = vrot.slane %v13690_v60, 1  ;;  %v12483_v52 = vadd.f32 %v6815_v5, %v12220_v47  }
 0x52a   : >> { %v6710_v54 = vmul.f32 %v6686_v21, %v12345_v17  ;;  %v6740_v28 = vrot.slane %v6686_v21, 7  ;;  %v12478_v32 = vadd.f32 %v6439_v6, %v12413_v27  ;;  %v6371_v21 = vmul.f32 %v13691_v55, %v6363_v4 }
 0x52b   : >> { %v6595_v50 = vadd.f32 %v6594_v59, %v6530_v23  ;;  %v6646_v18 = vmul.f32 %v6622_v2, %v12381_v58  ;;  %v6676_v31 = vrot.slane %v6622_v2, 7  ;;  %vm13692_vm9 = vcmp.eq.s32.totalorder %v13555_v14, 3 }
 0x52c   : >> { %v6748_v20 = vmul.f32 %v13679_v51, %v6740_v28  ;;  %v6717_v3 = vadd.f32 %v6710_v54, %v6709_v42  ;;  %v6497_v63 = vrot.slane %v12478_v32, 1  ;;  %v13693_v28 = vld [vmem:[#allocation108_spill] sm:$0xff]  ;;  %v6375_v42 = vadd.f32 %v6371_v21, %v12401_v24 }
 0x52d   : >> { %v6596_v35 = vsel %vm13692_vm9, %v6595_v50, %v6530_v23  ;;  %v6655_v47 = vadd.f32 %v6653_v8, %v6646_v18  ;;  %v6684_v5 = vmul.f32 %v13682_v48, %v6676_v31  ;;  %v6372_v59 = vmul.f32 %v13693_v28, %v6364_v38  ;;  %v12510_v38 = vpop.f32.mrf.mxu0 }
 0x52e   : >> { %v6752_v26 = vadd.f32 %v6748_v20, %v12231_v10  ;;  %v6505_v6 = vmul.f32 %v13687_v62, %v6497_v63  ;;  %vm13694_vm8 = vcmp.eq.s32.totalorder %v13555_v14, 0  ;;  %v6719_v8 = vadd.f32 %v6717_v3, %v6711_v19 }
 0x52f   : >> { %v6660_v56 = vrot.slane %v6655_v47, %v11247_v37  ;;  %v12504_v4 = vsel %vm13694_vm8, %v12404_v53, %v12391_v45  ;;  %v6688_v23 = vadd.f32 %v6684_v5, %v12262_v25  ;;  %v6376_v20 = vadd.f32 %v6372_v59, %v12436_v16 }
 0x530   : >> { %v6776_v54 = vmul.f32 %v6752_v26, %v12345_v17  ;;  %v6806_v2 = vrot.slane %v6752_v26, 7  ;;  %v12508_v60 = vadd.f32 %v6505_v6, %v12413_v27  ;;  %v6429_v63 = vrot.slane %v6375_v42, 1  ;;  %v12524_v6 = vpop.f32.mrf.mxu1 }
 0x531   : >> { %v6661_v31 = vadd.f32 %v6660_v56, %v6596_v35  ;;  %v6712_v21 = vmul.f32 %v6688_v23, %v12381_v58  ;;  %v6742_v26 = vrot.slane %v6688_v23, 7  ;;  %v6383_v53 = vmul.f32 %v6375_v42, %v12487_v39  ;;  %v13696_v56 = vld [vmem:[#allocation68_spill] sm:$0xff] }
 0x532   : >> { %v6783_v50 = vadd.f32 %v6776_v54, %v6775_v22  ;;  %v6814_v18 = vmul.f32 %v13679_v51, %v6806_v2  ;;  %v6563_v45 = vrot.slane %v12508_v60, 1  ;;  %vm13695_vm9 = vcmp.eq.s32.totalorder %v13555_v14, 4 }
 0x533   : >> { %v6662_v3 = vsel %vm13695_vm9, %v6661_v31, %v6596_v35  ;;  %v6384_v22 = vmul.f32 %v6376_v20, %v12510_v38  ;;  %v6721_v5 = vadd.f32 %v6719_v8, %v6712_v21  ;;  %v6750_v51 = vmul.f32 %v13682_v48, %v6742_v26  ;;  %v13697_v31 = vld [vmem:[#allocation110_spill] sm:$0xff] }
 0x534   : >> { %v12518_v19 = vadd.f32 %v6814_v18, %v12231_v10   ;;  %v6785_v47 = vadd.f32 %v6783_v50, %v6777_v7  ;;  %v6571_v59 = vmul.f32 %v13687_v62, %v6563_v45  ;;  %v6430_v54 = vrot.slane %v6376_v20, 1 }
 0x535   : >> { %v6388_v2 = vadd.f32 %v6384_v22, %v6383_v53  ;;  %v6437_v10 = vmul.f32 %v13691_v55, %v6429_v63  ;;  %v6366_v23 = vrot.slane %v13696_v56, 1  ;;  %v6726_v7 = vrot.slane %v6721_v5, %v11244_v44 }
 0x536   : >> { %v6842_v42 = vmul.f32 %v12518_v19, %v12345_v17  ;;  %v6754_v35 = vadd.f32 %v6750_v51, %v12262_v25  ;;  %v12534_v8 = vadd.f32 %v6571_v59, %v12413_v27  ;;  %v6438_v50 = vmul.f32 %v13693_v28, %v6430_v54 }
 0x537   : >> { %v6385_v20 = vmul.f32 %v12457_v30, %v12524_v6  ;;  %v6441_v17 = vadd.f32 %v6437_v10, %v12401_v24  ;;  %v6374_v63 = vmul.f32 %v13697_v31, %v6366_v23  ;;  %v6727_v21 = vadd.f32 %v6726_v7, %v6662_v3 }
 0x538   : >> { %v6849_v18 = vadd.f32 %v6842_v42, %v12469_v49  ;;  %v6778_v26 = vmul.f32 %v6754_v35, %v12381_v58  ;;  %v6808_v45 = vrot.slane %v6754_v35, 7  ;;  %v6843_v53 = vmul.f32 %v12483_v52, %v12314_v43  ;;  %v12550_v42 = vpop.f32.mrf.mxu1 }
 0x539   : >> { %v6629_v22 = vrot.slane %v12534_v8, 1  ;;  %v6442_v5 = vadd.f32 %v6438_v50, %v12436_v16  ;;  %v6390_v51 = vadd.f32 %v6388_v2, %v6385_v20  ;;  %vm13698_vm8 = vcmp.eq.s32.totalorder %v13555_v14, 5 }
 0x53a   : >> { %v6728_v49 = vsel %vm13698_vm8, %v6727_v21, %v6662_v3  ;;  %v6787_v30 = vadd.f32 %v6785_v47, %v6778_v26  ;;  %v6816_v59 = vmul.f32 %v13682_v48, %v6808_v45  ;;  %v6495_v54 = vrot.slane %v6441_v17, 1 }
 0x53b   : >> { %v6851_v10 = vadd.f32 %v6849_v18, %v6843_v53  ;;  %v6637_v56 = vmul.f32 %v13687_v62, %v6629_v22  ;;  %v6496_v23 = vrot.slane %v6442_v5, 1  ;;  %v6378_v43 = vadd.f32 %v6374_v63, %v12444_v13 }
 0x53c   : >> { %v6792_v7 = vrot.slane %v6787_v30, %v11233_v61  ;;  %v12556_v20 = vadd.f32 %v6816_v59, %v12262_v25   ;;  %v6450_v2 = vmul.f32 %v6442_v5, %v12510_v38  ;;  %v6503_v3 = vmul.f32 %v13691_v55, %v6495_v54 }
 0x53d   : >> { %v6449_v48 = vmul.f32 %v6441_v17, %v12487_v39  ;;  %v6504_v47 = vmul.f32 %v13693_v28, %v6496_v23  ;;  %v6386_v35 = vmul.f32 %v6378_v43, %v12550_v42  ;;  %v6432_v21 = vrot.slane %v6378_v43, 1 }
 0x53e   : >> { %v6793_v50 = vadd.f32 %v6792_v7, %v6728_v49  ;;  %v6844_v18 = vmul.f32 %v12556_v20, %v12381_v58  ;;  %v6507_v63 = vadd.f32 %v6503_v3, %v12401_v24  ;;  %v12567_v25 = vadd.f32 %v6637_v56, %v12413_v27  ;;  %v6868_v7 = vld [vmem:[%s6867_s30] sm:$0xff] }
 0x53f   : >> { %v6508_v26 = vadd.f32 %v6504_v47, %v12436_v16  ;;  %v6392_v45 = vadd.f32 %v6390_v51, %v6386_v35  ;;  %vm13699_vm9 = vcmp.eq.s32.totalorder %v13555_v14, 6  ;;  %v6454_v22 = vadd.f32 %v6450_v2, %v6449_v48 }
 0x540   : >> { %v6794_v17 = vsel %vm13699_vm9, %v6793_v50, %v6728_v49  ;;  %v6853_v53 = vadd.f32 %v6851_v10, %v6844_v18  ;;  %v6561_v5 = vrot.slane %v6507_v63, 1  ;;  %v6451_v54 = vmul.f32 %v12478_v32, %v12524_v6 }
 0x541   : >> { %v6562_v30 = vrot.slane %v6508_v26, 1  ;;  %v6402_v59 = vrot.slane %v6392_v45, %v11230_v41  ;;  %v6440_v23 = vmul.f32 %v13697_v31, %v6432_v21  ;;  %v6695_v51 = vrot.slane %v12567_v25, 1 }
 0x542   : >> { %v6858_v58 = vrot.slane %v6853_v53, %v11230_v41  ;;  %v6569_v56 = vmul.f32 %v13691_v55, %v6561_v5  ;;  %v6516_v43 = vmul.f32 %v6508_v26, %v12510_v38  ;;  %v6456_v32 = vadd.f32 %v6454_v22, %v6451_v54 }
 0x543   : >> { %v6570_v49 = vmul.f32 %v13693_v28, %v6562_v30  ;;  %v6403_v10 = vadd.f32 %v6402_v59, %v12504_v4  ;;  %v6444_v3 = vadd.f32 %v6440_v23, %v12444_v13  ;;  %vm13700_vm8 = vcmp.eq.s32.totalorder %v13555_v14, 7 }
 0x544   : >> { %v6859_v2 = vadd.f32 %v6858_v58, %v6794_v17  ;;  %v6573_v41 = vadd.f32 %v6569_v56, %v12401_v24  ;;  %vm13701_vm9 = vmmov %vm13700_vm8  ;;  %v6515_v50 = vmul.f32 %v6507_v63, %v12487_v39  ;;  %v6703_v45 = vmul.f32 %v13687_v62, %v6695_v51 }
 0x545   : >> { %v6574_v48 = vadd.f32 %v6570_v49, %v12436_v16  ;;  %v6404_v47 = vsel %vm13700_vm8, %v6403_v10, %v12504_v4  ;;  %v6452_v21 = vmul.f32 %v6444_v3, %v12550_v42  ;;  %v6498_v59 = vrot.slane %v6444_v3, 1 }
 0x546   : >> { %v6860_v35 = vsel %vm13701_vm9, %v6859_v2, %v6794_v17  ;;  %v6627_v18 = vrot.slane %v6573_v41, 1  ;;  %v6520_v5 = vadd.f32 %v6516_v43, %v6515_v50  ;;  %v6517_v63 = vmul.f32 %v12508_v60, %v12524_v6 }
 0x547   : >> { %v6869_v26 = vadd.f32 %v6868_v7, %v6860_v35  ;;  %v6628_v53 = vrot.slane %v6574_v48, 1  ;;  %v6458_v30 = vadd.f32 %v6456_v32, %v6452_v21  ;;  %v6582_v4 = vmul.f32 %v6574_v48, %v12510_v38 }
 0x548   : >> { %v6635_v22 = vmul.f32 %v13691_v55, %v6627_v18  ;;  %v6506_v56 = vmul.f32 %v13697_v31, %v6498_v59  ;;  %v6707_v23 = vadd.f32 %v6703_v45, %v12413_v27  ;;  %v6581_v51 = vmul.f32 %v6573_v41, %v12487_v39 }
 0x549   : >> { %6870 = vst [vmem:[%s6867_s30] sm:$0xff] %v6869_v26  ;;  %v6636_v58 = vmul.f32 %v13693_v28, %v6628_v53  ;;  %v6468_v54 = vrot.slane %v6458_v30, %v11233_v61  ;;  %v6522_v2 = vadd.f32 %v6520_v5, %v6517_v63  ;;  %vm13702_vm8 = vcmp.eq.s32.totalorder %v13555_v14, 6 }
 0x54a   : >> { %v6639_v17 = vadd.f32 %v6635_v22, %v12401_v24  ;;  %v6510_v7 = vadd.f32 %v6506_v56, %v12444_v13  ;;  %v6586_v3 = vadd.f32 %v6582_v4, %v6581_v51  ;;  %v6761_v50 = vrot.slane %v6707_v23, 1 }
 0x54b   : >> { %v6640_v43 = vadd.f32 %v6636_v58, %v12436_v16  ;;  %v6469_v10 = vadd.f32 %v6468_v54, %v6404_v47  ;;  %v6583_v21 = vmul.f32 %v12534_v8, %v12524_v6  ;;  %vm13703_vm9 = vcmp.eq.s32.totalorder %v13555_v14, 5 }
 0x54c   : >> { %v6693_v49 = vrot.slane %v6639_v17, 1  ;;  %v6518_v48 = vmul.f32 %v6510_v7, %v12550_v42  ;;  %v6564_v35 = vrot.slane %v6510_v7, 1  ;;  %v6647_v5 = vmul.f32 %v6639_v17, %v12487_v39 }
 0x54d   : >> { %v6694_v32 = vrot.slane %v6640_v43, 1  ;;  %v6470_v61 = vsel %vm13702_vm8, %v6469_v10, %v6404_v47  ;;  %v6648_v41 = vmul.f32 %v6640_v43, %v12510_v38  ;;  %v6588_v4 = vadd.f32 %v6586_v3, %v6583_v21 }
 0x54e   : >> { %v6701_v60 = vmul.f32 %v13691_v55, %v6693_v49  ;;  %v6524_v45 = vadd.f32 %v6522_v2, %v6518_v48  ;;  %v6572_v53 = vmul.f32 %v13697_v31, %v6564_v35  ;;  %v6769_v58 = vmul.f32 %v13687_v62, %v6761_v50 }
 0x54f   : >> { %v6702_v18 = vmul.f32 %v13693_v28, %v6694_v32  ;;  %v6652_v63 = vadd.f32 %v6648_v41, %v6647_v5  ;;  %v6649_v17 = vmul.f32 %v12567_v25, %v12524_v6  ;;  %v6715_v5 = vmul.f32 %v6707_v23, %v12524_v6 }
 0x550   : >> { %v6705_v26 = vadd.f32 %v6701_v60, %v12401_v24  ;;  %v6534_v30 = vrot.slane %v6524_v45, %v11244_v44  ;;  %v6576_v59 = vadd.f32 %v6572_v53, %v12444_v13  ;;  %v6773_v32 = vadd.f32 %v6769_v58, %v12413_v27 }
 0x551   : >> { %v6706_v47 = vadd.f32 %v6702_v18, %v12436_v16  ;;  %v6654_v48 = vadd.f32 %v6652_v63, %v6649_v17  ;;  %vm13704_vm8 = vcmp.eq.s32.totalorder %v13555_v14, 4 }
 0x552   : >> { %v6759_v22 = vrot.slane %v6705_v26, 1  ;;  %v6535_v56 = vadd.f32 %v6534_v30, %v6470_v61  ;;  %v6584_v51 = vmul.f32 %v6576_v59, %v12550_v42  ;;  %v6630_v43 = vrot.slane %v6576_v59, 1 }
 0x553   : >> { %v6760_v54 = vrot.slane %v6706_v47, 1  ;;  %v6714_v49 = vmul.f32 %v6706_v47, %v12510_v38  ;;  %v6713_v35 = vmul.f32 %v6705_v26, %v12487_v39  ;;  %v6827_v47 = vrot.slane %v6773_v32, 1 }
 0x554   : >> { %v6767_v8 = vmul.f32 %v13691_v55, %v6759_v22  ;;  %v6536_v7 = vsel %vm13703_vm9, %v6535_v56, %v6470_v61  ;;  %v6590_v2 = vadd.f32 %v6588_v4, %v6584_v51  ;;  %v6638_v3 = vmul.f32 %v13697_v31, %v6630_v43 }
 0x555   : >> { %v6768_v44 = vmul.f32 %v13693_v28, %v6760_v54  ;;  %v6718_v21 = vadd.f32 %v6714_v49, %v6713_v35  ;;  %v6835_v56 = vmul.f32 %v13687_v62, %v6827_v47  ;;  %v6781_v49 = vmul.f32 %v6773_v32, %v12524_v6 }
 0x556   : >> { %v6771_v10 = vadd.f32 %v6767_v8, %v12401_v24  ;;  %v6600_v50 = vrot.slane %v6590_v2, %v11247_v37  ;;  %v6642_v41 = vadd.f32 %v6638_v3, %v12444_v13  ;;  %vm13705_vm9 = vcmp.eq.s32.totalorder %v13555_v14, 3 }
 0x557   : >> { %v6772_v60 = vadd.f32 %v6768_v44, %v12436_v16  ;;  %v6720_v8 = vadd.f32 %v6718_v21, %v6715_v5 }
 0x558   : >> { %v6825_v25 = vrot.slane %v6771_v10, 1  ;;  %v6601_v45 = vadd.f32 %v6600_v50, %v6536_v7  ;;  %v6650_v61 = vmul.f32 %v6642_v41, %v12550_v42  ;;  %v6696_v53 = vrot.slane %v6642_v41, 1 }
 0x559   : >> { %v6826_v18 = vrot.slane %v6772_v60, 1  ;;  %v6780_v22 = vmul.f32 %v6772_v60, %v12510_v38  ;;  %v6779_v58 = vmul.f32 %v6771_v10, %v12487_v39  ;;  %v6839_v41 = vadd.f32 %v6835_v56, %v12413_v27   ;;  %v8634_v56 = vld [vmem:[%s13025_s12] sm:$0xff] (%p12677_p4)  }
 0x55a   : >> { %v6833_v26 = vmul.f32 %v13691_v55, %v6825_v25  ;;  %v6602_v37 = vsel %vm13704_vm8, %v6601_v45, %v6536_v7  ;;  %v6656_v59 = vadd.f32 %v6654_v48, %v6650_v61  ;;  %v6704_v4 = vmul.f32 %v13697_v31, %v6696_v53  ;;  %v6872_v53 = vld [vmem:[%s6871_s18] sm:$0xff] }
 0x55b   : >> { %v6834_v30 = vmul.f32 %v13693_v28, %v6826_v18  ;;  %v6784_v28 = vadd.f32 %v6780_v22, %v6779_v58  ;;  %v6847_v48 = vmul.f32 %v6839_v41, %v12524_v6  ;;  %vm13706_vm8 = vcmp.eq.s32.totalorder %v13555_v14, 2  ;;  %v13725_v58 = vld [vmem:[#allocation20_spill] sm:$0xff] }
 0x55c   : >> { %v6666_v54 = vrot.slane %v6656_v59, %v13600_v29  ;;  %v6708_v23 = vadd.f32 %v6704_v4, %v12444_v13  ;;  %v6837_v55 = vadd.f32 %v6833_v26, %v12401_v24   ;;  %v13714_v26 = vmov %v12279_v9  ;;  %v13732_v9 = vld [vmem:[#allocation17_spill] sm:$0xff]  ;;  %v7941_v59 = vld [vmem:[%s9061_s20 + $0x8] sm:$0xff] (%p12677_p4)  }
 0x55d   : >> { %v6838_v63 = vadd.f32 %v6834_v30, %v12436_v16   ;;  %v6786_v2 = vadd.f32 %v6784_v28, %v6781_v49  ;;  %v8632_v30 = vld [vmem:[%s13025_s12 + $0x10] sm:$0xff] (%p12677_p4)   ;;  %v8633_v58 = vld [vmem:[%s13025_s12 + $0x8] sm:$0xff] (%p12677_p4)   ;;  %v7039_v49 = vld [vmem:[#allocation2 + $0x20] sm:$0xff] (%p12677_p4) }
 0x55e   : >> { %v6667_v51 = vadd.f32 %v6666_v54, %v6602_v37  ;;  %v6716_v43 = vmul.f32 %v6708_v23, %v12550_v42  ;;  %v6762_v17 = vrot.slane %v6708_v23, 1  ;;  %v6845_v62 = vmul.f32 %v6837_v55, %v12487_v39  ;;  %v7037_v28 = vld [vmem:[#allocation2 + $0x10] sm:$0xff] (%p12677_p4) }
 0x55f   : >> { %v6846_v44 = vmul.f32 %v6838_v63, %v12510_v38  ;;  %v7928_v23 = vunpack.c.l.bf16 (%p12677_p4), %v7941_v59 }
 0x560   : >> { %v6668_v16 = vsel %vm13705_vm9, %v6667_v51, %v6602_v37  ;;  %v6722_v29 = vadd.f32 %v6720_v8, %v6716_v43  ;;  %v6770_v10 = vmul.f32 %v13697_v31, %v6762_v17  ;;  %vm13707_vm9 = vcmp.eq.s32.totalorder %v13555_v14, 1  ;;  %v13721_v51 = vld [vmem:[#allocation23_spill] sm:$0xff] }
 0x561   : >> { %v6850_v3 = vadd.f32 %v6846_v44, %v6845_v62  ;;  %v13728_v8 = vld [vmem:[#allocation15_spill] sm:$0xff] }
 0x562   : >> { %v6732_v24 = vrot.slane %v6722_v29, %v13605_v12  ;;  %v6774_v7 = vadd.f32 %v6770_v10, %v12444_v13  ;;  %v13726_v10 = vld [vmem:[#allocation16_spill] sm:$0xff]  ;;  %v7929_v8 = vunpack.c.h.bf16 (%p12677_p4), %v7941_v59  ;;  %v7040_v44 = vld [vmem:[#allocation2 + $0x28] sm:$0xff] (%p12677_p4)  ;;  %v7045_v29 = vmul.f32 (%p12677_p4), %v7928_v23, %v7037_v28 }
 0x563   : >> { %v6852_v12 = vadd.f32 %v6850_v3, %v6847_v48  ;;  %v13727_v3 = vld [vmem:[#allocation19_spill] sm:$0xff]  ;;  %v7041_v48 = vld [vmem:[#allocation2 + $0x30] sm:$0xff] (%p12677_p4) }
 0x564   : >> { %v6733_v60 = vadd.f32 %v6732_v24, %v6668_v16  ;;  %v6782_v38 = vmul.f32 %v6774_v7, %v12550_v42  ;;  %v6828_v32 = vrot.slane %v6774_v7, 1  ;;  %v7943_v7 = vld [vmem:[%s9061_s20 + $0x18] sm:$0xff] (%p12677_p4)  }
 0x566   : >> { %v6734_v35 = vsel %vm13706_vm8, %v6733_v60, %v6668_v16  ;;  %v6788_v25 = vadd.f32 %v6786_v2, %v6782_v38  ;;  %v6836_v27 = vmul.f32 %v13697_v31, %v6828_v32  ;;  %vm13708_vm8 = vcmp.eq.s32.totalorder %v13555_v14, 0  ;;  %v13723_v60 = vld [vmem:[#allocation18_spill] sm:$0xff]  ;;  %v8627_v14 = vld [vmem:[%s13025_s12 + $0x38] sm:$0xff] (%p12677_p4)  }
 0x567   : >> { %v13710_v38 = vmov %v6838_v63  ;;  %8097 = vmatprep.subr.bf16.mxu0 (%p12677_p4), %v8627_v14  ;;  %v7942_v63 = vld [vmem:[%s9061_s20 + $0x10] sm:$0xff] (%p12677_p4)   ;;  %v7936_v60 = vunpack.c.l.bf16 (%p12677_p4), %v7943_v7 }
 0x568   : >> { %v6798_v39 = vrot.slane %v6788_v25, %v13609_v0  ;;  %v6840_v24 = vadd.f32 %v6836_v27, %v12444_v13   ;;  %v13711_v0 = vmov %v6837_v55  ;;  %v13712_v27 = vmov %v12372_v11  ;;  %v13716_v13 = vld [vmem:[#allocation12_spill] sm:$0xff]  ;;  %v13718_v11 = vld [vmem:[#allocation10_spill] sm:$0xff]  ;;  %v13731_v25 = vld [vmem:[#allocation7_spill] sm:$0xff]  ;;  %8098 = vmatpush3.bf16.msra.mxu0 (%p12677_p4), %v8627_v14 }
 0x569   : > { %v8630_v13 = vld [vmem:[%s13025_s12 + $0x20] sm:$0xff] (%p12677_p4)   ;;  %v7038_v55 = vld [vmem:[#allocation2 + $0x18] sm:$0xff] (%p12677_p4)  ;;  %v7932_v51 = vunpack.c.l.bf16 (%p12677_p4), %v7942_v63  ;;  %v7933_v43 = vunpack.c.h.bf16 (%p12677_p4), %v7942_v63  ;;  %v7937_v38 = vunpack.c.h.bf16 (%p12677_p4), %v7943_v7  ;;  %v7049_v25 = vmul.f32 (%p12677_p4), %v7936_v60, %v7041_v48 }
 0x56a   : >> { %v6799_v50 = vadd.f32 %v6798_v39, %v6734_v35  ;;  %v6848_v18 = vmul.f32 %v6840_v24, %v12550_v42  ;;  %v13713_v39 = vmov %v12321_v15  ;;  %v13715_v15 = vld [vmem:[#allocation14_spill] sm:$0xff]  ;;  %v13730_v42 = vld [vmem:[#allocation8_spill] sm:$0xff]  ;;  %v7046_v10 = vmul.f32 (%p12677_p4), %v7929_v8, %v7038_v55 }
 0x56b   : > { %v7923_v0 = vld [vmem:[%s9061_s20] sm:$0xff] (%p12677_p4)   ;;  %v7047_v62 = vmul.f32 (%p12677_p4), %v7932_v51, %v7039_v49  ;;  %v7048_v24 = vmul.f32 (%p12677_p4), %v7933_v43, %v7040_v44 }
 0x56c   : >> { %v6800_v21 = vsel %vm13707_vm9, %v6799_v50, %v6734_v35  ;;  %v6854_v45 = vadd.f32 %v6852_v12, %v6848_v18  ;;  %v13719_v12 = vmov %v12518_v19  ;;  %v13720_v19 = vmov %v12451_v34  ;;  %v8628_v34 = vld [vmem:[%s13025_s12 + $0x30] sm:$0xff] (%p12677_p4)   ;;  %v7042_v35 = vld [vmem:[#allocation2 + $0x38] sm:$0xff] (%p12677_p4) }
 0x56d   : > { %8099 = vmatprep.subr.bf16.mxu0 (%p12677_p4), %v8628_v34  ;;  %v7924_v36 = vunpack.c.l.bf16 (%p12677_p4), %v7923_v0  ;;  %v7925_v33 = vunpack.c.h.bf16 (%p12677_p4), %v7923_v0  ;;  %v7052_v3 = vpack.c.bf16 (%p12677_p4), %v7046_v10, %v7045_v29  ;;  %v7053_v32 = vpack.c.bf16 (%p12677_p4), %v7048_v24, %v7047_v62 }
 0x56e   : >> { %v6864_v6 = vrot.slane %v6854_v45, %v13613_v46  ;;  %v13724_v45 = vld [vmem:[#allocation22_spill] sm:$0xff]  ;;  %v8629_v46 = vld [vmem:[%s13025_s12 + $0x28] sm:$0xff] (%p12677_p4)   ;;  %8100 = vmatpush3.bf16.msra.mxu0 (%p12677_p4), %v8628_v34  ;;  %v7050_v27 = vmul.f32 (%p12677_p4), %v7937_v38, %v7042_v35 }
 0x56f   : > { %8101 = vmatprep.subr.bf16.mxu0 (%p12677_p4), %v8629_v46  ;;  %v7043_v9 = vmul.f32 (%p12677_p4), %v7924_v36, %v7035_v57  ;;  %v7044_v15 = vmul.f32 (%p12677_p4), %v7925_v33, %v7036_v1 }
 0x570   : >> { %v6865_v61 = vadd.f32 %v6864_v6, %v6800_v21  ;;  %v7054_v39 = vpack.c.bf16 (%p12677_p4), %v7050_v27, %v7049_v25 }
 0x571   : > { %2075 = sbr.rel (!%p12677_p4) target bundleno = 696 (0x2b8), region = 146  ;;  %v7051_v19 = vpack.c.bf16 (%p12677_p4), %v7044_v15, %v7043_v9 }
 0x572   : >> { %v6866_v31 = vsel %vm13708_vm8, %v6865_v61, %v6800_v21  ;;  %v13729_v21 = vld [vmem:[#allocation9_spill] sm:$0xff]  ;;  %8102 = vmatpush3.bf16.msra.mxu0 (%p12677_p4), %v8629_v46 }
 0x573   : >> { %v6873_v5 = vadd.f32 %v6872_v53, %v6866_v31  ;;  %v13717_v31 = vld [vmem:[#allocation13_spill] sm:$0xff]  ;;  %8103 = vmatprep.subr.bf16.mxu0 (%p12677_p4), %v8630_v13  ;;  %8113 = vmatprep.mubr.bf16.mxu0 (%p12677_p4), %v7051_v19 }
 0x575   : >> { %6874 = vst [vmem:[%s6871_s18] sm:$0xff] %v6873_v5  ;;  %v13722_v5 = vld [vmem:[#allocation11_spill] sm:$0xff] }
 0x576   : > { %8104 = vmatpush3.bf16.msra.mxu0 %v8630_v13 }
 0x577   : > { %8105 = vmatprep.subr.bf16.mxu0 %v8631_v40 }
 0x57a   : > { %8106 = vmatpush3.bf16.msra.mxu0 %v8631_v40 }
 0x57b   : > { %8107 = vmatprep.subr.bf16.mxu0 %v8632_v30 }
 0x57c   : > { %v12795_v11 = vld [vmem:[#allocation5] sm:$0xff]  ;;  %v12797_v52 = vld [vmem:[#allocation5 + $0x8] sm:$0xff]  ;;  %v12801_v42 = vld [vmem:[#allocation5 + $0x18] sm:$0xff] }
 0x57d   : > { %v6886_v20 = vsel %vm6885_vm12, %v12795_v11, 0.0  ;;  %v12803_v41 = vld [vmem:[#allocation5 + $0x28] sm:$0xff]  ;;  %v6889_v47 = vsel %vm6885_vm12, %v12797_v52, 0.0  ;;  %v6895_v22 = vsel %vm6885_vm12, %v12801_v42, 0.0  ;;  %v12812_v26 = vld [vmem:[#allocation5 + $0x10] sm:$0xff]  ;;  %v12823_v54 = vld [vmem:[#allocation5 + $0x20] sm:$0xff] }
 0x57e   : > { %6887 = vadd.xlane.f32.xlu0 %v6886_v20  ;;  %6896 = vadd.xlane.f32.xlu1 %v6895_v22  ;;  %v6901_v37 = vsel %vm6885_vm12, %v12803_v41, 0.0  ;;  %v6892_v4 = vsel %vm6885_vm12, %v12812_v26, 0.0  ;;  %v6898_v17 = vsel %vm6885_vm12, %v12823_v54, 0.0  ;;  %v12830_v16 = vld [vmem:[#allocation5 + $0x30] sm:$0xff]  ;;  %v12854_v13 = vld [vmem:[#allocation5 + $0x38] sm:$0xff] }
 0x57f   : > { %8108 = vmatpush3.bf16.msra.mxu0 %v8632_v30  ;;  %v6904_v2 = vsel %vm6885_vm12, %v12830_v16, 0.0  ;;  %v6907_v15 = vsel %vm6885_vm12, %v12854_v13, 0.0 }
 0x580   : > { %8109 = vmatprep.subr.bf16.mxu0 %v8633_v58 }
 0x582   : > { %6890 = vadd.xlane.f32.xlu0 %v6889_v47  ;;  %6902 = vadd.xlane.f32.xlu1 %v6901_v37 }
 0x583   : > { %8110 = vmatpush3.bf16.msra.mxu0 %v8633_v58 }
 0x584   : > { %8111 = vmatprep.subr.bf16.mxu0 %v8634_v56 }
 0x586   : > { %6893 = vadd.xlane.f32.xlu0 %v6892_v4 }
 0x587   : > { %8112 = vmatpush3.bf16.msra.mxu0 %v8634_v56 }
 0x58a   : > { %6899 = vadd.xlane.f32.xlu0 %v6898_v17  ;;  %8114 = vmatmul.mubr.bf16.vlgmr.msra.gmra.mxu0 %v7052_v3 }
 0x58b   : > { %8117 = vmatprep.mubr.bf16.mxu0 %v7053_v32 }
 0x58e   : > { %6905 = vadd.xlane.f32.xlu0 %v6904_v2 }
 0x592   : > { %8118 = vmatmul.mubr.bf16.gmra.mxu0 %v7054_v39 }
 0x607   : > { %v6888_v12 = vpop.xlane.xlu0 %6887  ;;  %v6897_v40 = vpop.xlane.xlu1 %6896 }
 0x608   : > { %v6911_v31 = vmul.f32 0.125, %v6888_v12  ;;  %v6914_v37 = vmul.f32 0.125, %v6897_v40 }
 0x60a   : > { %v12852_v46 = vsub.f32 %v12795_v11, %v6911_v31  ;;  %v12887_v8 = vsub.f32 %v12801_v42, %v6914_v37 }
 0x60b   : > { %v6891_v50 = vpop.xlane.xlu0 %6890  ;;  %v6903_v63 = vpop.xlane.xlu1 %6902 }
 0x60c   : > { %v6912_v11 = vmul.f32 0.125, %v6891_v50  ;;  %v6927_v20 = vmul.f32 %v12852_v46, %v12852_v46  ;;  %v6916_v56 = vmul.f32 0.125, %v6903_v63  ;;  %v6930_v17 = vmul.f32 %v12887_v8, %v12887_v8 }
 0x60e   : > { %v12876_v59 = vsub.f32 %v12797_v52, %v6912_v11  ;;  %v6935_v4 = vsel %vm6885_vm12, %v6927_v20, 0.0  ;;  %v12897_v51 = vsub.f32 %v12803_v41, %v6916_v56  ;;  %v6944_v49 = vsel %vm6885_vm12, %v6930_v17, 0.0 }
 0x60f   : > { %v6894_v53 = vpop.xlane.xlu0 %6893 }
 0x610   : > { %v6913_v0 = vmul.f32 0.125, %v6894_v53  ;;  %v6928_v28 = vmul.f32 %v12876_v59, %v12876_v59  ;;  %v6932_v44 = vmul.f32 %v12897_v51, %v12897_v51 }
 0x612   : > { %v12867_v19 = vsub.f32 %v12812_v26, %v6913_v0  ;;  %v6938_v42 = vsel %vm6885_vm12, %v6928_v28, 0.0  ;;  %v6950_v29 = vsel %vm6885_vm12, %v6932_v44, 0.0 }
 0x613   : > { %v6900_v1 = vpop.xlane.xlu0 %6899 }
 0x614   : > { %v6915_v47 = vmul.f32 0.125, %v6900_v1  ;;  %v6929_v58 = vmul.f32 %v12867_v19, %v12867_v19 }
 0x616   : > { %v12880_v26 = vsub.f32 %v12823_v54, %v6915_v47  ;;  %v6941_v52 = vsel %vm6885_vm12, %v6929_v58, 0.0 }
 0x617   : > { %v6906_v41 = vpop.xlane.xlu0 %6905 }
 0x618   : > { %v6931_v54 = vmul.f32 %v12880_v26, %v12880_v26  ;;  %v6917_v24 = vmul.f32 0.125, %v6906_v41 }
 0x61a   : > { %v6947_v43 = vsel %vm6885_vm12, %v6931_v54, 0.0  ;;  %v12916_v32 = vsub.f32 %v12830_v16, %v6917_v24 }
 0x64a   : > { %v12835_v18 = vpop.f32.mrf.mxu0 }
 0x64b   : > { %v7192_v21 = vsel %vm6885_vm12, %v12835_v18, 0.0 }
 0x64c   : > { %v12839_v45 = vpop.f32.mrf.mxu0  ;;  %7193 = vadd.xlane.f32.xlu0 %v7192_v21 }
 0x64d   : > { %v7186_v6 = vsel %vm6885_vm12, %v12839_v45, 0.0 }
 0x64e   : > { %v12843_v61 = vpop.f32.mrf.mxu0  ;;  %7187 = vadd.xlane.f32.xlu1 %v7186_v6 }
 0x64f   : > { %v7195_v14 = vsel %vm6885_vm12, %v12843_v61, 0.0 }
 0x650   : > { %v12845_v5 = vpop.f32.mrf.mxu0 }
 0x651   : > { %v7189_v36 = vsel %vm6885_vm12, %v12845_v5, 0.0 }
 0x652   : > { %v12849_v34 = vpop.f32.mrf.mxu0  ;;  %7196 = vadd.xlane.f32.xlu1 %v7195_v14 }
 0x653   : > { %v7204_v22 = vsel %vm6885_vm12, %v12849_v34, 0.0 }
 0x654   : > { %v12856_v57 = vpop.f32.mrf.mxu0 }
 0x655   : > { %v7198_v33 = vsel %vm6885_vm12, %v12856_v57, 0.0 }
 0x656   : > { %v12862_v9 = vpop.f32.mrf.mxu0  ;;  %7190 = vadd.xlane.f32.xlu1 %v7189_v36  ;;  %7199 = vadd.xlane.f32.xlu0 %v7198_v33 }
 0x657   : > { %v7207_v55 = vsel %vm6885_vm12, %v12862_v9, 0.0 }
 0x658   : > { %v12873_v30 = vpop.f32.mrf.mxu0 }
 0x659   : > { %v7201_v23 = vsel %vm6885_vm12, %v12873_v30, 0.0 }
 0x65a   : > { %6908 = vadd.xlane.f32.xlu1 %v6907_v15  ;;  %7205 = vadd.xlane.f32.xlu0 %v7204_v22 }
 0x65e   : > { %7202 = vadd.xlane.f32.xlu1 %v7201_v23  ;;  %6936 = vadd.xlane.f32.xlu0 %v6935_v4 }
 0x662   : > { %7208 = vadd.xlane.f32.xlu1 %v7207_v55  ;;  %6942 = vadd.xlane.f32.xlu0 %v6941_v52  ;;  %v7330_v55 = vld [vmem:[%s13028_s15] sm:$0xf] }
 0x663   : > { %8163 = vmatprep.subr.msk.bf16.mxu1 %vm7343_vm11, %v7330_v55 }
 0x666   : > { %6939 = vadd.xlane.f32.xlu1 %v6938_v42  ;;  %6948 = vadd.xlane.f32.xlu0 %v6947_v43  ;;  %v7345_v42 = vsel %vm7343_vm11, %v7330_v55, 0 }
 0x667   : > { %8122 = vmatpush3.bf16.msra.mxu1 %v7345_v42 }
 0x66a   : > { %6945 = vadd.xlane.f32.xlu1 %v6944_v49 }
 0x66e   : > { %6951 = vadd.xlane.f32.xlu1 %v6950_v29 }
 0x6d5   : > { %v7194_v10 = vpop.xlane.xlu0 %7193 }
 0x6d6   : > { %v7212_v62 = vmul.f32 0.125, %v7194_v10 }
 0x6d7   : > { %v7188_v7 = vpop.xlane.xlu1 %7187 }
 0x6d8   : > { %v12908_v2 = vsub.f32 %v12835_v18, %v7212_v62  ;;  %v7210_v3 = vmul.f32 0.125, %v7188_v7  ;;  %v6933_v18 = vmul.f32 %v12916_v32, %v12916_v32 }
 0x6da   : > { %v12911_v60 = vsub.f32 %v12839_v45, %v7210_v3  ;;  %v7228_v38 = vmul.f32 %v12908_v2, %v12908_v2  ;;  %v6953_v1 = vsel %vm6885_vm12, %v6933_v18, 0.0 }
 0x6db   : > { %v7197_v48 = vpop.xlane.xlu1 %7196 }
 0x6dc   : > { %v7213_v35 = vmul.f32 0.125, %v7197_v48  ;;  %v7240_v25 = vsel %vm6885_vm12, %v7228_v38, 0.0  ;;  %v7226_v27 = vmul.f32 %v12911_v60, %v12911_v60 }
 0x6dd   : > { %7241 = vadd.xlane.f32.xlu0 %v7240_v25 }
 0x6de   : > { %v12922_v39 = vsub.f32 %v12843_v61, %v7213_v35  ;;  %v7234_v16 = vsel %vm6885_vm12, %v7226_v27, 0.0 }
 0x6df   : > { %v7191_v12 = vpop.xlane.xlu1 %7190  ;;  %v7200_v50 = vpop.xlane.xlu0 %7199 }
 0x6e0   : > { %v7211_v21 = vmul.f32 0.125, %v7191_v12  ;;  %v7214_v45 = vmul.f32 0.125, %v7200_v50  ;;  %v7229_v6 = vmul.f32 %v12922_v39, %v12922_v39 }
 0x6e1   : > { %7235 = vadd.xlane.f32.xlu0 %v7234_v16 }
 0x6e2   : > { %v12930_v53 = vsub.f32 %v12845_v5, %v7211_v21  ;;  %v12933_v31 = vsub.f32 %v12856_v57, %v7214_v45  ;;  %v7243_v61 = vsel %vm6885_vm12, %v7229_v6, 0.0 }
 0x6e3   : > { %v6909_v14 = vpop.xlane.xlu1 %6908  ;;  %7244 = vadd.xlane.f32.xlu1 %v7243_v61  ;;  %v7206_v0 = vpop.xlane.xlu0 %7205 }
 0x6e4   : > { %v6918_v36 = vmul.f32 0.125, %v6909_v14  ;;  %v7216_v33 = vmul.f32 0.125, %v7206_v0  ;;  %v7227_v15 = vmul.f32 %v12930_v53, %v12930_v53  ;;  %v7230_v40 = vmul.f32 %v12933_v31, %v12933_v31 }
 0x6e5   : > { %6954 = vadd.xlane.f32.xlu0 %v6953_v1 }
 0x6e6   : > { %v12942_v5 = vsub.f32 %v12854_v13, %v6918_v36  ;;  %v12945_v57 = vsub.f32 %v12849_v34, %v7216_v33  ;;  %v7237_v11 = vsel %vm6885_vm12, %v7227_v15, 0.0  ;;  %v7246_v22 = vsel %vm6885_vm12, %v7230_v40, 0.0 }
 0x6e7   : > { %v7203_v20 = vpop.xlane.xlu1 %7202  ;;  %7238 = vadd.xlane.f32.xlu1 %v7237_v11  ;;  %v6937_v43 = vpop.xlane.xlu0 %6936 }
 0x6e8   : > { %v7215_v47 = vmul.f32 0.125, %v7203_v20  ;;  %v6934_v37 = vmul.f32 %v12942_v5, %v12942_v5  ;;  %v7232_v4 = vmul.f32 %v12945_v57, %v12945_v57  ;;  %v6959_v29 = vmul.f32 0.125, %v6937_v43 }
 0x6e9   : > { %7247 = vadd.xlane.f32.xlu0 %v7246_v22 }
 0x6ea   : > { %v12954_v13 = vsub.f32 %v12873_v30, %v7215_v47  ;;  %v6956_v34 = vsel %vm6885_vm12, %v6934_v37, 0.0  ;;  %v7252_v23 = vsel %vm6885_vm12, %v7232_v4, 0.0  ;;  %v6967_v24 = vadd.f32 1e-05, %v6959_v29 }
 0x6eb   : > { %v7209_v58 = vpop.xlane.xlu1 %7208  ;;  %6957 = vadd.xlane.f32.xlu1 %v6956_v34 }
 0x6ec   : > { %v7217_v63 = vmul.f32 0.125, %v7209_v58  ;;  %v7231_v52 = vmul.f32 %v12954_v13, %v12954_v13  ;;  %8635 = vrsqrt.f32 %v6967_v24 }
 0x6ed   : > { %7253 = vadd.xlane.f32.xlu0 %v7252_v23 }
 0x6ee   : > { %v12961_v56 = vsub.f32 %v12862_v9, %v7217_v63  ;;  %v7249_v28 = vsel %vm6885_vm12, %v7231_v52, 0.0  ;;  %v6943_v9 = vpop.xlane.xlu0 %6942 }
 0x6ef   : > { %7250 = vadd.xlane.f32.xlu1 %v7249_v28  ;;  %v6940_v17 = vpop.xlane.xlu1 %6939  ;;  %v6961_v3 = vmul.f32 0.125, %v6943_v9 }
 0x6f0   : > { %v7233_v30 = vmul.f32 %v12961_v56, %v12961_v56  ;;  %v6960_v41 = vmul.f32 0.125, %v6940_v17 }
 0x6f1   : > { %v6969_v50 = vadd.f32 1e-05, %v6961_v3 }
 0x6f2   : > { %v7255_v54 = vsel %vm6885_vm12, %v7233_v30, 0.0  ;;  %v6949_v49 = vpop.xlane.xlu0 %6948  ;;  %v6968_v38 = vadd.f32 1e-05, %v6960_v41 }
 0x6f3   : > { %7256 = vadd.xlane.f32.xlu1 %v7255_v54  ;;  %v6946_v44 = vpop.xlane.xlu1 %6945  ;;  %v6963_v18 = vmul.f32 0.125, %v6949_v49 }
 0x6f4   : > { %v6962_v10 = vmul.f32 0.125, %v6946_v44  ;;  %8637 = vrsqrt.f32 %v6968_v38  ;;  %v7893_v38 = vld [vmem:[%s13026_s13] ss:$0 sm:$0xff] }
 0x6f5   : > { %v6971_v0 = vadd.f32 1e-05, %v6963_v18 }
 0x6f6   : > { %v6970_v35 = vadd.f32 1e-05, %v6962_v10 }
 0x6f7   : > { %v6952_v48 = vpop.xlane.xlu1 %6951 }
 0x6f8   : > { %8639 = vrsqrt.f32 %v6970_v35  ;;  %v6964_v6 = vmul.f32 0.125, %v6952_v48 }
 0x6f9   : > { %v8636_v23 = vpop.eup %8635 }
 0x6fa   : > { %v6972_v15 = vadd.f32 1e-05, %v6964_v6 }
 0x701   : > { %v8638_v28 = vpop.eup %8637 }
 0x702   : > { %v6984_v3 = vmul.f32 %v8638_v28, %v12876_v59 }
 0x705   : > { %v8640_v55 = vpop.eup %8639 }
 0x706   : > { %v6986_v10 = vmul.f32 %v8640_v55, %v12887_v8 }
 0x766   : > { %v7242_v62 = vpop.xlane.xlu0 %7241 }
 0x767   : > { %v7260_v7 = vmul.f32 0.125, %v7242_v62 }
 0x769   : > { %v7268_v25 = vadd.f32 1e-05, %v7260_v7  ;;  %v6983_v7 = vmul.f32 %v8636_v23, %v12852_v46 }
 0x76a   : > { %v7236_v27 = vpop.xlane.xlu0 %7235 }
 0x76b   : > { %v7258_v12 = vmul.f32 0.125, %v7236_v27  ;;  %8641 = vrsqrt.f32 %v7268_v25 }
 0x76c   : > { %v7245_v21 = vpop.xlane.xlu1 %7244 }
 0x76d   : > { %v7266_v45 = vadd.f32 1e-05, %v7258_v12  ;;  %v7261_v16 = vmul.f32 0.125, %v7245_v21 }
 0x76e   : > { %v6955_v61 = vpop.xlane.xlu0 %6954 }
 0x76f   : > { %8643 = vrsqrt.f32 %v7266_v45  ;;  %v7269_v14 = vadd.f32 1e-05, %v7261_v16  ;;  %v6965_v36 = vmul.f32 0.125, %v6955_v61 }
 0x770   : > { %8645 = vrsqrt.f32 %v6969_v50  ;;  %v7239_v1 = vpop.xlane.xlu1 %7238 }
 0x771   : > { %8647 = vrsqrt.f32 %v7269_v14  ;;  %v7259_v33 = vmul.f32 0.125, %v7239_v1  ;;  %v6973_v22 = vadd.f32 1e-05, %v6965_v36 }
 0x772   : > { %v7248_v40 = vpop.xlane.xlu0 %7247  ;;  %8649 = vrsqrt.f32 %v6971_v0 }
 0x773   : > { %v7267_v11 = vadd.f32 1e-05, %v7259_v33  ;;  %v7262_v20 = vmul.f32 0.125, %v7248_v40 }
 0x774   : > { %v6958_v47 = vpop.xlane.xlu1 %6957 }
 0x775   : > { %8651 = vrsqrt.f32 %v7267_v11  ;;  %v7270_v37 = vadd.f32 1e-05, %v7262_v20  ;;  %v6966_v4 = vmul.f32 0.125, %v6958_v47 }
 0x776   : > { %8653 = vrsqrt.f32 %v6972_v15  ;;  %v7254_v34 = vpop.xlane.xlu0 %7253 }
 0x777   : > { %8655 = vrsqrt.f32 %v7270_v37  ;;  %v6974_v58 = vadd.f32 1e-05, %v6966_v4  ;;  %v7264_v63 = vmul.f32 0.125, %v7254_v34 }
 0x778   : > { %v7251_v52 = vpop.xlane.xlu1 %7250  ;;  %8657 = vrsqrt.f32 %v6973_v22  ;;  %v8642_v42 = vpop.eup %8641 }
 0x779   : > { %v7272_v30 = vadd.f32 1e-05, %v7264_v63  ;;  %v7263_v54 = vmul.f32 0.125, %v7251_v52  ;;  %8659 = vrsqrt.f32 %v6974_v58  ;;  %v7284_v62 = vmul.f32 %v8642_v42, %v12908_v2 }
 0x77b   : > { %8661 = vrsqrt.f32 %v7272_v30  ;;  %v7271_v43 = vadd.f32 1e-05, %v7263_v54  ;;  %v7298_v12 = vmul.f32 %v7893_v38, %v7284_v62 }
 0x77c   : > { %v8644_v9 = vpop.eup %8643  ;;  %v7257_v17 = vpop.xlane.xlu1 %7256 }
 0x77d   : > { %v8646_v49 = vpop.eup %8645  ;;  %8663 = vrsqrt.f32 %v7271_v43  ;;  %v7265_v44 = vmul.f32 0.125, %v7257_v17  ;;  %v7282_v29 = vmul.f32 %v8644_v9, %v12911_v60  ;;  %v7883_v60 = vld [vmem:[%s13023_s10] ss:$0 sm:$0xff] }
 0x77e   : > { %v8648_v41 = vpop.eup %8647  ;;  %v6985_v35 = vmul.f32 %v8646_v49, %v12867_v19  ;;  %v7000_v46 = vmul.f32 %v7883_v60, %v6986_v10  ;;  %v6997_v50 = vmul.f32 %v7883_v60, %v6983_v7  ;;  %v6998_v18 = vmul.f32 %v7883_v60, %v6984_v3  ;;  %v7884_v19 = vld [vmem:[%s13024_s11] ss:$0 sm:$0xff] }
 0x77f   : > { %v7273_v24 = vadd.f32 1e-05, %v7265_v44  ;;  %v7285_v48 = vmul.f32 %v8648_v41, %v12922_v39  ;;  %v8650_v8 = vpop.eup %8649  ;;  %v7296_v2 = vmul.f32 %v7893_v38, %v7282_v29  ;;  %v7894_v39 = vld [vmem:[%s13027_s14] ss:$0 sm:$0xff] }
 0x780   : > { %v6999_v16 = vmul.f32 %v7883_v60, %v6985_v35  ;;  %v7014_v36 = vadd.f32 %v7884_v19, %v7000_v46  ;;  %v7312_v33 = vadd.f32 %v7894_v39, %v7298_v12  ;;  %v6987_v15 = vmul.f32 %v8650_v8, %v12880_v26 }
 0x781   : > { %8665 = vrsqrt.f32 %v7273_v24  ;;  %v7299_v25 = vmul.f32 %v7893_v38, %v7285_v48  ;;  %v7310_v14 = vadd.f32 %v7894_v39, %v7296_v2  ;;  %v7012_v20 = vadd.f32 %v7884_v19, %v6998_v18 }
 0x782   : > { %v8652_v27 = vpop.eup %8651  ;;  %v7013_v37 = vadd.f32 %v7884_v19, %v6999_v16  ;;  %v7001_v28 = vmul.f32 %v7883_v60, %v6987_v15 }
 0x783   : > { %v8654_v59 = vpop.eup %8653  ;;  %v7283_v21 = vmul.f32 %v8652_v27, %v12930_v53  ;;  %v7313_v6 = vadd.f32 %v7894_v39, %v7299_v25  ;;  %v7011_v53 = vadd.f32 %v7884_v19, %v6997_v50 }
 0x784   : > { %v8656_v45 = vpop.eup %8655  ;;  %v6988_v40 = vmul.f32 %v8654_v59, %v12897_v51  ;;  %v7320_v52 = vmul.f32 %v7312_v33, %v7013_v37  ;;  %v7015_v49 = vadd.f32 %v7884_v19, %v7001_v28 }
 0x785   : > { %v7297_v61 = vmul.f32 %v7893_v38, %v7283_v21  ;;  %v7286_v0 = vmul.f32 %v8656_v45, %v12933_v31  ;;  %v8658_v1 = vpop.eup %8657  ;;  %v7321_v4 = vmul.f32 %v7313_v6, %v7014_v36  ;;  %v7318_v58 = vmul.f32 %v7310_v14, %v7011_v53 }
 0x786   : > { %v8660_v11 = vpop.eup %8659  ;;  %v7002_v30 = vmul.f32 %v7883_v60, %v6988_v40  ;;  %v6989_v51 = vmul.f32 %v8658_v1, %v12916_v32 }
 0x787   : > { %v7311_v47 = vadd.f32 %v7894_v39, %v7297_v61  ;;  %v7300_v23 = vmul.f32 %v7893_v38, %v7286_v0  ;;  %v6990_v55 = vmul.f32 %v8660_v11, %v12942_v5  ;;  %v7327_v42 = vpack.c.bf16 %v7321_v4, %v7320_v52 }
 0x788   : > { %v8662_v22 = vpop.eup %8661  ;;  %v7016_v44 = vadd.f32 %v7884_v19, %v7002_v30  ;;  %v7003_v10 = vmul.f32 %v7883_v60, %v6989_v51 }
 0x789   : > { %v7288_v34 = vmul.f32 %v8662_v22, %v12945_v57  ;;  %v7319_v63 = vmul.f32 %v7311_v47, %v7012_v20  ;;  %v7314_v9 = vadd.f32 %v7894_v39, %v7300_v23 }
 0x78a   : > { %v8664_v31 = vpop.eup %8663  ;;  %v7017_v3 = vadd.f32 %v7884_v19, %v7003_v10 }
 0x78b   : > { %v7326_v54 = vpack.c.bf16 %v7319_v63, %v7318_v58  ;;  %v7287_v26 = vmul.f32 %v8664_v31, %v12954_v13  ;;  %v7302_v57 = vmul.f32 %v7893_v38, %v7288_v34  ;;  %v7004_v13 = vmul.f32 %v7883_v60, %v6990_v55 }
 0x78c   : > { %v7322_v32 = vmul.f32 %v7314_v9, %v7015_v49 }
 0x78d   : > { %8123 = vmatprep.mubr.msk.bf16.mxu1 %vm6885_vm12, %v7326_v54  ;;  %v7301_v43 = vmul.f32 %v7893_v38, %v7287_v26  ;;  %v7316_v24 = vadd.f32 %v7894_v39, %v7302_v57  ;;  %v7018_v48 = vadd.f32 %v7884_v19, %v7004_v13 }
 0x78e   : > { %v8666_v17 = vpop.eup %8665  ;;  %8124 = vmatmul.mubr.msk.bf16.vlgmr.msra.gmra.mxu1 %vm6885_vm12, %v7327_v42 }
 0x78f   : > { %v7289_v29 = vmul.f32 %v8666_v17, %v12961_v56  ;;  %v7315_v41 = vadd.f32 %v7894_v39, %v7301_v43  ;;  %v7324_v56 = vmul.f32 %v7316_v24, %v7017_v3 }
 0x791   : > { %v7323_v5 = vmul.f32 %v7315_v41, %v7016_v44  ;;  %v7303_v62 = vmul.f32 %v7893_v38, %v7289_v29 }
 0x793   : > { %v7328_v7 = vpack.c.bf16 %v7323_v5, %v7322_v32  ;;  %v7317_v35 = vadd.f32 %v7894_v39, %v7303_v62 }
 0x795   : > { %8127 = vmatprep.mubr.msk.bf16.mxu1 %vm6885_vm12, %v7328_v7  ;;  %v7325_v8 = vmul.f32 %v7317_v35, %v7018_v48 }
 0x797   : > { %v7329_v2 = vpack.c.bf16 %v7325_v8, %v7324_v56 }
 0x799   : > { %8128 = vmatmul.mubr.msk.bf16.gmra.mxu1 %vm6885_vm12, %v7329_v2 }
 0x84e   : > { %v8125_v60 = vpop.f32.mrf.mxu1 }
 0x84f   : > { %7414 = vst [vmem:[%s9066_s25 + $0x10] sm:$0xff] %v8125_v60 }
 0x850   : > { %v7381_v38 = vpop.f32.mrf.mxu1 }
 0x851   : > { %7412 = vst [vmem:[%s9066_s25] sm:$0xff] %v7381_v38 }
 0x852   : > { %v8126_v25 = vpop.f32.mrf.mxu1 }
 0x853   : > { %7415 = vst [vmem:[%s9066_s25 + $0x18] sm:$0xff] %v8126_v25 }
 0x854   : > { %v7384_v27 = vpop.f32.mrf.mxu1 }
 0x855   : > { %7413 = vst [vmem:[%s9066_s25 + $0x8] sm:$0xff] %v7384_v27 }
 0x859   : > { %v8129_v46 = vpop.f32.mrf.mxu1 }
 0x85a   : > { %7418 = vst [vmem:[%s9066_s25 + $0x30] sm:$0xff] %v8129_v46 }
 0x85b   : > { %v7397_v12 = vpop.f32.mrf.mxu1 }
 0x85c   : > { %7416 = vst [vmem:[%s9066_s25 + $0x20] sm:$0xff] %v7397_v12 }
 0x85d   : > { %v8130_v59 = vpop.f32.mrf.mxu1 }
 0x85e   : > { %7419 = vst [vmem:[%s9066_s25 + $0x38] sm:$0xff] %v8130_v59 }
 0x85f   : > { %v7400_v50 = vpop.f32.mrf.mxu1 }
 0x860   : > { %7417 = vst [vmem:[%s9066_s25 + $0x28] sm:$0xff] %v7400_v50 }
 0x861 PF: > { %s26_s21 = sadd.s32 1, %s8805_s21  }
 0x862   : > { %p23_p5 = scmp.ge.s32.totalorder %s26_s21, 4  }
 0x864   :  { %25 = sbr.rel (!%p23_p5) target bundleno = 3 (0x3), region = 157 }

</bundles_post_ra>
